<compile_context>
chip_gen: v7x
topology: tpu7x:2x2x1
jax: 0.10.0
libtpu: 0.0.40
codegen_flags: <defaults>
</compile_context>

<pallas_src>
import functools

import jax
import jax.numpy as jnp
import numpy as np
from jax.experimental import pallas as pl
from jax.experimental.pallas import tpu as pltpu


# ----------------------------------------------------------------------------
# Kernel 1: 3x3 SAME conv + bias + ReLU with in-kernel im2col.
#
# The activation is given zero-padded (by 1 in H and W, Cin padded to cin_p)
# and flattened over (B, H+2, W+2) into the lane axis.  For an output column
# q = flat(b, r, c), tap (dy, dx) lives at column q + dy*Wp + dx, so the
# im2col rows are static lane-offset slices of a 2*tn-wide VMEM window built
# from two consecutive column blocks.  Columns with r >= H or c >= W are
# garbage and discarded by the caller.
# ----------------------------------------------------------------------------
def _conv_bias_relu_kernel(x0_ref, x1_ref, w_ref, b_ref, o_ref,
                           win_ref, patch_ref, *, tn, wp, cin_p):
    # x0/x1 : (cin_p, tn)      bf16  consecutive column blocks (halo source)
    # w     : (cout, 9*cin_p)  bf16  column (dy*3+dx)*cin_p + ci
    # b     : (cout, 1)        f32
    # o     : (cout, tn)       bf16  lane-dense conv+bias+ReLU output
    # win   : (cin_p, 2*tn)    bf16  scratch window
    # patch : (9*cin_p, tn)    bf16  scratch im2col matrix
    win_ref[:, :tn] = x0_ref[...]
    win_ref[:, tn:] = x1_ref[...]
    for t in range(9):
        dy, dx = divmod(t, 3)
        off = dy * wp + dx                       # static lane offset
        patch_ref[t * cin_p:(t + 1) * cin_p, :] = win_ref[:, off:off + tn]
    y = jnp.dot(w_ref[...], patch_ref[...], preferred_element_type=jnp.float32)
    o_ref[...] = jnp.maximum(y + b_ref[...], 0.0).astype(o_ref.dtype)


def conv3x3_bias_relu(x_flat, w9, bias, *, wp, nsteps):
    cin_p, ncols = x_flat.shape
    assert ncols % (nsteps + 1) == 0
    tn = ncols // (nsteps + 1)
    assert tn % 128 == 0 and tn >= 2 * wp + 2
    cout = w9.shape[0]
    kern = functools.partial(_conv_bias_relu_kernel, tn=tn, wp=wp, cin_p=cin_p)
    return pl.pallas_call(
        kern,
        out_shape=jax.ShapeDtypeStruct((cout, nsteps * tn), jnp.bfloat16),
        grid_spec=pltpu.PrefetchScalarGridSpec(
            num_scalar_prefetch=0,
            grid=(nsteps,),
            in_specs=[
                pl.BlockSpec((cin_p, tn), lambda i: (0, i)),
                pl.BlockSpec((cin_p, tn), lambda i: (0, i + 1)),   # halo block
                pl.BlockSpec((cout, 9 * cin_p), lambda i: (0, 0)),
                pl.BlockSpec((cout, 1), lambda i: (0, 0)),
            ],
            out_specs=pl.BlockSpec((cout, tn), lambda i: (0, i)),
            scratch_shapes=[
                pltpu.VMEM((cin_p, 2 * tn), jnp.bfloat16),
                pltpu.VMEM((9 * cin_p, tn), jnp.bfloat16),
            ],
        ),
        compiler_params=pltpu.CompilerParams(
            dimension_semantics=("parallel",)),
    )(x_flat, x_flat, w9, bias)


# ----------------------------------------------------------------------------
# Kernel 2: fused MLP head.  fc1 is tiled over conv2 output CHANNELS on the
# grid (torch's channel-major flatten => no transpose needed): x block is
# (ck, B, 1024) of the pooled conv2 output, w1 block is (ck, 1024, 120) of the
# pre-reshaped fc1 weight.  bf16 streams, f32 accumulation; bias / eval-mode
# BN affine / ReLU / fc2 / fc3 run in f32 on the final step.
# ----------------------------------------------------------------------------
def _mlp_kernel(x_ref, w1_ref, b1_ref, s1_ref, t1_ref,
                w2_ref, b2_ref, s2_ref, t2_ref,
                w3_ref, b3_ref, o_ref, acc_ref, *, ck):
    k = pl.program_id(0)

    @pl.when(k == 0)
    def _():
        acc_ref[...] = jnp.zeros_like(acc_ref)

    part = jnp.dot(x_ref[0], w1_ref[0], preferred_element_type=jnp.float32)
    for c in range(1, ck):
        part = part + jnp.dot(x_ref[c], w1_ref[c],
                              preferred_element_type=jnp.float32)
    acc_ref[...] += part

    @pl.when(k == pl.num_programs(0) - 1)
    def _():
        h1 = acc_ref[...] + b1_ref[...]
        h1 = jnp.maximum(h1 * s1_ref[...] + t1_ref[...], 0.0)       # bn1+relu
        h2 = jnp.dot(h1, w2_ref[...], preferred_element_type=jnp.float32)
        h2 = h2 + b2_ref[...]
        h2 = jnp.maximum(h2 * s2_ref[...] + t2_ref[...], 0.0)       # bn2+relu
        h3 = jnp.dot(h2, w3_ref[...], preferred_element_type=jnp.float32)
        o_ref[...] = h3 + b3_ref[...]
        # NOTE: (B, 6) output is tiny; lanes/sublanes are underfilled but this
        # is negligible at B=2 (pad B if batch ever grows).


def mlp_head(x_cbp, w1, b1, s1, t1, w2, b2, s2, t2, w3, b3,
             *, channels_per_step=8):
    C, B, P = x_cbp.shape
    H1, H2, O = w1.shape[2], w2.shape[1], w3.shape[1]
    ck = channels_per_step
    assert C % ck == 0
    kern = functools.partial(_mlp_kernel, ck=ck)
    c2 = lambda k: (0, 0)        # noqa: E731
    c3 = lambda k: (k, 0, 0)     # noqa: E731
    return pl.pallas_call(
        kern,
        out_shape=jax.ShapeDtypeStruct((B, O), jnp.float32),
        grid_spec=pltpu.PrefetchScalarGridSpec(
            num_scalar_prefetch=0,
            grid=(C // ck,),
            in_specs=[
                pl.BlockSpec((ck, B, P), c3),
                pl.BlockSpec((ck, P, H1), c3),
                pl.BlockSpec((1, H1), c2),
                pl.BlockSpec((1, H1), c2),
                pl.BlockSpec((1, H1), c2),
                pl.BlockSpec((H1, H2), c2),
                pl.BlockSpec((1, H2), c2),
                pl.BlockSpec((1, H2), c2),
                pl.BlockSpec((1, H2), c2),
                pl.BlockSpec((H2, O), c2),
                pl.BlockSpec((1, O), c2),
            ],
            out_specs=pl.BlockSpec((B, O), c2),
            scratch_shapes=[pltpu.VMEM((B, H1), jnp.float32)],
        ),
        compiler_params=pltpu.CompilerParams(
            dimension_semantics=("arbitrary",)),
    )(x_cbp, w1, b1, s1, t1, w2, b2, s2, t2, w3, b3)


# ----------------------------------------------------------------------------
# Glue (plain JAX): only zero-pad/flatten and the 2x2 max-pool.
# TODO(synk): the stride-2 pool downsample is left to one tiny XLA fusion per
# conv layer; a fully in-kernel pool needs lane-strided gathers.
# ----------------------------------------------------------------------------
def to_padded_flat(x_cbhw, cin_p, ncols):
    """(C, B, H, W) -> (cin_p, ncols) bf16: zero-pad C->cin_p and H/W by 1,
    flatten (B, H+2, W+2) to one axis, zero-pad the tail to ncols columns."""
    C, B, H, W = x_cbhw.shape
    x = jnp.pad(x_cbhw, ((0, cin_p - C), (0, 0), (1, 1), (1, 1)))
    x = x.reshape(cin_p, B * (H + 2) * (W + 2))
    return jnp.pad(x, ((0, 0), (0, ncols - x.shape[1])))


def unflatten_pool(y_flat, B, H, W):
    """Conv kernel output (C, >=B*(H+2)*(W+2)) -> 2x2 max-pooled (C,B,H/2,W/2).
    ReLU/bias already applied in-kernel (both commute with max)."""
    C = y_flat.shape[0]
    Hp, Wp = H + 2, W + 2
    y = y_flat[:, :B * Hp * Wp].reshape(C, B, Hp, Wp)[:, :, :H, :W]
    y = y.reshape(C, B, H // 2, 2, W // 2, 2)
    return jnp.max(y, axis=(3, 5))


def _tiles(n_valid, nsteps_target, halo):
    tn = max(-(-n_valid // nsteps_target), halo)
    tn = -(-tn // 128) * 128
    nsteps = -(-n_valid // tn)
    return tn, nsteps


# ----------------------------------------------------------------------------
# Parameters (deterministic, PyTorch-default-style uniform init) and one-time
# conversion to kernel layouts / dtypes.
# ----------------------------------------------------------------------------
def init_params(key):
    def uni(k, shape, fan_in):
        bound = 1.0 / np.sqrt(fan_in)
        return jax.random.uniform(k, shape, jnp.float32, -bound, bound)

    ks = jax.random.split(key, 10)
    p = {}
    p["conv1_w"] = uni(ks[0], (12, 3, 3, 3), 3 * 9)        # torch layout
    p["conv1_b"] = uni(ks[1], (12,), 3 * 9)
    p["conv2_w"] = uni(ks[2], (24, 12, 3, 3), 12 * 9)
    p["conv2_b"] = uni(ks[3], (24,), 12 * 9)
    p["fc1_w"] = uni(ks[4], (120, 24576), 24576)           # torch (out, in)
    p["fc1_b"] = uni(ks[5], (120,), 24576)
    p["fc2_w"] = uni(ks[6], (84, 120), 120)
    p["fc2_b"] = uni(ks[7], (84,), 120)
    p["fc3_w"] = uni(ks[8], (6, 84), 84)
    p["fc3_b"] = uni(ks[9], (6,), 84)
    # BatchNorm1d defaults: gamma=1, beta=0, running_mean=0, running_var=1.
    eps = 1e-5
    for name, n in (("bn1", 120), ("bn2", 84)):
        gamma = jnp.ones((n,), jnp.float32)
        beta = jnp.zeros((n,), jnp.float32)
        rmean = jnp.zeros((n,), jnp.float32)
        rvar = jnp.ones((n,), jnp.float32)
        scale = gamma / jnp.sqrt(rvar + eps)
        shift = beta - rmean * scale
        p[f"{name}_scale"] = scale
        p[f"{name}_shift"] = shift
    return p


def conv_w9(w_oihw, cin_p):
    """(Cout, Cin, 3, 3) -> (Cout, 9*cin_p) bf16, column (dy*3+dx)*cin_p + ci,
    zero columns for the padded input channels."""
    co, ci, kh, kw = w_oihw.shape
    w = jnp.transpose(w_oihw, (2, 3, 1, 0))                     # (kh, kw, ci, co)
    w = jnp.pad(w, ((0, 0), (0, 0), (0, cin_p - ci), (0, 0)))
    w = jnp.transpose(w.reshape(kh * kw * cin_p, co), (1, 0))
    return w.astype(jnp.bfloat16)


def prepare_params(p):
    """One-time (outside the jitted forward) weight re-layout / bf16 cast."""
    fc1 = jnp.transpose(p["fc1_w"].reshape(120, 24, 1024), (1, 2, 0))
    return {
        "conv1_w": conv_w9(p["conv1_w"], 8),                # (12, 72)   bf16
        "conv1_b": p["conv1_b"].reshape(-1, 1),             # (12, 1)    f32
        "conv2_w": conv_w9(p["conv2_w"], 16),               # (24, 144)  bf16
        "conv2_b": p["conv2_b"].reshape(-1, 1),             # (24, 1)    f32
        "fc1_w": fc1.astype(jnp.bfloat16),                  # (24,1024,120) bf16
        "fc1_b": p["fc1_b"].reshape(1, -1),
        "bn1_scale": p["bn1_scale"].reshape(1, -1),
        "bn1_shift": p["bn1_shift"].reshape(1, -1),
        "fc2_w": p["fc2_w"].T,                              # (120, 84) f32
        "fc2_b": p["fc2_b"].reshape(1, -1),
        "bn2_scale": p["bn2_scale"].reshape(1, -1),
        "bn2_shift": p["bn2_shift"].reshape(1, -1),
        "fc3_w": p["fc3_w"].T,                              # (84, 6) f32
        "fc3_b": p["fc3_b"].reshape(1, -1),
    }


# ----------------------------------------------------------------------------
# Forward pass.
# ----------------------------------------------------------------------------
@jax.jit
def net_forward(x_nchw, kp):
    B, _, H, W = x_nchw.shape
    x = jnp.transpose(x_nchw, (1, 0, 2, 3)).astype(jnp.bfloat16)   # (3,B,H,W)

    # conv1 (3->12) + bias + ReLU (in-kernel im2col), then 2x2 max-pool.
    wp1 = W + 2
    tn1, ns1 = _tiles(B * (H + 2) * wp1, 5, 2 * wp1 + 2)
    xf1 = to_padded_flat(x, 8, (ns1 + 1) * tn1)
    y1 = conv3x3_bias_relu(xf1, kp["conv1_w"], kp["conv1_b"], wp=wp1, nsteps=ns1)
    a1 = unflatten_pool(y1, B, H, W)                               # (12,B,64,64)
    H, W = H // 2, W // 2

    # conv2 (12->24) + bias + ReLU, then 2x2 max-pool.
    wp2 = W + 2
    tn2, ns2 = _tiles(B * (H + 2) * wp2, 3, 2 * wp2 + 2)
    xf2 = to_padded_flat(a1, 16, (ns2 + 1) * tn2)
    y2 = conv3x3_bias_relu(xf2, kp["conv2_w"], kp["conv2_b"], wp=wp2, nsteps=ns2)
    a2 = unflatten_pool(y2, B, H, W)                               # (24,B,32,32)
    H, W = H // 2, W // 2

    # Dropout2d + F.dropout: identity (inference).
    # Channel-major flatten is a free reshape in this layout -- the MLP kernel
    # reads (channel-chunk, B, H*W) blocks directly (no transpose).
    feat = a2.reshape(24, B, H * W)
    return mlp_head(
        feat,
        kp["fc1_w"], kp["fc1_b"], kp["bn1_scale"], kp["bn1_shift"],
        kp["fc2_w"], kp["fc2_b"], kp["bn2_scale"], kp["bn2_shift"],
        kp["fc3_w"], kp["fc3_b"],
        channels_per_step=8)


# ----------------------------------------------------------------------------
# Plain-JAX f32 reference (eval-mode semantics) for a sanity check.
# ----------------------------------------------------------------------------
def reference_forward(x_nchw, p):
    x = jnp.transpose(x_nchw, (0, 2, 3, 1))

    def conv(x, w_t, b):
        w = jnp.transpose(w_t, (2, 3, 1, 0))                 # HWIO
        y = jax.lax.conv_general_dilated(
            x, w, (1, 1), "SAME",
            dimension_numbers=("NHWC", "HWIO", "NHWC"),
            precision=jax.lax.Precision.HIGHEST)
        return y + b

    def pool(x):
        B, H, W, C = x.shape
        return jnp.max(x.reshape(B, H // 2, 2, W // 2, 2, C), axis=(2, 4))

    x = jnp.maximum(pool(conv(x, p["conv1_w"], p["conv1_b"])), 0.0)
    x = jnp.maximum(pool(conv(x, p["conv2_w"], p["conv2_b"])), 0.0)
    B = x.shape[0]
    feat = jnp.transpose(x, (0, 3, 1, 2)).reshape(B, -1)

    hp = jax.lax.Precision.HIGHEST
    h = jnp.dot(feat, p["fc1_w"].T, precision=hp) + p["fc1_b"]
    h = jnp.maximum(h * p["bn1_scale"] + p["bn1_shift"], 0.0)
    h = jnp.dot(h, p["fc2_w"].T, precision=hp) + p["fc2_b"]
    h = jnp.maximum(h * p["bn2_scale"] + p["bn2_shift"], 0.0)
    return jnp.dot(h, p["fc3_w"].T, precision=hp) + p["fc3_b"]


if __name__ == "__main__":
    key = jax.random.PRNGKey(0)
    kx, kparam = jax.random.split(key)
    # Input spatial size is forced to 128x128 by fc1's 32*32*24 input features.
    x = jax.random.normal(kx, (2, 3, 128, 128), jnp.float32)
    params = init_params(kparam)
    kernel_params = prepare_params(params)

    out = net_forward(x, kernel_params)
    out = jax.block_until_ready(out)
    assert out.shape == (2, 6), out.shape

    ref = jax.block_until_ready(reference_forward(x, params))
    # Tolerance accounts for bf16-quantized weights/activations vs. f32 ref.
    np.testing.assert_allclose(np.asarray(out), np.asarray(ref),
                               rtol=2e-2, atol=2e-2)
    print("KERNEL_OK")
</pallas_src>

<mosaic_0001>
module attributes {stable_mosaic.version = 11 : i64} {
  func.func @_conv_bias_relu_kernel(%arg0: i32, %arg1: memref<8x6784xbf16, #tpu.memory_space<vmem>>, %arg2: memref<8x6784xbf16, #tpu.memory_space<vmem>>, %arg3: memref<12x72xbf16, #tpu.memory_space<vmem>>, %arg4: memref<12x1xf32, #tpu.memory_space<vmem>>, %arg5: memref<12x6784xbf16, #tpu.memory_space<vmem>>, %arg6: memref<8x13568xbf16, #tpu.memory_space<vmem>>, %arg7: memref<72x6784xbf16, #tpu.memory_space<vmem>>) attributes {dimension_semantics = [#tpu.dimension_semantics<parallel>], iteration_bounds = array<i64: 5>, scalar_prefetch = 0 : i64, scratch_operands = 2 : i64, tpu.core_type = #tpu.core_type<tc>, window_params = [{transform_indices = @transform_0, window_bounds = array<i64: 8, 6784>}, {transform_indices = @transform_1, window_bounds = array<i64: 8, 6784>}, {pipeline_mode = #tpu.pipeline_mode<synchronous>, transform_indices = @transform_2, window_bounds = array<i64: 12, 72>}, {pipeline_mode = #tpu.pipeline_mode<synchronous>, transform_indices = @transform_3, window_bounds = array<i64: 12, 1>}, {transform_indices = @transform_4, window_bounds = array<i64: 12, 6784>}]} {
    %c0 = arith.constant 0 : index
    %c0_0 = arith.constant 0 : index
    %0 = vector.load %arg1[%c0, %c0_0] : memref<8x6784xbf16, #tpu.memory_space<vmem>>, vector<8x6784xbf16>
    %c0_1 = arith.constant 0 : index
    %c0_2 = arith.constant 0 : index
    %1 = vector.load %arg6[%c0_1, %c0_2] : memref<8x13568xbf16, #tpu.memory_space<vmem>>, vector<8x6784xbf16>
    tpu.vector_store %arg6[%c0_1, %c0_2], %0 {strides = array<i32>} : memref<8x13568xbf16, #tpu.memory_space<vmem>>, vector<8x6784xbf16>,
    %c0_3 = arith.constant 0 : index
    %c0_4 = arith.constant 0 : index
    %2 = vector.load %arg2[%c0_3, %c0_4] : memref<8x6784xbf16, #tpu.memory_space<vmem>>, vector<8x6784xbf16>
    %c0_5 = arith.constant 0 : index
    %c6784 = arith.constant 6784 : index
    %3 = vector.load %arg6[%c0_5, %c6784] : memref<8x13568xbf16, #tpu.memory_space<vmem>>, vector<8x6784xbf16>
    tpu.vector_store %arg6[%c0_5, %c6784], %2 {strides = array<i32>} : memref<8x13568xbf16, #tpu.memory_space<vmem>>, vector<8x6784xbf16>,
    %c0_6 = arith.constant 0 : index
    %c0_7 = arith.constant 0 : index
    %4 = vector.load %arg6[%c0_6, %c0_7] : memref<8x13568xbf16, #tpu.memory_space<vmem>>, vector<8x6784xbf16>
    %c0_8 = arith.constant 0 : index
    %c0_9 = arith.constant 0 : index
    %5 = vector.load %arg7[%c0_8, %c0_9] : memref<72x6784xbf16, #tpu.memory_space<vmem>>, vector<8x6784xbf16>
    tpu.vector_store %arg7[%c0_8, %c0_9], %4 {strides = array<i32>} : memref<72x6784xbf16, #tpu.memory_space<vmem>>, vector<8x6784xbf16>,
    %c0_10 = arith.constant 0 : index
    %c1 = arith.constant 1 : index
    %6 = vector.load %arg6[%c0_10, %c1] : memref<8x13568xbf16, #tpu.memory_space<vmem>>, vector<8x6784xbf16>
    %c8 = arith.constant 8 : index
    %c0_11 = arith.constant 0 : index
    %7 = vector.load %arg7[%c8, %c0_11] : memref<72x6784xbf16, #tpu.memory_space<vmem>>, vector<8x6784xbf16>
    tpu.vector_store %arg7[%c8, %c0_11], %6 {strides = array<i32>} : memref<72x6784xbf16, #tpu.memory_space<vmem>>, vector<8x6784xbf16>,
    %c0_12 = arith.constant 0 : index
    %c2 = arith.constant 2 : index
    %8 = vector.load %arg6[%c0_12, %c2] : memref<8x13568xbf16, #tpu.memory_space<vmem>>, vector<8x6784xbf16>
    %c16 = arith.constant 16 : index
    %c0_13 = arith.constant 0 : index
    %9 = vector.load %arg7[%c16, %c0_13] : memref<72x6784xbf16, #tpu.memory_space<vmem>>, vector<8x6784xbf16>
    tpu.vector_store %arg7[%c16, %c0_13], %8 {strides = array<i32>} : memref<72x6784xbf16, #tpu.memory_space<vmem>>, vector<8x6784xbf16>,
    %c0_14 = arith.constant 0 : index
    %c130 = arith.constant 130 : index
    %10 = vector.load %arg6[%c0_14, %c130] : memref<8x13568xbf16, #tpu.memory_space<vmem>>, vector<8x6784xbf16>
    %c24 = arith.constant 24 : index
    %c0_15 = arith.constant 0 : index
    %11 = vector.load %arg7[%c24, %c0_15] : memref<72x6784xbf16, #tpu.memory_space<vmem>>, vector<8x6784xbf16>
    tpu.vector_store %arg7[%c24, %c0_15], %10 {strides = array<i32>} : memref<72x6784xbf16, #tpu.memory_space<vmem>>, vector<8x6784xbf16>,
    %c0_16 = arith.constant 0 : index
    %c131 = arith.constant 131 : index
    %12 = vector.load %arg6[%c0_16, %c131] : memref<8x13568xbf16, #tpu.memory_space<vmem>>, vector<8x6784xbf16>
    %c32 = arith.constant 32 : index
    %c0_17 = arith.constant 0 : index
    %13 = vector.load %arg7[%c32, %c0_17] : memref<72x6784xbf16, #tpu.memory_space<vmem>>, vector<8x6784xbf16>
    tpu.vector_store %arg7[%c32, %c0_17], %12 {strides = array<i32>} : memref<72x6784xbf16, #tpu.memory_space<vmem>>, vector<8x6784xbf16>,
    %c0_18 = arith.constant 0 : index
    %c132 = arith.constant 132 : index
    %14 = vector.load %arg6[%c0_18, %c132] : memref<8x13568xbf16, #tpu.memory_space<vmem>>, vector<8x6784xbf16>
    %c40 = arith.constant 40 : index
    %c0_19 = arith.constant 0 : index
    %15 = vector.load %arg7[%c40, %c0_19] : memref<72x6784xbf16, #tpu.memory_space<vmem>>, vector<8x6784xbf16>
    tpu.vector_store %arg7[%c40, %c0_19], %14 {strides = array<i32>} : memref<72x6784xbf16, #tpu.memory_space<vmem>>, vector<8x6784xbf16>,
    %c0_20 = arith.constant 0 : index
    %c260 = arith.constant 260 : index
    %16 = vector.load %arg6[%c0_20, %c260] : memref<8x13568xbf16, #tpu.memory_space<vmem>>, vector<8x6784xbf16>
    %c48 = arith.constant 48 : index
    %c0_21 = arith.constant 0 : index
    %17 = vector.load %arg7[%c48, %c0_21] : memref<72x6784xbf16, #tpu.memory_space<vmem>>, vector<8x6784xbf16>
    tpu.vector_store %arg7[%c48, %c0_21], %16 {strides = array<i32>} : memref<72x6784xbf16, #tpu.memory_space<vmem>>, vector<8x6784xbf16>,
    %c0_22 = arith.constant 0 : index
    %c261 = arith.constant 261 : index
    %18 = vector.load %arg6[%c0_22, %c261] : memref<8x13568xbf16, #tpu.memory_space<vmem>>, vector<8x6784xbf16>
    %c56 = arith.constant 56 : index
    %c0_23 = arith.constant 0 : index
    %19 = vector.load %arg7[%c56, %c0_23] : memref<72x6784xbf16, #tpu.memory_space<vmem>>, vector<8x6784xbf16>
    tpu.vector_store %arg7[%c56, %c0_23], %18 {strides = array<i32>} : memref<72x6784xbf16, #tpu.memory_space<vmem>>, vector<8x6784xbf16>,
    %c0_24 = arith.constant 0 : index
    %c262 = arith.constant 262 : index
    %20 = vector.load %arg6[%c0_24, %c262] : memref<8x13568xbf16, #tpu.memory_space<vmem>>, vector<8x6784xbf16>
    %c64 = arith.constant 64 : index
    %c0_25 = arith.constant 0 : index
    %21 = vector.load %arg7[%c64, %c0_25] : memref<72x6784xbf16, #tpu.memory_space<vmem>>, vector<8x6784xbf16>
    tpu.vector_store %arg7[%c64, %c0_25], %20 {strides = array<i32>} : memref<72x6784xbf16, #tpu.memory_space<vmem>>, vector<8x6784xbf16>,
    %c0_26 = arith.constant 0 : index
    %c0_27 = arith.constant 0 : index
    %22 = vector.load %arg3[%c0_26, %c0_27] : memref<12x72xbf16, #tpu.memory_space<vmem>>, vector<12x72xbf16>
    %c0_28 = arith.constant 0 : index
    %c0_29 = arith.constant 0 : index
    %23 = vector.load %arg7[%c0_28, %c0_29] : memref<72x6784xbf16, #tpu.memory_space<vmem>>, vector<72x6784xbf16>
    %cst = arith.constant dense<0.000000e+00> : vector<12x6784xf32>
    %24 = tpu.matmul %22, %23, %cst {dimension_numbers = #tpu.dot_dimension_numbers<[1], [0], [0], [1], [0, 0, 1, 1], [], []>} : vector<12x72xbf16>, vector<72x6784xbf16>, vector<12x6784xf32> -> vector<12x6784xf32>
    %c0_30 = arith.constant 0 : index
    %c0_31 = arith.constant 0 : index
    %25 = vector.load %arg4[%c0_30, %c0_31] : memref<12x1xf32, #tpu.memory_space<vmem>>, vector<12x1xf32>
    %26 = vector.broadcast %25 : vector<12x1xf32> to vector<12x6784xf32>
    %27 = arith.addf %24, %26 : vector<12x6784xf32>
    %cst_32 = arith.constant 0.000000e+00 : f32
    %28 = vector.broadcast %cst_32 : f32 to vector<12x6784xf32>
    %29 = arith.maximumf %27, %28 : vector<12x6784xf32>
    %30 = arith.truncf %29 : vector<12x6784xf32> to vector<12x6784xbf16>
    %c0_33 = arith.constant 0 : index
    %c0_34 = arith.constant 0 : index
    %31 = vector.load %arg5[%c0_33, %c0_34] : memref<12x6784xbf16, #tpu.memory_space<vmem>>, vector<12x6784xbf16>
    tpu.vector_store %arg5[%c0_33, %c0_34], %30 {strides = array<i32>} : memref<12x6784xbf16, #tpu.memory_space<vmem>>, vector<12x6784xbf16>,
    return
  }
  func.func @transform_0(%arg0: i32) -> (i32, i32) {
    %c0_i32 = arith.constant 0 : i32
    %c0_i32_0 = arith.constant 0 : i32
    return %c0_i32, %arg0 : i32, i32
  }
  func.func @transform_1(%arg0: i32) -> (i32, i32) {
    %c1_i32 = arith.constant 1 : i32
    %0 = arith.addi %arg0, %c1_i32 : i32
    %c0_i32 = arith.constant 0 : i32
    %c0_i32_0 = arith.constant 0 : i32
    return %c0_i32, %0 : i32, i32
  }
  func.func @transform_2(%arg0: i32) -> (i32, i32) {
    %c0_i32 = arith.constant 0 : i32
    %c0_i32_0 = arith.constant 0 : i32
    %c0_i32_1 = arith.constant 0 : i32
    return %c0_i32, %c0_i32_0 : i32, i32
  }
  func.func @transform_3(%arg0: i32) -> (i32, i32) {
    %c0_i32 = arith.constant 0 : i32
    %c0_i32_0 = arith.constant 0 : i32
    %c0_i32_1 = arith.constant 0 : i32
    return %c0_i32, %c0_i32_0 : i32, i32
  }
  func.func @transform_4(%arg0: i32) -> (i32, i32) {
    %c0_i32 = arith.constant 0 : i32
    %c0_i32_0 = arith.constant 0 : i32
    return %c0_i32, %arg0 : i32, i32
  }
}

module attributes {stable_mosaic.version = 11 : i64} {
  func.func @_conv_bias_relu_kernel(%arg0: i32, %arg1: memref<16x2944xbf16, #tpu.memory_space<vmem>>, %arg2: memref<16x2944xbf16, #tpu.memory_space<vmem>>, %arg3: memref<24x144xbf16, #tpu.memory_space<vmem>>, %arg4: memref<24x1xf32, #tpu.memory_space<vmem>>, %arg5: memref<24x2944xbf16, #tpu.memory_space<vmem>>, %arg6: memref<16x5888xbf16, #tpu.memory_space<vmem>>, %arg7: memref<144x2944xbf16, #tpu.memory_space<vmem>>) attributes {dimension_semantics = [#tpu.dimension_semantics<parallel>], iteration_bounds = array<i64: 3>, scalar_prefetch = 0 : i64, scratch_operands = 2 : i64, tpu.core_type = #tpu.core_type<tc>, window_params = [{transform_indices = @transform_0, window_bounds = array<i64: 16, 2944>}, {transform_indices = @transform_1, window_bounds = array<i64: 16, 2944>}, {pipeline_mode = #tpu.pipeline_mode<synchronous>, transform_indices = @transform_2, window_bounds = array<i64: 24, 144>}, {pipeline_mode = #tpu.pipeline_mode<synchronous>, transform_indices = @transform_3, window_bounds = array<i64: 24, 1>}, {transform_indices = @transform_4, window_bounds = array<i64: 24, 2944>}]} {
    %c0 = arith.constant 0 : index
    %c0_0 = arith.constant 0 : index
    %0 = vector.load %arg1[%c0, %c0_0] : memref<16x2944xbf16, #tpu.memory_space<vmem>>, vector<16x2944xbf16>
    %c0_1 = arith.constant 0 : index
    %c0_2 = arith.constant 0 : index
    %1 = vector.load %arg6[%c0_1, %c0_2] : memref<16x5888xbf16, #tpu.memory_space<vmem>>, vector<16x2944xbf16>
    tpu.vector_store %arg6[%c0_1, %c0_2], %0 {strides = array<i32>} : memref<16x5888xbf16, #tpu.memory_space<vmem>>, vector<16x2944xbf16>,
    %c0_3 = arith.constant 0 : index
    %c0_4 = arith.constant 0 : index
    %2 = vector.load %arg2[%c0_3, %c0_4] : memref<16x2944xbf16, #tpu.memory_space<vmem>>, vector<16x2944xbf16>
    %c0_5 = arith.constant 0 : index
    %c2944 = arith.constant 2944 : index
    %3 = vector.load %arg6[%c0_5, %c2944] : memref<16x5888xbf16, #tpu.memory_space<vmem>>, vector<16x2944xbf16>
    tpu.vector_store %arg6[%c0_5, %c2944], %2 {strides = array<i32>} : memref<16x5888xbf16, #tpu.memory_space<vmem>>, vector<16x2944xbf16>,
    %c0_6 = arith.constant 0 : index
    %c0_7 = arith.constant 0 : index
    %4 = vector.load %arg6[%c0_6, %c0_7] : memref<16x5888xbf16, #tpu.memory_space<vmem>>, vector<16x2944xbf16>
    %c0_8 = arith.constant 0 : index
    %c0_9 = arith.constant 0 : index
    %5 = vector.load %arg7[%c0_8, %c0_9] : memref<144x2944xbf16, #tpu.memory_space<vmem>>, vector<16x2944xbf16>
    tpu.vector_store %arg7[%c0_8, %c0_9], %4 {strides = array<i32>} : memref<144x2944xbf16, #tpu.memory_space<vmem>>, vector<16x2944xbf16>,
    %c0_10 = arith.constant 0 : index
    %c1 = arith.constant 1 : index
    %6 = vector.load %arg6[%c0_10, %c1] : memref<16x5888xbf16, #tpu.memory_space<vmem>>, vector<16x2944xbf16>
    %c16 = arith.constant 16 : index
    %c0_11 = arith.constant 0 : index
    %7 = vector.load %arg7[%c16, %c0_11] : memref<144x2944xbf16, #tpu.memory_space<vmem>>, vector<16x2944xbf16>
    tpu.vector_store %arg7[%c16, %c0_11], %6 {strides = array<i32>} : memref<144x2944xbf16, #tpu.memory_space<vmem>>, vector<16x2944xbf16>,
    %c0_12 = arith.constant 0 : index
    %c2 = arith.constant 2 : index
    %8 = vector.load %arg6[%c0_12, %c2] : memref<16x5888xbf16, #tpu.memory_space<vmem>>, vector<16x2944xbf16>
    %c32 = arith.constant 32 : index
    %c0_13 = arith.constant 0 : index
    %9 = vector.load %arg7[%c32, %c0_13] : memref<144x2944xbf16, #tpu.memory_space<vmem>>, vector<16x2944xbf16>
    tpu.vector_store %arg7[%c32, %c0_13], %8 {strides = array<i32>} : memref<144x2944xbf16, #tpu.memory_space<vmem>>, vector<16x2944xbf16>,
    %c0_14 = arith.constant 0 : index
    %c66 = arith.constant 66 : index
    %10 = vector.load %arg6[%c0_14, %c66] : memref<16x5888xbf16, #tpu.memory_space<vmem>>, vector<16x2944xbf16>
    %c48 = arith.constant 48 : index
    %c0_15 = arith.constant 0 : index
    %11 = vector.load %arg7[%c48, %c0_15] : memref<144x2944xbf16, #tpu.memory_space<vmem>>, vector<16x2944xbf16>
    tpu.vector_store %arg7[%c48, %c0_15], %10 {strides = array<i32>} : memref<144x2944xbf16, #tpu.memory_space<vmem>>, vector<16x2944xbf16>,
    %c0_16 = arith.constant 0 : index
    %c67 = arith.constant 67 : index
    %12 = vector.load %arg6[%c0_16, %c67] : memref<16x5888xbf16, #tpu.memory_space<vmem>>, vector<16x2944xbf16>
    %c64 = arith.constant 64 : index
    %c0_17 = arith.constant 0 : index
    %13 = vector.load %arg7[%c64, %c0_17] : memref<144x2944xbf16, #tpu.memory_space<vmem>>, vector<16x2944xbf16>
    tpu.vector_store %arg7[%c64, %c0_17], %12 {strides = array<i32>} : memref<144x2944xbf16, #tpu.memory_space<vmem>>, vector<16x2944xbf16>,
    %c0_18 = arith.constant 0 : index
    %c68 = arith.constant 68 : index
    %14 = vector.load %arg6[%c0_18, %c68] : memref<16x5888xbf16, #tpu.memory_space<vmem>>, vector<16x2944xbf16>
    %c80 = arith.constant 80 : index
    %c0_19 = arith.constant 0 : index
    %15 = vector.load %arg7[%c80, %c0_19] : memref<144x2944xbf16, #tpu.memory_space<vmem>>, vector<16x2944xbf16>
    tpu.vector_store %arg7[%c80, %c0_19], %14 {strides = array<i32>} : memref<144x2944xbf16, #tpu.memory_space<vmem>>, vector<16x2944xbf16>,
    %c0_20 = arith.constant 0 : index
    %c132 = arith.constant 132 : index
    %16 = vector.load %arg6[%c0_20, %c132] : memref<16x5888xbf16, #tpu.memory_space<vmem>>, vector<16x2944xbf16>
    %c96 = arith.constant 96 : index
    %c0_21 = arith.constant 0 : index
    %17 = vector.load %arg7[%c96, %c0_21] : memref<144x2944xbf16, #tpu.memory_space<vmem>>, vector<16x2944xbf16>
    tpu.vector_store %arg7[%c96, %c0_21], %16 {strides = array<i32>} : memref<144x2944xbf16, #tpu.memory_space<vmem>>, vector<16x2944xbf16>,
    %c0_22 = arith.constant 0 : index
    %c133 = arith.constant 133 : index
    %18 = vector.load %arg6[%c0_22, %c133] : memref<16x5888xbf16, #tpu.memory_space<vmem>>, vector<16x2944xbf16>
    %c112 = arith.constant 112 : index
    %c0_23 = arith.constant 0 : index
    %19 = vector.load %arg7[%c112, %c0_23] : memref<144x2944xbf16, #tpu.memory_space<vmem>>, vector<16x2944xbf16>
    tpu.vector_store %arg7[%c112, %c0_23], %18 {strides = array<i32>} : memref<144x2944xbf16, #tpu.memory_space<vmem>>, vector<16x2944xbf16>,
    %c0_24 = arith.constant 0 : index
    %c134 = arith.constant 134 : index
    %20 = vector.load %arg6[%c0_24, %c134] : memref<16x5888xbf16, #tpu.memory_space<vmem>>, vector<16x2944xbf16>
    %c128 = arith.constant 128 : index
    %c0_25 = arith.constant 0 : index
    %21 = vector.load %arg7[%c128, %c0_25] : memref<144x2944xbf16, #tpu.memory_space<vmem>>, vector<16x2944xbf16>
    tpu.vector_store %arg7[%c128, %c0_25], %20 {strides = array<i32>} : memref<144x2944xbf16, #tpu.memory_space<vmem>>, vector<16x2944xbf16>,
    %c0_26 = arith.constant 0 : index
    %c0_27 = arith.constant 0 : index
    %22 = vector.load %arg3[%c0_26, %c0_27] : memref<24x144xbf16, #tpu.memory_space<vmem>>, vector<24x144xbf16>
    %c0_28 = arith.constant 0 : index
    %c0_29 = arith.constant 0 : index
    %23 = vector.load %arg7[%c0_28, %c0_29] : memref<144x2944xbf16, #tpu.memory_space<vmem>>, vector<144x2944xbf16>
    %cst = arith.constant dense<0.000000e+00> : vector<24x2944xf32>
    %24 = tpu.matmul %22, %23, %cst {dimension_numbers = #tpu.dot_dimension_numbers<[1], [0], [0], [1], [0, 0, 1, 1], [], []>} : vector<24x144xbf16>, vector<144x2944xbf16>, vector<24x2944xf32> -> vector<24x2944xf32>
    %c0_30 = arith.constant 0 : index
    %c0_31 = arith.constant 0 : index
    %25 = vector.load %arg4[%c0_30, %c0_31] : memref<24x1xf32, #tpu.memory_space<vmem>>, vector<24x1xf32>
    %26 = vector.broadcast %25 : vector<24x1xf32> to vector<24x2944xf32>
    %27 = arith.addf %24, %26 : vector<24x2944xf32>
    %cst_32 = arith.constant 0.000000e+00 : f32
    %28 = vector.broadcast %cst_32 : f32 to vector<24x2944xf32>
    %29 = arith.maximumf %27, %28 : vector<24x2944xf32>
    %30 = arith.truncf %29 : vector<24x2944xf32> to vector<24x2944xbf16>
    %c0_33 = arith.constant 0 : index
    %c0_34 = arith.constant 0 : index
    %31 = vector.load %arg5[%c0_33, %c0_34] : memref<24x2944xbf16, #tpu.memory_space<vmem>>, vector<24x2944xbf16>
    tpu.vector_store %arg5[%c0_33, %c0_34], %30 {strides = array<i32>} : memref<24x2944xbf16, #tpu.memory_space<vmem>>, vector<24x2944xbf16>,
    return
  }
  func.func @transform_0(%arg0: i32) -> (i32, i32) {
    %c0_i32 = arith.constant 0 : i32
    %c0_i32_0 = arith.constant 0 : i32
    return %c0_i32, %arg0 : i32, i32
  }
  func.func @transform_1(%arg0: i32) -> (i32, i32) {
    %c1_i32 = arith.constant 1 : i32
    %0 = arith.addi %arg0, %c1_i32 : i32
    %c0_i32 = arith.constant 0 : i32
    %c0_i32_0 = arith.constant 0 : i32
    return %c0_i32, %0 : i32, i32
  }
  func.func @transform_2(%arg0: i32) -> (i32, i32) {
    %c0_i32 = arith.constant 0 : i32
    %c0_i32_0 = arith.constant 0 : i32
    %c0_i32_1 = arith.constant 0 : i32
    return %c0_i32, %c0_i32_0 : i32, i32
  }
  func.func @transform_3(%arg0: i32) -> (i32, i32) {
    %c0_i32 = arith.constant 0 : i32
    %c0_i32_0 = arith.constant 0 : i32
    %c0_i32_1 = arith.constant 0 : i32
    return %c0_i32, %c0_i32_0 : i32, i32
  }
  func.func @transform_4(%arg0: i32) -> (i32, i32) {
    %c0_i32 = arith.constant 0 : i32
    %c0_i32_0 = arith.constant 0 : i32
    return %c0_i32, %arg0 : i32, i32
  }
}

module attributes {stable_mosaic.version = 11 : i64} {
  func.func @_mlp_kernel(%arg0: i32, %arg1: memref<8x2x1024xbf16, #tpu.memory_space<vmem>>, %arg2: memref<8x1024x120xbf16, #tpu.memory_space<vmem>>, %arg3: memref<1x120xf32, #tpu.memory_space<vmem>>, %arg4: memref<1x120xf32, #tpu.memory_space<vmem>>, %arg5: memref<1x120xf32, #tpu.memory_space<vmem>>, %arg6: memref<120x84xf32, #tpu.memory_space<vmem>>, %arg7: memref<1x84xf32, #tpu.memory_space<vmem>>, %arg8: memref<1x84xf32, #tpu.memory_space<vmem>>, %arg9: memref<1x84xf32, #tpu.memory_space<vmem>>, %arg10: memref<84x6xf32, #tpu.memory_space<vmem>>, %arg11: memref<1x6xf32, #tpu.memory_space<vmem>>, %arg12: memref<2x6xf32, #tpu.memory_space<vmem>>, %arg13: memref<2x120xf32, #tpu.memory_space<vmem>>) attributes {dimension_semantics = [#tpu.dimension_semantics<arbitrary>], iteration_bounds = array<i64: 3>, scalar_prefetch = 0 : i64, scratch_operands = 1 : i64, tpu.core_type = #tpu.core_type<tc>, window_params = [{transform_indices = @transform_0, window_bounds = array<i64: 8, 2, 1024>}, {transform_indices = @transform_1, window_bounds = array<i64: 8, 1024, 120>}, {pipeline_mode = #tpu.pipeline_mode<synchronous>, transform_indices = @transform_2, window_bounds = array<i64: 1, 120>}, {pipeline_mode = #tpu.pipeline_mode<synchronous>, transform_indices = @transform_3, window_bounds = array<i64: 1, 120>}, {pipeline_mode = #tpu.pipeline_mode<synchronous>, transform_indices = @transform_4, window_bounds = array<i64: 1, 120>}, {pipeline_mode = #tpu.pipeline_mode<synchronous>, transform_indices = @transform_5, window_bounds = array<i64: 120, 84>}, {pipeline_mode = #tpu.pipeline_mode<synchronous>, transform_indices = @transform_6, window_bounds = array<i64: 1, 84>}, {pipeline_mode = #tpu.pipeline_mode<synchronous>, transform_indices = @transform_7, window_bounds = array<i64: 1, 84>}, {pipeline_mode = #tpu.pipeline_mode<synchronous>, transform_indices = @transform_8, window_bounds = array<i64: 1, 84>}, {pipeline_mode = #tpu.pipeline_mode<synchronous>, transform_indices = @transform_9, window_bounds = array<i64: 84, 6>}, {pipeline_mode = #tpu.pipeline_mode<synchronous>, transform_indices = @transform_10, window_bounds = array<i64: 1, 6>}, {pipeline_mode = #tpu.pipeline_mode<synchronous>, transform_indices = @transform_11, window_bounds = array<i64: 2, 6>}]} {
    %c0_i32 = arith.constant 0 : i32
    %0 = arith.cmpi eq, %arg0, %c0_i32 : i32
    %1 = arith.extui %0 : i1 to i32
    %c0_i32_0 = arith.constant 0 : i32
    %2 = arith.cmpi ne, %1, %c0_i32_0 : i32
    scf.if %2 {
      %cst_53 = arith.constant 0.000000e+00 : f32
      %56 = vector.broadcast %cst_53 : f32 to vector<2x120xf32>
      %c0_54 = arith.constant 0 : index
      %c0_55 = arith.constant 0 : index
      %57 = vector.load %arg13[%c0_54, %c0_55] : memref<2x120xf32, #tpu.memory_space<vmem>>, vector<2x120xf32>
      tpu.vector_store %arg13[%c0_54, %c0_55], %56 {strides = array<i32>} : memref<2x120xf32, #tpu.memory_space<vmem>>, vector<2x120xf32>,
    } else {
    }
    %c0 = arith.constant 0 : index
    %c0_1 = arith.constant 0 : index
    %c0_2 = arith.constant 0 : index
    %3 = vector.load %arg1[%c0, %c0_1, %c0_2] : memref<8x2x1024xbf16, #tpu.memory_space<vmem>>, vector<1x2x1024xbf16>
    %4 = vector.shape_cast %3 : vector<1x2x1024xbf16> to vector<2x1024xbf16>
    %c0_3 = arith.constant 0 : index
    %c0_4 = arith.constant 0 : index
    %c0_5 = arith.constant 0 : index
    %5 = vector.load %arg2[%c0_3, %c0_4, %c0_5] : memref<8x1024x120xbf16, #tpu.memory_space<vmem>>, vector<1x1024x120xbf16>
    %6 = vector.shape_cast %5 : vector<1x1024x120xbf16> to vector<1024x120xbf16>
    %cst = arith.constant dense<0.000000e+00> : vector<2x120xf32>
    %7 = tpu.matmul %4, %6, %cst {dimension_numbers = #tpu.dot_dimension_numbers<[1], [0], [0], [1], [0, 0, 1, 1], [], []>} : vector<2x1024xbf16>, vector<1024x120xbf16>, vector<2x120xf32> -> vector<2x120xf32>
    %c1 = arith.constant 1 : index
    %c0_6 = arith.constant 0 : index
    %c0_7 = arith.constant 0 : index
    %8 = vector.load %arg1[%c1, %c0_6, %c0_7] : memref<8x2x1024xbf16, #tpu.memory_space<vmem>>, vector<1x2x1024xbf16>
    %9 = vector.shape_cast %8 : vector<1x2x1024xbf16> to vector<2x1024xbf16>
    %c1_8 = arith.constant 1 : index
    %c0_9 = arith.constant 0 : index
    %c0_10 = arith.constant 0 : index
    %10 = vector.load %arg2[%c1_8, %c0_9, %c0_10] : memref<8x1024x120xbf16, #tpu.memory_space<vmem>>, vector<1x1024x120xbf16>
    %11 = vector.shape_cast %10 : vector<1x1024x120xbf16> to vector<1024x120xbf16>
    %cst_11 = arith.constant dense<0.000000e+00> : vector<2x120xf32>
    %12 = tpu.matmul %9, %11, %cst_11 {dimension_numbers = #tpu.dot_dimension_numbers<[1], [0], [0], [1], [0, 0, 1, 1], [], []>} : vector<2x1024xbf16>, vector<1024x120xbf16>, vector<2x120xf32> -> vector<2x120xf32>
    %13 = arith.addf %7, %12 : vector<2x120xf32>
    %c2 = arith.constant 2 : index
    %c0_12 = arith.constant 0 : index
    %c0_13 = arith.constant 0 : index
    %14 = vector.load %arg1[%c2, %c0_12, %c0_13] : memref<8x2x1024xbf16, #tpu.memory_space<vmem>>, vector<1x2x1024xbf16>
    %15 = vector.shape_cast %14 : vector<1x2x1024xbf16> to vector<2x1024xbf16>
    %c2_14 = arith.constant 2 : index
    %c0_15 = arith.constant 0 : index
    %c0_16 = arith.constant 0 : index
    %16 = vector.load %arg2[%c2_14, %c0_15, %c0_16] : memref<8x1024x120xbf16, #tpu.memory_space<vmem>>, vector<1x1024x120xbf16>
    %17 = vector.shape_cast %16 : vector<1x1024x120xbf16> to vector<1024x120xbf16>
    %cst_17 = arith.constant dense<0.000000e+00> : vector<2x120xf32>
    %18 = tpu.matmul %15, %17, %cst_17 {dimension_numbers = #tpu.dot_dimension_numbers<[1], [0], [0], [1], [0, 0, 1, 1], [], []>} : vector<2x1024xbf16>, vector<1024x120xbf16>, vector<2x120xf32> -> vector<2x120xf32>
    %19 = arith.addf %13, %18 : vector<2x120xf32>
    %c3 = arith.constant 3 : index
    %c0_18 = arith.constant 0 : index
    %c0_19 = arith.constant 0 : index
    %20 = vector.load %arg1[%c3, %c0_18, %c0_19] : memref<8x2x1024xbf16, #tpu.memory_space<vmem>>, vector<1x2x1024xbf16>
    %21 = vector.shape_cast %20 : vector<1x2x1024xbf16> to vector<2x1024xbf16>
    %c3_20 = arith.constant 3 : index
    %c0_21 = arith.constant 0 : index
    %c0_22 = arith.constant 0 : index
    %22 = vector.load %arg2[%c3_20, %c0_21, %c0_22] : memref<8x1024x120xbf16, #tpu.memory_space<vmem>>, vector<1x1024x120xbf16>
    %23 = vector.shape_cast %22 : vector<1x1024x120xbf16> to vector<1024x120xbf16>
    %cst_23 = arith.constant dense<0.000000e+00> : vector<2x120xf32>
    %24 = tpu.matmul %21, %23, %cst_23 {dimension_numbers = #tpu.dot_dimension_numbers<[1], [0], [0], [1], [0, 0, 1, 1], [], []>} : vector<2x1024xbf16>, vector<1024x120xbf16>, vector<2x120xf32> -> vector<2x120xf32>
    %25 = arith.addf %19, %24 : vector<2x120xf32>
    %c4 = arith.constant 4 : index
    %c0_24 = arith.constant 0 : index
    %c0_25 = arith.constant 0 : index
    %26 = vector.load %arg1[%c4, %c0_24, %c0_25] : memref<8x2x1024xbf16, #tpu.memory_space<vmem>>, vector<1x2x1024xbf16>
    %27 = vector.shape_cast %26 : vector<1x2x1024xbf16> to vector<2x1024xbf16>
    %c4_26 = arith.constant 4 : index
    %c0_27 = arith.constant 0 : index
    %c0_28 = arith.constant 0 : index
    %28 = vector.load %arg2[%c4_26, %c0_27, %c0_28] : memref<8x1024x120xbf16, #tpu.memory_space<vmem>>, vector<1x1024x120xbf16>
    %29 = vector.shape_cast %28 : vector<1x1024x120xbf16> to vector<1024x120xbf16>
    %cst_29 = arith.constant dense<0.000000e+00> : vector<2x120xf32>
    %30 = tpu.matmul %27, %29, %cst_29 {dimension_numbers = #tpu.dot_dimension_numbers<[1], [0], [0], [1], [0, 0, 1, 1], [], []>} : vector<2x1024xbf16>, vector<1024x120xbf16>, vector<2x120xf32> -> vector<2x120xf32>
    %31 = arith.addf %25, %30 : vector<2x120xf32>
    %c5 = arith.constant 5 : index
    %c0_30 = arith.constant 0 : index
    %c0_31 = arith.constant 0 : index
    %32 = vector.load %arg1[%c5, %c0_30, %c0_31] : memref<8x2x1024xbf16, #tpu.memory_space<vmem>>, vector<1x2x1024xbf16>
    %33 = vector.shape_cast %32 : vector<1x2x1024xbf16> to vector<2x1024xbf16>
    %c5_32 = arith.constant 5 : index
    %c0_33 = arith.constant 0 : index
    %c0_34 = arith.constant 0 : index
    %34 = vector.load %arg2[%c5_32, %c0_33, %c0_34] : memref<8x1024x120xbf16, #tpu.memory_space<vmem>>, vector<1x1024x120xbf16>
    %35 = vector.shape_cast %34 : vector<1x1024x120xbf16> to vector<1024x120xbf16>
    %cst_35 = arith.constant dense<0.000000e+00> : vector<2x120xf32>
    %36 = tpu.matmul %33, %35, %cst_35 {dimension_numbers = #tpu.dot_dimension_numbers<[1], [0], [0], [1], [0, 0, 1, 1], [], []>} : vector<2x1024xbf16>, vector<1024x120xbf16>, vector<2x120xf32> -> vector<2x120xf32>
    %37 = arith.addf %31, %36 : vector<2x120xf32>
    %c6 = arith.constant 6 : index
    %c0_36 = arith.constant 0 : index
    %c0_37 = arith.constant 0 : index
    %38 = vector.load %arg1[%c6, %c0_36, %c0_37] : memref<8x2x1024xbf16, #tpu.memory_space<vmem>>, vector<1x2x1024xbf16>
    %39 = vector.shape_cast %38 : vector<1x2x1024xbf16> to vector<2x1024xbf16>
    %c6_38 = arith.constant 6 : index
    %c0_39 = arith.constant 0 : index
    %c0_40 = arith.constant 0 : index
    %40 = vector.load %arg2[%c6_38, %c0_39, %c0_40] : memref<8x1024x120xbf16, #tpu.memory_space<vmem>>, vector<1x1024x120xbf16>
    %41 = vector.shape_cast %40 : vector<1x1024x120xbf16> to vector<1024x120xbf16>
    %cst_41 = arith.constant dense<0.000000e+00> : vector<2x120xf32>
    %42 = tpu.matmul %39, %41, %cst_41 {dimension_numbers = #tpu.dot_dimension_numbers<[1], [0], [0], [1], [0, 0, 1, 1], [], []>} : vector<2x1024xbf16>, vector<1024x120xbf16>, vector<2x120xf32> -> vector<2x120xf32>
    %43 = arith.addf %37, %42 : vector<2x120xf32>
    %c7 = arith.constant 7 : index
    %c0_42 = arith.constant 0 : index
    %c0_43 = arith.constant 0 : index
    %44 = vector.load %arg1[%c7, %c0_42, %c0_43] : memref<8x2x1024xbf16, #tpu.memory_space<vmem>>, vector<1x2x1024xbf16>
    %45 = vector.shape_cast %44 : vector<1x2x1024xbf16> to vector<2x1024xbf16>
    %c7_44 = arith.constant 7 : index
    %c0_45 = arith.constant 0 : index
    %c0_46 = arith.constant 0 : index
    %46 = vector.load %arg2[%c7_44, %c0_45, %c0_46] : memref<8x1024x120xbf16, #tpu.memory_space<vmem>>, vector<1x1024x120xbf16>
    %47 = vector.shape_cast %46 : vector<1x1024x120xbf16> to vector<1024x120xbf16>
    %cst_47 = arith.constant dense<0.000000e+00> : vector<2x120xf32>
    %48 = tpu.matmul %45, %47, %cst_47 {dimension_numbers = #tpu.dot_dimension_numbers<[1], [0], [0], [1], [0, 0, 1, 1], [], []>} : vector<2x1024xbf16>, vector<1024x120xbf16>, vector<2x120xf32> -> vector<2x120xf32>
    %49 = arith.addf %43, %48 : vector<2x120xf32>
    %c0_48 = arith.constant 0 : index
    %c0_49 = arith.constant 0 : index
    %50 = vector.load %arg13[%c0_48, %c0_49] : memref<2x120xf32, #tpu.memory_space<vmem>>, vector<2x120xf32>
    %51 = arith.addf %50, %49 : vector<2x120xf32>
    %c0_50 = arith.constant 0 : index
    %c0_51 = arith.constant 0 : index
    %52 = vector.load %arg13[%c0_50, %c0_51] : memref<2x120xf32, #tpu.memory_space<vmem>>, vector<2x120xf32>
    tpu.vector_store %arg13[%c0_50, %c0_51], %51 {strides = array<i32>} : memref<2x120xf32, #tpu.memory_space<vmem>>, vector<2x120xf32>,
    %c2_i32 = arith.constant 2 : i32
    %53 = arith.cmpi eq, %arg0, %c2_i32 : i32
    %54 = arith.extui %53 : i1 to i32
    %c0_i32_52 = arith.constant 0 : i32
    %55 = arith.cmpi ne, %54, %c0_i32_52 : i32
    scf.if %55 {
      %c0_53 = arith.constant 0 : index
      %c0_54 = arith.constant 0 : index
      %56 = vector.load %arg13[%c0_53, %c0_54] : memref<2x120xf32, #tpu.memory_space<vmem>>, vector<2x120xf32>
      %c0_55 = arith.constant 0 : index
      %c0_56 = arith.constant 0 : index
      %57 = vector.load %arg3[%c0_55, %c0_56] : memref<1x120xf32, #tpu.memory_space<vmem>>, vector<1x120xf32>
      %58 = vector.broadcast %57 : vector<1x120xf32> to vector<2x120xf32>
      %59 = arith.addf %56, %58 : vector<2x120xf32>
      %c0_57 = arith.constant 0 : index
      %c0_58 = arith.constant 0 : index
      %60 = vector.load %arg4[%c0_57, %c0_58] : memref<1x120xf32, #tpu.memory_space<vmem>>, vector<1x120xf32>
      %61 = vector.broadcast %60 : vector<1x120xf32> to vector<2x120xf32>
      %62 = arith.mulf %59, %61 : vector<2x120xf32>
      %c0_59 = arith.constant 0 : index
      %c0_60 = arith.constant 0 : index
      %63 = vector.load %arg5[%c0_59, %c0_60] : memref<1x120xf32, #tpu.memory_space<vmem>>, vector<1x120xf32>
      %64 = vector.broadcast %63 : vector<1x120xf32> to vector<2x120xf32>
      %65 = arith.addf %62, %64 : vector<2x120xf32>
      %cst_61 = arith.constant 0.000000e+00 : f32
      %66 = vector.broadcast %cst_61 : f32 to vector<2x120xf32>
      %67 = arith.maximumf %65, %66 : vector<2x120xf32>
      %c0_62 = arith.constant 0 : index
      %c0_63 = arith.constant 0 : index
      %68 = vector.load %arg6[%c0_62, %c0_63] : memref<120x84xf32, #tpu.memory_space<vmem>>, vector<120x84xf32>
      %cst_64 = arith.constant dense<0.000000e+00> : vector<2x84xf32>
      %69 = tpu.matmul %67, %68, %cst_64 {dimension_numbers = #tpu.dot_dimension_numbers<[1], [0], [0], [1], [0, 0, 1, 1], [], []>} : vector<2x120xf32>, vector<120x84xf32>, vector<2x84xf32> -> vector<2x84xf32>
      %c0_65 = arith.constant 0 : index
      %c0_66 = arith.constant 0 : index
      %70 = vector.load %arg7[%c0_65, %c0_66] : memref<1x84xf32, #tpu.memory_space<vmem>>, vector<1x84xf32>
      %71 = vector.broadcast %70 : vector<1x84xf32> to vector<2x84xf32>
      %72 = arith.addf %69, %71 : vector<2x84xf32>
      %c0_67 = arith.constant 0 : index
      %c0_68 = arith.constant 0 : index
      %73 = vector.load %arg8[%c0_67, %c0_68] : memref<1x84xf32, #tpu.memory_space<vmem>>, vector<1x84xf32>
      %74 = vector.broadcast %73 : vector<1x84xf32> to vector<2x84xf32>
      %75 = arith.mulf %72, %74 : vector<2x84xf32>
      %c0_69 = arith.constant 0 : index
      %c0_70 = arith.constant 0 : index
      %76 = vector.load %arg9[%c0_69, %c0_70] : memref<1x84xf32, #tpu.memory_space<vmem>>, vector<1x84xf32>
      %77 = vector.broadcast %76 : vector<1x84xf32> to vector<2x84xf32>
      %78 = arith.addf %75, %77 : vector<2x84xf32>
      %cst_71 = arith.constant 0.000000e+00 : f32
      %79 = vector.broadcast %cst_71 : f32 to vector<2x84xf32>
      %80 = arith.maximumf %78, %79 : vector<2x84xf32>
      %c0_72 = arith.constant 0 : index
      %c0_73 = arith.constant 0 : index
      %81 = vector.load %arg10[%c0_72, %c0_73] : memref<84x6xf32, #tpu.memory_space<vmem>>, vector<84x6xf32>
      %cst_74 = arith.constant dense<0.000000e+00> : vector<2x6xf32>
      %82 = tpu.matmul %80, %81, %cst_74 {dimension_numbers = #tpu.dot_dimension_numbers<[1], [0], [0], [1], [0, 0, 1, 1], [], []>} : vector<2x84xf32>, vector<84x6xf32>, vector<2x6xf32> -> vector<2x6xf32>
      %c0_75 = arith.constant 0 : index
      %c0_76 = arith.constant 0 : index
      %83 = vector.load %arg11[%c0_75, %c0_76] : memref<1x6xf32, #tpu.memory_space<vmem>>, vector<1x6xf32>
      %84 = vector.broadcast %83 : vector<1x6xf32> to vector<2x6xf32>
      %85 = arith.addf %82, %84 : vector<2x6xf32>
      %c0_77 = arith.constant 0 : index
      %c0_78 = arith.constant 0 : index
      %86 = vector.load %arg12[%c0_77, %c0_78] : memref<2x6xf32, #tpu.memory_space<vmem>>, vector<2x6xf32>
      tpu.vector_store %arg12[%c0_77, %c0_78], %85 {strides = array<i32>} : memref<2x6xf32, #tpu.memory_space<vmem>>, vector<2x6xf32>,
    } else {
    }
    return
  }
  func.func @transform_0(%arg0: i32) -> (i32, i32, i32) {
    %c0_i32 = arith.constant 0 : i32
    %c0_i32_0 = arith.constant 0 : i32
    %c0_i32_1 = arith.constant 0 : i32
    return %arg0, %c0_i32, %c0_i32_0 : i32, i32, i32
  }
  func.func @transform_1(%arg0: i32) -> (i32, i32, i32) {
    %c0_i32 = arith.constant 0 : i32
    %c0_i32_0 = arith.constant 0 : i32
    %c0_i32_1 = arith.constant 0 : i32
    return %arg0, %c0_i32, %c0_i32_0 : i32, i32, i32
  }
  func.func @transform_2(%arg0: i32) -> (i32, i32) {
    %c0_i32 = arith.constant 0 : i32
    %c0_i32_0 = arith.constant 0 : i32
    %c0_i32_1 = arith.constant 0 : i32
    return %c0_i32, %c0_i32_0 : i32, i32
  }
  func.func @transform_3(%arg0: i32) -> (i32, i32) {
    %c0_i32 = arith.constant 0 : i32
    %c0_i32_0 = arith.constant 0 : i32
    %c0_i32_1 = arith.constant 0 : i32
    return %c0_i32, %c0_i32_0 : i32, i32
  }
  func.func @transform_4(%arg0: i32) -> (i32, i32) {
    %c0_i32 = arith.constant 0 : i32
    %c0_i32_0 = arith.constant 0 : i32
    %c0_i32_1 = arith.constant 0 : i32
    return %c0_i32, %c0_i32_0 : i32, i32
  }
  func.func @transform_5(%arg0: i32) -> (i32, i32) {
    %c0_i32 = arith.constant 0 : i32
    %c0_i32_0 = arith.constant 0 : i32
    %c0_i32_1 = arith.constant 0 : i32
    return %c0_i32, %c0_i32_0 : i32, i32
  }
  func.func @transform_6(%arg0: i32) -> (i32, i32) {
    %c0_i32 = arith.constant 0 : i32
    %c0_i32_0 = arith.constant 0 : i32
    %c0_i32_1 = arith.constant 0 : i32
    return %c0_i32, %c0_i32_0 : i32, i32
  }
  func.func @transform_7(%arg0: i32) -> (i32, i32) {
    %c0_i32 = arith.constant 0 : i32
    %c0_i32_0 = arith.constant 0 : i32
    %c0_i32_1 = arith.constant 0 : i32
    return %c0_i32, %c0_i32_0 : i32, i32
  }
  func.func @transform_8(%arg0: i32) -> (i32, i32) {
    %c0_i32 = arith.constant 0 : i32
    %c0_i32_0 = arith.constant 0 : i32
    %c0_i32_1 = arith.constant 0 : i32
    return %c0_i32, %c0_i32_0 : i32, i32
  }
  func.func @transform_9(%arg0: i32) -> (i32, i32) {
    %c0_i32 = arith.constant 0 : i32
    %c0_i32_0 = arith.constant 0 : i32
    %c0_i32_1 = arith.constant 0 : i32
    return %c0_i32, %c0_i32_0 : i32, i32
  }
  func.func @transform_10(%arg0: i32) -> (i32, i32) {
    %c0_i32 = arith.constant 0 : i32
    %c0_i32_0 = arith.constant 0 : i32
    %c0_i32_1 = arith.constant 0 : i32
    return %c0_i32, %c0_i32_0 : i32, i32
  }
  func.func @transform_11(%arg0: i32) -> (i32, i32) {
    %c0_i32 = arith.constant 0 : i32
    %c0_i32_0 = arith.constant 0 : i32
    %c0_i32_1 = arith.constant 0 : i32
    return %c0_i32, %c0_i32_0 : i32, i32
  }
}

</mosaic_0001>

<bundles_post_ra>
// kernel: net_forward.3
= control target key start
LH: loop header
LB: loop body
LE: loop exit
PB: predicated region body
PF: predicated region fallthrough
CT: control target
= control target key end

     0   :  { %s6397_s15 = smov 0   ;;  %s6399_s16 = smov 0   ;;  %s8743_s0 = inlined_call_operand.vmem [shape: bf16[8,40704], index: 0, kind: input, shape index: {}, may-alias: {0,1}]   ;;  %s8744_s1 = inlined_call_operand.vmem [shape: bf16[8,40704], index: 1, kind: input, shape index: {}, may-alias: {0,1}]   ;;  %s8745_s2 = inlined_call_operand.vmem [shape: bf16[12,72], index: 2, kind: input, shape index: {}]   ;;  %s8746_s3 = inlined_call_operand.vmem [shape: f32[12,1], index: 3, kind: input, shape index: {}]   ;;  %s8747_s4 = inlined_call_operand.vmem [shape: bf16[12,33920], index: 4, kind: output, shape index: {}]  }
   0x1   :  { %s6401_s17 = smov 0  }
   0x2 LB: > { %s6410_s18 = sadd.s32 4294967295, %s6361_s17   ;;  %s6412_s19 = sadd.s32 1, %s6361_s17   ;;  %s6361_s17 = sphi %s6401_s17, %s8802_s17   ;;  %s6357_s16 = sphi %s6399_s16, %s8801_s16   ;;  %s6353_s15 = sphi %s6397_s15, %s8800_s15  }
   0x3   : > { %s114_s20 = ssub.s32 %s6361_s17, %s6412_s19  ;;  %s117_s21 = sadd.s32 1, %s6357_s16 }
   0x4   : > { %p115_p0 = scmp.eq.s32.totalorder %s114_s20, 0  ;;  %p127_p1 = scmp.ne.s32.totalorder %s6357_s16, %s6353_s15 }
   0x5   : > { %p128_p2 = scmp.eq.s32.totalorder %s6410_s18, 4  ;;  %p5804_p3 = scmp.ge.s32.totalorder %s6361_s17, 1 }
   0x6   : > { %s6420_s22 = scalar_select %p115_p0, %s6357_s16, %s117_s21  }
   0x7   : > { %p6422_p4 = por %p128_p2, %p127_p1  ;;  %p178_p5 = scmp.lt.s32.totalorder %s6361_s17, 6 }
   0x9   : > { %p179_p6 = pnand %p5804_p3, %p178_p5 }
   0xb   : > { %182 = sbr.rel (%p179_p6) target bundleno = 816 (0x330), region = 36 }
  0x12   : > { %s209_s24 = smul.u32 53, %s6410_s18  ;;  %s6363_s29 = smov 126   ;;  %v8755_v13 = vmov 0   ;;  %vm522_vm0 = vcmask 1043456   ;;  %vm767_vm1 = vcmask 1031168   ;;  %vm524_vm2 = vcmask 1039360  }
  0x13   : > { %s6364_s30 = smov 127   ;;  %s6365_s5 = smov 125   ;;  %3985 = vmatprep.mubr.bf16.mxu0 %v8755_v13  ;;  %4028 = vmatprep.mubr.bf16.mxu1 %v8755_v13  ;;  %vm1252_vm3 = vcmask 1022976   ;;  %vm1495_vm4 = vcmask 1014784   ;;  %vm1980_vm5 = vcmask 1006592   ;;  %vm2223_vm6 = vcmask 998400  }
  0x14   : > { %p210_p7 = scmp.lt.s32.totalorder %s209_s24, 317  ;;  %s6366_s6 = smov 124   ;;  %6297 = vset.pattern.permute.xlu1 %v8755_v13  ;;  %6296 = vset.pattern.permute.xlu0 %v8755_v13  ;;  %vm3789_vm7 = vcmask 588800   ;;  %vm6371_vm8 = vmmov 0  }
  0x15   : > { %s6367_s7 = smov 123   ;;  %s6369_s8 = smov 122  }
  0x16   : > { %s8804_s24 = smov (!%p210_p7, %s209_s24), 317  ;;  %s215_s11 = sadd.s32 1, %s6410_s18 }
  0x17   : > { %s5805_s25 = sshll.u32 %s8804_s24, 2  ;;  %s216_s12 = smul.u32 53, %s215_s11 }
  0x18   : > { %s6430_s28 = scalar_lea.vmem %s8743_s0, %s5805_s25  ;;  %s6241_s9 = smul.u32 (%p6422_p4), 212, %s6410_s18 }
  0x19   : > { %v6433_v0 = vld [vmem:[%s6430_s28] sm:$0xff]  ;;  %v6436_v1 = vld [vmem:[%s6430_s28 + $0x8] sm:$0xff]  ;;  %v6439_v2 = vld [vmem:[%s6430_s28 + $0x10] sm:$0xff]  ;;  %p217_p8 = scmp.lt.s32.totalorder %s216_s12, 317 }
  0x1a   : > { %252 = vst [vmem:[#allocation2] sm:$0xff] %v6433_v0  ;;  %685 = vrot.lane.b32.xlu1 %v6433_v0, %s6363_s29  ;;  %441 = vrot.lane.b32.xlu0 %v6433_v0, %s6364_s30  ;;  %253 = vst [vmem:[#allocation2 + $0x8] sm:$0xff] %v6436_v1  ;;  %v6449_v3 = vld [vmem:[%s6430_s28 + $0x18] sm:$0xff]  ;;  %v6452_v4 = vld [vmem:[%s6430_s28 + $0x20] sm:$0xff]  ;;  %s8629_s11 = scalar_lea.vmem (%p6422_p4), %s8747_s4, %s6241_s9 }
  0x1b   : > { %254 = vst [vmem:[#allocation2 + $0x10] sm:$0xff] %v6439_v2  ;;  %255 = vst [vmem:[#allocation2 + $0x18] sm:$0xff] %v6449_v3  ;;  %v6457_v5 = vld [vmem:[%s6430_s28 + $0x28] sm:$0xff]  ;;  %v6460_v6 = vld [vmem:[%s6430_s28 + $0x30] sm:$0xff]  ;;  %s8806_s12 = smov (!%p217_p8, %s216_s12), 317 }
  0x1c   : > { %256 = vst [vmem:[#allocation2 + $0x20] sm:$0xff] %v6452_v4  ;;  %v6463_v7 = vld [vmem:[%s6430_s28 + $0x38] sm:$0xff]  ;;  %257 = vst [vmem:[#allocation2 + $0x28] sm:$0xff] %v6457_v5  ;;  %v6469_v8 = vld [vmem:[%s6430_s28 + $0x40] sm:$0xff]  ;;  %s5806_s13 = sshll.u32 %s8806_s12, 2 }
  0x1d   : > { %258 = vst [vmem:[#allocation2 + $0x30] sm:$0xff] %v6460_v6  ;;  %259 = vst [vmem:[#allocation2 + $0x38] sm:$0xff] %v6463_v7  ;;  %v6472_v9 = vld [vmem:[%s6430_s28 + $0x48] sm:$0xff]  ;;  %v6475_v10 = vld [vmem:[%s6430_s28 + $0x50] sm:$0xff]  ;;  %s7229_s20 = scalar_lea.vmem %s8744_s1, %s5806_s13 }
  0x1e   : > { %260 = vst [vmem:[#allocation2 + $0x40] sm:$0xff] %v6469_v8  ;;  %261 = vst [vmem:[#allocation2 + $0x48] sm:$0xff] %v6472_v9  ;;  %687 = vrot.lane.b32.xlu1 %v6436_v1, %s6363_s29  ;;  %443 = vrot.lane.b32.xlu0 %v6436_v1, %s6364_s30  ;;  %v6503_v14 = vld [vmem:[%s6430_s28 + $0x58] sm:$0xff]  ;;  %v6515_v15 = vld [vmem:[%s6430_s28 + $0x60] sm:$0xff] }
  0x1f   : > { %262 = vst [vmem:[#allocation2 + $0x50] sm:$0xff] %v6475_v10  ;;  %263 = vst [vmem:[#allocation2 + $0x58] sm:$0xff] %v6503_v14  ;;  %v6541_v18 = vld [vmem:[%s6430_s28 + $0x68] sm:$0xff]  ;;  %v6549_v20 = vld [vmem:[%s6430_s28 + $0x70] sm:$0xff] }
  0x20   : > { %264 = vst [vmem:[#allocation2 + $0x60] sm:$0xff] %v6515_v15  ;;  %265 = vst [vmem:[#allocation2 + $0x68] sm:$0xff] %v6541_v18  ;;  %v6579_v24 = vld [vmem:[%s6430_s28 + $0x78] sm:$0xff]  ;;  %v241_v26 = vld [vmem:[%s6430_s28 + $0x80] sm:$0xff] }
  0x21   : > { %v874_v12 = vld [vmem:[#allocation2 + $0x4] sm:$0xff]  ;;  %266 = vst [vmem:[#allocation2 + $0x70] sm:$0xff] %v6549_v20  ;;  %267 = vst [vmem:[#allocation2 + $0x78] sm:$0xff] %v6579_v24  ;;  %v243_v62 = vld [vmem:[%s6430_s28 + $0x90] sm:$0xff] }
  0x22   : > { %v875_v11 = vld [vmem:[#allocation2 + $0xc] sm:$0xff]  ;;  %928 = vrot.lane.b32.xlu0 %v874_v12, %s6363_s29  ;;  %v876_v16 = vld [vmem:[#allocation2 + $0x14] sm:$0xff]  ;;  %268 = vst [vmem:[#allocation2 + $0x80] sm:$0xff] %v241_v26  ;;  %270 = vst [vmem:[#allocation2 + $0x90] sm:$0xff] %v243_v62 }
  0x23   : > { %930 = vrot.lane.b32.xlu1 %v875_v11, %s6363_s29  ;;  %v877_v17 = vld [vmem:[#allocation2 + $0x1c] sm:$0xff]  ;;  %v878_v19 = vld [vmem:[#allocation2 + $0x24] sm:$0xff] }
  0x24   : > { %v879_v21 = vld [vmem:[#allocation2 + $0x2c] sm:$0xff]  ;;  %v880_v25 = vld [vmem:[#allocation2 + $0x34] sm:$0xff] }
  0x25   : > { %v6570_v22 = vld [vmem:[#allocation2 + $0x28] sm:$0xff]  ;;  %v6572_v23 = vld [vmem:[#allocation2 + $0x30] sm:$0xff]  ;;  %v881_v27 = vld [vmem:[#allocation2 + $0x3c] sm:$0xff] }
  0x26   : > { %1170 = vrot.lane.b32.xlu0 %v874_v12, %s6365_s5  ;;  %v340_v38 = vld [vmem:[#allocation2 + $0x38] sm:$0xff]  ;;  %v341_v39 = vld [vmem:[#allocation2 + $0x40] sm:$0xff]  ;;  %v242_v52 = vld [vmem:[%s6430_s28 + $0x88] sm:$0xff] }
  0x27   : > { %1172 = vrot.lane.b32.xlu1 %v875_v11, %s6365_s5  ;;  %367 = vst [vmem:[#allocation3 + $0x38] sm:$0xff] %v340_v38  ;;  %368 = vst [vmem:[#allocation3 + $0x40] sm:$0xff] %v341_v39  ;;  %v882_v58 = vld [vmem:[#allocation2 + $0x44] sm:$0xff] }
  0x28   : > { %269 = vst [vmem:[#allocation2 + $0x88] sm:$0xff] %v242_v52 }
  0x2a   : > { %1413 = vrot.lane.b32.xlu0 %v874_v12, %s6366_s6 }
  0x2b   : > { %1415 = vrot.lane.b32.xlu1 %v875_v11, %s6366_s6 }
  0x2e   : > { %1656 = vrot.lane.b32.xlu0 %v6436_v1, %s6366_s6 }
  0x2f   : > { %1658 = vrot.lane.b32.xlu1 %v6439_v2, %s6366_s6 }
  0x32   : > { %1898 = vrot.lane.b32.xlu0 %v6436_v1, %s6367_s7 }
  0x33   : > { %1900 = vrot.lane.b32.xlu1 %v6439_v2, %s6367_s7 }
  0x36   : > { %2141 = vrot.lane.b32.xlu0 %v6436_v1, %s6369_s8 }
  0x37   : > { %2143 = vrot.lane.b32.xlu1 %v6439_v2, %s6369_s8 }
  0x3a   : > { %445 = vrot.lane.b32.xlu0 %v6439_v2, %s6364_s30 }
  0x3b   : > { %447 = vrot.lane.b32.xlu1 %v6449_v3, %s6364_s30 }
  0x3e   : > { %689 = vrot.lane.b32.xlu0 %v6439_v2, %s6363_s29 }
  0x3f   : > { %932 = vrot.lane.b32.xlu1 %v876_v16, %s6363_s29 }
  0x42   : > { %691 = vrot.lane.b32.xlu0 %v6449_v3, %s6363_s29 }
  0x43   : > { %934 = vrot.lane.b32.xlu1 %v877_v17, %s6363_s29 }
  0x46   : > { %1174 = vrot.lane.b32.xlu0 %v876_v16, %s6365_s5 }
  0x47   : > { %1417 = vrot.lane.b32.xlu1 %v876_v16, %s6366_s6 }
  0x4a   : > { %1176 = vrot.lane.b32.xlu0 %v877_v17, %s6365_s5 }
  0x4b   : > { %1419 = vrot.lane.b32.xlu1 %v877_v17, %s6366_s6 }
  0x4e   : > { %1660 = vrot.lane.b32.xlu0 %v6449_v3, %s6366_s6 }
  0x4f   : > { %1902 = vrot.lane.b32.xlu1 %v6449_v3, %s6367_s7 }
  0x52   : > { %1662 = vrot.lane.b32.xlu0 %v6452_v4, %s6366_s6 }
  0x53   : > { %1904 = vrot.lane.b32.xlu1 %v6452_v4, %s6367_s7 }
  0x56   : > { %2145 = vrot.lane.b32.xlu0 %v6449_v3, %s6369_s8 }
  0x57   : > { %2147 = vrot.lane.b32.xlu1 %v6452_v4, %s6369_s8 }
  0x5a   : > { %449 = vrot.lane.b32.xlu0 %v6452_v4, %s6364_s30 }
  0x5b   : > { %451 = vrot.lane.b32.xlu1 %v6457_v5, %s6364_s30 }
  0x5e   : > { %693 = vrot.lane.b32.xlu0 %v6452_v4, %s6363_s29 }
  0x5f   : > { %936 = vrot.lane.b32.xlu1 %v878_v19, %s6363_s29 }
  0x62   : > { %695 = vrot.lane.b32.xlu0 %v6457_v5, %s6363_s29 }
  0x63   : > { %938 = vrot.lane.b32.xlu1 %v879_v21, %s6363_s29 }
  0x66   : > { %1178 = vrot.lane.b32.xlu0 %v878_v19, %s6365_s5 }
  0x67   : > { %1421 = vrot.lane.b32.xlu1 %v878_v19, %s6366_s6 }
  0x6a   : > { %1180 = vrot.lane.b32.xlu0 %v879_v21, %s6365_s5 }
  0x6b   : > { %1423 = vrot.lane.b32.xlu1 %v879_v21, %s6366_s6 }
  0x6e   : > { %1664 = vrot.lane.b32.xlu0 %v6457_v5, %s6366_s6 }
  0x6f   : > { %1906 = vrot.lane.b32.xlu1 %v6457_v5, %s6367_s7 }
  0x72   : > { %1666 = vrot.lane.b32.xlu0 %v6460_v6, %s6366_s6 }
  0x73   : > { %1908 = vrot.lane.b32.xlu1 %v6460_v6, %s6367_s7 }
  0x76   : > { %2149 = vrot.lane.b32.xlu0 %v6457_v5, %s6369_s8 }
  0x77   : > { %2151 = vrot.lane.b32.xlu1 %v6460_v6, %s6369_s8 }
  0x7a   : > { %453 = vrot.lane.b32.xlu0 %v6460_v6, %s6364_s30 }
  0x7b   : > { %455 = vrot.lane.b32.xlu1 %v6463_v7, %s6364_s30 }
  0x7e   : > { %697 = vrot.lane.b32.xlu0 %v6460_v6, %s6363_s29  ;;  %v883_v6 = vld [vmem:[#allocation2 + $0x4c] sm:$0xff] }
  0x7f   : > { %940 = vrot.lane.b32.xlu1 %v880_v25, %s6363_s29 }
  0x82   : > { %699 = vrot.lane.b32.xlu0 %v6463_v7, %s6363_s29 }
  0x83   : > { %942 = vrot.lane.b32.xlu1 %v881_v27, %s6363_s29 }
  0x86   : > { %1182 = vrot.lane.b32.xlu0 %v880_v25, %s6365_s5 }
  0x87   : > { %1425 = vrot.lane.b32.xlu1 %v880_v25, %s6366_s6 }
  0x8a   : > { %1184 = vrot.lane.b32.xlu0 %v881_v27, %s6365_s5 }
  0x8b   : > { %1427 = vrot.lane.b32.xlu1 %v881_v27, %s6366_s6 }
  0x8c   : > { %v686_v28 = vpop.permute.xlu1 %685  ;;  %v442_v29 = vpop.permute.xlu0 %441 }
  0x8d   : > { %v739_v30 = vrot.slane %v686_v28, 4  ;;  %v495_v33 = vrot.slane %v442_v29, 4 }
  0x8e   : > { %1668 = vrot.lane.b32.xlu0 %v6463_v7, %s6366_s6 }
  0x8f   : > { %1910 = vrot.lane.b32.xlu1 %v6463_v7, %s6367_s7 }
  0x90   : > { %v6601_v31 = vpop.permute.xlu1 %687  ;;  %v6603_v32 = vpop.permute.xlu0 %443 }
  0x91   : > { %v740_v34 = vrot.slane %v6601_v31, 4  ;;  %v496_v35 = vrot.slane %v6603_v32, 4 }
  0x92   : > { %1670 = vrot.lane.b32.xlu0 %v6469_v8, %s6366_s6 }
  0x93   : > { %1912 = vrot.lane.b32.xlu1 %v6469_v8, %s6367_s7  ;;  %v766_v36 = vsel %vm522_vm0, %v739_v30, %v740_v34  ;;  %v523_v37 = vsel %vm522_vm0, %v495_v33, %v496_v35 }
  0x94   : > { %v768_v40 = vsel %vm767_vm1, %v686_v28, %v766_v36  ;;  %v525_v41 = vsel %vm524_vm2, %v442_v29, %v523_v37  ;;  %v929_v43 = vpop.permute.xlu0 %928 }
  0x95   : > { %v6619_v42 = vpop.permute.xlu1 %930  ;;  %v982_v45 = vrot.slane %v929_v43, 4  ;;  %v5809_v46 = vcombine.high %v6433_v0, %v525_v41  ;;  %v5808_v47 = vcombine.low %v6433_v0, %v525_v41 }
  0x96   : > { %v983_v44 = vrot.slane %v6619_v42, 4  ;;  %2153 = vrot.lane.b32.xlu0 %v6463_v7, %s6369_s8 }
  0x97   : > { %2155 = vrot.lane.b32.xlu1 %v6469_v8, %s6369_s8  ;;  %3953 = vmatprep.subr.bf16.mxu0 %v5809_v46 }
  0x98   : > { %v1009_v48 = vsel %vm522_vm0, %v982_v45, %v983_v44  ;;  %v1171_v51 = vpop.permute.xlu0 %1170  ;;  %3954 = vmatpush1.bf16.msra.mxu0 %v5808_v47 }
  0x99   : > { %v1010_v49 = vsel %vm767_vm1, %v929_v43, %v1009_v48  ;;  %v6632_v50 = vpop.permute.xlu1 %1172  ;;  %v1224_v54 = vrot.slane %v1171_v51, 4 }
  0x9a   : > { %v1225_v53 = vrot.slane %v6632_v50, 4  ;;  %v5862_v55 = vcombine.high %v768_v40, %v1010_v49  ;;  %v5861_v56 = vcombine.low %v768_v40, %v1010_v49  ;;  %457 = vrot.lane.b32.xlu0 %v6469_v8, %s6364_s30 }
  0x9b   : > { %459 = vrot.lane.b32.xlu1 %v6472_v9, %s6364_s30 }
  0x9c   : > { %v1251_v57 = vsel %vm522_vm0, %v1224_v54, %v1225_v53  ;;  %3955 = vmatprep.subr.bf16.mxu0 %v5862_v55  ;;  %v1414_v61 = vpop.permute.xlu0 %1413 }
  0x9d   : > { %v1253_v59 = vsel %vm1252_vm3, %v1171_v51, %v1251_v57  ;;  %v6644_v60 = vpop.permute.xlu1 %1415  ;;  %3956 = vmatpush1.bf16.msra.mxu0 %v5861_v56  ;;  %v1467_v0 = vrot.slane %v1414_v61, 4  ;;  %v6701_v57 = vld [vmem:[%s8745_s2] sm:$0x3f]  }
  0x9e   : > { %v1468_v63 = vrot.slane %v6644_v60, 4  ;;  %701 = vrot.lane.b32.xlu0 %v6469_v8, %s6363_s29 }
  0x9f   : > { %944 = vrot.lane.b32.xlu1 %v882_v58, %s6363_s29 }
  0xa0   : > { %v1494_v5 = vsel %vm522_vm0, %v1467_v0, %v1468_v63  ;;  %v1657_v12 = vpop.permute.xlu0 %1656 }
  0xa1   : > { %v1496_v7 = vsel %vm1495_vm4, %v1414_v61, %v1494_v5  ;;  %v6655_v11 = vpop.permute.xlu1 %1658  ;;  %v1710_v17 = vrot.slane %v1657_v12, 4 }
  0xa2   : > { %v1711_v16 = vrot.slane %v6655_v11, 4  ;;  %v5915_v19 = vcombine.high %v1253_v59, %v1496_v7  ;;  %v5914_v21 = vcombine.low %v1253_v59, %v1496_v7  ;;  %703 = vrot.lane.b32.xlu0 %v6472_v9, %s6363_s29 }
  0xa3   : > { %946 = vrot.lane.b32.xlu1 %v883_v6, %s6363_s29 }
  0xa4   : > { %v1737_v8 = vsel %vm522_vm0, %v1710_v17, %v1711_v16  ;;  %3957 = vmatprep.subr.bf16.mxu0 %v5915_v19  ;;  %v1899_v27 = vpop.permute.xlu0 %1898  ;;  %v342_v19 = vld [vmem:[#allocation2 + $0x48] sm:$0xff] }
  0xa5   : > { %v1738_v25 = vsel %vm1495_vm4, %v1657_v12, %v1737_v8  ;;  %v6665_v26 = vpop.permute.xlu1 %1900  ;;  %3958 = vmatpush1.bf16.msra.mxu0 %v5914_v21  ;;  %v1952_v29 = vrot.slane %v1899_v27, 4  ;;  %v343_v21 = vld [vmem:[#allocation2 + $0x50] sm:$0xff]  ;;  %369 = vst [vmem:[#allocation3 + $0x48] sm:$0xff] %v342_v19 }
  0xa6   : > { %v1953_v28 = vrot.slane %v6665_v26, 4  ;;  %1186 = vrot.lane.b32.xlu0 %v882_v58, %s6365_s5  ;;  %370 = vst [vmem:[#allocation3 + $0x50] sm:$0xff] %v343_v21 }
  0xa7   : > { %1429 = vrot.lane.b32.xlu1 %v882_v58, %s6366_s6 }
  0xa8   : > { %v1979_v30 = vsel %vm522_vm0, %v1952_v29, %v1953_v28  ;;  %v2142_v37 = vpop.permute.xlu0 %2141 }
  0xa9   : > { %v1981_v33 = vsel %vm1980_vm5, %v1899_v27, %v1979_v30  ;;  %v6674_v36 = vpop.permute.xlu1 %2143  ;;  %v2195_v39 = vrot.slane %v2142_v37, 4 }
  0xaa   : > { %v2196_v38 = vrot.slane %v6674_v36, 4  ;;  %v5968_v40 = vcombine.high %v1738_v25, %v1981_v33  ;;  %v5967_v41 = vcombine.low %v1738_v25, %v1981_v33  ;;  %1188 = vrot.lane.b32.xlu0 %v883_v6, %s6365_s5 }
  0xab   : > { %1431 = vrot.lane.b32.xlu1 %v883_v6, %s6366_s6 }
  0xac   : > { %v2222_v43 = vsel %vm522_vm0, %v2195_v39, %v2196_v38  ;;  %3959 = vmatprep.subr.bf16.mxu0 %v5968_v40  ;;  %v446_v47 = vpop.permute.xlu0 %445  ;;  %v244_v40 = vld [vmem:[%s6430_s28 + $0x98] sm:$0xff] }
  0xad   : > { %v2224_v45 = vsel %vm2223_vm6, %v2142_v37, %v2222_v43  ;;  %v6683_v46 = vpop.permute.xlu1 %447  ;;  %3960 = vmatpush1.bf16.msra.mxu0 %v5967_v41  ;;  %v497_v49 = vrot.slane %v446_v47, 4  ;;  %271 = vst [vmem:[#allocation2 + $0x98] sm:$0xff] %v244_v40 }
  0xae   : > { %v498_v48 = vrot.slane %v6683_v46, 4  ;;  %v6021_v51 = vcombine.high %v2224_v45, %v2224_v45  ;;  %v6020_v52 = vcombine.low %v2224_v45, %v2224_v45  ;;  %1672 = vrot.lane.b32.xlu0 %v6472_v9, %s6366_s6 }
  0xaf   : > { %1914 = vrot.lane.b32.xlu1 %v6472_v9, %s6367_s7  ;;  %v526_v54 = vsel %vm522_vm0, %v496_v35, %v497_v49 }
  0xb0   : > { %v528_v55 = vsel %vm522_vm0, %v497_v49, %v498_v48  ;;  %6073 = vmatprep.subr.msk.bf16.mxu0 %vm522_vm0, %v6021_v51  ;;  %v3795_v56 = vsel %vm522_vm0, %v6020_v52, 0  ;;  %v527_v58 = vsel %vm524_vm2, %v6603_v32, %v526_v54  ;;  %v690_v35 = vpop.permute.xlu0 %689  ;;  %v884_v51 = vld [vmem:[#allocation2 + $0x54] sm:$0xff] }
  0xb1   : > { %v529_v59 = vsel %vm524_vm2, %v446_v47, %v528_v55  ;;  %v933_v61 = vpop.permute.xlu1 %932  ;;  %3962 = vmatpush1.bf16.msra.mxu0 %v3795_v56  ;;  %v741_v0 = vrot.slane %v690_v35, 4  ;;  %v5811_v5 = vcombine.high %v6436_v1, %v527_v58  ;;  %v5810_v7 = vcombine.low %v6436_v1, %v527_v58  ;;  %v245_v58 = vld [vmem:[%s6430_s28 + $0xa0] sm:$0xff] }
  0xb2   : > { %v984_v62 = vrot.slane %v933_v61, 4  ;;  %v5812_v6 = vcombine.low %v6439_v2, %v529_v59  ;;  %1674 = vrot.lane.b32.xlu0 %v6475_v10, %s6366_s6  ;;  %v5813_v32 = vcombine.high %v6439_v2, %v529_v59  ;;  %272 = vst [vmem:[#allocation2 + $0xa0] sm:$0xff] %v245_v58 }
  0xb3   : > { %1916 = vrot.lane.b32.xlu1 %v6475_v10, %s6367_s7  ;;  %v769_v17 = vsel %vm522_vm0, %v740_v34, %v741_v0  ;;  %3996 = vmatprep.subr.bf16.mxu1 %v5811_v5 }
  0xb4   : > { %v1011_v12 = vsel %vm522_vm0, %v983_v44, %v984_v62  ;;  %6074 = vmatmul.mubr.msk.bf16.vlgmr.msra.gmra.mrb[0].mxu0 %vm3789_vm7, %v6701_v57  ;;  %v770_v1 = vsel %vm767_vm1, %v6601_v31, %v769_v17  ;;  %v6728_v25 = vpop.permute.xlu0 %691  ;;  %4039 = vmatprep.subr.bf16.mxu0 %v5813_v32 }
  0xb5   : > { %v1012_v8 = vsel %vm767_vm1, %v6619_v42, %v1011_v12  ;;  %v6726_v2 = vpop.permute.xlu1 %934  ;;  %3997 = vmatpush1.bf16.msra.mxu1 %v5810_v7  ;;  %v742_v44 = vrot.slane %v6728_v25, 4  ;;  %4040 = vmatpush1.bf16.msra.mxu0 %v5812_v6 }
  0xb6   : > { %v985_v34 = vrot.slane %v6726_v2, 4  ;;  %v5864_v27 = vcombine.high %v770_v1, %v1012_v8  ;;  %v5863_v29 = vcombine.low %v770_v1, %v1012_v8  ;;  %4071 = vmatprep.mubr.bf16.mxu0 %v8755_v13  ;;  %2157 = vrot.lane.b32.xlu0 %v6472_v9, %s6369_s8 }
  0xb7   : > { %2159 = vrot.lane.b32.xlu1 %v6475_v10, %s6369_s8  ;;  %v771_v42 = vsel %vm522_vm0, %v741_v0, %v742_v44 }
  0xb8   : > { %v1013_v31 = vsel %vm522_vm0, %v984_v62, %v985_v34  ;;  %3998 = vmatprep.subr.bf16.mxu1 %v5864_v27  ;;  %v772_v33 = vsel %vm767_vm1, %v690_v35, %v771_v42  ;;  %v1175_v39 = vpop.permute.xlu0 %1174  ;;  %v885_v35 = vld [vmem:[#allocation2 + $0x5c] sm:$0xff] }
  0xb9   : > { %v1014_v30 = vsel %vm767_vm1, %v933_v61, %v1013_v31  ;;  %v1418_v37 = vpop.permute.xlu1 %1417  ;;  %3999 = vmatpush1.bf16.msra.mxu1 %v5863_v29  ;;  %v1226_v9 = vrot.slane %v1175_v39, 4 }
  0xba   : > { %v1469_v41 = vrot.slane %v1418_v37, 4  ;;  %v5865_v43 = vcombine.low %v772_v33, %v1014_v30  ;;  %v5866_v45 = vcombine.high %v772_v33, %v1014_v30  ;;  %461 = vrot.lane.b32.xlu0 %v6475_v10, %s6364_s30 }
  0xbb   : > { %463 = vrot.lane.b32.xlu1 %v6503_v14, %s6364_s30  ;;  %v1254_v49 = vsel %vm522_vm0, %v1225_v53, %v1226_v9 }
  0xbc   : > { %v1497_v47 = vsel %vm522_vm0, %v1468_v63, %v1469_v41  ;;  %4041 = vmatprep.subr.bf16.mxu0 %v5866_v45  ;;  %v1255_v54 = vsel %vm1252_vm3, %v6632_v50, %v1254_v49  ;;  %v6762_v56 = vpop.permute.xlu0 %1176 }
  0xbd   : > { %v1498_v52 = vsel %vm1495_vm4, %v6644_v60, %v1497_v47  ;;  %v6760_v55 = vpop.permute.xlu1 %1419  ;;  %4042 = vmatpush1.bf16.msra.mxu0 %v5865_v43  ;;  %v1227_v59 = vrot.slane %v6762_v56, 4 }
  0xbe   : > { %v1470_v63 = vrot.slane %v6760_v55, 4  ;;  %v5917_v61 = vcombine.high %v1255_v54, %v1498_v52  ;;  %v5916_v53 = vcombine.low %v1255_v54, %v1498_v52  ;;  %705 = vrot.lane.b32.xlu0 %v6475_v10, %s6363_s29 }
  0xbf   : > { %948 = vrot.lane.b32.xlu1 %v884_v51, %s6363_s29  ;;  %v1256_v60 = vsel %vm522_vm0, %v1226_v9, %v1227_v59 }
  0xc0   : > { %v1499_v50 = vsel %vm522_vm0, %v1469_v41, %v1470_v63  ;;  %4000 = vmatprep.subr.bf16.mxu1 %v5917_v61  ;;  %v1257_v0 = vsel %vm1252_vm3, %v1175_v39, %v1256_v60  ;;  %v1661_v6 = vpop.permute.xlu0 %1660 }
  0xc1   : > { %v1500_v62 = vsel %vm1495_vm4, %v1418_v37, %v1499_v50  ;;  %v1903_v5 = vpop.permute.xlu1 %1902  ;;  %4001 = vmatpush1.bf16.msra.mxu1 %v5916_v53  ;;  %v1712_v7 = vrot.slane %v1661_v6, 4 }
  0xc2   : > { %v1954_v32 = vrot.slane %v1903_v5, 4  ;;  %v5918_v10 = vcombine.low %v1257_v0, %v1500_v62  ;;  %v5919_v12 = vcombine.high %v1257_v0, %v1500_v62  ;;  %707 = vrot.lane.b32.xlu0 %v6503_v14, %s6363_s29 }
  0xc3   : > { %950 = vrot.lane.b32.xlu1 %v885_v35, %s6363_s29  ;;  %v1739_v19 = vsel %vm522_vm0, %v1711_v16, %v1712_v7 }
  0xc4   : > { %v1982_v17 = vsel %vm522_vm0, %v1953_v28, %v1954_v32  ;;  %4043 = vmatprep.subr.bf16.mxu0 %v5919_v12  ;;  %v1740_v8 = vsel %vm1495_vm4, %v6655_v11, %v1739_v19  ;;  %v6793_v27 = vpop.permute.xlu0 %1662 }
  0xc5   : > { %v1983_v21 = vsel %vm1980_vm5, %v6665_v26, %v1982_v17  ;;  %v6791_v1 = vpop.permute.xlu1 %1904  ;;  %4044 = vmatpush1.bf16.msra.mxu0 %v5918_v10  ;;  %v1713_v28 = vrot.slane %v6793_v27, 4 }
  0xc6   : > { %v1955_v29 = vrot.slane %v6791_v1, 4  ;;  %v5970_v31 = vcombine.high %v1740_v8, %v1983_v21  ;;  %v5969_v42 = vcombine.low %v1740_v8, %v1983_v21  ;;  %1190 = vrot.lane.b32.xlu0 %v884_v51, %s6365_s5  ;;  %v345_v8 = vld [vmem:[#allocation2 + $0x60] sm:$0xff] }
  0xc7   : > { %1433 = vrot.lane.b32.xlu1 %v884_v51, %s6366_s6  ;;  %v1741_v11 = vsel %vm522_vm0, %v1712_v7, %v1713_v28  ;;  %372 = vst [vmem:[#allocation3 + $0x60] sm:$0xff] %v345_v8 }
  0xc8   : > { %v1984_v16 = vsel %vm522_vm0, %v1954_v32, %v1955_v29  ;;  %4002 = vmatprep.subr.bf16.mxu1 %v5970_v31  ;;  %v1742_v30 = vsel %vm1495_vm4, %v1661_v6, %v1741_v11  ;;  %v2146_v37 = vpop.permute.xlu0 %2145 }
  0xc9   : > { %v1985_v26 = vsel %vm1980_vm5, %v1903_v5, %v1984_v16  ;;  %v6807_v33 = vpop.permute.xlu1 %2147  ;;  %4003 = vmatpush1.bf16.msra.mxu1 %v5969_v42  ;;  %v2197_v40 = vrot.slane %v2146_v37, 4 }
  0xca   : > { %v2198_v39 = vrot.slane %v6807_v33, 4  ;;  %v5971_v41 = vcombine.low %v1742_v30, %v1985_v26  ;;  %v5972_v9 = vcombine.high %v1742_v30, %v1985_v26  ;;  %1192 = vrot.lane.b32.xlu0 %v885_v35, %s6365_s5 }
  0xcb   : > { %1435 = vrot.lane.b32.xlu1 %v885_v35, %s6366_s6  ;;  %v2225_v43 = vsel %vm522_vm0, %v2196_v38, %v2197_v40 }
  0xcc   : > { %v2227_v45 = vsel %vm522_vm0, %v2197_v40, %v2198_v39  ;;  %4045 = vmatprep.subr.bf16.mxu0 %v5972_v9  ;;  %v2226_v47 = vsel %vm2223_vm6, %v6674_v36, %v2225_v43  ;;  %v450_v52 = vpop.permute.xlu0 %449 }
  0xcd   : > { %v2228_v49 = vsel %vm2223_vm6, %v2146_v37, %v2227_v45  ;;  %v6821_v51 = vpop.permute.xlu1 %451  ;;  %4046 = vmatpush1.bf16.msra.mxu0 %v5971_v41  ;;  %v499_v58 = vrot.slane %v450_v52, 4  ;;  %v6023_v61 = vcombine.high %v2226_v47, %v2226_v47  ;;  %v6022_v38 = vcombine.low %v2226_v47, %v2226_v47 }
  0xce   : > { %v500_v54 = vrot.slane %v6821_v51, 4  ;;  %v6025_v53 = vcombine.high %v2228_v49, %v2228_v49  ;;  %1676 = vrot.lane.b32.xlu0 %v6503_v14, %s6366_s6  ;;  %v6024_v50 = vcombine.low %v2228_v49, %v2228_v49 }
  0xcf   : > { %1918 = vrot.lane.b32.xlu1 %v6503_v14, %s6367_s7  ;;  %v530_v36 = vsel %vm522_vm0, %v498_v48, %v499_v58  ;;  %6075 = vmatprep.subr.msk.bf16.mxu1 %vm522_vm0, %v6023_v61  ;;  %v3801_v6 = vsel %vm522_vm0, %v6022_v38, 0 }
  0xd0   : > { %v532_v60 = vsel %vm522_vm0, %v499_v58, %v500_v54  ;;  %6077 = vmatprep.subr.msk.bf16.mxu0 %vm522_vm0, %v6025_v53  ;;  %v531_v35 = vsel %vm524_vm2, %v6683_v46, %v530_v36  ;;  %v694_v5 = vpop.permute.xlu0 %693  ;;  %v3807_v32 = vsel %vm522_vm0, %v6024_v50, 0  ;;  %4005 = vmatpush1.bf16.msra.mxu1 %v3801_v6  ;;  %v886_v58 = vld [vmem:[#allocation2 + $0x64] sm:$0xff]  ;;  %v247_v36 = vld [vmem:[%s6430_s28 + $0xb0] sm:$0xff] }
  0xd1   : > { %v533_v62 = vsel %vm524_vm2, %v450_v52, %v532_v60  ;;  %v937_v0 = vpop.permute.xlu1 %936  ;;  %v743_v7 = vrot.slane %v694_v5, 4  ;;  %4048 = vmatpush1.bf16.msra.mxu0 %v3807_v32  ;;  %v5814_v10 = vcombine.low %v6449_v3, %v531_v35  ;;  %v5815_v12 = vcombine.high %v6449_v3, %v531_v35  ;;  %v344_v3 = vld [vmem:[#allocation2 + $0x58] sm:$0xff]  ;;  %274 = vst [vmem:[#allocation2 + $0xb0] sm:$0xff] %v247_v36 }
  0xd2   : > { %v986_v48 = vrot.slane %v937_v0, 4  ;;  %1678 = vrot.lane.b32.xlu0 %v6515_v15, %s6366_s6  ;;  %v5817_v46 = vcombine.high %v6452_v4, %v533_v62  ;;  %v5816_v21 = vcombine.low %v6452_v4, %v533_v62  ;;  %371 = vst [vmem:[#allocation3 + $0x58] sm:$0xff] %v344_v3  ;;  %v887_v62 = vld [vmem:[#allocation2 + $0x6c] sm:$0xff] }
  0xd3   : > { %1920 = vrot.lane.b32.xlu1 %v6515_v15, %s6367_s7  ;;  %v773_v19 = vsel %vm522_vm0, %v742_v44, %v743_v7  ;;  %4082 = vmatprep.subr.bf16.mxu1 %v5815_v12 }
  0xd4   : > { %v1015_v17 = vsel %vm522_vm0, %v985_v34, %v986_v48  ;;  %v774_v42 = vsel %vm767_vm1, %v6728_v25, %v773_v19  ;;  %v6861_v11 = vpop.permute.xlu0 %695  ;;  %4125 = vmatprep.subr.bf16.mxu0 %v5817_v46  ;;  %6076 = vmatmul.mubr.msk.bf16.vlgmr.msra.gmra.mrb[0].mxu1 %vm3789_vm7, %v6701_v57 }
  0xd5   : > { %v1016_v31 = vsel %vm767_vm1, %v6726_v2, %v1015_v17  ;;  %v6859_v16 = vpop.permute.xlu1 %938  ;;  %v744_v34 = vrot.slane %v6861_v11, 4  ;;  %4083 = vmatpush1.bf16.msra.mxu1 %v5814_v10  ;;  %6078 = vmatmul.mubr.msk.bf16.vlgmr.msra.gmra.mrb[4].mxu0 %vm3789_vm7, %v6701_v57 }
  0xd6   : > { %v987_v4 = vrot.slane %v6859_v16, 4  ;;  %v5867_v2 = vcombine.low %v774_v42, %v1016_v31  ;;  %v5868_v25 = vcombine.high %v774_v42, %v1016_v31  ;;  %2161 = vrot.lane.b32.xlu0 %v6503_v14, %s6369_s8  ;;  %4126 = vmatpush1.bf16.msra.mxu0 %v5816_v21  ;;  %v246_v14 = vld [vmem:[%s6430_s28 + $0xa8] sm:$0xff] }
  0xd7   : > { %2163 = vrot.lane.b32.xlu1 %v6515_v15, %s6369_s8  ;;  %v775_v26 = vsel %vm522_vm0, %v743_v7, %v744_v34  ;;  %4114 = vmatprep.mubr.bf16.mxu1 %v8755_v13  ;;  %273 = vst [vmem:[#allocation2 + $0xa8] sm:$0xff] %v246_v14 }
  0xd8   : > { %v1017_v44 = vsel %vm522_vm0, %v986_v48, %v987_v4  ;;  %4084 = vmatprep.subr.bf16.mxu1 %v5868_v25  ;;  %v776_v37 = vsel %vm767_vm1, %v694_v5, %v775_v26  ;;  %v1179_v41 = vpop.permute.xlu0 %1178  ;;  %4157 = vmatprep.mubr.bf16.mxu0 %v8755_v13 }
  0xd9   : > { %v1018_v30 = vsel %vm767_vm1, %v937_v0, %v1017_v44  ;;  %v1422_v40 = vpop.permute.xlu1 %1421  ;;  %v1228_v43 = vrot.slane %v1179_v41, 4  ;;  %4085 = vmatpush1.bf16.msra.mxu1 %v5867_v2 }
  0xda   : > { %v1471_v9 = vrot.slane %v1422_v40, 4  ;;  %v5869_v45 = vcombine.low %v776_v37, %v1018_v30  ;;  %v5870_v47 = vcombine.high %v776_v37, %v1018_v30  ;;  %465 = vrot.lane.b32.xlu0 %v6515_v15, %s6364_s30 }
  0xdb   : > { %467 = vrot.lane.b32.xlu1 %v6541_v18, %s6364_s30  ;;  %v1258_v52 = vsel %vm522_vm0, %v1227_v59, %v1228_v43 }
  0xdc   : > { %v1501_v49 = vsel %vm522_vm0, %v1470_v63, %v1471_v9  ;;  %4127 = vmatprep.subr.bf16.mxu0 %v5870_v47  ;;  %v1259_v53 = vsel %vm1252_vm3, %v6762_v56, %v1258_v52  ;;  %v6900_v50 = vpop.permute.xlu0 %1180 }
  0xdd   : > { %v1502_v61 = vsel %vm1495_vm4, %v6760_v55, %v1501_v49  ;;  %v6898_v38 = vpop.permute.xlu1 %1423  ;;  %4128 = vmatpush1.bf16.msra.mxu0 %v5869_v45  ;;  %v1229_v60 = vrot.slane %v6900_v50, 4 }
  0xde   : > { %v1472_v63 = vrot.slane %v6898_v38, 4  ;;  %v5920_v35 = vcombine.low %v1259_v53, %v1502_v61  ;;  %v5921_v59 = vcombine.high %v1259_v53, %v1502_v61  ;;  %709 = vrot.lane.b32.xlu0 %v6515_v15, %s6363_s29 }
  0xdf   : > { %952 = vrot.lane.b32.xlu1 %v886_v58, %s6363_s29  ;;  %v1260_v56 = vsel %vm522_vm0, %v1228_v43, %v1229_v60 }
  0xe0   : > { %v1503_v55 = vsel %vm522_vm0, %v1471_v9, %v1472_v63  ;;  %4086 = vmatprep.subr.bf16.mxu1 %v5921_v59  ;;  %v1261_v5 = vsel %vm1252_vm3, %v1179_v41, %v1260_v56  ;;  %v1665_v32 = vpop.permute.xlu0 %1664 }
  0xe1   : > { %v1504_v0 = vsel %vm1495_vm4, %v1422_v40, %v1503_v55  ;;  %v1907_v6 = vpop.permute.xlu1 %1906  ;;  %4087 = vmatpush1.bf16.msra.mxu1 %v5920_v35  ;;  %v1714_v7 = vrot.slane %v1665_v32, 4 }
  0xe2   : > { %v1956_v48 = vrot.slane %v1907_v6, 4  ;;  %v5922_v15 = vcombine.low %v1261_v5, %v1504_v0  ;;  %v5923_v10 = vcombine.high %v1261_v5, %v1504_v0  ;;  %711 = vrot.lane.b32.xlu0 %v6541_v18, %s6363_s29 }
  0xe3   : > { %954 = vrot.lane.b32.xlu1 %v887_v62, %s6363_s29  ;;  %v1743_v46 = vsel %vm522_vm0, %v1713_v28, %v1714_v7 }
  0xe4   : > { %v1986_v12 = vsel %vm522_vm0, %v1955_v29, %v1956_v48  ;;  %4129 = vmatprep.subr.bf16.mxu0 %v5923_v10  ;;  %v1744_v19 = vsel %vm1495_vm4, %v6793_v27, %v1743_v46  ;;  %v6931_v3 = vpop.permute.xlu0 %1666  ;;  %v347_v10 = vld [vmem:[#allocation2 + $0x70] sm:$0xff] }
  0xe5   : > { %v1987_v17 = vsel %vm1980_vm5, %v6791_v1, %v1986_v12  ;;  %v6929_v21 = vpop.permute.xlu1 %1908  ;;  %4130 = vmatpush1.bf16.msra.mxu0 %v5922_v15  ;;  %v1715_v29 = vrot.slane %v6931_v3, 4  ;;  %374 = vst [vmem:[#allocation3 + $0x70] sm:$0xff] %v347_v10 }
  0xe6   : > { %v1957_v8 = vrot.slane %v6929_v21, 4  ;;  %v5973_v31 = vcombine.low %v1744_v19, %v1987_v17  ;;  %v5974_v42 = vcombine.high %v1744_v19, %v1987_v17  ;;  %1194 = vrot.lane.b32.xlu0 %v886_v58, %s6365_s5 }
  0xe7   : > { %1437 = vrot.lane.b32.xlu1 %v886_v58, %s6366_s6  ;;  %v1745_v27 = vsel %vm522_vm0, %v1714_v7, %v1715_v29 }
  0xe8   : > { %v1988_v1 = vsel %vm522_vm0, %v1956_v48, %v1957_v8  ;;  %4088 = vmatprep.subr.bf16.mxu1 %v5974_v42  ;;  %v1746_v2 = vsel %vm1495_vm4, %v1665_v32, %v1745_v27  ;;  %v2150_v44 = vpop.permute.xlu0 %2149 }
  0xe9   : > { %v1989_v28 = vsel %vm1980_vm5, %v1907_v6, %v1988_v1  ;;  %v6945_v25 = vpop.permute.xlu1 %2151  ;;  %4089 = vmatpush1.bf16.msra.mxu1 %v5973_v31  ;;  %v2199_v30 = vrot.slane %v2150_v44, 4 }
  0xea   : > { %v2200_v26 = vrot.slane %v6945_v25, 4  ;;  %v5975_v37 = vcombine.low %v1746_v2, %v1989_v28  ;;  %v5976_v40 = vcombine.high %v1746_v2, %v1989_v28  ;;  %1196 = vrot.lane.b32.xlu0 %v887_v62, %s6365_s5 }
  0xeb   : > { %1439 = vrot.lane.b32.xlu1 %v887_v62, %s6366_s6  ;;  %v2229_v41 = vsel %vm522_vm0, %v2198_v39, %v2199_v30 }
  0xec   : > { %v2231_v14 = vsel %vm522_vm0, %v2199_v30, %v2200_v26  ;;  %4131 = vmatprep.subr.bf16.mxu0 %v5976_v40  ;;  %v2230_v9 = vsel %vm2223_vm6, %v6807_v33, %v2229_v41  ;;  %v454_v47 = vpop.permute.xlu0 %453 }
  0xed   : > { %v2232_v43 = vsel %vm2223_vm6, %v2150_v44, %v2231_v14  ;;  %v6959_v45 = vpop.permute.xlu1 %455  ;;  %4132 = vmatpush1.bf16.msra.mxu0 %v5975_v37  ;;  %v501_v52 = vrot.slane %v454_v47, 4  ;;  %v6027_v58 = vcombine.high %v2230_v9, %v2230_v9  ;;  %v6026_v39 = vcombine.low %v2230_v9, %v2230_v9  ;;  %v6304_v37 = vld [vmem:[#allocation2 + $0x70] sm:$0xff] }
  0xee   : > { %v502_v49 = vrot.slane %v6959_v45, 4  ;;  %v6029_v61 = vcombine.high %v2232_v43, %v2232_v43  ;;  %1680 = vrot.lane.b32.xlu0 %v6541_v18, %s6366_s6  ;;  %v6028_v53 = vcombine.low %v2232_v43, %v2232_v43  ;;  %v888_v14 = vld [vmem:[#allocation2 + $0x74] sm:$0xff] }
  0xef   : > { %1922 = vrot.lane.b32.xlu1 %v6541_v18, %s6367_s7  ;;  %v534_v33 = vsel %vm522_vm0, %v500_v54, %v501_v52  ;;  %6079 = vmatprep.subr.msk.bf16.mxu1 %vm522_vm0, %v6027_v58  ;;  %v3813_v62 = vsel %vm522_vm0, %v6026_v39, 0  ;;  %v889_v39 = vld [vmem:[#allocation2 + $0x7c] sm:$0xff] }
  0xf0   : > { %v536_v36 = vsel %vm522_vm0, %v501_v52, %v502_v49  ;;  %6081 = vmatprep.subr.msk.bf16.mxu0 %vm522_vm0, %v6029_v61  ;;  %v535_v35 = vsel %vm524_vm2, %v6821_v51, %v534_v33  ;;  %v698_v56 = vpop.permute.xlu0 %697  ;;  %v3819_v0 = vsel %vm522_vm0, %v6028_v53, 0  ;;  %4091 = vmatpush1.bf16.msra.mxu1 %v3813_v62  ;;  %v249_v52 = vld [vmem:[%s6430_s28 + $0xc0] sm:$0xff] }
  0xf1   : > { %v537_v59 = vsel %vm524_vm2, %v454_v47, %v536_v36  ;;  %v941_v55 = vpop.permute.xlu1 %940  ;;  %v745_v5 = vrot.slane %v698_v56, 4  ;;  %4134 = vmatpush1.bf16.msra.mxu0 %v3819_v0  ;;  %v5818_v6 = vcombine.low %v6570_v22, %v535_v35  ;;  %v5819_v32 = vcombine.high %v6570_v22, %v535_v35  ;;  %v346_v22 = vld [vmem:[#allocation2 + $0x68] sm:$0xff]  ;;  %276 = vst [vmem:[#allocation2 + $0xc0] sm:$0xff] %v249_v52  ;;  %v7053_v0 = vld [vmem:[#allocation2 + $0x78] sm:$0xff] }
  0xf2   : > { %v988_v54 = vrot.slane %v941_v55, 4  ;;  %1682 = vrot.lane.b32.xlu0 %v6549_v20, %s6366_s6  ;;  %v5821_v51 = vcombine.high %v6572_v23, %v537_v59  ;;  %v5820_v15 = vcombine.low %v6572_v23, %v537_v59  ;;  %373 = vst [vmem:[#allocation3 + $0x68] sm:$0xff] %v346_v22 }
  0xf3   : > { %1924 = vrot.lane.b32.xlu1 %v6549_v20, %s6367_s7  ;;  %v777_v7 = vsel %vm522_vm0, %v744_v34, %v745_v5  ;;  %4168 = vmatprep.subr.bf16.mxu1 %v5819_v32 }
  0xf4   : > { %v1019_v48 = vsel %vm522_vm0, %v987_v4, %v988_v54  ;;  %v778_v46 = vsel %vm767_vm1, %v6861_v11, %v777_v7  ;;  %v6999_v19 = vpop.permute.xlu0 %699  ;;  %4211 = vmatprep.subr.bf16.mxu0 %v5821_v51  ;;  %6080 = vmatmul.mubr.msk.bf16.vlgmr.msra.gmra.mrb[4].mxu1 %vm3789_vm7, %v6701_v57 }
  0xf5   : > { %v1020_v12 = vsel %vm767_vm1, %v6859_v16, %v1019_v48  ;;  %v6997_v17 = vpop.permute.xlu1 %942  ;;  %v746_v4 = vrot.slane %v6999_v19, 4  ;;  %4169 = vmatpush1.bf16.msra.mxu1 %v5818_v6  ;;  %6082 = vmatmul.mubr.msk.bf16.vlgmr.msra.gmra.mrb[8].mxu0 %vm3789_vm7, %v6701_v57 }
  0xf6   : > { %v989_v23 = vrot.slane %v6997_v17, 4  ;;  %v5871_v16 = vcombine.low %v778_v46, %v1020_v12  ;;  %v5872_v11 = vcombine.high %v778_v46, %v1020_v12  ;;  %2165 = vrot.lane.b32.xlu0 %v6541_v18, %s6369_s8  ;;  %4212 = vmatpush1.bf16.msra.mxu0 %v5820_v15  ;;  %v248_v18 = vld [vmem:[%s6430_s28 + $0xb8] sm:$0xff] }
  0xf7   : > { %2167 = vrot.lane.b32.xlu1 %v6549_v20, %s6369_s8  ;;  %v779_v31 = vsel %vm522_vm0, %v745_v5, %v746_v4  ;;  %4200 = vmatprep.mubr.bf16.mxu1 %v8755_v13  ;;  %275 = vst [vmem:[#allocation2 + $0xb8] sm:$0xff] %v248_v18 }
  0xf8   : > { %v1021_v34 = vsel %vm522_vm0, %v988_v54, %v989_v23  ;;  %4170 = vmatprep.subr.bf16.mxu1 %v5872_v11  ;;  %v780_v1 = vsel %vm767_vm1, %v698_v56, %v779_v31  ;;  %v1183_v28 = vpop.permute.xlu0 %1182  ;;  %4243 = vmatprep.mubr.bf16.mxu0 %v8755_v13 }
  0xf9   : > { %v1022_v42 = vsel %vm767_vm1, %v941_v55, %v1021_v34  ;;  %v1426_v27 = vpop.permute.xlu1 %1425  ;;  %v1230_v2 = vrot.slane %v1183_v28, 4  ;;  %4171 = vmatpush1.bf16.msra.mxu1 %v5871_v16 }
  0xfa   : > { %v1473_v20 = vrot.slane %v1426_v27, 4  ;;  %v5873_v44 = vcombine.low %v780_v1, %v1022_v42  ;;  %v5874_v30 = vcombine.high %v780_v1, %v1022_v42  ;;  %469 = vrot.lane.b32.xlu0 %v6304_v37, %s6364_s30 }
  0xfb   : > { %471 = vrot.lane.b32.xlu1 %v6579_v24, %s6364_s30  ;;  %v1262_v41 = vsel %vm522_vm0, %v1229_v60, %v1230_v2 }
  0xfc   : > { %v1505_v40 = vsel %vm522_vm0, %v1472_v63, %v1473_v20  ;;  %4213 = vmatprep.subr.bf16.mxu0 %v5874_v30  ;;  %v1263_v43 = vsel %vm1252_vm3, %v6900_v50, %v1262_v41  ;;  %v7037_v47 = vpop.permute.xlu0 %1184 }
  0xfd   : > { %v1506_v9 = vsel %vm1495_vm4, %v6898_v38, %v1505_v40  ;;  %v7035_v24 = vpop.permute.xlu1 %1427  ;;  %4214 = vmatpush1.bf16.msra.mxu0 %v5873_v44  ;;  %v1231_v58 = vrot.slane %v7037_v47, 4 }
  0xfe   : > { %v1474_v63 = vrot.slane %v7035_v24, 4  ;;  %v5924_v61 = vcombine.low %v1263_v43, %v1506_v9  ;;  %v5925_v60 = vcombine.high %v1263_v43, %v1506_v9  ;;  %713 = vrot.lane.b32.xlu0 %v6304_v37, %s6363_s29 }
  0xff   : > { %956 = vrot.lane.b32.xlu1 %v888_v14, %s6363_s29  ;;  %v1264_v50 = vsel %vm522_vm0, %v1230_v2, %v1231_v58 }
 0x100   : > { %v1507_v38 = vsel %vm522_vm0, %v1473_v20, %v1474_v63  ;;  %4172 = vmatprep.subr.bf16.mxu1 %v5925_v60  ;;  %v1265_v33 = vsel %vm1252_vm3, %v1183_v28, %v1264_v50  ;;  %v1669_v35 = vpop.permute.xlu0 %1668  ;;  %v6306_v50 = vld [vmem:[#allocation3 + $0x38] sm:$0xff] }
 0x101   : > { %v1508_v53 = vsel %vm1495_vm4, %v1426_v27, %v1507_v38  ;;  %v1911_v36 = vpop.permute.xlu1 %1910  ;;  %4173 = vmatpush1.bf16.msra.mxu1 %v5924_v61  ;;  %v1716_v55 = vrot.slane %v1669_v35, 4 }
 0x102   : > { %v1958_v59 = vrot.slane %v1911_v36, 4  ;;  %v5926_v56 = vcombine.low %v1265_v33, %v1508_v53  ;;  %v5927_v62 = vcombine.high %v1265_v33, %v1508_v53  ;;  %715 = vrot.lane.b32.xlu0 %v7053_v0, %s6363_s29  ;;  %v6307_v33 = vld [vmem:[#allocation2 + $0x80] sm:$0xff] }
 0x103   : > { %958 = vrot.lane.b32.xlu1 %v889_v39, %s6363_s29  ;;  %v1747_v5 = vsel %vm522_vm0, %v1715_v29, %v1716_v55 }
 0x104   : > { %v1990_v54 = vsel %vm522_vm0, %v1957_v8, %v1958_v59  ;;  %4215 = vmatprep.subr.bf16.mxu0 %v5927_v62  ;;  %v1748_v32 = vsel %vm1495_vm4, %v6931_v3, %v1747_v5  ;;  %v7069_v48 = vpop.permute.xlu0 %1670  ;;  %v349_v62 = vld [vmem:[#allocation2 + $0x80] sm:$0xff] }
 0x105   : > { %v1991_v6 = vsel %vm1980_vm5, %v6929_v21, %v1990_v54  ;;  %v7067_v51 = vpop.permute.xlu1 %1912  ;;  %4216 = vmatpush1.bf16.msra.mxu0 %v5926_v56  ;;  %v1717_v8 = vrot.slane %v7069_v48, 4  ;;  %v348_v56 = vld [vmem:[#allocation2 + $0x78] sm:$0xff]  ;;  %376 = vst [vmem:[#allocation3 + $0x80] sm:$0xff] %v349_v62 }
 0x106   : > { %v1959_v7 = vrot.slane %v7067_v51, 4  ;;  %v5977_v15 = vcombine.low %v1748_v32, %v1991_v6  ;;  %v5978_v22 = vcombine.high %v1748_v32, %v1991_v6  ;;  %1198 = vrot.lane.b32.xlu0 %v888_v14, %s6365_s5  ;;  %375 = vst [vmem:[#allocation3 + $0x78] sm:$0xff] %v348_v56 }
 0x107   : > { %1441 = vrot.lane.b32.xlu1 %v888_v14, %s6366_s6  ;;  %v1749_v3 = vsel %vm522_vm0, %v1716_v55, %v1717_v8 }
 0x108   : > { %v1992_v21 = vsel %vm522_vm0, %v1958_v59, %v1959_v7  ;;  %4174 = vmatprep.subr.bf16.mxu1 %v5978_v22  ;;  %v1750_v10 = vsel %vm1495_vm4, %v1669_v35, %v1749_v3  ;;  %v2154_v46 = vpop.permute.xlu0 %2153 }
 0x109   : > { %v1993_v29 = vsel %vm1980_vm5, %v1911_v36, %v1992_v21  ;;  %v7083_v12 = vpop.permute.xlu1 %2155  ;;  %4175 = vmatpush1.bf16.msra.mxu1 %v5977_v15  ;;  %v2201_v11 = vrot.slane %v2154_v46, 4 }
 0x10a   : > { %v2202_v16 = vrot.slane %v7083_v12, 4  ;;  %v5979_v34 = vcombine.low %v1750_v10, %v1993_v29  ;;  %v5980_v31 = vcombine.high %v1750_v10, %v1993_v29  ;;  %1200 = vrot.lane.b32.xlu0 %v889_v39, %s6365_s5 }
 0x10b   : > { %1443 = vrot.lane.b32.xlu1 %v889_v39, %s6366_s6  ;;  %v2233_v42 = vsel %vm522_vm0, %v2200_v26, %v2201_v11 }
 0x10c   : > { %v2235_v1 = vsel %vm522_vm0, %v2201_v11, %v2202_v16  ;;  %4217 = vmatprep.subr.bf16.mxu0 %v5980_v31  ;;  %v2234_v27 = vsel %vm2223_vm6, %v6945_v25, %v2233_v42  ;;  %v458_v20 = vpop.permute.xlu0 %457  ;;  %v7153_v31 = vld [vmem:[#allocation2 + $0x88] sm:$0xff] }
 0x10d   : > { %v2236_v28 = vsel %vm2223_vm6, %v2154_v46, %v2235_v1  ;;  %v7097_v18 = vpop.permute.xlu1 %459  ;;  %4218 = vmatpush1.bf16.msra.mxu0 %v5979_v34  ;;  %v503_v44 = vrot.slane %v458_v20, 4  ;;  %v6031_v30 = vcombine.high %v2234_v27, %v2234_v27  ;;  %v6030_v26 = vcombine.low %v2234_v27, %v2234_v27  ;;  %v890_v27 = vld [vmem:[#allocation2 + $0x84] sm:$0xff] }
 0x10e   : > { %v504_v2 = vrot.slane %v7097_v18, 4  ;;  %v6033_v37 = vcombine.high %v2236_v28, %v2236_v28  ;;  %1684 = vrot.lane.b32.xlu0 %v7053_v0, %s6366_s6  ;;  %v6032_v40 = vcombine.low %v2236_v28, %v2236_v28 }
 0x10f   : > { %1926 = vrot.lane.b32.xlu1 %v7053_v0, %s6367_s7  ;;  %v538_v25 = vsel %vm522_vm0, %v502_v49, %v503_v44  ;;  %6083 = vmatprep.subr.msk.bf16.mxu1 %vm522_vm0, %v6031_v30  ;;  %v3825_v61 = vsel %vm522_vm0, %v6030_v26, 0 }
 0x110   : > { %v540_v41 = vsel %vm522_vm0, %v503_v44, %v504_v2  ;;  %6085 = vmatprep.subr.msk.bf16.mxu0 %vm522_vm0, %v6033_v37  ;;  %v539_v14 = vsel %vm524_vm2, %v6959_v45, %v538_v25  ;;  %v702_v52 = vpop.permute.xlu0 %701  ;;  %v3831_v60 = vsel %vm522_vm0, %v6032_v40, 0  ;;  %4177 = vmatpush1.bf16.msra.mxu1 %v3825_v61  ;;  %v6308_v45 = vld [vmem:[#allocation3 + $0x40] sm:$0xff]  ;;  %v251_v37 = vld [vmem:[%s6430_s28 + $0xd0] sm:$0xf] }
 0x111   : > { %v541_v9 = vsel %vm524_vm2, %v458_v20, %v540_v41  ;;  %v945_v43 = vpop.permute.xlu1 %944  ;;  %v747_v38 = vrot.slane %v702_v52, 4  ;;  %4220 = vmatpush1.bf16.msra.mxu0 %v3831_v60  ;;  %v5822_v39 = vcombine.low %v6306_v50, %v539_v14  ;;  %v5823_v53 = vcombine.high %v6306_v50, %v539_v14  ;;  %278 = vst [vmem:[#allocation2 + $0xd0] sm:$0xf] %v251_v37  ;;  %v891_v25 = vld [vmem:[#allocation2 + $0x8c] sm:$0xff] }
 0x112   : > { %v990_v49 = vrot.slane %v945_v43, 4  ;;  %1686 = vrot.lane.b32.xlu0 %v6307_v33, %s6366_s6  ;;  %v5825_v36 = vcombine.high %v6308_v45, %v541_v9  ;;  %v5824_v55 = vcombine.low %v6308_v45, %v541_v9 }
 0x113   : > { %1928 = vrot.lane.b32.xlu1 %v6307_v33, %s6367_s7  ;;  %v781_v59 = vsel %vm522_vm0, %v746_v4, %v747_v38  ;;  %4254 = vmatprep.subr.bf16.mxu1 %v5823_v53 }
 0x114   : > { %v1023_v35 = vsel %vm522_vm0, %v989_v23, %v990_v49  ;;  %v782_v5 = vsel %vm767_vm1, %v6999_v19, %v781_v59  ;;  %v7131_v32 = vpop.permute.xlu0 %703  ;;  %4297 = vmatprep.subr.bf16.mxu0 %v5825_v36  ;;  %6084 = vmatmul.mubr.msk.bf16.vlgmr.msra.gmra.mrb[8].mxu1 %vm3789_vm7, %v6701_v57 }
 0x115   : > { %v1024_v54 = vsel %vm767_vm1, %v6997_v17, %v1023_v35  ;;  %v7129_v6 = vpop.permute.xlu1 %946  ;;  %v748_v4 = vrot.slane %v7131_v32, 4  ;;  %4255 = vmatpush1.bf16.msra.mxu1 %v5822_v39  ;;  %6086 = vmatmul.mubr.msk.bf16.vlgmr.msra.gmra.mrb[12].mxu0 %vm3789_vm7, %v6701_v57 }
 0x116   : > { %v991_v23 = vrot.slane %v7129_v6, 4  ;;  %v5875_v17 = vcombine.low %v782_v5, %v1024_v54  ;;  %v5876_v19 = vcombine.high %v782_v5, %v1024_v54  ;;  %2169 = vrot.lane.b32.xlu0 %v7053_v0, %s6369_s8  ;;  %4298 = vmatpush1.bf16.msra.mxu0 %v5824_v55  ;;  %v250_v0 = vld [vmem:[%s6430_s28 + $0xc8] sm:$0xff] }
 0x117   : > { %2171 = vrot.lane.b32.xlu1 %v6307_v33, %s6369_s8  ;;  %v783_v22 = vsel %vm522_vm0, %v747_v38, %v748_v4  ;;  %4286 = vmatprep.mubr.bf16.mxu1 %v8755_v13  ;;  %277 = vst [vmem:[#allocation2 + $0xc8] sm:$0xff] %v250_v0 }
 0x118   : > { %v1025_v15 = vsel %vm522_vm0, %v990_v49, %v991_v23  ;;  %4256 = vmatprep.subr.bf16.mxu1 %v5876_v19  ;;  %v784_v57 = vsel %vm767_vm1, %v702_v52, %v783_v22  ;;  %v1187_v29 = vpop.permute.xlu0 %1186  ;;  %4329 = vmatprep.mubr.bf16.mxu0 %v8755_v13 }
 0x119   : > { %v1026_v21 = vsel %vm767_vm1, %v945_v43, %v1025_v15  ;;  %v1430_v3 = vpop.permute.xlu1 %1429  ;;  %v1232_v46 = vrot.slane %v1187_v29, 4  ;;  %4257 = vmatpush1.bf16.msra.mxu1 %v5875_v17 }
 0x11a   : > { %v1475_v10 = vrot.slane %v1430_v3, 4  ;;  %v5877_v11 = vcombine.low %v784_v57, %v1026_v21  ;;  %v5878_v34 = vcombine.high %v784_v57, %v1026_v21  ;;  %473 = vrot.lane.b32.xlu0 %v6307_v33, %s6364_s30 }
 0x11b   : > { %475 = vrot.lane.b32.xlu1 %v7153_v31, %s6364_s30  ;;  %v1266_v1 = vsel %vm522_vm0, %v1231_v58, %v1232_v46 }
 0x11c   : > { %v1509_v42 = vsel %vm522_vm0, %v1474_v63, %v1475_v10  ;;  %4299 = vmatprep.subr.bf16.mxu0 %v5878_v34  ;;  %v1267_v20 = vsel %vm1252_vm3, %v7037_v47, %v1266_v1  ;;  %v7170_v30 = vpop.permute.xlu0 %1188 }
 0x11d   : > { %v1510_v28 = vsel %vm1495_vm4, %v7035_v24, %v1509_v42  ;;  %v7168_v44 = vpop.permute.xlu1 %1431  ;;  %4300 = vmatpush1.bf16.msra.mxu0 %v5877_v11  ;;  %v1233_v26 = vrot.slane %v7170_v30, 4 }
 0x11e   : > { %v1476_v63 = vrot.slane %v7168_v44, 4  ;;  %v5928_v40 = vcombine.low %v1267_v20, %v1510_v28  ;;  %v5929_v58 = vcombine.high %v1267_v20, %v1510_v28  ;;  %717 = vrot.lane.b32.xlu0 %v6307_v33, %s6363_s29 }
 0x11f   : > { %960 = vrot.lane.b32.xlu1 %v890_v27, %s6363_s29  ;;  %v1268_v47 = vsel %vm522_vm0, %v1232_v46, %v1233_v26 }
 0x120   : > { %v1511_v24 = vsel %vm522_vm0, %v1475_v10, %v1476_v63  ;;  %4258 = vmatprep.subr.bf16.mxu1 %v5929_v58  ;;  %v1269_v14 = vsel %vm1252_vm3, %v1187_v29, %v1268_v47  ;;  %v1673_v43 = vpop.permute.xlu0 %1672  ;;  %v6310_v47 = vld [vmem:[#allocation3 + $0x48] sm:$0xff] }
 0x121   : > { %v1512_v41 = vsel %vm1495_vm4, %v1430_v3, %v1511_v24  ;;  %v1915_v9 = vpop.permute.xlu1 %1914  ;;  %4259 = vmatpush1.bf16.msra.mxu1 %v5928_v40  ;;  %v1718_v61 = vrot.slane %v1673_v43, 4 }
 0x122   : > { %v1960_v52 = vrot.slane %v1915_v9, 4  ;;  %v5930_v60 = vcombine.low %v1269_v14, %v1512_v41  ;;  %v5931_v49 = vcombine.high %v1269_v14, %v1512_v41  ;;  %719 = vrot.lane.b32.xlu0 %v7153_v31, %s6363_s29  ;;  %v6311_v14 = vld [vmem:[#allocation2 + $0x90] sm:$0xff] }
 0x123   : > { %962 = vrot.lane.b32.xlu1 %v891_v25, %s6363_s29  ;;  %v1751_v50 = vsel %vm522_vm0, %v1717_v8, %v1718_v61 }
 0x124   : > { %v1994_v38 = vsel %vm522_vm0, %v1959_v7, %v1960_v52  ;;  %4301 = vmatprep.subr.bf16.mxu0 %v5931_v49  ;;  %v1752_v53 = vsel %vm1495_vm4, %v7069_v48, %v1751_v50  ;;  %v7201_v45 = vpop.permute.xlu0 %1674  ;;  %v351_v49 = vld [vmem:[#allocation2 + $0x90] sm:$0xff] }
 0x125   : > { %v1995_v39 = vsel %vm1980_vm5, %v7067_v51, %v1994_v38  ;;  %v7199_v33 = vpop.permute.xlu1 %1916  ;;  %4302 = vmatpush1.bf16.msra.mxu0 %v5930_v60  ;;  %v1719_v36 = vrot.slane %v7201_v45, 4  ;;  %v350_v60 = vld [vmem:[#allocation2 + $0x88] sm:$0xff]  ;;  %378 = vst [vmem:[#allocation3 + $0x90] sm:$0xff] %v351_v49 }
 0x126   : > { %v1961_v7 = vrot.slane %v7199_v33, 4  ;;  %v5981_v35 = vcombine.low %v1752_v53, %v1995_v39  ;;  %v5982_v8 = vcombine.high %v1752_v53, %v1995_v39  ;;  %1202 = vrot.lane.b32.xlu0 %v890_v27, %s6365_s5  ;;  %377 = vst [vmem:[#allocation3 + $0x88] sm:$0xff] %v350_v60 }
 0x127   : > { %1445 = vrot.lane.b32.xlu1 %v890_v27, %s6366_s6  ;;  %v1753_v48 = vsel %vm522_vm0, %v1718_v61, %v1719_v36 }
 0x128   : > { %v1996_v51 = vsel %vm522_vm0, %v1960_v52, %v1961_v7  ;;  %4260 = vmatprep.subr.bf16.mxu1 %v5982_v8  ;;  %v1754_v55 = vsel %vm1495_vm4, %v1673_v43, %v1753_v48  ;;  %v2158_v62 = vpop.permute.xlu0 %2157 }
 0x129   : > { %v1997_v59 = vsel %vm1980_vm5, %v1915_v9, %v1996_v51  ;;  %v7215_v56 = vpop.permute.xlu1 %2159  ;;  %4261 = vmatpush1.bf16.msra.mxu1 %v5981_v35  ;;  %v2203_v5 = vrot.slane %v2158_v62, 4 }
 0x12a   : > { %v2204_v54 = vrot.slane %v7215_v56, 4  ;;  %v5983_v17 = vcombine.low %v1754_v55, %v1997_v59  ;;  %v5984_v19 = vcombine.high %v1754_v55, %v1997_v59  ;;  %1204 = vrot.lane.b32.xlu0 %v891_v25, %s6365_s5 }
 0x12b   : > { %1447 = vrot.lane.b32.xlu1 %v891_v25, %s6366_s6  ;;  %v2237_v15 = vsel %vm522_vm0, %v2202_v16, %v2203_v5  ;;  %v279_v16 = vld [vmem:[%s7229_s20] sm:$0xff] }
 0x12c   : > { %v2239_v22 = vsel %vm522_vm0, %v2203_v5, %v2204_v54  ;;  %4303 = vmatprep.subr.bf16.mxu0 %v5984_v19  ;;  %v2238_v21 = vsel %vm2223_vm6, %v7083_v12, %v2237_v15  ;;  %v462_v29 = vpop.permute.xlu0 %461  ;;  %306 = vst [vmem:[#allocation2 + $0xd4] sm:$0xff] %v279_v16  ;;  %v7295_v15 = vld [vmem:[#allocation2 + $0x98] sm:$0xff] }
 0x12d   : > { %v2240_v57 = vsel %vm2223_vm6, %v2158_v62, %v2239_v22  ;;  %v7234_v3 = vpop.permute.xlu1 %463  ;;  %4304 = vmatpush1.bf16.msra.mxu0 %v5983_v17  ;;  %v505_v10 = vrot.slane %v462_v29, 4  ;;  %v6035_v46 = vcombine.high %v2238_v21, %v2238_v21  ;;  %v6034_v12 = vcombine.low %v2238_v21, %v2238_v21  ;;  %v892_v22 = vld [vmem:[#allocation2 + $0x94] sm:$0xff] }
 0x12e   : > { %v506_v0 = vrot.slane %v7234_v3, 4  ;;  %v6037_v11 = vcombine.high %v2240_v57, %v2240_v57  ;;  %1688 = vrot.lane.b32.xlu0 %v7153_v31, %s6366_s6  ;;  %v6036_v34 = vcombine.low %v2240_v57, %v2240_v57 }
 0x12f   : > { %1930 = vrot.lane.b32.xlu1 %v7153_v31, %s6367_s7  ;;  %v542_v42 = vsel %vm522_vm0, %v504_v2, %v505_v10  ;;  %6087 = vmatprep.subr.msk.bf16.mxu1 %vm522_vm0, %v6035_v46  ;;  %v3837_v40 = vsel %vm522_vm0, %v6034_v12, 0 }
 0x130   : > { %v544_v1 = vsel %vm522_vm0, %v505_v10, %v506_v0  ;;  %6089 = vmatprep.subr.msk.bf16.mxu0 %vm522_vm0, %v6037_v11  ;;  %v543_v27 = vsel %vm524_vm2, %v7097_v18, %v542_v42  ;;  %v706_v37 = vpop.permute.xlu0 %705  ;;  %v3843_v58 = vsel %vm522_vm0, %v6036_v34, 0  ;;  %4263 = vmatpush1.bf16.msra.mxu1 %v3837_v40  ;;  %v6312_v18 = vld [vmem:[#allocation3 + $0x50] sm:$0xff] }
 0x131   : > { %v545_v28 = vsel %vm524_vm2, %v462_v29, %v544_v1  ;;  %v949_v20 = vpop.permute.xlu1 %948  ;;  %v749_v24 = vrot.slane %v706_v37, 4  ;;  %4306 = vmatpush1.bf16.msra.mxu0 %v3843_v58  ;;  %v5826_v25 = vcombine.low %v6310_v47, %v543_v27  ;;  %v5827_v41 = vcombine.high %v6310_v47, %v543_v27  ;;  %v893_v42 = vld [vmem:[#allocation2 + $0x9c] sm:$0xff] }
 0x132   : > { %v992_v2 = vrot.slane %v949_v20, 4  ;;  %1690 = vrot.lane.b32.xlu0 %v6311_v14, %s6366_s6  ;;  %v5829_v9 = vcombine.high %v6312_v18, %v545_v28  ;;  %v5828_v61 = vcombine.low %v6312_v18, %v545_v28 }
 0x133   : > { %1932 = vrot.lane.b32.xlu1 %v6311_v14, %s6367_s7  ;;  %v785_v52 = vsel %vm522_vm0, %v748_v4, %v749_v24  ;;  %4340 = vmatprep.subr.bf16.mxu1 %v5827_v41 }
 0x134   : > { %v1027_v43 = vsel %vm522_vm0, %v991_v23, %v992_v2  ;;  %v786_v50 = vsel %vm767_vm1, %v7131_v32, %v785_v52  ;;  %v7269_v53 = vpop.permute.xlu0 %707  ;;  %4383 = vmatprep.subr.bf16.mxu0 %v5829_v9  ;;  %v7274_v23 = vld [vmem:[%s8745_s2] sm:$0x3f]  }
 0x135   : > { %v1028_v38 = vsel %vm767_vm1, %v7129_v6, %v1027_v43  ;;  %v7267_v39 = vpop.permute.xlu1 %950  ;;  %6088 = vmatmul.mubr.msk.bf16.vlgmr.msra.gmra.mrb[12].mxu1 %vm3789_vm7, %v7274_v23  ;;  %v750_v4 = vrot.slane %v7269_v53, 4  ;;  %6090 = vmatmul.mubr.msk.bf16.vlgmr.msra.gmra.mrb[16].mxu0 %vm3789_vm7, %v7274_v23 }
 0x136   : > { %v993_v6 = vrot.slane %v7267_v39, 4  ;;  %4341 = vmatpush1.bf16.msra.mxu1 %v5826_v25  ;;  %v5879_v32 = vcombine.low %v786_v50, %v1028_v38  ;;  %v5880_v35 = vcombine.high %v786_v50, %v1028_v38  ;;  %2173 = vrot.lane.b32.xlu0 %v7153_v31, %s6369_s8 }
 0x137   : > { %2175 = vrot.lane.b32.xlu1 %v6311_v14, %s6369_s8  ;;  %v787_v51 = vsel %vm522_vm0, %v749_v24, %v750_v4  ;;  %4384 = vmatpush1.bf16.msra.mxu0 %v5828_v61 }
 0x138   : > { %v1029_v8 = vsel %vm522_vm0, %v992_v2, %v993_v6  ;;  %4342 = vmatprep.subr.bf16.mxu1 %v5880_v35  ;;  %v788_v59 = vsel %vm767_vm1, %v706_v37, %v787_v51  ;;  %v1191_v62 = vpop.permute.xlu0 %1190  ;;  %4372 = vmatprep.mubr.bf16.mxu1 %v8755_v13 }
 0x139   : > { %v1030_v48 = vsel %vm767_vm1, %v949_v20, %v1029_v8  ;;  %v1434_v55 = vpop.permute.xlu1 %1433  ;;  %4415 = vmatprep.mubr.bf16.mxu0 %v8755_v13  ;;  %v1234_v5 = vrot.slane %v1191_v62, 4 }
 0x13a   : > { %v1477_v31 = vrot.slane %v1434_v55, 4  ;;  %4343 = vmatpush1.bf16.msra.mxu1 %v5879_v32  ;;  %v5881_v17 = vcombine.low %v788_v59, %v1030_v48  ;;  %v5882_v19 = vcombine.high %v788_v59, %v1030_v48  ;;  %477 = vrot.lane.b32.xlu0 %v6311_v14, %s6364_s30 }
 0x13b   : > { %479 = vrot.lane.b32.xlu1 %v7295_v15, %s6364_s30  ;;  %v1270_v57 = vsel %vm522_vm0, %v1233_v26, %v1234_v5  ;;  %v280_v26 = vld [vmem:[%s7229_s20 + $0x8] sm:$0xff] }
 0x13c   : > { %v1513_v21 = vsel %vm522_vm0, %v1476_v63, %v1477_v31  ;;  %4385 = vmatprep.subr.bf16.mxu0 %v5882_v19  ;;  %v1271_v16 = vsel %vm1252_vm3, %v7170_v30, %v1270_v57  ;;  %v7312_v46 = vpop.permute.xlu0 %1192  ;;  %307 = vst [vmem:[#allocation2 + $0xdc] sm:$0xff] %v280_v26 }
 0x13d   : > { %v1514_v29 = vsel %vm1495_vm4, %v7168_v44, %v1513_v21  ;;  %v7310_v10 = vpop.permute.xlu1 %1435  ;;  %4386 = vmatpush1.bf16.msra.mxu0 %v5881_v17  ;;  %v1235_v63 = vrot.slane %v7312_v46, 4 }
 0x13e   : > { %v1478_v11 = vrot.slane %v7310_v10, 4  ;;  %v5932_v12 = vcombine.low %v1271_v16, %v1514_v29  ;;  %v5933_v34 = vcombine.high %v1271_v16, %v1514_v29  ;;  %721 = vrot.lane.b32.xlu0 %v6311_v14, %s6363_s29 }
 0x13f   : > { %964 = vrot.lane.b32.xlu1 %v892_v22, %s6363_s29  ;;  %v1272_v30 = vsel %vm522_vm0, %v1234_v5, %v1235_v63 }
 0x140   : > { %v1515_v44 = vsel %vm522_vm0, %v1477_v31, %v1478_v11  ;;  %4344 = vmatprep.subr.bf16.mxu1 %v5933_v34  ;;  %v1273_v27 = vsel %vm1252_vm3, %v1191_v62, %v1272_v30  ;;  %v1677_v20 = vpop.permute.xlu0 %1676  ;;  %v6315_v30 = vld [vmem:[#allocation3 + $0x58] sm:$0xff] }
 0x141   : > { %v1516_v1 = vsel %vm1495_vm4, %v1434_v55, %v1515_v44  ;;  %v1919_v28 = vpop.permute.xlu1 %1918  ;;  %4345 = vmatpush1.bf16.msra.mxu1 %v5932_v12  ;;  %v1720_v40 = vrot.slane %v1677_v20, 4 }
 0x142   : > { %v1962_v37 = vrot.slane %v1919_v28, 4  ;;  %v5934_v58 = vcombine.low %v1273_v27, %v1516_v1  ;;  %v5935_v2 = vcombine.high %v1273_v27, %v1516_v1  ;;  %723 = vrot.lane.b32.xlu0 %v7295_v15, %s6363_s29  ;;  %v6316_v27 = vld [vmem:[#allocation2 + $0xa0] sm:$0xff] }
 0x143   : > { %966 = vrot.lane.b32.xlu1 %v893_v42, %s6363_s29  ;;  %v1755_v47 = vsel %vm522_vm0, %v1719_v36, %v1720_v40 }
 0x144   : > { %v1998_v24 = vsel %vm522_vm0, %v1961_v7, %v1962_v37  ;;  %4387 = vmatprep.subr.bf16.mxu0 %v5935_v2  ;;  %v1756_v41 = vsel %vm1495_vm4, %v7201_v45, %v1755_v47  ;;  %v7342_v18 = vpop.permute.xlu0 %1678  ;;  %v353_v2 = vld [vmem:[#allocation2 + $0xa0] sm:$0xff] }
 0x145   : > { %v1999_v25 = vsel %vm1980_vm5, %v7199_v33, %v1998_v24  ;;  %v7340_v14 = vpop.permute.xlu1 %1920  ;;  %4388 = vmatpush1.bf16.msra.mxu0 %v5934_v58  ;;  %v1721_v7 = vrot.slane %v7342_v18, 4  ;;  %v352_v58 = vld [vmem:[#allocation2 + $0x98] sm:$0xff]  ;;  %380 = vst [vmem:[#allocation3 + $0xa0] sm:$0xff] %v353_v2 }
 0x146   : > { %v1963_v9 = vrot.slane %v7340_v14, 4  ;;  %v5985_v43 = vcombine.low %v1756_v41, %v1999_v25  ;;  %v5986_v52 = vcombine.high %v1756_v41, %v1999_v25  ;;  %1206 = vrot.lane.b32.xlu0 %v892_v22, %s6365_s5  ;;  %379 = vst [vmem:[#allocation3 + $0x98] sm:$0xff] %v352_v58 }
 0x147   : > { %1449 = vrot.lane.b32.xlu1 %v892_v22, %s6366_s6  ;;  %v1757_v45 = vsel %vm522_vm0, %v1720_v40, %v1721_v7 }
 0x148   : > { %v2000_v33 = vsel %vm522_vm0, %v1962_v37, %v1963_v9  ;;  %4346 = vmatprep.subr.bf16.mxu1 %v5986_v52  ;;  %v1758_v61 = vsel %vm1495_vm4, %v1677_v20, %v1757_v45  ;;  %v2162_v49 = vpop.permute.xlu0 %2161 }
 0x149   : > { %v2001_v36 = vsel %vm1980_vm5, %v1919_v28, %v2000_v33  ;;  %v7356_v60 = vpop.permute.xlu1 %2163  ;;  %4347 = vmatpush1.bf16.msra.mxu1 %v5985_v43  ;;  %v2205_v50 = vrot.slane %v2162_v49, 4 }
 0x14a   : > { %v2206_v38 = vrot.slane %v7356_v60, 4  ;;  %v5987_v32 = vcombine.low %v1758_v61, %v2001_v36  ;;  %v5988_v35 = vcombine.high %v1758_v61, %v2001_v36  ;;  %1208 = vrot.lane.b32.xlu0 %v893_v42, %s6365_s5 }
 0x14b   : > { %1451 = vrot.lane.b32.xlu1 %v893_v42, %s6366_s6  ;;  %v2241_v8 = vsel %vm522_vm0, %v2204_v54, %v2205_v50 }
 0x14c   : > { %v2243_v51 = vsel %vm522_vm0, %v2205_v50, %v2206_v38  ;;  %4389 = vmatprep.subr.bf16.mxu0 %v5988_v35  ;;  %v2242_v48 = vsel %vm2223_vm6, %v7215_v56, %v2241_v8  ;;  %v466_v62 = vpop.permute.xlu0 %465  ;;  %v7425_v35 = vld [vmem:[#allocation2 + $0xa8] sm:$0xff] }
 0x14d   : > { %v2244_v59 = vsel %vm2223_vm6, %v2162_v49, %v2243_v51  ;;  %v7370_v55 = vpop.permute.xlu1 %467  ;;  %4390 = vmatpush1.bf16.msra.mxu0 %v5987_v32  ;;  %v507_v5 = vrot.slane %v466_v62, 4  ;;  %v6039_v17 = vcombine.high %v2242_v48, %v2242_v48  ;;  %v6038_v54 = vcombine.low %v2242_v48, %v2242_v48  ;;  %v894_v48 = vld [vmem:[#allocation2 + $0xa4] sm:$0xff] }
 0x14e   : > { %v508_v31 = vrot.slane %v7370_v55, 4  ;;  %v6041_v19 = vcombine.high %v2244_v59, %v2244_v59  ;;  %1692 = vrot.lane.b32.xlu0 %v7295_v15, %s6366_s6  ;;  %v6040_v22 = vcombine.low %v2244_v59, %v2244_v59 }
 0x14f   : > { %1934 = vrot.lane.b32.xlu1 %v7295_v15, %s6367_s7  ;;  %v546_v56 = vsel %vm522_vm0, %v506_v0, %v507_v5  ;;  %6091 = vmatprep.subr.msk.bf16.mxu1 %vm522_vm0, %v6039_v17  ;;  %v3849_v34 = vsel %vm522_vm0, %v6038_v54, 0 }
 0x150   : > { %v548_v21 = vsel %vm522_vm0, %v507_v5, %v508_v31  ;;  %6093 = vmatprep.subr.msk.bf16.mxu0 %vm522_vm0, %v6041_v19  ;;  %v547_v57 = vsel %vm524_vm2, %v7234_v3, %v546_v56  ;;  %v710_v12 = vpop.permute.xlu0 %709  ;;  %v3855_v26 = vsel %vm522_vm0, %v6040_v22, 0  ;;  %4349 = vmatpush1.bf16.msra.mxu1 %v3849_v34  ;;  %v6317_v3 = vld [vmem:[#allocation3 + $0x60] sm:$0xff] }
 0x151   : > { %v549_v29 = vsel %vm524_vm2, %v466_v62, %v548_v21  ;;  %v953_v16 = vpop.permute.xlu1 %952  ;;  %v751_v44 = vrot.slane %v710_v12, 4  ;;  %4392 = vmatpush1.bf16.msra.mxu0 %v3855_v26  ;;  %v5830_v42 = vcombine.low %v6315_v30, %v547_v57  ;;  %v5831_v1 = vcombine.high %v6315_v30, %v547_v57 }
 0x152   : > { %v994_v0 = vrot.slane %v953_v16, 4  ;;  %1694 = vrot.lane.b32.xlu0 %v6316_v27, %s6366_s6  ;;  %v5833_v28 = vcombine.high %v6317_v3, %v549_v29  ;;  %v5832_v40 = vcombine.low %v6317_v3, %v549_v29 }
 0x153   : > { %1936 = vrot.lane.b32.xlu1 %v6316_v27, %s6367_s7  ;;  %v789_v37 = vsel %vm522_vm0, %v750_v4, %v751_v44  ;;  %4426 = vmatprep.subr.bf16.mxu1 %v5831_v1 }
 0x154   : > { %v1031_v20 = vsel %vm522_vm0, %v993_v6, %v994_v0  ;;  %v790_v47 = vsel %vm767_vm1, %v7269_v53, %v789_v37  ;;  %v7404_v41 = vpop.permute.xlu0 %711  ;;  %4469 = vmatprep.subr.bf16.mxu0 %v5833_v28  ;;  %6092 = vmatmul.mubr.msk.bf16.vlgmr.msra.gmra.mrb[16].mxu1 %vm3789_vm7, %v7274_v23 }
 0x155   : > { %v1032_v24 = vsel %vm767_vm1, %v7267_v39, %v1031_v20  ;;  %v7402_v25 = vpop.permute.xlu1 %954  ;;  %v752_v4 = vrot.slane %v7404_v41, 4  ;;  %4427 = vmatpush1.bf16.msra.mxu1 %v5830_v42  ;;  %6094 = vmatmul.mubr.msk.bf16.vlgmr.msra.gmra.mrb[20].mxu0 %vm3789_vm7, %v7274_v23 }
 0x156   : > { %v995_v6 = vrot.slane %v7402_v25, 4  ;;  %v5883_v39 = vcombine.low %v790_v47, %v1032_v24  ;;  %v5884_v53 = vcombine.high %v790_v47, %v1032_v24  ;;  %2177 = vrot.lane.b32.xlu0 %v7295_v15, %s6369_s8  ;;  %4470 = vmatpush1.bf16.msra.mxu0 %v5832_v40 }
 0x157   : > { %2179 = vrot.lane.b32.xlu1 %v6316_v27, %s6369_s8  ;;  %v791_v52 = vsel %vm522_vm0, %v751_v44, %v752_v4  ;;  %4458 = vmatprep.mubr.bf16.mxu1 %v8755_v13 }
 0x158   : > { %v1033_v43 = vsel %vm522_vm0, %v994_v0, %v995_v6  ;;  %4428 = vmatprep.subr.bf16.mxu1 %v5884_v53  ;;  %v792_v45 = vsel %vm767_vm1, %v710_v12, %v791_v52  ;;  %v1195_v61 = vpop.permute.xlu0 %1194  ;;  %4501 = vmatprep.mubr.bf16.mxu0 %v8755_v13 }
 0x159   : > { %v1034_v33 = vsel %vm767_vm1, %v953_v16, %v1033_v43  ;;  %v1438_v36 = vpop.permute.xlu1 %1437  ;;  %v1236_v49 = vrot.slane %v1195_v61, 4  ;;  %4429 = vmatpush1.bf16.msra.mxu1 %v5883_v39 }
 0x15a   : > { %v1479_v15 = vrot.slane %v1438_v36, 4  ;;  %v5885_v50 = vcombine.low %v792_v45, %v1034_v33  ;;  %v5886_v32 = vcombine.high %v792_v45, %v1034_v33  ;;  %481 = vrot.lane.b32.xlu0 %v6316_v27, %s6364_s30 }
 0x15b   : > { %483 = vrot.lane.b32.xlu1 %v7425_v35, %s6364_s30  ;;  %v1274_v51 = vsel %vm522_vm0, %v1235_v63, %v1236_v49  ;;  %v895_v63 = vld [vmem:[#allocation2 + $0xac] sm:$0xff] }
 0x15c   : > { %v1517_v8 = vsel %vm522_vm0, %v1478_v11, %v1479_v15  ;;  %4471 = vmatprep.subr.bf16.mxu0 %v5886_v32  ;;  %v1275_v62 = vsel %vm1252_vm3, %v7312_v46, %v1274_v51  ;;  %v7442_v17 = vpop.permute.xlu0 %1196 }
 0x15d   : > { %v1518_v59 = vsel %vm1495_vm4, %v7310_v10, %v1517_v8  ;;  %v7440_v5 = vpop.permute.xlu1 %1439  ;;  %4472 = vmatpush1.bf16.msra.mxu0 %v5885_v50  ;;  %v1237_v11 = vrot.slane %v7442_v17, 4 }
 0x15e   : > { %v1480_v19 = vrot.slane %v7440_v5, 4  ;;  %v5936_v54 = vcombine.low %v1275_v62, %v1518_v59  ;;  %v5937_v22 = vcombine.high %v1275_v62, %v1518_v59  ;;  %725 = vrot.lane.b32.xlu0 %v6316_v27, %s6363_s29 }
 0x15f   : > { %968 = vrot.lane.b32.xlu1 %v894_v48, %s6363_s29  ;;  %v1276_v46 = vsel %vm522_vm0, %v1236_v49, %v1237_v11 }
 0x160   : > { %v1519_v10 = vsel %vm522_vm0, %v1479_v15, %v1480_v19  ;;  %4430 = vmatprep.subr.bf16.mxu1 %v5937_v22  ;;  %v1277_v21 = vsel %vm1252_vm3, %v1195_v61, %v1276_v46  ;;  %v1681_v29 = vpop.permute.xlu0 %1680  ;;  %v6319_v46 = vld [vmem:[#allocation3 + $0x68] sm:$0xff] }
 0x161   : > { %v1520_v56 = vsel %vm1495_vm4, %v1438_v36, %v1519_v10  ;;  %v1923_v57 = vpop.permute.xlu1 %1922  ;;  %4431 = vmatpush1.bf16.msra.mxu1 %v5936_v54  ;;  %v1722_v12 = vrot.slane %v1681_v29, 4 }
 0x162   : > { %v1964_v16 = vrot.slane %v1923_v57, 4  ;;  %v5938_v34 = vcombine.low %v1277_v21, %v1520_v56  ;;  %v5939_v26 = vcombine.high %v1277_v21, %v1520_v56  ;;  %727 = vrot.lane.b32.xlu0 %v7425_v35, %s6363_s29  ;;  %v6320_v21 = vld [vmem:[#allocation2 + $0xb0] sm:$0xff] }
 0x163   : > { %970 = vrot.lane.b32.xlu1 %v895_v63, %s6363_s29  ;;  %v1759_v44 = vsel %vm522_vm0, %v1721_v7, %v1722_v12 }
 0x164   : > { %v2002_v0 = vsel %vm522_vm0, %v1963_v9, %v1964_v16  ;;  %4473 = vmatprep.subr.bf16.mxu0 %v5939_v26  ;;  %v1760_v42 = vsel %vm1495_vm4, %v7342_v18, %v1759_v44  ;;  %v7471_v27 = vpop.permute.xlu0 %1682  ;;  %v355_v26 = vld [vmem:[#allocation2 + $0xb0] sm:$0xff] }
 0x165   : > { %v2003_v30 = vsel %vm1980_vm5, %v7340_v14, %v2002_v0  ;;  %v7469_v1 = vpop.permute.xlu1 %1924  ;;  %4474 = vmatpush1.bf16.msra.mxu0 %v5938_v34  ;;  %v1723_v9 = vrot.slane %v7471_v27, 4  ;;  %v354_v34 = vld [vmem:[#allocation2 + $0xa8] sm:$0xff]  ;;  %382 = vst [vmem:[#allocation3 + $0xb0] sm:$0xff] %v355_v26 }
 0x166   : > { %v1965_v3 = vrot.slane %v7469_v1, 4  ;;  %v5989_v28 = vcombine.low %v1760_v42, %v2003_v30  ;;  %v5990_v20 = vcombine.high %v1760_v42, %v2003_v30  ;;  %1210 = vrot.lane.b32.xlu0 %v894_v48, %s6365_s5  ;;  %381 = vst [vmem:[#allocation3 + $0xa8] sm:$0xff] %v354_v34 }
 0x167   : > { %1453 = vrot.lane.b32.xlu1 %v894_v48, %s6366_s6  ;;  %v1761_v18 = vsel %vm522_vm0, %v1722_v12, %v1723_v9 }
 0x168   : > { %v2004_v14 = vsel %vm522_vm0, %v1964_v16, %v1965_v3  ;;  %4432 = vmatprep.subr.bf16.mxu1 %v5990_v20  ;;  %v1762_v37 = vsel %vm1495_vm4, %v1681_v29, %v1761_v18  ;;  %v2166_v58 = vpop.permute.xlu0 %2165 }
 0x169   : > { %v2005_v7 = vsel %vm1980_vm5, %v1923_v57, %v2004_v14  ;;  %v7485_v40 = vpop.permute.xlu1 %2167  ;;  %4433 = vmatpush1.bf16.msra.mxu1 %v5989_v28  ;;  %v2207_v24 = vrot.slane %v2166_v58, 4 }
 0x16a   : > { %v2208_v2 = vrot.slane %v7485_v40, 4  ;;  %v5991_v47 = vcombine.low %v1762_v37, %v2005_v7  ;;  %v5992_v39 = vcombine.high %v1762_v37, %v2005_v7  ;;  %1212 = vrot.lane.b32.xlu0 %v895_v63, %s6365_s5 }
 0x16b   : > { %1455 = vrot.lane.b32.xlu1 %v895_v63, %s6366_s6  ;;  %v2245_v53 = vsel %vm522_vm0, %v2206_v38, %v2207_v24 }
 0x16c   : > { %v2247_v43 = vsel %vm522_vm0, %v2207_v24, %v2208_v2  ;;  %4475 = vmatprep.subr.bf16.mxu0 %v5992_v39  ;;  %v2246_v52 = vsel %vm2223_vm6, %v7356_v60, %v2245_v53  ;;  %v470_v36 = vpop.permute.xlu0 %469  ;;  %v7554_v39 = vld [vmem:[#allocation2 + $0xb8] sm:$0xff] }
 0x16d   : > { %v2248_v33 = vsel %vm2223_vm6, %v2166_v58, %v2247_v43  ;;  %v7499_v45 = vpop.permute.xlu1 %471  ;;  %4476 = vmatpush1.bf16.msra.mxu0 %v5991_v47  ;;  %v509_v15 = vrot.slane %v470_v36, 4  ;;  %v6043_v49 = vcombine.high %v2246_v52, %v2246_v52  ;;  %v6042_v38 = vcombine.low %v2246_v52, %v2246_v52  ;;  %v896_v52 = vld [vmem:[#allocation2 + $0xb4] sm:$0xff] }
 0x16e   : > { %v510_v61 = vrot.slane %v7499_v45, 4  ;;  %v6045_v50 = vcombine.high %v2248_v33, %v2248_v33  ;;  %1696 = vrot.lane.b32.xlu0 %v7425_v35, %s6366_s6  ;;  %v6044_v32 = vcombine.low %v2248_v33, %v2248_v33 }
 0x16f   : > { %1938 = vrot.lane.b32.xlu1 %v7425_v35, %s6367_s7  ;;  %v550_v60 = vsel %vm522_vm0, %v508_v31, %v509_v15  ;;  %6095 = vmatprep.subr.msk.bf16.mxu1 %vm522_vm0, %v6043_v49  ;;  %v3861_v54 = vsel %vm522_vm0, %v6042_v38, 0 }
 0x170   : > { %v552_v8 = vsel %vm522_vm0, %v509_v15, %v510_v61  ;;  %6097 = vmatprep.subr.msk.bf16.mxu0 %vm522_vm0, %v6045_v50  ;;  %v551_v51 = vsel %vm524_vm2, %v7370_v55, %v550_v60  ;;  %v714_v62 = vpop.permute.xlu0 %713  ;;  %v3867_v22 = vsel %vm522_vm0, %v6044_v32, 0  ;;  %4435 = vmatpush1.bf16.msra.mxu1 %v3861_v54  ;;  %v6321_v55 = vld [vmem:[#allocation3 + $0x70] sm:$0xff] }
 0x171   : > { %v553_v48 = vsel %vm524_vm2, %v470_v36, %v552_v8  ;;  %v957_v59 = vpop.permute.xlu1 %956  ;;  %v753_v10 = vrot.slane %v714_v62, 4  ;;  %4478 = vmatpush1.bf16.msra.mxu0 %v3867_v22  ;;  %v5834_v63 = vcombine.low %v6319_v46, %v551_v51  ;;  %v5835_v56 = vcombine.high %v6319_v46, %v551_v51 }
 0x172   : > { %v996_v31 = vrot.slane %v957_v59, 4  ;;  %1698 = vrot.lane.b32.xlu0 %v6320_v21, %s6366_s6  ;;  %v5837_v57 = vcombine.high %v6321_v55, %v553_v48  ;;  %v5836_v12 = vcombine.low %v6321_v55, %v553_v48 }
 0x173   : > { %1940 = vrot.lane.b32.xlu1 %v6320_v21, %s6367_s7  ;;  %v793_v16 = vsel %vm522_vm0, %v752_v4, %v753_v10  ;;  %4512 = vmatprep.subr.bf16.mxu1 %v5835_v56 }
 0x174   : > { %v1035_v29 = vsel %vm522_vm0, %v995_v6, %v996_v31  ;;  %v794_v44 = vsel %vm767_vm1, %v7404_v41, %v793_v16  ;;  %v7533_v42 = vpop.permute.xlu0 %715  ;;  %4555 = vmatprep.subr.bf16.mxu0 %v5837_v57  ;;  %6096 = vmatmul.mubr.msk.bf16.vlgmr.msra.gmra.mrb[20].mxu1 %vm3789_vm7, %v7274_v23 }
 0x175   : > { %v1036_v0 = vsel %vm767_vm1, %v7402_v25, %v1035_v29  ;;  %v7531_v30 = vpop.permute.xlu1 %958  ;;  %v754_v4 = vrot.slane %v7533_v42, 4  ;;  %4513 = vmatpush1.bf16.msra.mxu1 %v5834_v63  ;;  %6098 = vmatmul.mubr.msk.bf16.vlgmr.msra.gmra.mrb[24].mxu0 %vm3789_vm7, %v7274_v23 }
 0x176   : > { %v997_v6 = vrot.slane %v7531_v30, 4  ;;  %v5887_v25 = vcombine.low %v794_v44, %v1036_v0  ;;  %v5888_v41 = vcombine.high %v794_v44, %v1036_v0  ;;  %2181 = vrot.lane.b32.xlu0 %v7425_v35, %s6369_s8  ;;  %4556 = vmatpush1.bf16.msra.mxu0 %v5836_v12 }
 0x177   : > { %2183 = vrot.lane.b32.xlu1 %v6320_v21, %s6369_s8  ;;  %v795_v20 = vsel %vm522_vm0, %v753_v10, %v754_v4  ;;  %4544 = vmatprep.mubr.bf16.mxu1 %v8755_v13 }
 0x178   : > { %v1037_v28 = vsel %vm522_vm0, %v996_v31, %v997_v6  ;;  %4514 = vmatprep.subr.bf16.mxu1 %v5888_v41  ;;  %v796_v18 = vsel %vm767_vm1, %v714_v62, %v795_v20  ;;  %v1199_v37 = vpop.permute.xlu0 %1198  ;;  %4587 = vmatprep.mubr.bf16.mxu0 %v8755_v13 }
 0x179   : > { %v1038_v14 = vsel %vm767_vm1, %v957_v59, %v1037_v28  ;;  %v1442_v7 = vpop.permute.xlu1 %1441  ;;  %v1238_v58 = vrot.slane %v1199_v37, 4  ;;  %4515 = vmatpush1.bf16.msra.mxu1 %v5887_v25 }
 0x17a   : > { %v1481_v35 = vrot.slane %v1442_v7, 4  ;;  %v5889_v24 = vcombine.low %v796_v18, %v1038_v14  ;;  %v5890_v47 = vcombine.high %v796_v18, %v1038_v14  ;;  %485 = vrot.lane.b32.xlu0 %v6320_v21, %s6364_s30 }
 0x17b   : > { %487 = vrot.lane.b32.xlu1 %v7554_v39, %s6364_s30  ;;  %v1278_v43 = vsel %vm522_vm0, %v1237_v11, %v1238_v58  ;;  %v897_v11 = vld [vmem:[#allocation2 + $0xbc] sm:$0xff] }
 0x17c   : > { %v1521_v53 = vsel %vm522_vm0, %v1480_v19, %v1481_v35  ;;  %4557 = vmatprep.subr.bf16.mxu0 %v5890_v47  ;;  %v1279_v36 = vsel %vm1252_vm3, %v7442_v17, %v1278_v43  ;;  %v7571_v49 = vpop.permute.xlu0 %1200 }
 0x17d   : > { %v1522_v33 = vsel %vm1495_vm4, %v7440_v5, %v1521_v53  ;;  %v7569_v15 = vpop.permute.xlu1 %1443  ;;  %4558 = vmatpush1.bf16.msra.mxu0 %v5889_v24  ;;  %v1239_v19 = vrot.slane %v7571_v49, 4 }
 0x17e   : > { %v1482_v50 = vrot.slane %v7569_v15, 4  ;;  %v5940_v38 = vcombine.low %v1279_v36, %v1522_v33  ;;  %v5941_v32 = vcombine.high %v1279_v36, %v1522_v33  ;;  %729 = vrot.lane.b32.xlu0 %v6320_v21, %s6363_s29 }
 0x17f   : > { %972 = vrot.lane.b32.xlu1 %v896_v52, %s6363_s29  ;;  %v1280_v17 = vsel %vm522_vm0, %v1238_v58, %v1239_v19 }
 0x180   : > { %v1523_v5 = vsel %vm522_vm0, %v1481_v35, %v1482_v50  ;;  %4516 = vmatprep.subr.bf16.mxu1 %v5941_v32  ;;  %v1281_v8 = vsel %vm1252_vm3, %v1199_v37, %v1280_v17  ;;  %v1685_v48 = vpop.permute.xlu0 %1684  ;;  %v6323_v17 = vld [vmem:[#allocation3 + $0x78] sm:$0xff] }
 0x181   : > { %v1524_v60 = vsel %vm1495_vm4, %v1442_v7, %v1523_v5  ;;  %v1927_v51 = vpop.permute.xlu1 %1926  ;;  %4517 = vmatpush1.bf16.msra.mxu1 %v5940_v38  ;;  %v1724_v62 = vrot.slane %v1685_v48, 4 }
 0x182   : > { %v1966_v59 = vrot.slane %v1927_v51, 4  ;;  %v5942_v54 = vcombine.low %v1281_v8, %v1524_v60  ;;  %v5943_v22 = vcombine.high %v1281_v8, %v1524_v60  ;;  %731 = vrot.lane.b32.xlu0 %v7554_v39, %s6363_s29  ;;  %v6324_v8 = vld [vmem:[#allocation2 + $0xc0] sm:$0xff] }
 0x183   : > { %974 = vrot.lane.b32.xlu1 %v897_v11, %s6363_s29  ;;  %v1763_v10 = vsel %vm522_vm0, %v1723_v9, %v1724_v62 }
 0x184   : > { %v2006_v31 = vsel %vm522_vm0, %v1965_v3, %v1966_v59  ;;  %4559 = vmatprep.subr.bf16.mxu0 %v5943_v22  ;;  %v1764_v63 = vsel %vm1495_vm4, %v7471_v27, %v1763_v10  ;;  %v7600_v21 = vpop.permute.xlu0 %1686  ;;  %v357_v22 = vld [vmem:[#allocation2 + $0xc0] sm:$0xff] }
 0x185   : > { %v2007_v46 = vsel %vm1980_vm5, %v7469_v1, %v2006_v31  ;;  %v7598_v56 = vpop.permute.xlu1 %1928  ;;  %4560 = vmatpush1.bf16.msra.mxu0 %v5942_v54  ;;  %v1725_v3 = vrot.slane %v7600_v21, 4  ;;  %v356_v54 = vld [vmem:[#allocation2 + $0xb8] sm:$0xff]  ;;  %384 = vst [vmem:[#allocation3 + $0xc0] sm:$0xff] %v357_v22 }
 0x186   : > { %v1967_v55 = vrot.slane %v7598_v56, 4  ;;  %v5993_v57 = vcombine.low %v1764_v63, %v2007_v46  ;;  %v5994_v29 = vcombine.high %v1764_v63, %v2007_v46  ;;  %1214 = vrot.lane.b32.xlu0 %v896_v52, %s6365_s5  ;;  %383 = vst [vmem:[#allocation3 + $0xb8] sm:$0xff] %v356_v54 }
 0x187   : > { %1457 = vrot.lane.b32.xlu1 %v896_v52, %s6366_s6  ;;  %v1765_v27 = vsel %vm522_vm0, %v1724_v62, %v1725_v3 }
 0x188   : > { %v2008_v1 = vsel %vm522_vm0, %v1966_v59, %v1967_v55  ;;  %4518 = vmatprep.subr.bf16.mxu1 %v5994_v29  ;;  %v1766_v16 = vsel %vm1495_vm4, %v1685_v48, %v1765_v27  ;;  %v2170_v34 = vpop.permute.xlu0 %2169 }
 0x189   : > { %v2009_v9 = vsel %vm1980_vm5, %v1927_v51, %v2008_v1  ;;  %v7614_v12 = vpop.permute.xlu1 %2171  ;;  %4519 = vmatpush1.bf16.msra.mxu1 %v5993_v57  ;;  %v2209_v0 = vrot.slane %v2170_v34, 4 }
 0x18a   : > { %v2210_v26 = vrot.slane %v7614_v12, 4  ;;  %v5995_v44 = vcombine.low %v1766_v16, %v2009_v9  ;;  %v5996_v25 = vcombine.high %v1766_v16, %v2009_v9  ;;  %1216 = vrot.lane.b32.xlu0 %v897_v11, %s6365_s5 }
 0x18b   : > { %1459 = vrot.lane.b32.xlu1 %v897_v11, %s6366_s6  ;;  %v2249_v41 = vsel %vm522_vm0, %v2208_v2, %v2209_v0 }
 0x18c   : > { %v2251_v28 = vsel %vm522_vm0, %v2209_v0, %v2210_v26  ;;  %4561 = vmatprep.subr.bf16.mxu0 %v5996_v25  ;;  %v2250_v20 = vsel %vm2223_vm6, %v7485_v40, %v2249_v41  ;;  %v474_v7 = vpop.permute.xlu0 %473 }
 0x18d   : > { %v2252_v14 = vsel %vm2223_vm6, %v2170_v34, %v2251_v28  ;;  %v7628_v18 = vpop.permute.xlu1 %475  ;;  %4562 = vmatpush1.bf16.msra.mxu0 %v5995_v44  ;;  %v511_v35 = vrot.slane %v474_v7, 4  ;;  %v6047_v58 = vcombine.high %v2250_v20, %v2250_v20  ;;  %v6046_v2 = vcombine.low %v2250_v20, %v2250_v20  ;;  %v7683_v44 = vld [vmem:[#allocation2 + $0xc8] sm:$0xff] }
 0x18e   : > { %v512_v37 = vrot.slane %v7628_v18, 4  ;;  %v6049_v24 = vcombine.high %v2252_v14, %v2252_v14  ;;  %1700 = vrot.lane.b32.xlu0 %v7554_v39, %s6366_s6  ;;  %v6048_v47 = vcombine.low %v2252_v14, %v2252_v14  ;;  %v898_v28 = vld [vmem:[#allocation2 + $0xc4] sm:$0xff] }
 0x18f   : > { %1942 = vrot.lane.b32.xlu1 %v7554_v39, %s6367_s7  ;;  %v554_v40 = vsel %vm522_vm0, %v510_v61, %v511_v35  ;;  %6099 = vmatprep.subr.msk.bf16.mxu1 %vm522_vm0, %v6047_v58  ;;  %v3873_v38 = vsel %vm522_vm0, %v6046_v2, 0 }
 0x190   : > { %v556_v53 = vsel %vm522_vm0, %v511_v35, %v512_v37  ;;  %6101 = vmatprep.subr.msk.bf16.mxu0 %vm522_vm0, %v6049_v24  ;;  %v555_v43 = vsel %vm524_vm2, %v7499_v45, %v554_v40  ;;  %v718_v36 = vpop.permute.xlu0 %717  ;;  %v3879_v32 = vsel %vm522_vm0, %v6048_v47, 0  ;;  %4521 = vmatpush1.bf16.msra.mxu1 %v3873_v38  ;;  %v6325_v45 = vld [vmem:[#allocation3 + $0x80] sm:$0xff] }
 0x191   : > { %v557_v52 = vsel %vm524_vm2, %v474_v7, %v556_v53  ;;  %v961_v33 = vpop.permute.xlu1 %960  ;;  %v755_v5 = vrot.slane %v718_v36, 4  ;;  %4564 = vmatpush1.bf16.msra.mxu0 %v3879_v32  ;;  %v5838_v11 = vcombine.low %v6323_v17, %v555_v43  ;;  %v5839_v60 = vcombine.high %v6323_v17, %v555_v43  ;;  %v899_v40 = vld [vmem:[#allocation2 + $0xcc] sm:$0xff] }
 0x192   : > { %v998_v61 = vrot.slane %v961_v33, 4  ;;  %1702 = vrot.lane.b32.xlu0 %v6324_v8, %s6366_s6  ;;  %v5841_v51 = vcombine.high %v6325_v45, %v557_v52  ;;  %v5840_v62 = vcombine.low %v6325_v45, %v557_v52 }
 0x193   : > { %1944 = vrot.lane.b32.xlu1 %v6324_v8, %s6367_s7  ;;  %v797_v59 = vsel %vm522_vm0, %v754_v4, %v755_v5  ;;  %4598 = vmatprep.subr.bf16.mxu1 %v5839_v60 }
 0x194   : > { %v1039_v48 = vsel %vm522_vm0, %v997_v6, %v998_v61  ;;  %v798_v10 = vsel %vm767_vm1, %v7533_v42, %v797_v59  ;;  %v7662_v63 = vpop.permute.xlu0 %719  ;;  %4641 = vmatprep.subr.bf16.mxu0 %v5841_v51  ;;  %6100 = vmatmul.mubr.msk.bf16.vlgmr.msra.gmra.mrb[24].mxu1 %vm3789_vm7, %v7274_v23 }
 0x195   : > { %v1040_v31 = vsel %vm767_vm1, %v7531_v30, %v1039_v48  ;;  %v7660_v46 = vpop.permute.xlu1 %962  ;;  %v756_v4 = vrot.slane %v7662_v63, 4  ;;  %4599 = vmatpush1.bf16.msra.mxu1 %v5838_v11  ;;  %6102 = vmatmul.mubr.msk.bf16.vlgmr.msra.gmra.mrb[28].mxu0 %vm3789_vm7, %v7274_v23 }
 0x196   : > { %v999_v6 = vrot.slane %v7660_v46, 4  ;;  %v5891_v30 = vcombine.low %v798_v10, %v1040_v31  ;;  %v5892_v42 = vcombine.high %v798_v10, %v1040_v31  ;;  %2185 = vrot.lane.b32.xlu0 %v7554_v39, %s6369_s8  ;;  %4642 = vmatpush1.bf16.msra.mxu0 %v5840_v62 }
 0x197   : > { %2187 = vrot.lane.b32.xlu1 %v6324_v8, %s6369_s8  ;;  %v799_v29 = vsel %vm522_vm0, %v755_v5, %v756_v4  ;;  %4630 = vmatprep.mubr.bf16.mxu1 %v8755_v13 }
 0x198   : > { %v1041_v57 = vsel %vm522_vm0, %v998_v61, %v999_v6  ;;  %4600 = vmatprep.subr.bf16.mxu1 %v5892_v42  ;;  %v800_v23 = vsel %vm767_vm1, %v718_v36, %v799_v29  ;;  %v1203_v9 = vpop.permute.xlu0 %1202  ;;  %4673 = vmatprep.mubr.bf16.mxu0 %v8755_v13 }
 0x199   : > { %v1042_v1 = vsel %vm767_vm1, %v961_v33, %v1041_v57  ;;  %v1446_v27 = vpop.permute.xlu1 %1445  ;;  %v1240_v16 = vrot.slane %v1203_v9, 4  ;;  %4601 = vmatpush1.bf16.msra.mxu1 %v5891_v30 }
 0x19a   : > { %v1483_v39 = vrot.slane %v1446_v27, 4  ;;  %v5893_v34 = vcombine.low %v800_v23, %v1042_v1  ;;  %v5894_v0 = vcombine.high %v800_v23, %v1042_v1  ;;  %489 = vrot.lane.b32.xlu0 %v6324_v8, %s6364_s30 }
 0x19b   : > { %491 = vrot.lane.b32.xlu1 %v7683_v44, %s6364_s30  ;;  %v1282_v41 = vsel %vm522_vm0, %v1239_v19, %v1240_v16  ;;  %v7704_v19 = vpop.f32.mrb[0].mxu0 }
 0x19c   : > { %v1525_v25 = vsel %vm522_vm0, %v1482_v50, %v1483_v39  ;;  %4643 = vmatprep.subr.bf16.mxu0 %v5894_v0  ;;  %v1283_v14 = vsel %vm1252_vm3, %v7571_v49, %v1282_v41  ;;  %v7700_v35 = vpop.permute.xlu0 %1204 }
 0x19d   : > { %v1526_v20 = vsel %vm1495_vm4, %v7569_v15, %v1525_v25  ;;  %v7698_v7 = vpop.permute.xlu1 %1447  ;;  %4644 = vmatpush1.bf16.msra.mxu0 %v5893_v34  ;;  %v1241_v50 = vrot.slane %v7700_v35, 4  ;;  %v7708_v15 = vpop.f32.mrb[1].mxu0 }
 0x19e   : > { %v1484_v58 = vrot.slane %v7698_v7, 4  ;;  %v5944_v24 = vcombine.low %v1283_v14, %v1526_v20  ;;  %v5945_v2 = vcombine.high %v1283_v14, %v1526_v20  ;;  %733 = vrot.lane.b32.xlu0 %v6324_v8, %s6363_s29  ;;  %v7716_v53 = vpop.f32.mrb[2].mxu0  ;;  %v7778_v14 = vld [vmem:[#allocation2 + $0xd0] sm:$0xff] }
 0x19f   : > { %976 = vrot.lane.b32.xlu1 %v898_v28, %s6363_s29  ;;  %v1284_v47 = vsel %vm522_vm0, %v1240_v16, %v1241_v50  ;;  %v7720_v17 = vpop.f32.mrb[3].mxu0 }
 0x1a0   : > { %v1527_v49 = vsel %vm522_vm0, %v1483_v39, %v1484_v58  ;;  %4602 = vmatprep.subr.bf16.mxu1 %v5945_v2  ;;  %v1285_v52 = vsel %vm1252_vm3, %v1203_v9, %v1284_v47  ;;  %v1689_v36 = vpop.permute.xlu0 %1688 }
 0x1a1   : > { %v1528_v43 = vsel %vm1495_vm4, %v1446_v27, %v1527_v49  ;;  %v1931_v33 = vpop.permute.xlu1 %1930  ;;  %4603 = vmatpush1.bf16.msra.mxu1 %v5944_v24  ;;  %v1726_v32 = vrot.slane %v1689_v36, 4 }
 0x1a2   : > { %v1968_v38 = vrot.slane %v1931_v33, 4  ;;  %v5946_v61 = vcombine.low %v1285_v52, %v1528_v43  ;;  %v5947_v5 = vcombine.high %v1285_v52, %v1528_v43  ;;  %735 = vrot.lane.b32.xlu0 %v7683_v44, %s6363_s29 }
 0x1a3   : > { %978 = vrot.lane.b32.xlu1 %v899_v40, %s6363_s29  ;;  %v1767_v60 = vsel %vm522_vm0, %v1725_v3, %v1726_v32 }
 0x1a4   : > { %v2010_v11 = vsel %vm522_vm0, %v1967_v55, %v1968_v38  ;;  %4645 = vmatprep.subr.bf16.mxu0 %v5947_v5  ;;  %v1768_v45 = vsel %vm1495_vm4, %v7600_v21, %v1767_v60  ;;  %v7737_v48 = vpop.permute.xlu0 %1690 }
 0x1a5   : > { %v2011_v8 = vsel %vm1980_vm5, %v7598_v56, %v2010_v11  ;;  %v7735_v51 = vpop.permute.xlu1 %1932  ;;  %4646 = vmatpush1.bf16.msra.mxu0 %v5946_v61  ;;  %v1727_v55 = vrot.slane %v7737_v48, 4 }
 0x1a6   : > { %v1969_v59 = vrot.slane %v7735_v51, 4  ;;  %v5997_v62 = vcombine.low %v1768_v45, %v2011_v8  ;;  %v5998_v54 = vcombine.high %v1768_v45, %v2011_v8  ;;  %1218 = vrot.lane.b32.xlu0 %v898_v28, %s6365_s5  ;;  %v359_v45 = vld [vmem:[#allocation2 + $0xd0] sm:$0xf] }
 0x1a7   : > { %1461 = vrot.lane.b32.xlu1 %v898_v28, %s6366_s6  ;;  %v1769_v21 = vsel %vm522_vm0, %v1726_v32, %v1727_v55  ;;  %v7782_v24 = vpop.f32.mrb[0].mxu1  ;;  %386 = vst [vmem:[#allocation3 + $0xd0] sm:$0xf] %v359_v45 }
 0x1a8   : > { %v2012_v56 = vsel %vm522_vm0, %v1968_v38, %v1969_v59  ;;  %4604 = vmatprep.subr.bf16.mxu1 %v5998_v54  ;;  %v1770_v22 = vsel %vm1495_vm4, %v1689_v36, %v1769_v21  ;;  %v2174_v10 = vpop.permute.xlu0 %2173  ;;  %v6327_v36 = vld [vmem:[#allocation3 + $0x88] sm:$0xff]  ;;  %v7789_v61 = vpop.f32.mrb[1].mxu1 }
 0x1a9   : > { %v2013_v3 = vsel %vm1980_vm5, %v1931_v33, %v2012_v56  ;;  %v7751_v31 = vpop.permute.xlu1 %2175  ;;  %4605 = vmatpush1.bf16.msra.mxu1 %v5997_v62  ;;  %v2211_v42 = vrot.slane %v2174_v10, 4  ;;  %v7791_v5 = vpop.f32.mrb[4].mxu0 }
 0x1aa   : > { %v2212_v30 = vrot.slane %v7751_v31, 4  ;;  %v5999_v57 = vcombine.low %v1770_v22, %v2013_v3  ;;  %v6000_v29 = vcombine.high %v1770_v22, %v2013_v3  ;;  %1220 = vrot.lane.b32.xlu0 %v899_v40, %s6365_s5  ;;  %v7797_v60 = vpop.f32.mrb[2].mxu1  ;;  %v7799_v8 = vpop.f32.mrb[5].mxu0  ;;  %v358_v22 = vld [vmem:[#allocation2 + $0xc8] sm:$0xff] }
 0x1ab   : > { %1463 = vrot.lane.b32.xlu1 %v899_v40, %s6366_s6  ;;  %v2253_v1 = vsel %vm522_vm0, %v2210_v26, %v2211_v42  ;;  %v7807_v21 = vpop.f32.mrb[3].mxu1  ;;  %v7809_v3 = vpop.f32.mrb[6].mxu0  ;;  %385 = vst [vmem:[#allocation3 + $0xc8] sm:$0xff] %v358_v22 }
 0x1ac   : > { %v2255_v23 = vsel %vm522_vm0, %v2211_v42, %v2212_v30  ;;  %4647 = vmatprep.subr.bf16.mxu0 %v6000_v29  ;;  %v2254_v27 = vsel %vm2223_vm6, %v7614_v12, %v2253_v1  ;;  %v478_v16 = vpop.permute.xlu0 %477 }
 0x1ad   : > { %v2256_v9 = vsel %vm2223_vm6, %v2174_v10, %v2255_v23  ;;  %v7765_v39 = vpop.permute.xlu1 %479  ;;  %4648 = vmatpush1.bf16.msra.mxu0 %v5999_v57  ;;  %v513_v0 = vrot.slane %v478_v16, 4  ;;  %v6051_v25 = vcombine.high %v2254_v27, %v2254_v27  ;;  %v6050_v26 = vcombine.low %v2254_v27, %v2254_v27  ;;  %v7830_v23 = vpop.f32.mrb[7].mxu0 }
 0x1ae   : > { %v514_v34 = vrot.slane %v7765_v39, 4  ;;  %v6053_v41 = vcombine.high %v2256_v9, %v2256_v9  ;;  %1704 = vrot.lane.b32.xlu0 %v7683_v44, %s6366_s6  ;;  %v6052_v28 = vcombine.low %v2256_v9, %v2256_v9 }
 0x1af   : > { %1946 = vrot.lane.b32.xlu1 %v7683_v44, %s6367_s7  ;;  %v558_v12 = vsel %vm522_vm0, %v512_v37, %v513_v0  ;;  %6103 = vmatprep.subr.msk.bf16.mxu1 %vm522_vm0, %v6051_v25  ;;  %v3885_v37 = vsel %vm522_vm0, %v6050_v26, 0 }
 0x1b0   : > { %v560_v20 = vsel %vm522_vm0, %v513_v0, %v514_v34  ;;  %6105 = vmatprep.subr.msk.bf16.mxu0 %vm522_vm0, %v6053_v41  ;;  %v559_v2 = vsel %vm524_vm2, %v7628_v18, %v558_v12  ;;  %v722_v40 = vpop.permute.xlu0 %721  ;;  %v3891_v43 = vsel %vm522_vm0, %v6052_v28, 0  ;;  %4607 = vmatpush1.bf16.msra.mxu1 %v3885_v37  ;;  %v6328_v18 = vld [vmem:[#allocation3 + $0x90] sm:$0xff] }
 0x1b1   : > { %v561_v49 = vsel %vm524_vm2, %v478_v16, %v560_v20  ;;  %v965_v47 = vpop.permute.xlu1 %964  ;;  %v757_v33 = vrot.slane %v722_v40, 4  ;;  %4650 = vmatpush1.bf16.msra.mxu0 %v3891_v43  ;;  %v5842_v38 = vcombine.low %v6327_v36, %v559_v2  ;;  %v5843_v32 = vcombine.high %v6327_v36, %v559_v2 }
 0x1b2   : > { %v1000_v52 = vrot.slane %v965_v47, 4  ;;  %1706 = vrot.lane.b32.xlu0 %v7778_v14, %s6366_s6  ;;  %v5845_v11 = vcombine.high %v6328_v18, %v561_v49  ;;  %v5844_v56 = vcombine.low %v6328_v18, %v561_v49 }
 0x1b3   : > { %1948 = vrot.lane.b32.xlu1 %v7778_v14, %s6367_s7  ;;  %v801_v54 = vsel %vm522_vm0, %v756_v4, %v757_v33  ;;  %4684 = vmatprep.subr.bf16.mxu1 %v5843_v32  ;;  %v7822_v4 = vld [vmem:[%s8745_s2] sm:$0x3f]  }
 0x1b4   : > { %v1043_v62 = vsel %vm522_vm0, %v999_v6, %v1000_v52  ;;  %v802_v42 = vsel %vm767_vm1, %v7662_v63, %v801_v54  ;;  %v7817_v6 = vpop.permute.xlu0 %723  ;;  %4727 = vmatprep.subr.bf16.mxu0 %v5845_v11  ;;  %6104 = vmatmul.mubr.msk.bf16.vlgmr.msra.gmra.mrb[28].mxu1 %vm3789_vm7, %v7822_v4 }
 0x1b5   : > { %v1044_v10 = vsel %vm767_vm1, %v7660_v46, %v1043_v62  ;;  %v7815_v57 = vpop.permute.xlu1 %966  ;;  %v758_v46 = vrot.slane %v7817_v6, 4  ;;  %4685 = vmatpush1.bf16.msra.mxu1 %v5842_v38  ;;  %6106 = vmatmul.mubr.msk.bf16.vlgmr.msra.gmra.mrb[32].mxu0 %vm3789_vm7, %v7822_v4 }
 0x1b6   : > { %v1001_v29 = vrot.slane %v7815_v57, 4  ;;  %v5895_v63 = vcombine.low %v802_v42, %v1044_v10  ;;  %v5896_v1 = vcombine.high %v802_v42, %v1044_v10  ;;  %2189 = vrot.lane.b32.xlu0 %v7683_v44, %s6369_s8  ;;  %4728 = vmatpush1.bf16.msra.mxu0 %v5844_v56 }
 0x1b7   : > { %2191 = vrot.lane.b32.xlu1 %v7778_v14, %s6369_s8  ;;  %v803_v9 = vsel %vm522_vm0, %v757_v33, %v758_v46  ;;  %4716 = vmatprep.mubr.bf16.mxu1 %v8755_v13  ;;  %v6330_v33 = vld [vmem:[#allocation2 + $0xd4] sm:$0xff] }
 0x1b8   : > { %v1045_v27 = vsel %vm522_vm0, %v1000_v52, %v1001_v29  ;;  %4686 = vmatprep.subr.bf16.mxu1 %v5896_v1  ;;  %v804_v0 = vsel %vm767_vm1, %v722_v40, %v803_v9  ;;  %v1207_v41 = vpop.permute.xlu0 %1206  ;;  %4759 = vmatprep.mubr.bf16.mxu0 %v8755_v13 }
 0x1b9   : > { %v1046_v16 = vsel %vm767_vm1, %v965_v47, %v1045_v27  ;;  %v1450_v25 = vpop.permute.xlu1 %1449  ;;  %v1242_v26 = vrot.slane %v1207_v41, 4  ;;  %4687 = vmatpush1.bf16.msra.mxu1 %v5895_v63 }
 0x1ba   : > { %v1485_v44 = vrot.slane %v1450_v25, 4  ;;  %v5897_v28 = vcombine.low %v804_v0, %v1046_v16  ;;  %v5898_v12 = vcombine.high %v804_v0, %v1046_v16  ;;  %493 = vrot.lane.b32.xlu0 %v7778_v14, %s6364_s30  ;;  %v2575_v0 = vld [vmem:[%s8746_s3] sm:$0xff] }
 0x1bb   : > { %737 = vrot.lane.b32.xlu1 %v7778_v14, %s6363_s29  ;;  %v1286_v2 = vsel %vm522_vm0, %v1241_v50, %v1242_v26  ;;  %v1628_v50 = vld [vmem:[#allocation2 + $0xd8] sm:$0xff] }
 0x1bc   : > { %v1529_v20 = vsel %vm522_vm0, %v1484_v58, %v1485_v44  ;;  %4729 = vmatprep.subr.bf16.mxu0 %v5898_v12  ;;  %v1287_v47 = vsel %vm1252_vm3, %v7700_v35, %v1286_v2  ;;  %v7862_v37 = vpop.permute.xlu0 %1208 }
 0x1bd   : > { %v1530_v49 = vsel %vm1495_vm4, %v7698_v7, %v1529_v20  ;;  %v7860_v40 = vpop.permute.xlu1 %1451  ;;  %4730 = vmatpush1.bf16.msra.mxu0 %v5897_v28  ;;  %v1243_v58 = vrot.slane %v7862_v37, 4 }
 0x1be   : > { %v1486_v14 = vrot.slane %v7860_v40, 4  ;;  %v5948_v43 = vcombine.low %v1287_v47, %v1530_v49  ;;  %v5949_v52 = vcombine.high %v1287_v47, %v1530_v49  ;;  %980 = vrot.lane.b32.xlu0 %v6330_v33, %s6363_s29 }
 0x1bf   : > { %1222 = vrot.lane.b32.xlu1 %v6330_v33, %s6365_s5  ;;  %v1288_v35 = vsel %vm522_vm0, %v1242_v26, %v1243_v58 }
 0x1c0   : > { %v1531_v7 = vsel %vm522_vm0, %v1485_v44, %v1486_v14  ;;  %4688 = vmatprep.subr.bf16.mxu1 %v5949_v52  ;;  %v1289_v38 = vsel %vm1252_vm3, %v1207_v41, %v1288_v35  ;;  %v1693_v18 = vpop.permute.xlu0 %1692 }
 0x1c1   : > { %v1532_v36 = vsel %vm1495_vm4, %v1450_v25, %v1531_v7  ;;  %v1935_v32 = vpop.permute.xlu1 %1934  ;;  %4689 = vmatpush1.bf16.msra.mxu1 %v5948_v43  ;;  %v1728_v45 = vrot.slane %v1693_v18, 4 }
 0x1c2   : > { %v1970_v11 = vrot.slane %v1935_v32, 4  ;;  %v5950_v62 = vcombine.low %v1289_v38, %v1532_v36  ;;  %v5951_v54 = vcombine.high %v1289_v38, %v1532_v36  ;;  %1465 = vrot.lane.b32.xlu0 %v6330_v33, %s6366_s6 }
 0x1c3   : > { %1708 = vrot.lane.b32.xlu1 %v1628_v50, %s6366_s6  ;;  %v1771_v22 = vsel %vm522_vm0, %v1727_v55, %v1728_v45  ;;  %v2576_v55 = vld [vmem:[%s8746_s3 + $0x8] sm:$0xf] }
 0x1c4   : > { %v2014_v56 = vsel %vm522_vm0, %v1969_v59, %v1970_v11  ;;  %4731 = vmatprep.subr.bf16.mxu0 %v5951_v54  ;;  %v1772_v42 = vsel %vm1495_vm4, %v7737_v48, %v1771_v22  ;;  %v7890_v1 = vpop.permute.xlu0 %1694 }
 0x1c5   : > { %v2015_v10 = vsel %vm1980_vm5, %v7735_v51, %v2014_v56  ;;  %v7888_v63 = vpop.permute.xlu1 %1936  ;;  %4732 = vmatpush1.bf16.msra.mxu0 %v5950_v62  ;;  %v1729_v59 = vrot.slane %v7890_v1, 4 }
 0x1c6   : > { %v1971_v27 = vrot.slane %v7888_v63, 4  ;;  %v6001_v9 = vcombine.low %v1772_v42, %v2015_v10  ;;  %v6002_v16 = vcombine.high %v1772_v42, %v2015_v10  ;;  %1950 = vrot.lane.b32.xlu0 %v1628_v50, %s6367_s7  ;;  %s206_s7 = sand.u32 1, %s6353_s15  }
 0x1c7   : > { %2193 = vrot.lane.b32.xlu1 %v1628_v50, %s6369_s8  ;;  %v1773_v48 = vsel %vm522_vm0, %v1728_v45, %v1729_v59  ;;  %v7908_v25 = vpop.f32.mrb[4].mxu1  ;;  %s8386_s8 = smul.u32 424, %s206_s7 }
 0x1c8   : > { %v2016_v51 = vsel %vm522_vm0, %v1970_v11, %v1971_v27  ;;  %4690 = vmatprep.subr.bf16.mxu1 %v6002_v16  ;;  %v1774_v44 = vsel %vm1495_vm4, %v1693_v18, %v1773_v48  ;;  %v2178_v28 = vpop.permute.xlu0 %2177  ;;  %v7915_v47 = vpop.f32.mrb[5].mxu1 }
 0x1c9   : > { %v2017_v41 = vsel %vm1980_vm5, %v1935_v32, %v2016_v51  ;;  %v7912_v26 = vpop.permute.xlu1 %2179  ;;  %4691 = vmatpush1.bf16.msra.mxu1 %v6001_v9  ;;  %v2213_v20 = vrot.slane %v2178_v28, 4  ;;  %v7917_v43 = vpop.f32.mrb[8].mxu0  ;;  %s8429_s15 = scalar_lea.vmem [#allocation4], %s8386_s8 }
 0x1ca   : > { %v2214_v12 = vrot.slane %v7912_v26, 4  ;;  %v6003_v2 = vcombine.low %v1774_v44, %v2017_v41  ;;  %v6004_v49 = vcombine.high %v1774_v44, %v2017_v41  ;;  %2579 = vperm.xlu0 %6296, %v2575_v0   ;;  %v7919_v52 = vpop.f32.mrb[6].mxu1  ;;  %v7921_v33 = vpop.f32.mrb[9].mxu0  ;;  %v6331_v44 = vld [vmem:[#allocation3 + $0x98] sm:$0xff] }
 0x1cb   : > { %2584 = vperm.xlu1 %6297, %v2576_v55   ;;  %v2257_v7 = vsel %vm522_vm0, %v2212_v30, %v2213_v20  ;;  %v7929_v50 = vpop.f32.mrb[7].mxu1  ;;  %v7931_v36 = vpop.f32.mrb[10].mxu0 }
 0x1cc   : > { %v2259_v35 = vsel %vm522_vm0, %v2213_v20, %v2214_v12  ;;  %4733 = vmatprep.subr.bf16.mxu0 %v6004_v49  ;;  %v2258_v38 = vsel %vm2223_vm6, %v7751_v31, %v2257_v7  ;;  %v482_v11 = vpop.permute.xlu0 %481  ;;  %v7939_v56 = vpop.f32.mrb[11].mxu0 }
 0x1cd   : > { %v2260_v32 = vsel %vm2223_vm6, %v2178_v28, %v2259_v35  ;;  %v7936_v18 = vpop.permute.xlu1 %483  ;;  %4734 = vmatpush1.bf16.msra.mxu0 %v6003_v2  ;;  %v515_v45 = vrot.slane %v482_v11, 4  ;;  %v6055_v62 = vcombine.high %v2258_v38, %v2258_v38  ;;  %v6054_v22 = vcombine.low %v2258_v38, %v2258_v38  ;;  %v6332_v2 = vld [vmem:[#allocation3 + $0xa0] sm:$0xff] }
 0x1ce   : > { %v516_v30 = vrot.slane %v7936_v18, 4  ;;  %v6057_v54 = vcombine.high %v2260_v32, %v2260_v32  ;;  %v6056_v10 = vcombine.low %v2260_v32, %v2260_v32 }
 0x1cf   : > { %v562_v42 = vsel %vm522_vm0, %v514_v34, %v515_v45  ;;  %6107 = vmatprep.subr.msk.bf16.mxu1 %vm522_vm0, %v6055_v62  ;;  %v3897_v55 = vsel %vm522_vm0, %v6054_v22, 0 }
 0x1d0   : > { %v564_v31 = vsel %vm522_vm0, %v515_v45, %v516_v30  ;;  %6109 = vmatprep.subr.msk.bf16.mxu0 %vm522_vm0, %v6057_v54  ;;  %v563_v9 = vsel %vm524_vm2, %v7765_v39, %v562_v42  ;;  %v726_v48 = vpop.permute.xlu0 %725  ;;  %v3903_v0 = vsel %vm522_vm0, %v6056_v10, 0  ;;  %4693 = vmatpush1.bf16.msra.mxu1 %v3897_v55 }
 0x1d1   : > { %v565_v16 = vsel %vm524_vm2, %v482_v11, %v564_v31  ;;  %v969_v51 = vpop.permute.xlu1 %968  ;;  %v759_v41 = vrot.slane %v726_v48, 4  ;;  %4736 = vmatpush1.bf16.msra.mxu0 %v3903_v0  ;;  %v5846_v28 = vcombine.low %v6331_v44, %v563_v9  ;;  %v5847_v20 = vcombine.high %v6331_v44, %v563_v9 }
 0x1d2   : > { %v1002_v34 = vrot.slane %v969_v51, 4  ;;  %v5848_v49 = vcombine.low %v6332_v2, %v565_v16  ;;  %v5849_v7 = vcombine.high %v6332_v2, %v565_v16 }
 0x1d3   : > { %v805_v35 = vsel %vm522_vm0, %v758_v46, %v759_v41  ;;  %4770 = vmatprep.subr.bf16.mxu1 %v5847_v20  ;;  %6108 = vmatmul.mubr.msk.bf16.vlgmr.msra.gmra.mrb[32].mxu1 %vm3789_vm7, %v7822_v4 }
 0x1d4   : > { %v1047_v39 = vsel %vm522_vm0, %v1001_v29, %v1002_v34  ;;  %v806_v32 = vsel %vm767_vm1, %v7817_v6, %v805_v35  ;;  %v7966_v45 = vpop.permute.xlu0 %727  ;;  %4813 = vmatprep.subr.bf16.mxu0 %v5849_v7  ;;  %4771 = vmatpush1.bf16.msra.mxu1 %v5846_v28 }
 0x1d5   : > { %v1048_v38 = vsel %vm767_vm1, %v7815_v57, %v1047_v39  ;;  %v7964_v11 = vpop.permute.xlu1 %970  ;;  %v760_v62 = vrot.slane %v7966_v45, 4  ;;  %6110 = vmatmul.mubr.msk.bf16.vlgmr.msra.gmra.mrb[36].mxu0 %vm3789_vm7, %v7822_v4  ;;  %4802 = vmatprep.mubr.bf16.mxu1 %v8755_v13 }
 0x1d6   : > { %v1003_v29 = vrot.slane %v7964_v11, 4  ;;  %v5899_v57 = vcombine.low %v806_v32, %v1048_v38  ;;  %v5900_v46 = vcombine.high %v806_v32, %v1048_v38  ;;  %4814 = vmatpush1.bf16.msra.mxu0 %v5848_v49  ;;  %4845 = vmatprep.mubr.bf16.mxu0 %v8755_v13 }
 0x1d7   : > { %v807_v54 = vsel %vm522_vm0, %v759_v41, %v760_v62 }
 0x1d8   : > { %v1049_v6 = vsel %vm522_vm0, %v1002_v34, %v1003_v29  ;;  %4772 = vmatprep.subr.bf16.mxu1 %v5900_v46  ;;  %v808_v10 = vsel %vm767_vm1, %v726_v48, %v807_v54  ;;  %v1211_v31 = vpop.permute.xlu0 %1210 }
 0x1d9   : > { %v1050_v22 = vsel %vm767_vm1, %v969_v51, %v1049_v6  ;;  %v1454_v42 = vpop.permute.xlu1 %1453  ;;  %v1244_v16 = vrot.slane %v1211_v31, 4  ;;  %4773 = vmatpush1.bf16.msra.mxu1 %v5899_v57 }
 0x1da   : > { %v1487_v9 = vrot.slane %v1454_v42, 4  ;;  %v5901_v55 = vcombine.low %v808_v10, %v1050_v22  ;;  %v5902_v0 = vcombine.high %v808_v10, %v1050_v22 }
 0x1db   : > { %v1290_v41 = vsel %vm522_vm0, %v1243_v58, %v1244_v16 }
 0x1dc   : > { %v1533_v34 = vsel %vm522_vm0, %v1486_v14, %v1487_v9  ;;  %4815 = vmatprep.subr.bf16.mxu0 %v5902_v0  ;;  %v1291_v48 = vsel %vm1252_vm3, %v7862_v37, %v1290_v41  ;;  %v7996_v28 = vpop.permute.xlu0 %1212 }
 0x1dd   : > { %v1534_v51 = vsel %vm1495_vm4, %v7860_v40, %v1533_v34  ;;  %v7994_v44 = vpop.permute.xlu1 %1455  ;;  %4816 = vmatpush1.bf16.msra.mxu0 %v5901_v55  ;;  %v1245_v14 = vrot.slane %v7996_v28, 4 }
 0x1de   : > { %v1488_v20 = vrot.slane %v7994_v44, 4  ;;  %v5952_v2 = vcombine.low %v1291_v48, %v1534_v51  ;;  %v5953_v49 = vcombine.high %v1291_v48, %v1534_v51 }
 0x1df   : > { %v1292_v40 = vsel %vm522_vm0, %v1244_v16, %v1245_v14 }
 0x1e0   : > { %v1535_v58 = vsel %vm522_vm0, %v1487_v9, %v1488_v20  ;;  %4774 = vmatprep.subr.bf16.mxu1 %v5953_v49  ;;  %v1293_v7 = vsel %vm1252_vm3, %v1211_v31, %v1292_v40  ;;  %v1697_v35 = vpop.permute.xlu0 %1696 }
 0x1e1   : > { %v1536_v37 = vsel %vm1495_vm4, %v1454_v42, %v1535_v58  ;;  %v1939_v39 = vpop.permute.xlu1 %1938  ;;  %4775 = vmatpush1.bf16.msra.mxu1 %v5952_v2  ;;  %v1730_v32 = vrot.slane %v1697_v35, 4 }
 0x1e2   : > { %v1972_v38 = vrot.slane %v1939_v39, 4  ;;  %v5954_v57 = vcombine.low %v1293_v7, %v1536_v37  ;;  %v5955_v46 = vcombine.high %v1293_v7, %v1536_v37 }
 0x1e3   : > { %v1775_v54 = vsel %vm522_vm0, %v1729_v59, %v1730_v32 }
 0x1e4   : > { %v2018_v6 = vsel %vm522_vm0, %v1971_v27, %v1972_v38  ;;  %4817 = vmatprep.subr.bf16.mxu0 %v5955_v46  ;;  %v1776_v10 = vsel %vm1495_vm4, %v7890_v1, %v1775_v54  ;;  %v8020_v31 = vpop.permute.xlu0 %1698 }
 0x1e5   : > { %v2019_v22 = vsel %vm1980_vm5, %v7888_v63, %v2018_v6  ;;  %v8018_v42 = vpop.permute.xlu1 %1940  ;;  %4818 = vmatpush1.bf16.msra.mxu0 %v5954_v57  ;;  %v1731_v27 = vrot.slane %v8020_v31, 4 }
 0x1e6   : > { %v1973_v9 = vrot.slane %v8018_v42, 4  ;;  %v6005_v16 = vcombine.low %v1776_v10, %v2019_v22  ;;  %v6006_v55 = vcombine.high %v1776_v10, %v2019_v22 }
 0x1e7   : > { %v1777_v63 = vsel %vm522_vm0, %v1730_v32, %v1731_v27  ;;  %v8030_v1 = vpop.f32.mrb[8].mxu1 }
 0x1e8   : > { %v2020_v59 = vsel %vm522_vm0, %v1972_v38, %v1973_v9  ;;  %4776 = vmatprep.subr.bf16.mxu1 %v6006_v55  ;;  %v1778_v34 = vsel %vm1495_vm4, %v1697_v35, %v1777_v63  ;;  %v2182_v51 = vpop.permute.xlu0 %2181  ;;  %v8037_v40 = vpop.f32.mrb[9].mxu1 }
 0x1e9   : > { %v2021_v0 = vsel %vm1980_vm5, %v1939_v39, %v2020_v59  ;;  %v8034_v41 = vpop.permute.xlu1 %2183  ;;  %4777 = vmatpush1.bf16.msra.mxu1 %v6005_v16  ;;  %v2215_v2 = vrot.slane %v2182_v51, 4  ;;  %v8039_v37 = vpop.f32.mrb[12].mxu0 }
 0x1ea   : > { %v8749_v48 = vrot.slane %v8034_v41, 4  ;;  %v6007_v49 = vcombine.low %v1778_v34, %v2021_v0  ;;  %v6008_v58 = vcombine.high %v1778_v34, %v2021_v0  ;;  %v8041_v7 = vpop.f32.mrb[10].mxu1  ;;  %v8043_v38 = vpop.f32.mrb[13].mxu0 }
 0x1eb   : > { %v2261_v39 = vsel %vm522_vm0, %v2214_v12, %v2215_v2  ;;  %v8051_v32 = vpop.f32.mrb[11].mxu1  ;;  %v8053_v57 = vpop.f32.mrb[14].mxu0 }
 0x1ec   : > { %v2263_v35 = vsel %vm522_vm0, %v2215_v2, %v8749_v48  ;;  %4819 = vmatprep.subr.bf16.mxu0 %v6008_v58  ;;  %v2262_v46 = vsel %vm2223_vm6, %v7912_v26, %v2261_v39  ;;  %v486_v22 = vpop.permute.xlu0 %485  ;;  %v8061_v59 = vpop.f32.mrb[15].mxu0 }
 0x1ed   : > { %v2264_v6 = vsel %vm2223_vm6, %v2182_v51, %v2263_v35  ;;  %v8058_v54 = vpop.permute.xlu1 %487  ;;  %4820 = vmatpush1.bf16.msra.mxu0 %v6007_v49  ;;  %v517_v10 = vrot.slane %v486_v22, 4  ;;  %v6059_v16 = vcombine.high %v2262_v46, %v2262_v46  ;;  %v6058_v63 = vcombine.low %v2262_v46, %v2262_v46 }
 0x1ee   : > { %v8748_v12 = vrot.slane %v8058_v54, 4  ;;  %v6061_v55 = vcombine.high %v2264_v6, %v2264_v6  ;;  %v6060_v0 = vcombine.low %v2264_v6, %v2264_v6  ;;  %v6333_v6 = vld [vmem:[#allocation3 + $0xa8] sm:$0xff] }
 0x1ef   : > { %v566_v34 = vsel %vm522_vm0, %v516_v30, %v517_v10  ;;  %6111 = vmatprep.subr.msk.bf16.mxu1 %vm522_vm0, %v6059_v16  ;;  %v3909_v39 = vsel %vm522_vm0, %v6058_v63, 0 }
 0x1f0   : > { %v568_v26 = vsel %vm522_vm0, %v517_v10, %v8748_v12  ;;  %6113 = vmatprep.subr.msk.bf16.mxu0 %vm522_vm0, %v6061_v55  ;;  %v567_v51 = vsel %vm524_vm2, %v7936_v18, %v566_v34  ;;  %v730_v58 = vpop.permute.xlu0 %729  ;;  %v3915_v35 = vsel %vm522_vm0, %v6060_v0, 0  ;;  %4779 = vmatpush1.bf16.msra.mxu1 %v3909_v39  ;;  %v6334_v12 = vld [vmem:[#allocation3 + $0xb0] sm:$0xff] }
 0x1f1   : > { %v569_v2 = vsel %vm524_vm2, %v486_v22, %v568_v26  ;;  %v973_v49 = vpop.permute.xlu1 %972  ;;  %v761_v46 = vrot.slane %v730_v58, 4  ;;  %4822 = vmatpush1.bf16.msra.mxu0 %v3915_v35  ;;  %v5850_v10 = vcombine.low %v6333_v6, %v567_v51  ;;  %v5851_v16 = vcombine.high %v6333_v6, %v567_v51 }
 0x1f2   : > { %v1004_v30 = vrot.slane %v973_v49, 4  ;;  %v5852_v55 = vcombine.low %v6334_v12, %v569_v2  ;;  %v5853_v48 = vcombine.high %v6334_v12, %v569_v2 }
 0x1f3   : > { %v809_v22 = vsel %vm522_vm0, %v760_v62, %v761_v46  ;;  %4856 = vmatprep.subr.bf16.mxu1 %v5851_v16  ;;  %6112 = vmatmul.mubr.msk.bf16.vlgmr.msra.gmra.mrb[36].mxu1 %vm3789_vm7, %v7822_v4 }
 0x1f4   : > { %v1051_v18 = vsel %vm522_vm0, %v1003_v29, %v1004_v30  ;;  %v810_v0 = vsel %vm767_vm1, %v7966_v45, %v809_v22  ;;  %v8088_v26 = vpop.permute.xlu0 %731  ;;  %4899 = vmatprep.subr.bf16.mxu0 %v5853_v48  ;;  %4857 = vmatpush1.bf16.msra.mxu1 %v5850_v10 }
 0x1f5   : > { %v1052_v63 = vsel %vm767_vm1, %v7964_v11, %v1051_v18  ;;  %v8086_v34 = vpop.permute.xlu1 %974  ;;  %v8757_v12 = vrot.slane %v8088_v26, 4  ;;  %6114 = vmatmul.mubr.msk.bf16.vlgmr.msra.gmra.mrb[40].mxu0 %vm3789_vm7, %v7822_v4  ;;  %4888 = vmatprep.mubr.bf16.mxu1 %v8755_v13 }
 0x1f6   : > { %v8759_v29 = vrot.slane %v8086_v34, 4  ;;  %v5903_v11 = vcombine.low %v810_v0, %v1052_v63  ;;  %v5904_v62 = vcombine.high %v810_v0, %v1052_v63  ;;  %4900 = vmatpush1.bf16.msra.mxu0 %v5852_v55  ;;  %4931 = vmatprep.mubr.bf16.mxu0 %v8755_v13 }
 0x1f7   : > { %v811_v48 = vsel %vm522_vm0, %v761_v46, %v8757_v12 }
 0x1f8   : > { %v1053_v45 = vsel %vm522_vm0, %v1004_v30, %v8759_v29  ;;  %4858 = vmatprep.subr.bf16.mxu1 %v5904_v62  ;;  %v812_v2 = vsel %vm767_vm1, %v730_v58, %v811_v48  ;;  %v1215_v35 = vpop.permute.xlu0 %1214  ;;  %v6336_v29 = vld [vmem:[#allocation3 + $0xc0] sm:$0xff] }
 0x1f9   : > { %v1054_v51 = vsel %vm767_vm1, %v973_v49, %v1053_v45  ;;  %v1458_v39 = vpop.permute.xlu1 %1457  ;;  %v1246_v10 = vrot.slane %v1215_v35, 4  ;;  %4859 = vmatpush1.bf16.msra.mxu1 %v5903_v11 }
 0x1fa   : > { %v1489_v6 = vrot.slane %v1458_v39, 4  ;;  %v5905_v16 = vcombine.low %v812_v2, %v1054_v51  ;;  %v5906_v55 = vcombine.high %v812_v2, %v1054_v51 }
 0x1fb   : > { %v1294_v46 = vsel %vm522_vm0, %v1245_v14, %v1246_v10 }
 0x1fc   : > { %v1537_v30 = vsel %vm522_vm0, %v1488_v20, %v1489_v6  ;;  %4901 = vmatprep.subr.bf16.mxu0 %v5906_v55  ;;  %v1295_v58 = vsel %vm1252_vm3, %v7996_v28, %v1294_v46  ;;  %v8118_v22 = vpop.permute.xlu0 %1216 }
 0x1fd   : > { %v1538_v49 = vsel %vm1495_vm4, %v7994_v44, %v1537_v30  ;;  %v8116_v18 = vpop.permute.xlu1 %1459  ;;  %4902 = vmatpush1.bf16.msra.mxu0 %v5905_v16  ;;  %v8752_v20 = vrot.slane %v8118_v22, 4 }
 0x1fe   : > { %v8754_v63 = vrot.slane %v8116_v18, 4  ;;  %v5956_v0 = vcombine.low %v1295_v58, %v1538_v49  ;;  %v5957_v11 = vcombine.high %v1295_v58, %v1538_v49 }
 0x1ff   : > { %v1296_v44 = vsel %vm522_vm0, %v1246_v10, %v8752_v20 }
 0x200   : > { %v1539_v14 = vsel %vm522_vm0, %v1489_v6, %v8754_v63  ;;  %4860 = vmatprep.subr.bf16.mxu1 %v5957_v11  ;;  %v1297_v62 = vsel %vm1252_vm3, %v1215_v35, %v1296_v44  ;;  %v1701_v48 = vpop.permute.xlu0 %1700  ;;  %v8770_v63 = vrot.slane %v8058_v54, 4 }
 0x201   : > { %v1540_v28 = vsel %vm1495_vm4, %v1458_v39, %v1539_v14  ;;  %v1943_v45 = vpop.permute.xlu1 %1942  ;;  %4861 = vmatpush1.bf16.msra.mxu1 %v5956_v0  ;;  %v1732_v2 = vrot.slane %v1701_v48, 4 }
 0x202   : > { %v1974_v51 = vrot.slane %v1943_v45, 4  ;;  %v5958_v16 = vcombine.low %v1297_v62, %v1540_v28  ;;  %v5959_v55 = vcombine.high %v1297_v62, %v1540_v28 }
 0x203   : > { %v1779_v10 = vsel %vm522_vm0, %v1731_v27, %v1732_v2 }
 0x204   : > { %v2022_v6 = vsel %vm522_vm0, %v1973_v9, %v1974_v51  ;;  %4903 = vmatprep.subr.bf16.mxu0 %v5959_v55  ;;  %v1780_v35 = vsel %vm1495_vm4, %v8020_v31, %v1779_v10  ;;  %v8142_v46 = vpop.permute.xlu0 %1702 }
 0x205   : > { %v2023_v39 = vsel %vm1980_vm5, %v8018_v42, %v2022_v6  ;;  %v8140_v30 = vpop.permute.xlu1 %1944  ;;  %4904 = vmatpush1.bf16.msra.mxu0 %v5958_v16  ;;  %v8750_v9 = vrot.slane %v8142_v46, 4 }
 0x206   : > { %v8751_v49 = vrot.slane %v8140_v30, 4  ;;  %v6009_v58 = vcombine.low %v1780_v35, %v2023_v39  ;;  %v6010_v0 = vcombine.high %v1780_v35, %v2023_v39 }
 0x207   : > { %v1781_v42 = vsel %vm522_vm0, %v1732_v2, %v8750_v9 }
 0x208   : > { %v2024_v27 = vsel %vm522_vm0, %v1974_v51, %v8751_v49  ;;  %4862 = vmatprep.subr.bf16.mxu1 %v6010_v0  ;;  %v8152_v31 = vpop.f32.mrb[12].mxu1  ;;  %v1782_v14 = vsel %vm1495_vm4, %v1701_v48, %v1781_v42  ;;  %v2186_v28 = vpop.permute.xlu0 %2185 }
 0x209   : > { %v2025_v11 = vsel %vm1980_vm5, %v1943_v45, %v2024_v27  ;;  %v8156_v44 = vpop.permute.xlu1 %2187  ;;  %4863 = vmatpush1.bf16.msra.mxu1 %v6009_v58  ;;  %v2217_v16 = vrot.slane %v2186_v28, 4  ;;  %v8159_v6 = vpop.f32.mrb[13].mxu1  ;;  %v8768_v45 = vrot.slane %v8034_v41, 4 }
 0x20a   : > { %v8753_v62 = vrot.slane %v8156_v44, 4  ;;  %v6011_v55 = vcombine.low %v1782_v14, %v2025_v11  ;;  %v6012_v51 = vcombine.high %v1782_v14, %v2025_v11  ;;  %v8161_v10 = vpop.f32.mrb[16].mxu0  ;;  %v8163_v2 = vpop.f32.mrb[14].mxu1 }
 0x20b   : > { %v8165_v39 = vpop.f32.mrb[17].mxu0  ;;  %v2265_v48 = vsel %vm522_vm0, %v8768_v45, %v2217_v16  ;;  %v8173_v58 = vpop.f32.mrb[15].mxu1 }
 0x20c   : > { %v2267_v35 = vsel %vm522_vm0, %v2217_v16, %v8753_v62  ;;  %4905 = vmatprep.subr.bf16.mxu0 %v6012_v51  ;;  %v8175_v0 = vpop.f32.mrb[18].mxu0  ;;  %v2266_v27 = vsel %vm2223_vm6, %v8034_v41, %v2265_v48  ;;  %v490_v14 = vpop.permute.xlu0 %489 }
 0x20d   : > { %v2268_v42 = vsel %vm2223_vm6, %v2186_v28, %v2267_v35  ;;  %v8180_v11 = vpop.permute.xlu1 %491  ;;  %4906 = vmatpush1.bf16.msra.mxu0 %v6011_v55  ;;  %v519_v9 = vrot.slane %v490_v14, 4  ;;  %v6063_v49 = vcombine.high %v2266_v27, %v2266_v27  ;;  %v8183_v16 = vpop.f32.mrb[19].mxu0  ;;  %v6062_v51 = vcombine.low %v2266_v27, %v2266_v27 }
 0x20e   : > { %v8758_v45 = vrot.slane %v8180_v11, 4  ;;  %v6065_v20 = vcombine.high %v2268_v42, %v2268_v42  ;;  %8769 = vst [vmem:[#allocation5_spill] sm:$0xff] %v8183_v16  ;;  %v6064_v62 = vcombine.low %v2268_v42, %v2268_v42 }
 0x20f   : > { %v570_v13 = vsel %vm522_vm0, %v8770_v63, %v519_v9  ;;  %6115 = vmatprep.subr.msk.bf16.mxu1 %vm522_vm0, %v6063_v49  ;;  %v3921_v27 = vsel %vm522_vm0, %v6062_v51, 0 }
 0x210   : > { %v572_v41 = vsel %vm522_vm0, %v519_v9, %v8758_v45  ;;  %6117 = vmatprep.subr.msk.bf16.mxu0 %vm522_vm0, %v6065_v20  ;;  %v571_v28 = vsel %vm524_vm2, %v8058_v54, %v570_v13  ;;  %v734_v35 = vpop.permute.xlu0 %733  ;;  %v3927_v42 = vsel %vm522_vm0, %v6064_v62, 0  ;;  %4865 = vmatpush1.bf16.msra.mxu1 %v3921_v27  ;;  %v6335_v9 = vld [vmem:[#allocation3 + $0xb8] sm:$0xff]  ;;  %v8771_v13 = vrot.slane %v8086_v34, 4 }
 0x211   : > { %v573_v55 = vsel %vm524_vm2, %v490_v14, %v572_v41  ;;  %v977_v48 = vpop.permute.xlu1 %976  ;;  %v763_v12 = vrot.slane %v734_v35, 4  ;;  %4908 = vmatpush1.bf16.msra.mxu0 %v3927_v42  ;;  %v5854_v45 = vcombine.low %v6335_v9, %v571_v28  ;;  %v5855_v49 = vcombine.high %v6335_v9, %v571_v28 }
 0x212   : > { %v1006_v63 = vrot.slane %v977_v48, 4  ;;  %v5856_v20 = vcombine.low %v6336_v29, %v573_v55  ;;  %v5857_v16 = vcombine.high %v6336_v29, %v573_v55  ;;  %v8772_v14 = vrot.slane %v8088_v26, 4 }
 0x213   : > { %4942 = vmatprep.subr.bf16.mxu1 %v5855_v49  ;;  %6116 = vmatmul.mubr.msk.bf16.vlgmr.msra.gmra.mrb[40].mxu1 %vm3789_vm7, %v7822_v4 }
 0x214   : > { %v1055_v54 = vsel %vm522_vm0, %v8771_v13, %v1006_v63  ;;  %v813_v51 = vsel %vm522_vm0, %v8772_v14, %v763_v12  ;;  %v8210_v28 = vpop.permute.xlu0 %735  ;;  %4985 = vmatprep.subr.bf16.mxu0 %v5857_v16  ;;  %4943 = vmatpush1.bf16.msra.mxu1 %v5854_v45 }
 0x215   : > { %v1056_v62 = vsel %vm767_vm1, %v8086_v34, %v1055_v54  ;;  %v814_v41 = vsel %vm767_vm1, %v8088_v26, %v813_v51  ;;  %v8208_v27 = vpop.permute.xlu1 %978  ;;  %v8765_v55 = vrot.slane %v8210_v28, 4  ;;  %6118 = vmatmul.mubr.msk.bf16.vlgmr.msra.gmra.mrb[44].mxu0 %vm3789_vm7, %v7822_v4  ;;  %v8773_v26 = vmov 0  }
 0x216   : > { %v8760_v29 = vrot.slane %v8208_v27, 4  ;;  %v5907_v34 = vcombine.low %v814_v41, %v1056_v62  ;;  %v5908_v42 = vcombine.high %v814_v41, %v1056_v62  ;;  %4986 = vmatpush1.bf16.msra.mxu0 %v5856_v20  ;;  %4974 = vmatprep.mubr.bf16.mxu1 %v8773_v26 }
 0x217   : > { %v815_v9 = vsel %vm522_vm0, %v763_v12, %v8765_v55  ;;  %5017 = vmatprep.mubr.bf16.mxu0 %v8773_v26  ;;  %v8775_v12 = vrot.slane %v8118_v22, 4 }
 0x218   : > { %v1057_v16 = vsel %vm522_vm0, %v1006_v63, %v8760_v29  ;;  %4944 = vmatprep.subr.bf16.mxu1 %v5908_v42  ;;  %v816_v4 = vsel %vm767_vm1, %v734_v35, %v815_v9  ;;  %v1219_v13 = vpop.permute.xlu0 %1218  ;;  %v8774_v63 = vrot.slane %v8116_v18, 4 }
 0x219   : > { %v1058_v45 = vsel %vm767_vm1, %v977_v48, %v1057_v16  ;;  %v1462_v49 = vpop.permute.xlu1 %1461  ;;  %v1248_v54 = vrot.slane %v1219_v13, 4  ;;  %4945 = vmatpush1.bf16.msra.mxu1 %v5907_v34 }
 0x21a   : > { %v1491_v20 = vrot.slane %v1462_v49, 4  ;;  %v5909_v14 = vcombine.low %v816_v4, %v1058_v45  ;;  %v5910_v51 = vcombine.high %v816_v4, %v1058_v45 }
 0x21b   : > { %v1298_v41 = vsel %vm522_vm0, %v8775_v12, %v1248_v54 }
 0x21c   : > { %v1541_v62 = vsel %vm522_vm0, %v8774_v63, %v1491_v20  ;;  %4987 = vmatprep.subr.bf16.mxu0 %v5910_v51  ;;  %v1299_v35 = vsel %vm1252_vm3, %v8118_v22, %v1298_v41  ;;  %v8240_v34 = vpop.permute.xlu0 %1220 }
 0x21d   : > { %v1542_v48 = vsel %vm1495_vm4, %v8116_v18, %v1541_v62  ;;  %v8238_v42 = vpop.permute.xlu1 %1463  ;;  %4988 = vmatpush1.bf16.msra.mxu0 %v5909_v14  ;;  %v8763_v9 = vrot.slane %v8240_v34, 4 }
 0x21e   : > { %v8761_v16 = vrot.slane %v8238_v42, 4  ;;  %v5960_v45 = vcombine.low %v1299_v35, %v1542_v48  ;;  %v5961_v4 = vcombine.high %v1299_v35, %v1542_v48  ;;  %v8776_v35 = vrot.slane %v8140_v30, 4 }
 0x21f   : > { %v1300_v18 = vsel %vm522_vm0, %v1248_v54, %v8763_v9 }
 0x220   : > { %v1543_v51 = vsel %vm522_vm0, %v1491_v20, %v8761_v16  ;;  %4946 = vmatprep.subr.bf16.mxu1 %v5961_v4  ;;  %v1301_v63 = vsel %vm1252_vm3, %v1219_v13, %v1300_v18  ;;  %v1705_v62 = vpop.permute.xlu0 %1704  ;;  %v8777_v16 = vrot.slane %v8142_v46, 4 }
 0x221   : > { %v1544_v22 = vsel %vm1495_vm4, %v1462_v49, %v1543_v51  ;;  %v1947_v14 = vpop.permute.xlu1 %1946  ;;  %4947 = vmatpush1.bf16.msra.mxu1 %v5960_v45  ;;  %v1734_v41 = vrot.slane %v1705_v62, 4 }
 0x222   : > { %v1976_v12 = vrot.slane %v1947_v14, 4  ;;  %v5962_v29 = vcombine.low %v1301_v63, %v1544_v22  ;;  %v5963_v48 = vcombine.high %v1301_v63, %v1544_v22 }
 0x223   : > { %v1783_v54 = vsel %vm522_vm0, %v8777_v16, %v1734_v41 }
 0x224   : > { %v2026_v20 = vsel %vm522_vm0, %v8776_v35, %v1976_v12  ;;  %4989 = vmatprep.subr.bf16.mxu0 %v5963_v48  ;;  %v1784_v13 = vsel %vm1495_vm4, %v8142_v46, %v1783_v54  ;;  %v8264_v4 = vpop.permute.xlu0 %1706 }
 0x225   : > { %v2027_v49 = vsel %vm1980_vm5, %v8140_v30, %v2026_v20  ;;  %v8262_v45 = vpop.permute.xlu1 %1948  ;;  %4990 = vmatpush1.bf16.msra.mxu0 %v5962_v29  ;;  %v8764_v18 = vrot.slane %v8264_v4, 4 }
 0x226   : > { %v8762_v51 = vrot.slane %v8262_v45, 4  ;;  %v6013_v22 = vcombine.low %v1784_v13, %v2027_v49  ;;  %v6014_v63 = vcombine.high %v1784_v13, %v2027_v49 }
 0x227   : > { %v1785_v30 = vsel %vm522_vm0, %v1734_v41, %v8764_v18  ;;  %v8274_v46 = vpop.f32.mrb[16].mxu1 }
 0x228   : > { %v2028_v16 = vsel %vm522_vm0, %v1976_v12, %v8762_v51  ;;  %4948 = vmatprep.subr.bf16.mxu1 %v6014_v63  ;;  %v1786_v29 = vsel %vm1495_vm4, %v1705_v62, %v1785_v30  ;;  %v2190_v20 = vpop.permute.xlu0 %2189  ;;  %v8281_v51 = vpop.f32.mrb[17].mxu1 }
 0x229   : > { %v2029_v48 = vsel %vm1980_vm5, %v1947_v14, %v2028_v16  ;;  %v8278_v35 = vpop.permute.xlu1 %2191  ;;  %4949 = vmatpush1.bf16.msra.mxu1 %v6013_v22  ;;  %v2219_v49 = vrot.slane %v2190_v20, 4  ;;  %8778 = vst [vmem:[#allocation6_spill] sm:$0xff] %v8281_v51  ;;  %v8283_v9 = vpop.f32.mrb[20].mxu0  ;;  %v8782_v14 = vrot.slane %v8156_v44, 4 }
 0x22a   : > { %v8766_v54 = vrot.slane %v8278_v35, 4  ;;  %v6015_v13 = vcombine.low %v1786_v29, %v2029_v48  ;;  %v6016_v12 = vcombine.high %v1786_v29, %v2029_v48  ;;  %8779 = vst [vmem:[#allocation7_spill] sm:$0xff] %v8283_v9  ;;  %v8285_v41 = vpop.f32.mrb[18].mxu1  ;;  %v8287_v63 = vpop.f32.mrb[21].mxu0 }
 0x22b   : > { %8780 = vst [vmem:[#allocation8_spill] sm:$0xff] %v8285_v41  ;;  %8781 = vst [vmem:[#allocation9_spill] sm:$0xff] %v8287_v63  ;;  %v2269_v62 = vsel %vm522_vm0, %v8782_v14, %v2219_v49  ;;  %v8295_v16 = vpop.f32.mrb[19].mxu1  ;;  %v8297_v30 = vpop.f32.mrb[22].mxu0 }
 0x22c   : > { %v2271_v22 = vsel %vm522_vm0, %v2219_v49, %v8766_v54  ;;  %4991 = vmatprep.subr.bf16.mxu0 %v6016_v12  ;;  %8783 = vst [vmem:[#allocation10_spill] sm:$0xff] %v8295_v16  ;;  %8784 = vst [vmem:[#allocation11_spill] sm:$0xff] %v8297_v30  ;;  %v2270_v48 = vsel %vm2223_vm6, %v8156_v44, %v2269_v62  ;;  %v494_v55 = vpop.permute.xlu0 %493  ;;  %v8302_v51 = vpop.f32.mrb[23].mxu0  ;;  %v8785_v54 = vrot.slane %v8210_v28, 4  ;;  %v8786_v44 = vrot.slane %v8180_v11, 4 }
 0x22d   : > { %v2272_v29 = vsel %vm2223_vm6, %v2190_v20, %v2271_v22  ;;  %v738_v18 = vpop.permute.xlu1 %737  ;;  %4992 = vmatpush1.bf16.msra.mxu0 %v6015_v13  ;;  %v521_v41 = vrot.slane %v494_v55, 4  ;;  %v6067_v14 = vcombine.high %v2270_v48, %v2270_v48  ;;  %v6066_v49 = vcombine.low %v2270_v48, %v2270_v48 }
 0x22e   : > { %v765_v63 = vrot.slane %v738_v18, 4  ;;  %v6069_v9 = vcombine.high %v2272_v29, %v2272_v29  ;;  %v6068_v12 = vcombine.low %v2272_v29, %v2272_v29 }
 0x22f   : > { %v574_v20 = vsel %vm522_vm0, %v8786_v44, %v521_v41  ;;  %v576_v13 = vsel %vm524_vm2, %v494_v55, %v521_v41  ;;  %6119 = vmatprep.subr.msk.bf16.mxu1 %vm522_vm0, %v6067_v14  ;;  %v6337_v41 = vld [vmem:[#allocation3 + $0xc8] sm:$0xff] }
 0x230   : > { %v817_v30 = vsel %vm522_vm0, %v8785_v54, %v765_v63  ;;  %v819_v16 = vsel %vm767_vm1, %v738_v18, %v765_v63  ;;  %v575_v22 = vsel %vm524_vm2, %v8180_v11, %v574_v20  ;;  %630 = vst [vmem:[#allocation3 + $0x1a4] sm:$0xf] %v576_v13  ;;  %v981_v54 = vpop.permute.xlu0 %980  ;;  %6121 = vmatprep.subr.msk.bf16.mxu0 %vm522_vm0, %v6069_v9  ;;  %v3933_v18 = vsel %vm522_vm0, %v6066_v49, 0 }
 0x231   : > { %v818_v62 = vsel %vm767_vm1, %v8210_v28, %v817_v30  ;;  %873 = vst [vmem:[#allocation3 + $0x278] sm:$0xf] %v819_v16  ;;  %v1223_v48 = vpop.permute.xlu1 %1222  ;;  %v3939_v63 = vsel %vm522_vm0, %v6068_v12, 0  ;;  %v1008_v55 = vrot.slane %v981_v54, 4  ;;  %4951 = vmatpush1.bf16.msra.mxu1 %v3933_v18  ;;  %v5858_v14 = vcombine.low %v6337_v41, %v575_v22 }
 0x232   : > { %v1250_v29 = vrot.slane %v1223_v48, 4  ;;  %4994 = vmatpush1.bf16.msra.mxu0 %v3939_v63  ;;  %v5859_v28 = vcombine.high %v6337_v41, %v575_v22  ;;  %v6370_v16 = vmov 0.0   ;;  %v8787_v11 = vrot.slane %v8240_v34, 4 }
 0x233   : > { %6248 = vmatprep.subr.bf16.mxu0 %v6370_v16  ;;  %v8788_v49 = vrot.slane %v8208_v27, 4  ;;  %v1061_v44 = vsel %vm767_vm1, %v981_v54, %v1008_v55 }
 0x234   : > { %v1302_v30 = vsel %vm522_vm0, %v8787_v11, %v1250_v29  ;;  %v1304_v9 = vsel %vm1252_vm3, %v1223_v48, %v1250_v29  ;;  %5028 = vmatprep.subr.bf16.mxu1 %v5859_v28  ;;  %1115 = vst [vmem:[#allocation3 + $0x34c] sm:$0xf] %v1061_v44  ;;  %v1466_v18 = vpop.permute.xlu0 %1465  ;;  %v8336_v48 = vld [vmem:[%s8745_s2] sm:$0x3f]   ;;  %v8790_v28 = vrot.slane %v8238_v42, 4 }
 0x235   : > { %v1059_v12 = vsel %vm522_vm0, %v8788_v49, %v1008_v55  ;;  %v1303_v20 = vsel %vm1252_vm3, %v8240_v34, %v1302_v30  ;;  %1358 = vst [vmem:[#allocation3 + $0x420] sm:$0xf] %v1304_v9  ;;  %v1709_v22 = vpop.permute.xlu1 %1708  ;;  %6120 = vmatmul.mubr.msk.bf16.vlgmr.msra.gmra.mrb[44].mxu1 %vm3789_vm7, %v8336_v48  ;;  %6122 = vmatmul.mubr.msk.bf16.vlgmr.msra.gmra.mrb[48].mxu0 %vm3789_vm7, %v8336_v48  ;;  %v1493_v34 = vrot.slane %v1466_v18, 4 }
 0x236   : > { %v1060_v13 = vsel %vm767_vm1, %v8208_v27, %v1059_v12  ;;  %v1736_v54 = vrot.slane %v1709_v22, 4  ;;  %5029 = vmatpush1.bf16.msra.mxu1 %v5858_v14  ;;  %5060 = vmatprep.mubr.bf16.mxu1 %v8773_v26  ;;  %v8789_v27 = vrot.slane %v8264_v4, 4 }
 0x237   : > { %v5911_v63 = vcombine.low %v818_v62, %v1060_v13  ;;  %v5912_v29 = vcombine.high %v818_v62, %v1060_v13  ;;  %6258 = vmatprep.mubr.msk.bf16.mxu0 %vm6371_vm8, %v6370_v16  ;;  %v1545_v11 = vsel %vm522_vm0, %v8790_v28, %v1493_v34  ;;  %v1547_v30 = vsel %vm1495_vm4, %v1466_v18, %v1493_v34  ;;  %v6299_v14 = vld [vmem:[#allocation3 + $0xd0] ss:$212 sps:$4 sm:$0xff]  }
 0x238   : > { %v1787_v55 = vsel %vm522_vm0, %v8789_v27, %v1736_v54  ;;  %v1789_v41 = vsel %vm1495_vm4, %v1709_v22, %v1736_v54  ;;  %v1546_v62 = vsel %vm1495_vm4, %v8238_v42, %v1545_v11  ;;  %1601 = vst [vmem:[#allocation3 + $0x4f4] sm:$0xf] %v1547_v30  ;;  %v1951_v49 = vpop.permute.xlu0 %1950  ;;  %6249 = vmatpush3.bf16.msra.mxu0 %v6299_v14  ;;  %v8791_v18 = vrot.slane %v8278_v35, 4 }
 0x239   : > { %5030 = vmatprep.subr.bf16.mxu1 %v5912_v29  ;;  %v1788_v26 = vsel %vm1495_vm4, %v8264_v4, %v1787_v55  ;;  %1843 = vst [vmem:[#allocation3 + $0x5c8] sm:$0xf] %v1789_v41  ;;  %v2194_v9 = vpop.permute.xlu1 %2193  ;;  %v1978_v44 = vrot.slane %v1951_v49, 4  ;;  %v5964_v13 = vcombine.low %v1303_v20, %v1546_v62  ;;  %v5965_v22 = vcombine.high %v1303_v20, %v1546_v62 }
 0x23a   : > { %v2221_v12 = vrot.slane %v2194_v9, 4  ;;  %5031 = vmatpush1.bf16.msra.mxu1 %v5911_v63  ;;  %6250 = vmatprep.subr.bf16.mxu0 %v6370_v16  ;;  %v8792_v34 = vrot.slane %v8262_v45, 4 }
 0x23b   : > { %v2032_v29 = vsel %vm1980_vm5, %v1951_v49, %v1978_v44  ;;  %v6300_v27 = vld [vmem:[#allocation3 + $0x278] ss:$212 sps:$4 sm:$0xff]   ;;  %5032 = vmatprep.subr.bf16.mxu1 %v5965_v22 }
 0x23c   : > { %v2273_v54 = vsel %vm522_vm0, %v8791_v18, %v2221_v12  ;;  %v2275_v4 = vsel %vm2223_vm6, %v2194_v9, %v2221_v12  ;;  %v2030_v42 = vsel %vm522_vm0, %v8792_v34, %v1978_v44  ;;  %2086 = vst [vmem:[#allocation3 + $0x69c] sm:$0xf] %v2032_v29  ;;  %6251 = vmatpush3.bf16.msra.mxu0 %v6300_v27 }
 0x23d   : > { %v2274_v63 = vsel %vm2223_vm6, %v8278_v35, %v2273_v54  ;;  %2329 = vst [vmem:[#allocation3 + $0x770] sm:$0xf] %v2275_v4  ;;  %v2031_v20 = vsel %vm1980_vm5, %v8262_v45, %v2030_v42  ;;  %6252 = vmatprep.subr.bf16.mxu0 %v6370_v16 }
 0x23e   : > { %5033 = vmatpush1.bf16.msra.mxu1 %v5964_v13  ;;  %v6017_v55 = vcombine.low %v1788_v26, %v2031_v20  ;;  %v6018_v41 = vcombine.high %v1788_v26, %v2031_v20  ;;  %v6071_v11 = vcombine.high %v2274_v63, %v2274_v63  ;;  %v6070_v30 = vcombine.low %v2274_v63, %v2274_v63 }
 0x23f   : > { %v6301_v28 = vld [vmem:[#allocation3 + $0x420] ss:$212 sps:$4 sm:$0xff]  }
 0x240   : > { %5034 = vmatprep.subr.bf16.mxu1 %v6018_v41  ;;  %6253 = vmatpush3.bf16.msra.mxu0 %v6301_v28  ;;  %v3945_v45 = vsel %vm522_vm0, %v6070_v30, 0 }
 0x241   : > { %6254 = vmatprep.subr.bf16.mxu0 %v6370_v16 }
 0x242   : > { %5035 = vmatpush1.bf16.msra.mxu1 %v6017_v55 }
 0x243   : > { %6123 = vmatprep.subr.msk.bf16.mxu1 %vm522_vm0, %v6071_v11  ;;  %v6302_v35 = vld [vmem:[#allocation3 + $0x5c8] ss:$212 sps:$4 sm:$0xff]  }
 0x244   : > { %v6303_v14 = vld [vmem:[#allocation3 + $0x770] ss:$0 sps:$4 sm:$0xff]   ;;  %6255 = vmatpush3.bf16.msra.mxu0 %v6302_v35 }
 0x245   : > { %6256 = vmatprep.subr.bf16.mxu0 %v6370_v16  ;;  %v3951_v62 = vsel %vm522_vm0, %v6303_v14, 0 }
 0x246   : > { %5037 = vmatpush1.bf16.msra.mxu1 %v3945_v45 }
 0x247   : > { %v8375_v26 = vpop.f32.mrb[20].mxu1 }
 0x248   : > { %v8380_v9 = vpop.f32.mrb[21].mxu1  ;;  %v8382_v49 = vpop.f32.mrb[24].mxu0  ;;  %6257 = vmatpush3.bf16.msra.mxu0 %v3951_v62 }
 0x249   : > { %6124 = vmatmul.mubr.msk.bf16.vlgmr.msra.gmra.mrb[48].mxu1 %vm3789_vm7, %v8336_v48  ;;  %v8396_v18 = vpop.f32.mrb[22].mxu1  ;;  %v8398_v54 = vpop.f32.mrb[25].mxu0 }
 0x24a   : > { %v8384_v12 = vpop.permute.xlu1 %2584  ;;  %v8410_v42 = vpop.f32.mrb[26].mxu0 }
 0x24b   : > { %v3992_v16 = vadd.f32 %v7716_v53, %v8384_v12  ;;  %v3994_v44 = vadd.f32 %v7720_v17, %v8384_v12  ;;  %v4035_v13 = vadd.f32 %v7797_v60, %v8384_v12  ;;  %v4037_v22 = vadd.f32 %v7807_v21, %v8384_v12  ;;  %v8408_v60 = vpop.f32.mrb[23].mxu1  ;;  %v8416_v63 = vpop.permute.xlu0 %2579  ;;  %6259 = vmatmul.mubr.msk.bf16.vlgmr.msra.gmra.mrb[52].mxu0 %vm3789_vm7, %v8336_v48 }
 0x24c   : > { %v4078_v4 = vadd.f32 %v7809_v3, %v8384_v12  ;;  %v4080_v34 = vadd.f32 %v7830_v23, %v8384_v12  ;;  %v4121_v53 = vadd.f32 %v7919_v52, %v8384_v12  ;;  %v4123_v17 = vadd.f32 %v7929_v50, %v8384_v12  ;;  %v8420_v23 = vpop.f32.mrb[27].mxu0 }
 0x24d   : > { %v4164_v21 = vadd.f32 %v7931_v36, %v8384_v12  ;;  %v4166_v29 = vadd.f32 %v7939_v56, %v8384_v12  ;;  %v5165_v3 = vmax.f32 %v3992_v16, 0.0  ;;  %v5166_v27 = vmax.f32 %v3994_v44, 0.0 }
 0x24e   : > { %v5167_v52 = vmax.f32 %v4035_v13, 0.0  ;;  %v5168_v50 = vmax.f32 %v4037_v22, 0.0  ;;  %v5169_v20 = vmax.f32 %v4078_v4, 0.0  ;;  %v5170_v55 = vmax.f32 %v4080_v34, 0.0 }
 0x24f   : > { %v5171_v41 = vmax.f32 %v4121_v53, 0.0  ;;  %v5172_v28 = vmax.f32 %v4123_v17, 0.0  ;;  %v5173_v36 = vmax.f32 %v4164_v21, 0.0  ;;  %v5174_v11 = vmax.f32 %v4166_v29, 0.0 }
 0x250   : > { %v6214_v30 = vpack.c.bf16 %v5166_v27, %v5165_v3  ;;  %v6215_v56 = vpack.c.bf16 %v5168_v50, %v5167_v52  ;;  %v6216_v35 = vpack.c.bf16 %v5170_v55, %v5169_v20  ;;  %v3988_v45 = vadd.f32 %v7704_v19, %v8416_v63 }
 0x251   : > { %v6217_v14 = vpack.c.bf16 %v5172_v28, %v5171_v41  ;;  %v6218_v62 = vpack.c.bf16 %v5174_v11, %v5173_v36  ;;  %v3990_v48 = vadd.f32 %v7708_v15, %v8416_v63  ;;  %v4031_v16 = vadd.f32 %v7782_v24, %v8416_v63 }
 0x252   : > { %5565 = vst [vmem:[%s8429_s15 + $0xd4] sm:$0x33] %v6214_v30  ;;  %5566 = vst [vmem:[%s8429_s15 + $0xdc] sm:$0x33] %v6215_v56  ;;  %v4033_v19 = vadd.f32 %v7789_v61, %v8416_v63  ;;  %v4074_v44 = vadd.f32 %v7791_v5, %v8416_v63  ;;  %v4076_v15 = vadd.f32 %v7799_v8, %v8416_v63  ;;  %v5112_v4 = vmax.f32 %v3988_v45, 0.0 }
 0x253   : > { %5567 = vst [vmem:[%s8429_s15 + $0xe4] sm:$0x33] %v6216_v35  ;;  %v4117_v24 = vadd.f32 %v7908_v25, %v8416_v63  ;;  %5568 = vst [vmem:[%s8429_s15 + $0xec] sm:$0x33] %v6217_v14  ;;  %v4119_v13 = vadd.f32 %v7915_v47, %v8416_v63  ;;  %v4160_v22 = vadd.f32 %v7917_v43, %v8416_v63  ;;  %v5113_v34 = vmax.f32 %v3990_v48, 0.0 }
 0x254   : > { %5569 = vst [vmem:[%s8429_s15 + $0xf4] sm:$0x33] %v6218_v62  ;;  %v4162_v61 = vadd.f32 %v7921_v33, %v8416_v63  ;;  %v5114_v5 = vmax.f32 %v4031_v16, 0.0  ;;  %v5115_v53 = vmax.f32 %v4033_v19, 0.0  ;;  %v5116_v8 = vmax.f32 %v4074_v44, 0.0 }
 0x255   : > { %v5117_v17 = vmax.f32 %v4076_v15, 0.0  ;;  %v5118_v25 = vmax.f32 %v4117_v24, 0.0  ;;  %v5119_v21 = vmax.f32 %v4119_v13, 0.0  ;;  %v5120_v29 = vmax.f32 %v4160_v22, 0.0 }
 0x256   : > { %v5121_v47 = vmax.f32 %v4162_v61, 0.0  ;;  %v6187_v3 = vpack.c.bf16 %v5113_v34, %v5112_v4  ;;  %v6188_v27 = vpack.c.bf16 %v5115_v53, %v5114_v5  ;;  %v4203_v43 = vadd.f32 %v8030_v1, %v8416_v63  ;;  %v8793_v4 = vld [vmem:[#allocation5_spill] sm:$0xff]  ;;  %v8794_v53 = vld [vmem:[#allocation6_spill] sm:$0xff] }
 0x257   : > { %v6189_v33 = vpack.c.bf16 %v5117_v17, %v5116_v8  ;;  %v6190_v52 = vpack.c.bf16 %v5119_v21, %v5118_v25  ;;  %v4205_v50 = vadd.f32 %v8037_v40, %v8416_v63  ;;  %v4246_v20 = vadd.f32 %v8039_v37, %v8416_v63  ;;  %v8795_v17 = vld [vmem:[#allocation7_spill] sm:$0xff]  ;;  %v8796_v21 = vld [vmem:[#allocation8_spill] sm:$0xff] }
 0x258   : > { %v6191_v55 = vpack.c.bf16 %v5121_v47, %v5120_v29  ;;  %5538 = vst [vmem:[%s8429_s15] sm:$0xff] %v6187_v3  ;;  %5539 = vst [vmem:[%s8429_s15 + $0x8] sm:$0xff] %v6188_v27  ;;  %v5122_v41 = vmax.f32 %v4203_v43, 0.0  ;;  %v4207_v28 = vadd.f32 %v8041_v7, %v8384_v12  ;;  %v4248_v36 = vadd.f32 %v8043_v38, %v8416_v63  ;;  %v8797_v43 = vld [vmem:[#allocation9_spill] sm:$0xff] }
 0x259   : > { %5540 = vst [vmem:[%s8429_s15 + $0x10] sm:$0xff] %v6189_v33  ;;  %5541 = vst [vmem:[%s8429_s15 + $0x18] sm:$0xff] %v6190_v52  ;;  %v5123_v1 = vmax.f32 %v4205_v50, 0.0  ;;  %v5124_v11 = vmax.f32 %v4246_v20, 0.0  ;;  %v4209_v40 = vadd.f32 %v8051_v32, %v8384_v12  ;;  %v4250_v37 = vadd.f32 %v8053_v57, %v8384_v12  ;;  %v8798_v20 = vld [vmem:[#allocation10_spill] sm:$0xff] }
 0x25a   : > { %5542 = vst [vmem:[%s8429_s15 + $0x20] sm:$0xff] %v6191_v55  ;;  %v5175_v30 = vmax.f32 %v4207_v28, 0.0  ;;  %v5125_v56 = vmax.f32 %v4248_v36, 0.0  ;;  %v4252_v7 = vadd.f32 %v8061_v59, %v8384_v12  ;;  %v4289_v38 = vadd.f32 %v8152_v31, %v8416_v63  ;;  %v8799_v36 = vld [vmem:[#allocation11_spill] sm:$0xff] }
 0x25b   : > { %v6192_v35 = vpack.c.bf16 %v5123_v1, %v5122_v41  ;;  %v5176_v45 = vmax.f32 %v4209_v40, 0.0  ;;  %v5177_v14 = vmax.f32 %v4250_v37, 0.0  ;;  %v4291_v32 = vadd.f32 %v8159_v6, %v8416_v63 }
 0x25c   : > { %v6193_v62 = vpack.c.bf16 %v5125_v56, %v5124_v11  ;;  %v5178_v48 = vmax.f32 %v4252_v7, 0.0  ;;  %v5126_v57 = vmax.f32 %v4289_v38, 0.0  ;;  %v4332_v16 = vadd.f32 %v8161_v10, %v8416_v63 }
 0x25d   : > { %5543 = vst [vmem:[%s8429_s15 + $0x28] sm:$0xff] %v6192_v35  ;;  %v6219_v19 = vpack.c.bf16 %v5176_v45, %v5175_v30  ;;  %v5127_v59 = vmax.f32 %v4291_v32, 0.0  ;;  %v4293_v31 = vadd.f32 %v8163_v2, %v8384_v12  ;;  %v4334_v44 = vadd.f32 %v8165_v39, %v8416_v63 }
 0x25e   : > { %5544 = vst [vmem:[%s8429_s15 + $0x30] sm:$0xff] %v6193_v62  ;;  %v6220_v15 = vpack.c.bf16 %v5178_v48, %v5177_v14  ;;  %v5128_v6 = vmax.f32 %v4332_v16, 0.0  ;;  %v4295_v24 = vadd.f32 %v8173_v58, %v8384_v12  ;;  %v4336_v10 = vadd.f32 %v8175_v0, %v8384_v12 }
 0x25f   : > { %5570 = vst [vmem:[%s8429_s15 + $0xfc] sm:$0x33] %v6219_v19  ;;  %v6194_v13 = vpack.c.bf16 %v5127_v59, %v5126_v57  ;;  %v5179_v22 = vmax.f32 %v4293_v31, 0.0  ;;  %v5129_v61 = vmax.f32 %v4334_v44, 0.0  ;;  %v4338_v2 = vadd.f32 %v8793_v4, %v8384_v12 }
 0x260   : > { %5571 = vst [vmem:[%s8429_s15 + $0x104] sm:$0x33] %v6220_v15  ;;  %v5180_v39 = vmax.f32 %v4295_v24, 0.0  ;;  %v5181_v34 = vmax.f32 %v4336_v10, 0.0  ;;  %v4375_v5 = vadd.f32 %v8274_v46, %v8416_v63  ;;  %v4377_v58 = vadd.f32 %v8794_v53, %v8416_v63 }
 0x261   : > { %5545 = vst [vmem:[%s8429_s15 + $0x38] sm:$0xff] %v6194_v13  ;;  %v6195_v0 = vpack.c.bf16 %v5129_v61, %v5128_v6  ;;  %v5182_v8 = vmax.f32 %v4338_v2, 0.0  ;;  %v4418_v25 = vadd.f32 %v8795_v17, %v8416_v63  ;;  %v4379_v29 = vadd.f32 %v8796_v21, %v8384_v12 }
 0x262   : > { %v6221_v47 = vpack.c.bf16 %v5180_v39, %v5179_v22  ;;  %v5130_v3 = vmax.f32 %v4375_v5, 0.0  ;;  %v5131_v27 = vmax.f32 %v4377_v58, 0.0  ;;  %v4420_v46 = vadd.f32 %v8797_v43, %v8416_v63 }
 0x263   : > { %5546 = vst [vmem:[%s8429_s15 + $0x40] sm:$0xff] %v6195_v0  ;;  %v6222_v33 = vpack.c.bf16 %v5182_v8, %v5181_v34  ;;  %v5132_v52 = vmax.f32 %v4418_v25, 0.0  ;;  %v5183_v50 = vmax.f32 %v4379_v29, 0.0  ;;  %v4381_v55 = vadd.f32 %v8798_v20, %v8384_v12 }
 0x264   : > { %5572 = vst [vmem:[%s8429_s15 + $0x10c] sm:$0x33] %v6221_v47  ;;  %v6196_v41 = vpack.c.bf16 %v5131_v27, %v5130_v3  ;;  %v5133_v28 = vmax.f32 %v4420_v46, 0.0  ;;  %v4422_v1 = vadd.f32 %v8799_v36, %v8384_v12  ;;  %v4424_v11 = vadd.f32 %v8302_v51, %v8384_v12 }
 0x265   : > { %5573 = vst [vmem:[%s8429_s15 + $0x114] sm:$0x33] %v6222_v33  ;;  %v5184_v40 = vmax.f32 %v4381_v55, 0.0  ;;  %v4461_v37 = vadd.f32 %v8375_v26, %v8416_v63  ;;  %v4463_v30 = vadd.f32 %v8380_v9, %v8416_v63  ;;  %v4504_v56 = vadd.f32 %v8382_v49, %v8416_v63 }
 0x266   : > { %5547 = vst [vmem:[%s8429_s15 + $0x48] sm:$0xff] %v6196_v41  ;;  %v6197_v7 = vpack.c.bf16 %v5133_v28, %v5132_v52  ;;  %v5185_v38 = vmax.f32 %v4422_v1, 0.0  ;;  %v5186_v35 = vmax.f32 %v4424_v11, 0.0  ;;  %v4465_v45 = vadd.f32 %v8396_v18, %v8384_v12 }
 0x267   : > { %v6223_v51 = vpack.c.bf16 %v5184_v40, %v5183_v50  ;;  %v5134_v14 = vmax.f32 %v4461_v37, 0.0  ;;  %v5135_v32 = vmax.f32 %v4463_v30, 0.0  ;;  %v5136_v62 = vmax.f32 %v4504_v56, 0.0  ;;  %v4546_v57 = vpop.f32.mrb[24].mxu1 }
 0x268   : > { %5548 = vst [vmem:[%s8429_s15 + $0x50] sm:$0xff] %v6197_v7  ;;  %v6224_v26 = vpack.c.bf16 %v5186_v35, %v5185_v38  ;;  %v5187_v48 = vmax.f32 %v4465_v45, 0.0  ;;  %v4506_v9 = vadd.f32 %v8398_v54, %v8416_v63  ;;  %v4467_v49 = vadd.f32 %v8408_v60, %v8384_v12  ;;  %v4548_v31 = vpop.f32.mrb[25].mxu1  ;;  %v4589_v44 = vpop.f32.mrb[28].mxu0 }
 0x269   : > { %5574 = vst [vmem:[%s8429_s15 + $0x11c] sm:$0x33] %v6223_v51  ;;  %v6198_v16 = vpack.c.bf16 %v5135_v32, %v5134_v14  ;;  %v4508_v18 = vadd.f32 %v8410_v42, %v8384_v12  ;;  %v4510_v19 = vadd.f32 %v8420_v23, %v8384_v12  ;;  %v4547_v59 = vadd.f32 %v4546_v57, %v8416_v63  ;;  %v4550_v24 = vpop.f32.mrb[26].mxu1  ;;  %v4591_v10 = vpop.f32.mrb[29].mxu0 }
 0x26a   : > { %5575 = vst [vmem:[%s8429_s15 + $0x124] sm:$0x33] %v6224_v26  ;;  %v5137_v15 = vmax.f32 %v4506_v9, 0.0  ;;  %v5188_v54 = vmax.f32 %v4467_v49, 0.0  ;;  %v4549_v6 = vadd.f32 %v4548_v31, %v8416_v63  ;;  %v4590_v60 = vadd.f32 %v4589_v44, %v8416_v63  ;;  %v4552_v61 = vpop.f32.mrb[27].mxu1  ;;  %v4593_v4 = vpop.f32.mrb[30].mxu0 }
 0x26b   : > { %5549 = vst [vmem:[%s8429_s15 + $0x58] sm:$0xff] %v6198_v16  ;;  %v5189_v13 = vmax.f32 %v4508_v18, 0.0  ;;  %v5190_v42 = vmax.f32 %v4510_v19, 0.0  ;;  %v5138_v22 = vmax.f32 %v4547_v59, 0.0  ;;  %v4551_v23 = vadd.f32 %v4550_v24, %v8384_v12  ;;  %v4595_v53 = vpop.f32.mrb[31].mxu0 }
 0x26c   : > { %v6199_v2 = vpack.c.bf16 %v5137_v15, %v5136_v62  ;;  %v6225_v39 = vpack.c.bf16 %v5188_v54, %v5187_v48  ;;  %v5139_v34 = vmax.f32 %v4549_v6, 0.0  ;;  %v5140_v5 = vmax.f32 %v4590_v60, 0.0 }
 0x26d   : > { %v6226_v58 = vpack.c.bf16 %v5190_v42, %v5189_v13  ;;  %v5191_v0 = vmax.f32 %v4551_v23, 0.0  ;;  %v4592_v8 = vadd.f32 %v4591_v10, %v8416_v63  ;;  %v4553_v17 = vadd.f32 %v4552_v61, %v8384_v12 }
 0x26e   : > { %5550 = vst [vmem:[%s8429_s15 + $0x60] sm:$0xff] %v6199_v2  ;;  %5576 = vst [vmem:[%s8429_s15 + $0x12c] sm:$0x33] %v6225_v39  ;;  %v6200_v25 = vpack.c.bf16 %v5139_v34, %v5138_v22  ;;  %v4594_v21 = vadd.f32 %v4593_v4, %v8384_v12  ;;  %v4596_v29 = vadd.f32 %v4595_v53, %v8384_v12 }
 0x26f   : > { %5577 = vst [vmem:[%s8429_s15 + $0x134] sm:$0x33] %v6226_v58  ;;  %v5141_v47 = vmax.f32 %v4592_v8, 0.0  ;;  %v5192_v3 = vmax.f32 %v4553_v17, 0.0 }
 0x270   : > { %5551 = vst [vmem:[%s8429_s15 + $0x68] sm:$0xff] %v6200_v25  ;;  %v5193_v27 = vmax.f32 %v4594_v21, 0.0  ;;  %v5194_v43 = vmax.f32 %v4596_v29, 0.0 }
 0x271   : > { %v6201_v46 = vpack.c.bf16 %v5141_v47, %v5140_v5  ;;  %v6227_v33 = vpack.c.bf16 %v5192_v3, %v5191_v0 }
 0x272   : > { %v6228_v52 = vpack.c.bf16 %v5194_v43, %v5193_v27 }
 0x273   : > { %5552 = vst [vmem:[%s8429_s15 + $0x70] sm:$0xff] %v6201_v46  ;;  %5578 = vst [vmem:[%s8429_s15 + $0x13c] sm:$0x33] %v6227_v33 }
 0x274   : > { %5579 = vst [vmem:[%s8429_s15 + $0x144] sm:$0x33] %v6228_v52 }
 0x287   : > { %v4632_v50 = vpop.f32.mrb[28].mxu1 }
 0x288   : > { %v4633_v20 = vadd.f32 %v4632_v50, %v8416_v63  ;;  %v4634_v55 = vpop.f32.mrb[29].mxu1  ;;  %v4675_v41 = vpop.f32.mrb[32].mxu0 }
 0x289   : > { %v4635_v28 = vadd.f32 %v4634_v55, %v8416_v63  ;;  %v4676_v36 = vadd.f32 %v4675_v41, %v8416_v63  ;;  %v4636_v1 = vpop.f32.mrb[30].mxu1  ;;  %v4677_v11 = vpop.f32.mrb[33].mxu0 }
 0x28a   : > { %v5142_v40 = vmax.f32 %v4633_v20, 0.0  ;;  %v4637_v37 = vadd.f32 %v4636_v1, %v8384_v12  ;;  %v4678_v30 = vadd.f32 %v4677_v11, %v8416_v63  ;;  %v4638_v56 = vpop.f32.mrb[31].mxu1  ;;  %v4679_v7 = vpop.f32.mrb[34].mxu0 }
 0x28b   : > { %v5143_v38 = vmax.f32 %v4635_v28, 0.0  ;;  %v5144_v35 = vmax.f32 %v4676_v36, 0.0  ;;  %v4639_v45 = vadd.f32 %v4638_v56, %v8384_v12  ;;  %v4680_v51 = vadd.f32 %v4679_v7, %v8384_v12  ;;  %v4681_v14 = vpop.f32.mrb[35].mxu0 }
 0x28c   : > { %v5195_v32 = vmax.f32 %v4637_v37, 0.0  ;;  %v5145_v62 = vmax.f32 %v4678_v30, 0.0  ;;  %v4682_v26 = vadd.f32 %v4681_v14, %v8384_v12 }
 0x28d   : > { %v6202_v48 = vpack.c.bf16 %v5143_v38, %v5142_v40  ;;  %v5196_v9 = vmax.f32 %v4639_v45, 0.0  ;;  %v5197_v49 = vmax.f32 %v4680_v51, 0.0 }
 0x28e   : > { %v6203_v57 = vpack.c.bf16 %v5145_v62, %v5144_v35  ;;  %v5198_v16 = vmax.f32 %v4682_v26, 0.0 }
 0x28f   : > { %5553 = vst [vmem:[%s8429_s15 + $0x78] sm:$0xff] %v6202_v48  ;;  %v6229_v18 = vpack.c.bf16 %v5196_v9, %v5195_v32 }
 0x290   : > { %5554 = vst [vmem:[%s8429_s15 + $0x80] sm:$0xff] %v6203_v57  ;;  %v6230_v19 = vpack.c.bf16 %v5198_v16, %v5197_v49 }
 0x291   : > { %5580 = vst [vmem:[%s8429_s15 + $0x14c] sm:$0x33] %v6229_v18 }
 0x292   : > { %5581 = vst [vmem:[%s8429_s15 + $0x154] sm:$0x33] %v6230_v19 }
 0x2a6   : > { %v4718_v59 = vpop.f32.mrb[32].mxu1 }
 0x2a7   : > { %v4719_v31 = vadd.f32 %v4718_v59, %v8416_v63  ;;  %v4720_v44 = vpop.f32.mrb[33].mxu1 }
 0x2a8   : > { %v4761_v15 = vpop.f32.mrb[36].mxu0  ;;  %v4721_v54 = vadd.f32 %v4720_v44, %v8416_v63  ;;  %v4722_v60 = vpop.f32.mrb[34].mxu1 }
 0x2a9   : > { %v4762_v6 = vadd.f32 %v4761_v15, %v8416_v63  ;;  %v4763_v24 = vpop.f32.mrb[37].mxu0  ;;  %v5146_v10 = vmax.f32 %v4719_v31, 0.0  ;;  %v4723_v13 = vadd.f32 %v4722_v60, %v8384_v12  ;;  %v4724_v22 = vpop.f32.mrb[35].mxu1 }
 0x2aa   : > { %v4764_v42 = vadd.f32 %v4763_v24, %v8416_v63  ;;  %v4765_v23 = vpop.f32.mrb[38].mxu0  ;;  %v5147_v61 = vmax.f32 %v4721_v54, 0.0  ;;  %v4725_v2 = vadd.f32 %v4724_v22, %v8384_v12 }
 0x2ab   : > { %v5148_v4 = vmax.f32 %v4762_v6, 0.0  ;;  %v4766_v39 = vadd.f32 %v4765_v23, %v8384_v12  ;;  %v4767_v34 = vpop.f32.mrb[39].mxu0  ;;  %v5199_v5 = vmax.f32 %v4723_v13, 0.0 }
 0x2ac   : > { %v5149_v53 = vmax.f32 %v4764_v42, 0.0  ;;  %v4768_v58 = vadd.f32 %v4767_v34, %v8384_v12  ;;  %v6204_v0 = vpack.c.bf16 %v5147_v61, %v5146_v10  ;;  %v5200_v8 = vmax.f32 %v4725_v2, 0.0 }
 0x2ad   : > { %v5201_v17 = vmax.f32 %v4766_v39, 0.0 }
 0x2ae   : > { %v6205_v25 = vpack.c.bf16 %v5149_v53, %v5148_v4  ;;  %v5202_v21 = vmax.f32 %v4768_v58, 0.0  ;;  %5555 = vst [vmem:[%s8429_s15 + $0x88] sm:$0xff] %v6204_v0  ;;  %v6231_v29 = vpack.c.bf16 %v5200_v8, %v5199_v5 }
 0x2b0   : > { %5556 = vst [vmem:[%s8429_s15 + $0x90] sm:$0xff] %v6205_v25  ;;  %v6232_v47 = vpack.c.bf16 %v5202_v21, %v5201_v17  ;;  %5582 = vst [vmem:[%s8429_s15 + $0x15c] sm:$0x33] %v6231_v29 }
 0x2b2   : > { %5583 = vst [vmem:[%s8429_s15 + $0x164] sm:$0x33] %v6232_v47 }
 0x2c6   : > { %v4804_v3 = vpop.f32.mrb[36].mxu1 }
 0x2c7   : > { %v4805_v27 = vadd.f32 %v4804_v3, %v8416_v63  ;;  %v4806_v43 = vpop.f32.mrb[37].mxu1 }
 0x2c8   : > { %v4847_v46 = vpop.f32.mrb[40].mxu0  ;;  %v4807_v33 = vadd.f32 %v4806_v43, %v8416_v63  ;;  %v4808_v50 = vpop.f32.mrb[38].mxu1 }
 0x2c9   : > { %v4848_v52 = vadd.f32 %v4847_v46, %v8416_v63  ;;  %v4849_v20 = vpop.f32.mrb[41].mxu0  ;;  %v5150_v55 = vmax.f32 %v4805_v27, 0.0  ;;  %v4809_v41 = vadd.f32 %v4808_v50, %v8384_v12  ;;  %v4810_v36 = vpop.f32.mrb[39].mxu1 }
 0x2ca   : > { %v4850_v28 = vadd.f32 %v4849_v20, %v8416_v63  ;;  %v4851_v1 = vpop.f32.mrb[42].mxu0  ;;  %v5151_v11 = vmax.f32 %v4807_v33, 0.0  ;;  %v4811_v37 = vadd.f32 %v4810_v36, %v8384_v12 }
 0x2cb   : > { %v5152_v40 = vmax.f32 %v4848_v52, 0.0  ;;  %v4852_v30 = vadd.f32 %v4851_v1, %v8384_v12  ;;  %v4853_v56 = vpop.f32.mrb[43].mxu0  ;;  %v5203_v7 = vmax.f32 %v4809_v41, 0.0 }
 0x2cc   : > { %v5153_v38 = vmax.f32 %v4850_v28, 0.0  ;;  %v4854_v35 = vadd.f32 %v4853_v56, %v8384_v12  ;;  %v6206_v45 = vpack.c.bf16 %v5151_v11, %v5150_v55  ;;  %v5204_v51 = vmax.f32 %v4811_v37, 0.0 }
 0x2cd   : > { %v5205_v14 = vmax.f32 %v4852_v30, 0.0 }
 0x2ce   : > { %v6207_v32 = vpack.c.bf16 %v5153_v38, %v5152_v40  ;;  %v5206_v62 = vmax.f32 %v4854_v35, 0.0  ;;  %5557 = vst [vmem:[%s8429_s15 + $0x98] sm:$0xff] %v6206_v45  ;;  %v6233_v26 = vpack.c.bf16 %v5204_v51, %v5203_v7 }
 0x2d0   : > { %5558 = vst [vmem:[%s8429_s15 + $0xa0] sm:$0xff] %v6207_v32  ;;  %v6234_v48 = vpack.c.bf16 %v5206_v62, %v5205_v14  ;;  %5584 = vst [vmem:[%s8429_s15 + $0x16c] sm:$0x33] %v6233_v26 }
 0x2d2   : > { %5585 = vst [vmem:[%s8429_s15 + $0x174] sm:$0x33] %v6234_v48 }
 0x2e6   : > { %v4890_v9 = vpop.f32.mrb[40].mxu1 }
 0x2e7   : > { %v4891_v49 = vadd.f32 %v4890_v9, %v8416_v63  ;;  %v4892_v57 = vpop.f32.mrb[41].mxu1 }
 0x2e8   : > { %v4933_v16 = vpop.f32.mrb[44].mxu0  ;;  %v4893_v18 = vadd.f32 %v4892_v57, %v8416_v63  ;;  %v4894_v59 = vpop.f32.mrb[42].mxu1 }
 0x2e9   : > { %v4934_v19 = vadd.f32 %v4933_v16, %v8416_v63  ;;  %v4935_v31 = vpop.f32.mrb[45].mxu0  ;;  %v5154_v44 = vmax.f32 %v4891_v49, 0.0  ;;  %v4895_v15 = vadd.f32 %v4894_v59, %v8384_v12  ;;  %v4896_v6 = vpop.f32.mrb[43].mxu1 }
 0x2ea   : > { %v4936_v54 = vadd.f32 %v4935_v31, %v8416_v63  ;;  %v4937_v60 = vpop.f32.mrb[46].mxu0  ;;  %v5155_v24 = vmax.f32 %v4893_v18, 0.0  ;;  %v4897_v13 = vadd.f32 %v4896_v6, %v8384_v12 }
 0x2eb   : > { %v5156_v10 = vmax.f32 %v4934_v19, 0.0  ;;  %v4938_v42 = vadd.f32 %v4937_v60, %v8384_v12  ;;  %v4939_v22 = vpop.f32.mrb[47].mxu0  ;;  %v5207_v23 = vmax.f32 %v4895_v15, 0.0 }
 0x2ec   : > { %v5157_v61 = vmax.f32 %v4936_v54, 0.0  ;;  %v4940_v4 = vadd.f32 %v4939_v22, %v8384_v12  ;;  %v6208_v2 = vpack.c.bf16 %v5155_v24, %v5154_v44  ;;  %v5208_v39 = vmax.f32 %v4897_v13, 0.0 }
 0x2ed   : > { %v5209_v34 = vmax.f32 %v4938_v42, 0.0 }
 0x2ee   : > { %v6209_v5 = vpack.c.bf16 %v5157_v61, %v5156_v10  ;;  %v5210_v53 = vmax.f32 %v4940_v4, 0.0  ;;  %5559 = vst [vmem:[%s8429_s15 + $0xa8] sm:$0xff] %v6208_v2  ;;  %v6235_v58 = vpack.c.bf16 %v5208_v39, %v5207_v23  ;;  %v5620_v23 = vld [vmem:[%s8429_s15 + $0x10] sm:$0xff] (%p6422_p4)  ;;  %v5622_v61 = vld [vmem:[%s8429_s15 + $0x18] sm:$0xff] (%p6422_p4)  ;;  %v5624_v4 = vld [vmem:[%s8429_s15 + $0x20] sm:$0xff] (%p6422_p4) }
 0x2ef   : > { %v5626_v2 = vld [vmem:[%s8429_s15 + $0x28] sm:$0xff] (%p6422_p4)  ;;  %v5628_v39 = vld [vmem:[%s8429_s15 + $0x30] sm:$0xff] (%p6422_p4)  ;;  %5621 = vst [vmem:[%s8629_s11 + $0x10] sm:$0xff] (%p6422_p4), %v5620_v23  ;;  %5623 = vst [vmem:[%s8629_s11 + $0x18] sm:$0xff] (%p6422_p4), %v5622_v61 }
 0x2f0   : > { %5560 = vst [vmem:[%s8429_s15 + $0xb0] sm:$0xff] %v6209_v5  ;;  %v6236_v0 = vpack.c.bf16 %v5210_v53, %v5209_v34  ;;  %5586 = vst [vmem:[%s8429_s15 + $0x17c] sm:$0x33] %v6235_v58  ;;  %v5630_v34 = vld [vmem:[%s8429_s15 + $0x38] sm:$0xff] (%p6422_p4)  ;;  %v5632_v5 = vld [vmem:[%s8429_s15 + $0x40] sm:$0xff] (%p6422_p4) }
 0x2f1   : > { %5625 = vst [vmem:[%s8629_s11 + $0x20] sm:$0xff] (%p6422_p4), %v5624_v4  ;;  %5627 = vst [vmem:[%s8629_s11 + $0x28] sm:$0xff] (%p6422_p4), %v5626_v2  ;;  %v5634_v53 = vld [vmem:[%s8429_s15 + $0x48] sm:$0xff] (%p6422_p4)  ;;  %v5636_v58 = vld [vmem:[%s8429_s15 + $0x50] sm:$0xff] (%p6422_p4) }
 0x2f2   : > { %5587 = vst [vmem:[%s8429_s15 + $0x184] sm:$0x33] %v6236_v0  ;;  %5629 = vst [vmem:[%s8629_s11 + $0x30] sm:$0xff] (%p6422_p4), %v5628_v39  ;;  %v5638_v0 = vld [vmem:[%s8429_s15 + $0x58] sm:$0xff] (%p6422_p4) }
 0x2f3   : > { %5631 = vst [vmem:[%s8629_s11 + $0x38] sm:$0xff] (%p6422_p4), %v5630_v34  ;;  %5633 = vst [vmem:[%s8629_s11 + $0x40] sm:$0xff] (%p6422_p4), %v5632_v5 }
 0x2f4   : > { %5635 = vst [vmem:[%s8629_s11 + $0x48] sm:$0xff] (%p6422_p4), %v5634_v53  ;;  %5637 = vst [vmem:[%s8629_s11 + $0x50] sm:$0xff] (%p6422_p4), %v5636_v58 }
 0x2f5   : > { %5639 = vst [vmem:[%s8629_s11 + $0x58] sm:$0xff] (%p6422_p4), %v5638_v0 }
 0x308   : > { %v4976_v8 = vpop.f32.mrb[44].mxu1  ;;  %v5019_v17 = vpop.f32.mrb[48].mxu0 }
 0x309   : > { %v4977_v25 = vadd.f32 %v4976_v8, %v8416_v63  ;;  %v5020_v21 = vadd.f32 %v5019_v17, %v8416_v63  ;;  %v4978_v29 = vpop.f32.mrb[45].mxu1  ;;  %v5021_v47 = vpop.f32.mrb[49].mxu0  ;;  %v5640_v8 = vld [vmem:[%s8429_s15 + $0x60] sm:$0xff] (%p6422_p4)  ;;  %v5642_v17 = vld [vmem:[%s8429_s15 + $0x68] sm:$0xff] (%p6422_p4) }
 0x30a   : > { %v4979_v3 = vadd.f32 %v4978_v29, %v8416_v63  ;;  %v5022_v27 = vadd.f32 %v5021_v47, %v8416_v63  ;;  %v4980_v43 = vpop.f32.mrb[46].mxu1  ;;  %v5023_v46 = vpop.f32.mrb[50].mxu0  ;;  %5641 = vst [vmem:[%s8629_s11 + $0x60] sm:$0xff] (%p6422_p4), %v5640_v8  ;;  %5643 = vst [vmem:[%s8629_s11 + $0x68] sm:$0xff] (%p6422_p4), %v5642_v17  ;;  %v5648_v29 = vld [vmem:[%s8429_s15 + $0x80] sm:$0xff] (%p6422_p4)  ;;  %v5650_v47 = vld [vmem:[%s8429_s15 + $0x88] sm:$0xff] (%p6422_p4) }
 0x30b   : > { %v5158_v33 = vmax.f32 %v4977_v25, 0.0  ;;  %v5160_v52 = vmax.f32 %v5020_v21, 0.0  ;;  %v4981_v50 = vadd.f32 %v4980_v43, %v8384_v12  ;;  %v5024_v20 = vadd.f32 %v5023_v46, %v8384_v12  ;;  %v4982_v55 = vpop.f32.mrb[47].mxu1  ;;  %v5025_v41 = vpop.f32.mrb[51].mxu0  ;;  %v5644_v25 = vld [vmem:[%s8429_s15 + $0x70] sm:$0xff] (%p6422_p4)  ;;  %v5646_v21 = vld [vmem:[%s8429_s15 + $0x78] sm:$0xff] (%p6422_p4) }
 0x30c   : > { %v5159_v28 = vmax.f32 %v4979_v3, 0.0  ;;  %v5161_v36 = vmax.f32 %v5022_v27, 0.0  ;;  %v4983_v1 = vadd.f32 %v4982_v55, %v8384_v12  ;;  %v5026_v11 = vadd.f32 %v5025_v41, %v8384_v12  ;;  %5645 = vst [vmem:[%s8629_s11 + $0x70] sm:$0xff] (%p6422_p4), %v5644_v25  ;;  %5647 = vst [vmem:[%s8629_s11 + $0x78] sm:$0xff] (%p6422_p4), %v5646_v21  ;;  %v5652_v3 = vld [vmem:[%s8429_s15 + $0x90] sm:$0xff] (%p6422_p4)  ;;  %v5654_v27 = vld [vmem:[%s8429_s15 + $0x98] sm:$0xff] (%p6422_p4) }
 0x30d   : > { %v5211_v40 = vmax.f32 %v4981_v50, 0.0  ;;  %v5213_v37 = vmax.f32 %v5024_v20, 0.0  ;;  %5649 = vst [vmem:[%s8629_s11 + $0x80] sm:$0xff] (%p6422_p4), %v5648_v29  ;;  %5651 = vst [vmem:[%s8629_s11 + $0x88] sm:$0xff] (%p6422_p4), %v5650_v47  ;;  %v5656_v43 = vld [vmem:[%s8429_s15 + $0xa0] sm:$0xff] (%p6422_p4)  ;;  %v5658_v46 = vld [vmem:[%s8429_s15 + $0xa8] sm:$0xff] (%p6422_p4) }
 0x30e   : > { %v6210_v30 = vpack.c.bf16 %v5159_v28, %v5158_v33  ;;  %v6211_v56 = vpack.c.bf16 %v5161_v36, %v5160_v52  ;;  %v5212_v7 = vmax.f32 %v4983_v1, 0.0  ;;  %v5214_v38 = vmax.f32 %v5026_v11, 0.0  ;;  %5653 = vst [vmem:[%s8629_s11 + $0x90] sm:$0xff] (%p6422_p4), %v5652_v3  ;;  %5655 = vst [vmem:[%s8629_s11 + $0x98] sm:$0xff] (%p6422_p4), %v5654_v27  ;;  %v5660_v33 = vld [vmem:[%s8429_s15 + $0xb0] sm:$0xff] (%p6422_p4)  ;;  %v5670_v41 = vld [vmem:[%s8429_s15 + $0xdc] sm:$0xff] (%p6422_p4) }
 0x30f   : > { %5657 = vst [vmem:[%s8629_s11 + $0xa0] sm:$0xff] (%p6422_p4), %v5656_v43  ;;  %5659 = vst [vmem:[%s8629_s11 + $0xa8] sm:$0xff] (%p6422_p4), %v5658_v46  ;;  %v5668_v55 = vld [vmem:[%s8429_s15 + $0xd4] sm:$0xff] (%p6422_p4)  ;;  %v5672_v28 = vld [vmem:[%s8429_s15 + $0xe4] sm:$0xff] (%p6422_p4) }
 0x310   : > { %5561 = vst [vmem:[%s8429_s15 + $0xb8] sm:$0xff] %v6210_v30  ;;  %5562 = vst [vmem:[%s8429_s15 + $0xc0] sm:$0xff] %v6211_v56  ;;  %v6237_v35 = vpack.c.bf16 %v5212_v7, %v5211_v40  ;;  %v6238_v45 = vpack.c.bf16 %v5214_v38, %v5213_v37  ;;  %v5674_v36 = vld [vmem:[%s8429_s15 + $0xec] sm:$0xff] (%p6422_p4)  ;;  %v5676_v1 = vld [vmem:[%s8429_s15 + $0xf4] sm:$0xff] (%p6422_p4) }
 0x311   : > { %5661 = vst [vmem:[%s8629_s11 + $0xb0] sm:$0xff] (%p6422_p4), %v5660_v33  ;;  %5669 = vst [vmem:[%s8629_s11 + $0x424] sm:$0xff] (%p6422_p4), %v5668_v55  ;;  %v5678_v11 = vld [vmem:[%s8429_s15 + $0xfc] sm:$0xff] (%p6422_p4)  ;;  %v5680_v40 = vld [vmem:[%s8429_s15 + $0x104] sm:$0xff] (%p6422_p4) }
 0x312   : > { %5588 = vst [vmem:[%s8429_s15 + $0x18c] sm:$0x33] %v6237_v35  ;;  %5589 = vst [vmem:[%s8429_s15 + $0x194] sm:$0x33] %v6238_v45  ;;  %v5682_v37 = vld [vmem:[%s8429_s15 + $0x10c] sm:$0xff] (%p6422_p4)  ;;  %v5684_v30 = vld [vmem:[%s8429_s15 + $0x114] sm:$0xff] (%p6422_p4) }
 0x313   : > { %5671 = vst [vmem:[%s8629_s11 + $0x42c] sm:$0xff] (%p6422_p4), %v5670_v41  ;;  %5673 = vst [vmem:[%s8629_s11 + $0x434] sm:$0xff] (%p6422_p4), %v5672_v28  ;;  %v5686_v56 = vld [vmem:[%s8429_s15 + $0x11c] sm:$0xff] (%p6422_p4)  ;;  %v5688_v7 = vld [vmem:[%s8429_s15 + $0x124] sm:$0xff] (%p6422_p4) }
 0x314   : > { %5675 = vst [vmem:[%s8629_s11 + $0x43c] sm:$0xff] (%p6422_p4), %v5674_v36  ;;  %5677 = vst [vmem:[%s8629_s11 + $0x444] sm:$0xff] (%p6422_p4), %v5676_v1  ;;  %v5690_v38 = vld [vmem:[%s8429_s15 + $0x12c] sm:$0xff] (%p6422_p4)  ;;  %v5692_v35 = vld [vmem:[%s8429_s15 + $0x134] sm:$0xff] (%p6422_p4) }
 0x315   : > { %5679 = vst [vmem:[%s8629_s11 + $0x44c] sm:$0xff] (%p6422_p4), %v5678_v11  ;;  %5681 = vst [vmem:[%s8629_s11 + $0x454] sm:$0xff] (%p6422_p4), %v5680_v40  ;;  %v5694_v45 = vld [vmem:[%s8429_s15 + $0x13c] sm:$0xff] (%p6422_p4) }
 0x316   : > { %5683 = vst [vmem:[%s8629_s11 + $0x45c] sm:$0xff] (%p6422_p4), %v5682_v37  ;;  %5685 = vst [vmem:[%s8629_s11 + $0x464] sm:$0xff] (%p6422_p4), %v5684_v30 }
 0x317   : > { %v5662_v52 = vld [vmem:[%s8429_s15 + $0xb8] sm:$0xff] (%p6422_p4)  ;;  %v5664_v50 = vld [vmem:[%s8429_s15 + $0xc0] sm:$0xff] (%p6422_p4)  ;;  %5687 = vst [vmem:[%s8629_s11 + $0x46c] sm:$0xff] (%p6422_p4), %v5686_v56  ;;  %5689 = vst [vmem:[%s8629_s11 + $0x474] sm:$0xff] (%p6422_p4), %v5688_v7 }
 0x318   : > { %5663 = vst [vmem:[%s8629_s11 + $0xb8] sm:$0xff] (%p6422_p4), %v5662_v52  ;;  %5665 = vst [vmem:[%s8629_s11 + $0xc0] sm:$0xff] (%p6422_p4), %v5664_v50 }
 0x319   : > { %5691 = vst [vmem:[%s8629_s11 + $0x47c] sm:$0xff] (%p6422_p4), %v5690_v38  ;;  %5693 = vst [vmem:[%s8629_s11 + $0x484] sm:$0xff] (%p6422_p4), %v5692_v35 }
 0x31a   : > { %5695 = vst [vmem:[%s8629_s11 + $0x48c] sm:$0xff] (%p6422_p4), %v5694_v45 }
 0x31c   : > { %v5062_v51 = vpop.f32.mrb[48].mxu1 }
 0x31d   : > { %v5063_v14 = vadd.f32 %v5062_v51, %v8416_v63  ;;  %v5064_v32 = vpop.f32.mrb[49].mxu1  ;;  %v5696_v51 = vld [vmem:[%s8429_s15 + $0x144] sm:$0xff] (%p6422_p4) }
 0x31e   : > { %v5065_v62 = vadd.f32 %v5064_v32, %v8416_v63  ;;  %v5066_v26 = vpop.f32.mrb[50].mxu1  ;;  %v5105_v57 = vpop.f32.mrb[52].mxu0  ;;  %5697 = vst [vmem:[%s8629_s11 + $0x494] sm:$0xff] (%p6422_p4), %v5696_v51  ;;  %v5700_v32 = vld [vmem:[%s8429_s15 + $0x154] sm:$0xff] (%p6422_p4) }
 0x31f   : > { %v5162_v48 = vmax.f32 %v5063_v14, 0.0  ;;  %v5067_v9 = vadd.f32 %v5066_v26, %v8384_v12  ;;  %v5068_v49 = vpop.f32.mrb[51].mxu1  ;;  %v5106_v19 = vadd.f32 %v5105_v57, %v8416_v63  ;;  %v6260_v59 = vpop.f32.mrb[53].mxu0  ;;  %v5618_v63 = vld [vmem:[%s8429_s15 + $0x8] sm:$0xff] (%p6422_p4)  ;;  %5701 = vst [vmem:[%s8629_s11 + $0x4a4] sm:$0xff] (%p6422_p4), %v5700_v32 }
 0x320   : > { %v5163_v16 = vmax.f32 %v5065_v62, 0.0  ;;  %v5069_v18 = vadd.f32 %v5068_v49, %v8384_v12  ;;  %v5108_v15 = vpop.f32.mrb[54].mxu0  ;;  %5619 = vst [vmem:[%s8629_s11 + $0x8] sm:$0xff] (%p6422_p4), %v5618_v63  ;;  %v5698_v14 = vld [vmem:[%s8429_s15 + $0x14c] sm:$0xff] (%p6422_p4)  ;;  %v5702_v62 = vld [vmem:[%s8429_s15 + $0x15c] sm:$0xff] (%p6422_p4)  ;;  %v5704_v26 = vld [vmem:[%s8429_s15 + $0x164] sm:$0xff] (%p6422_p4) }
 0x321   : > { %v5215_v31 = vmax.f32 %v5067_v9, 0.0  ;;  %v5164_v6 = vmax.f32 %v5106_v19, 0.0  ;;  %v5109_v60 = vadd.f32 %v5108_v15, %v8384_v12  ;;  %v6261_v24 = vpop.f32.mrb[55].mxu0  ;;  %5598 = sbr.rel (!%p6422_p4) target bundleno = 816 (0x330), region = 40  ;;  %v5616_v12 = vld [vmem:[%s8429_s15] sm:$0xff] (%p6422_p4)  ;;  %5699 = vst [vmem:[%s8629_s11 + $0x49c] sm:$0xff] (%p6422_p4), %v5698_v14 }
 0x322   : > { %v6212_v44 = vpack.c.bf16 %v5163_v16, %v5162_v48  ;;  %v5216_v54 = vmax.f32 %v5069_v18, 0.0  ;;  %5617 = vst [vmem:[%s8629_s11] sm:$0xff] (%p6422_p4), %v5616_v12  ;;  %5703 = vst [vmem:[%s8629_s11 + $0x4ac] sm:$0xff] (%p6422_p4), %v5702_v62  ;;  %v5706_v48 = vld [vmem:[%s8429_s15 + $0x16c] sm:$0xff] (%p6422_p4)  ;;  %v5708_v9 = vld [vmem:[%s8429_s15 + $0x174] sm:$0xff] (%p6422_p4) }
 0x323   : > { %v6213_v13 = vpack.c.bf16 %v5164_v6, %v5164_v6  ;;  %v5217_v42 = vmax.f32 %v5109_v60, 0.0  ;;  %5705 = vst [vmem:[%s8629_s11 + $0x4b4] sm:$0xff] (%p6422_p4), %v5704_v26  ;;  %v5710_v49 = vld [vmem:[%s8429_s15 + $0x17c] sm:$0xff] (%p6422_p4)  ;;  %5707 = vst [vmem:[%s8629_s11 + $0x4bc] sm:$0xff] (%p6422_p4), %v5706_v48  ;;  %v5712_v57 = vld [vmem:[%s8429_s15 + $0x184] sm:$0xff] (%p6422_p4) }
 0x324   : > { %5563 = vst [vmem:[%s8429_s15 + $0xc8] sm:$0xff] %v6212_v44  ;;  %v6239_v10 = vpack.c.bf16 %v5216_v54, %v5215_v31  ;;  %5709 = vst [vmem:[%s8629_s11 + $0x4c4] sm:$0xff] (%p6422_p4), %v5708_v9  ;;  %v5714_v16 = vld [vmem:[%s8429_s15 + $0x18c] sm:$0xff] (%p6422_p4)  ;;  %v5716_v18 = vld [vmem:[%s8429_s15 + $0x194] sm:$0xff] (%p6422_p4) }
 0x325   : > { %5564 = vst [vmem:[%s8429_s15 + $0xd0] sm:$0xf] %v6213_v13  ;;  %v6240_v22 = vpack.c.bf16 %v5217_v42, %v5217_v42  ;;  %5711 = vst [vmem:[%s8629_s11 + $0x4cc] sm:$0xff] (%p6422_p4), %v5710_v49 }
 0x326   : > { %5590 = vst [vmem:[%s8429_s15 + $0x19c] sm:$0x33] %v6239_v10  ;;  %5713 = vst [vmem:[%s8629_s11 + $0x4d4] sm:$0xff] (%p6422_p4), %v5712_v57 }
 0x327   : > { %5591 = vst [vmem:[%s8429_s15 + $0x1a4] sm:$0x3] %v6240_v22  ;;  %5715 = vst [vmem:[%s8629_s11 + $0x4dc] sm:$0xff] (%p6422_p4), %v5714_v16 }
 0x328   : > { %5717 = vst [vmem:[%s8629_s11 + $0x4e4] sm:$0xff] %v5716_v18 }
 0x32b   : > { %v5666_v20 = vld [vmem:[%s8429_s15 + $0xc8] sm:$0xff] }
 0x32c   : > { %5667 = vst [vmem:[%s8629_s11 + $0xc8] sm:$0xff] %v5666_v20  ;;  %v6181_v59 = vld [vmem:[%s8429_s15 + $0xd0] sm:$0xf] }
 0x32d   : > { %v5718_v19 = vld [vmem:[%s8429_s15 + $0x19c] sm:$0xff]  ;;  %6182 = vst [vmem:[%s8629_s11 + $0xd0] sm:$0xf] %v6181_v59 }
 0x32e   : > { %v6183_v31 = vld [vmem:[%s8429_s15 + $0x1a4] sm:$0xf]  ;;  %5719 = vst [vmem:[%s8629_s11 + $0x4ec] sm:$0xff] %v5718_v19 }
 0x32f   : > { %6184 = vst [vmem:[%s8629_s11 + $0x4f4] sm:$0xf] %v6183_v31 }
 0x330 PF: > { %p11_p9 = scmp.ge.s32.totalorder %s6412_s19, 7   ;;  %s8800_s15 = smov %s6357_s16 }
 0x331   : > { %s8801_s16 = smov %s6420_s22  ;;  %s8802_s17 = smov %s6412_s19 }
 0x332   :  { %13 = sbr.rel (!%p11_p9) target bundleno = 2 (0x2), region = 101 }

// kernel: net_forward.4
= control target key start
LH: loop header
LB: loop body
LE: loop exit
PB: predicated region body
PF: predicated region fallthrough
CT: control target
= control target key end

     0   :  { %s3828_s15 = smov 0   ;;  %s3830_s16 = smov 0   ;;  %s5197_s0 = inlined_call_operand.vmem [shape: bf16[16,11776], index: 0, kind: input, shape index: {}, may-alias: {0,1}]   ;;  %s5198_s1 = inlined_call_operand.vmem [shape: bf16[16,11776], index: 1, kind: input, shape index: {}, may-alias: {0,1}]   ;;  %s5199_s2 = inlined_call_operand.vmem [shape: bf16[24,144], index: 2, kind: input, shape index: {}]   ;;  %s5200_s3 = inlined_call_operand.vmem [shape: f32[24,1], index: 3, kind: input, shape index: {}]   ;;  %s5201_s4 = inlined_call_operand.vmem [shape: bf16[24,8832], index: 4, kind: output, shape index: {}]  }
   0x1   :  { %s3832_s17 = smov 0   ;;  %s3834_s18 = smov 0  }
   0x2   :  { %s3836_s19 = smov 0  }
   0x3 LB: > { %s3461_s20 = sadd.s32 4294967295, %s3792_s19   ;;  %s3855_s21 = sadd.s32 1, %s3792_s19   ;;  %s3792_s19 = sphi %s3836_s19, %s5208_s19   ;;  %s3788_s18 = sphi %s3834_s18, %s5207_s18   ;;  %s3784_s17 = sphi %s3832_s17, %s5206_s17   ;;  %s3780_s16 = sphi %s3830_s16, %s5205_s16   ;;  %s3776_s15 = sphi %s3828_s15, %s5204_s15  }
   0x4   : > { %s18_s22 = ssub.s32 %s3792_s19, %s3855_s21  ;;  %s21_s23 = sadd.s32 1, %s3788_s18 }
   0x5   : > { %p19_p0 = scmp.eq.s32.totalorder %s18_s22, 0  ;;  %p28_p1 = scmp.ne.s32.totalorder %s3788_s18, %s3784_s17 }
   0x6   : > { %p29_p2 = scmp.eq.s32.totalorder %s3792_s19, 0  ;;  %s45_s24 = sadd.s32 1, %s3855_s21 }
   0x7   : > { %s3865_s25 = scalar_select %p19_p0, %s3788_s18, %s21_s23  }
   0x8   : > { %p30_p3 = por %p29_p2, %p28_p1  ;;  %s46_s26 = ssub.s32 %s3855_s21, %s45_s24 }
   0x9   : > { %p47_p4 = scmp.eq.s32.totalorder %s46_s26, 0  ;;  %s49_s27 = sadd.s32 1, %s3780_s16 }
   0xa   : > { %p56_p5 = scmp.ne.s32.totalorder %s3780_s16, %s3776_s15  ;;  %p128_p6 = scmp.eq.s32.totalorder %s3461_s20, 2 }
   0xb   : > { %s3874_s28 = scalar_select %p47_p4, %s3780_s16, %s49_s27  }
   0xc   : > { %p3876_p7 = por %p56_p5, %p29_p2  ;;  %p3880_p8 = por %p128_p6, %p28_p1 }
   0xd   : > { %p3464_p9 = scmp.ge.s32.totalorder %s3792_s19, 3 }
   0xf   : > { %156 = sbr.rel (%p3464_p9) target bundleno = 56 (0x38), region = 24 }
  0x16   : > { %159 = sbr.rel (!%p30_p3) target bundleno = 39 (0x27), region = 28  ;;  %s161_s5 = sand.u32 (%p30_p3), 1, %s3788_s18  }
  0x17   : > { %s3616_s6 = smul.u32 (%p30_p3), 92, %s3792_s19 }
  0x18   : > { %s3654_s7 = smul.u32 (%p30_p3), 184, %s161_s5 }
  0x19   : > { %s3890_s10 = scalar_lea.vmem (%p30_p3), %s5197_s0, %s3616_s6 }
  0x1a   : > { %v181_v0 = vld [vmem:[%s3890_s10] sm:$0xff] (%p30_p3)  ;;  %v183_v1 = vld [vmem:[%s3890_s10 + $0x8] sm:$0xff] (%p30_p3)  ;;  %v185_v2 = vld [vmem:[%s3890_s10 + $0x10] sm:$0xff] (%p30_p3)  ;;  %s3895_s11 = scalar_lea.vmem (%p30_p3), [#allocation4], %s3654_s7 }
  0x1b   : > { %182 = vst [vmem:[%s3895_s11] sm:$0xff] (%p30_p3), %v181_v0  ;;  %184 = vst [vmem:[%s3895_s11 + $0x8] sm:$0xff] (%p30_p3), %v183_v1  ;;  %v187_v3 = vld [vmem:[%s3890_s10 + $0x18] sm:$0xff] (%p30_p3)  ;;  %v189_v4 = vld [vmem:[%s3890_s10 + $0x20] sm:$0xff] (%p30_p3) }
  0x1c   : > { %186 = vst [vmem:[%s3895_s11 + $0x10] sm:$0xff] (%p30_p3), %v185_v2  ;;  %v191_v5 = vld [vmem:[%s3890_s10 + $0x28] sm:$0xff] (%p30_p3)  ;;  %188 = vst [vmem:[%s3895_s11 + $0x18] sm:$0xff] (%p30_p3), %v187_v3  ;;  %v193_v6 = vld [vmem:[%s3890_s10 + $0x30] sm:$0xff] (%p30_p3) }
  0x1d   : > { %190 = vst [vmem:[%s3895_s11 + $0x20] sm:$0xff] %v189_v4  ;;  %192 = vst [vmem:[%s3895_s11 + $0x28] sm:$0xff] %v191_v5  ;;  %v195_v7 = vld [vmem:[%s3890_s10 + $0x38] sm:$0xff]  ;;  %v197_v8 = vld [vmem:[%s3890_s10 + $0x40] sm:$0xff] }
  0x1e   : > { %194 = vst [vmem:[%s3895_s11 + $0x30] sm:$0xff] %v193_v6  ;;  %196 = vst [vmem:[%s3895_s11 + $0x38] sm:$0xff] %v195_v7  ;;  %v199_v9 = vld [vmem:[%s3890_s10 + $0x48] sm:$0xff]  ;;  %v201_v10 = vld [vmem:[%s3890_s10 + $0x50] sm:$0xff] }
  0x1f   : > { %198 = vst [vmem:[%s3895_s11 + $0x40] sm:$0xff] %v197_v8  ;;  %v203_v11 = vld [vmem:[%s3890_s10 + $0x170] sm:$0xff]  ;;  %200 = vst [vmem:[%s3895_s11 + $0x48] sm:$0xff] %v199_v9  ;;  %v205_v12 = vld [vmem:[%s3890_s10 + $0x178] sm:$0xff] }
  0x20   : > { %202 = vst [vmem:[%s3895_s11 + $0x50] sm:$0xff] %v201_v10  ;;  %204 = vst [vmem:[%s3895_s11 + $0x5c] sm:$0xff] %v203_v11  ;;  %v207_v13 = vld [vmem:[%s3890_s10 + $0x180] sm:$0xff]  ;;  %v209_v14 = vld [vmem:[%s3890_s10 + $0x188] sm:$0xff] }
  0x21   : > { %206 = vst [vmem:[%s3895_s11 + $0x64] sm:$0xff] %v205_v12  ;;  %208 = vst [vmem:[%s3895_s11 + $0x6c] sm:$0xff] %v207_v13  ;;  %v211_v15 = vld [vmem:[%s3890_s10 + $0x190] sm:$0xff]  ;;  %v213_v16 = vld [vmem:[%s3890_s10 + $0x198] sm:$0xff] }
  0x22   : > { %210 = vst [vmem:[%s3895_s11 + $0x74] sm:$0xff] %v209_v14  ;;  %v215_v17 = vld [vmem:[%s3890_s10 + $0x1a0] sm:$0xff]  ;;  %212 = vst [vmem:[%s3895_s11 + $0x7c] sm:$0xff] %v211_v15  ;;  %v217_v18 = vld [vmem:[%s3890_s10 + $0x1a8] sm:$0xff] }
  0x23   : > { %214 = vst [vmem:[%s3895_s11 + $0x84] sm:$0xff] %v213_v16  ;;  %216 = vst [vmem:[%s3895_s11 + $0x8c] sm:$0xff] %v215_v17  ;;  %v219_v19 = vld [vmem:[%s3890_s10 + $0x1b0] sm:$0xff]  ;;  %v221_v20 = vld [vmem:[%s3890_s10 + $0x1b8] sm:$0xff] }
  0x24   : > { %218 = vst [vmem:[%s3895_s11 + $0x94] sm:$0xff] %v217_v18  ;;  %220 = vst [vmem:[%s3895_s11 + $0x9c] sm:$0xff] %v219_v19  ;;  %v223_v21 = vld [vmem:[%s3890_s10 + $0x1c0] sm:$0xff]  ;;  %v3466_v22 = vld [vmem:[%s3890_s10 + $0x58] sm:$0xf] }
  0x25   : > { %222 = vst [vmem:[%s3895_s11 + $0xa4] sm:$0xff] %v221_v20  ;;  %v3468_v23 = vld [vmem:[%s3890_s10 + $0x1c8] sm:$0xf]  ;;  %224 = vst [vmem:[%s3895_s11 + $0xac] sm:$0xff] %v223_v21 }
  0x26   : > { %3467 = vst [vmem:[%s3895_s11 + $0x58] sm:$0xf] %v3466_v22  ;;  %3469 = vst [vmem:[%s3895_s11 + $0xb4] sm:$0xf] %v3468_v23 }
  0x27 PF: > { %241 = sbr.rel (!%p3876_p7) target bundleno = 56 (0x38), region = 54  ;;  %s243_s12 = sand.u32 (%p3876_p7), 1, %s3780_s16  }
  0x28   : > { %s3391_s13 = smul.u32 (%p3876_p7), 92, %s3792_s19 }
  0x29   : > { %s3655_s14 = smul.u32 (%p3876_p7), 184, %s243_s12 }
  0x2a   : > { %s3949_s24 = scalar_lea.vmem (%p3876_p7), %s5198_s1, %s3391_s13 }
  0x2b   : > { %v3470_v24 = vld [vmem:[%s3949_s24 + $0x5c] sm:$0xff] (%p3876_p7)  ;;  %v3471_v25 = vld [vmem:[%s3949_s24 + $0x64] sm:$0xff] (%p3876_p7)  ;;  %v3472_v26 = vld [vmem:[%s3949_s24 + $0x6c] sm:$0xff] (%p3876_p7)  ;;  %s3954_s26 = scalar_lea.vmem (%p3876_p7), [#allocation5], %s3655_s14 }
  0x2c   : > { %265 = vst [vmem:[%s3954_s26] sm:$0xff] (%p3876_p7), %v3470_v24  ;;  %267 = vst [vmem:[%s3954_s26 + $0x8] sm:$0xff] (%p3876_p7), %v3471_v25  ;;  %v3473_v27 = vld [vmem:[%s3949_s24 + $0x74] sm:$0xff] (%p3876_p7)  ;;  %v3474_v28 = vld [vmem:[%s3949_s24 + $0x7c] sm:$0xff] (%p3876_p7) }
  0x2d   : > { %269 = vst [vmem:[%s3954_s26 + $0x10] sm:$0xff] (%p3876_p7), %v3472_v26  ;;  %v3475_v29 = vld [vmem:[%s3949_s24 + $0x84] sm:$0xff] (%p3876_p7)  ;;  %271 = vst [vmem:[%s3954_s26 + $0x18] sm:$0xff] (%p3876_p7), %v3473_v27  ;;  %v3476_v30 = vld [vmem:[%s3949_s24 + $0x8c] sm:$0xff] (%p3876_p7) }
  0x2e   : > { %273 = vst [vmem:[%s3954_s26 + $0x20] sm:$0xff] %v3474_v28  ;;  %275 = vst [vmem:[%s3954_s26 + $0x28] sm:$0xff] %v3475_v29  ;;  %v3477_v31 = vld [vmem:[%s3949_s24 + $0x94] sm:$0xff]  ;;  %v3478_v32 = vld [vmem:[%s3949_s24 + $0x9c] sm:$0xff] }
  0x2f   : > { %277 = vst [vmem:[%s3954_s26 + $0x30] sm:$0xff] %v3476_v30  ;;  %279 = vst [vmem:[%s3954_s26 + $0x38] sm:$0xff] %v3477_v31  ;;  %v3479_v33 = vld [vmem:[%s3949_s24 + $0xa4] sm:$0xff]  ;;  %v3480_v34 = vld [vmem:[%s3949_s24 + $0xac] sm:$0xff] }
  0x30   : > { %281 = vst [vmem:[%s3954_s26 + $0x40] sm:$0xff] %v3478_v32  ;;  %v3481_v35 = vld [vmem:[%s3949_s24 + $0x1cc] sm:$0xff]  ;;  %283 = vst [vmem:[%s3954_s26 + $0x48] sm:$0xff] %v3479_v33  ;;  %v3482_v36 = vld [vmem:[%s3949_s24 + $0x1d4] sm:$0xff] }
  0x31   : > { %285 = vst [vmem:[%s3954_s26 + $0x50] sm:$0xff] %v3480_v34  ;;  %287 = vst [vmem:[%s3954_s26 + $0x5c] sm:$0xff] %v3481_v35  ;;  %v3483_v37 = vld [vmem:[%s3949_s24 + $0x1dc] sm:$0xff]  ;;  %v3484_v38 = vld [vmem:[%s3949_s24 + $0x1e4] sm:$0xff] }
  0x32   : > { %289 = vst [vmem:[%s3954_s26 + $0x64] sm:$0xff] %v3482_v36  ;;  %291 = vst [vmem:[%s3954_s26 + $0x6c] sm:$0xff] %v3483_v37  ;;  %v3485_v39 = vld [vmem:[%s3949_s24 + $0x1ec] sm:$0xff]  ;;  %v3486_v40 = vld [vmem:[%s3949_s24 + $0x1f4] sm:$0xff] }
  0x33   : > { %293 = vst [vmem:[%s3954_s26 + $0x74] sm:$0xff] %v3484_v38  ;;  %v3487_v41 = vld [vmem:[%s3949_s24 + $0x1fc] sm:$0xff]  ;;  %295 = vst [vmem:[%s3954_s26 + $0x7c] sm:$0xff] %v3485_v39  ;;  %v3488_v42 = vld [vmem:[%s3949_s24 + $0x204] sm:$0xff] }
  0x34   : > { %297 = vst [vmem:[%s3954_s26 + $0x84] sm:$0xff] %v3486_v40  ;;  %299 = vst [vmem:[%s3954_s26 + $0x8c] sm:$0xff] %v3487_v41  ;;  %v3489_v43 = vld [vmem:[%s3949_s24 + $0x20c] sm:$0xff]  ;;  %v3490_v44 = vld [vmem:[%s3949_s24 + $0x214] sm:$0xff] }
  0x35   : > { %301 = vst [vmem:[%s3954_s26 + $0x94] sm:$0xff] %v3488_v42  ;;  %303 = vst [vmem:[%s3954_s26 + $0x9c] sm:$0xff] %v3489_v43  ;;  %v3491_v45 = vld [vmem:[%s3949_s24 + $0x21c] sm:$0xff]  ;;  %v3492_v46 = vld [vmem:[%s3949_s24 + $0xb4] sm:$0xf] }
  0x36   : > { %305 = vst [vmem:[%s3954_s26 + $0xa4] sm:$0xff] %v3490_v44  ;;  %v3494_v47 = vld [vmem:[%s3949_s24 + $0x224] sm:$0xf]  ;;  %307 = vst [vmem:[%s3954_s26 + $0xac] sm:$0xff] %v3491_v45 }
  0x37   : > { %3493 = vst [vmem:[%s3954_s26 + $0x58] sm:$0xf] %v3492_v46  ;;  %3495 = vst [vmem:[%s3954_s26 + $0xb4] sm:$0xf] %v3494_v47 }
  0x38 PF: > { %p3496_p10 = scmp.ge.s32.totalorder %s3792_s19, 1  ;;  %p323_p11 = scmp.lt.s32.totalorder %s3792_s19, 4 }
  0x3a   : > { %p324_p12 = pnand %p3496_p10, %p323_p11 }
  0x3b   : > { %s330_s27 = sand.u32 (!%p324_p12), 1, %s3784_s17   ;;  %s3794_s6 = smov (!%p324_p12), 127   ;;  %v4060_v54 = vld [vmem:[%s5199_s2 + $0x4] ss:$8 sps:$4 sm:$0xff] (!%p324_p12)   ;;  %vm2313_vm0 = vcmask (!%p324_p12), 130048   ;;  %vm838_vm1 = vcmask (!%p324_p12), 1039360  }
  0x3c   : > { %327 = sbr.rel (%p324_p12) target bundleno = 801 (0x321), region = 80  ;;  %s3795_s7 = smov (!%p324_p12), 126   ;;  %3547 = vmatprep.mubr.msk.bf16.mxu0 (!%p324_p12), %vm2313_vm0, %v4060_v54  ;;  %3549 = vmatprep.mubr.msk.bf16.mxu1 (!%p324_p12), %vm2313_vm0, %v4060_v54  ;;  %vm1004_vm2 = vcmask (!%p324_p12), 1031168   ;;  %vm1170_vm3 = vcmask (!%p324_p12), 506880   ;;  %vm1336_vm4 = vcmask (!%p324_p12), 498688   ;;  %vm1502_vm5 = vcmask (!%p324_p12), 490496  }
  0x3d   : > { %s3656_s29 = smul.u32 (!%p324_p12), 184, %s330_s27  ;;  %s3796_s8 = smov (!%p324_p12), 62   ;;  %vm1668_vm6 = vcmask (!%p324_p12), 1014784   ;;  %vm1834_vm7 = vcmask (!%p324_p12), 1006592   ;;  %vm2000_vm8 = vcmask (!%p324_p12), 998400  }
  0x3e   : > { %s3797_s9 = smov (!%p324_p12), 61   ;;  %s3798_s10 = smov (!%p324_p12), 60  }
  0x3f   : > { %s4006_s5 = scalar_lea.vmem (!%p324_p12), [#allocation4], %s3656_s29  ;;  %s3799_s11 = smov (!%p324_p12), 124  }
  0x40   : > { %v3710_v48 = vld [vmem:[%s4006_s5 + $0x4] ss:$92 sps:$4 sm:$0xff] (!%p324_p12)   ;;  %v3715_v51 = vld [vmem:[%s4006_s5 + $0xc] ss:$92 sps:$4 sm:$0xff] (!%p324_p12)   ;;  %v4049_v53 = vld [vmem:[%s4006_s5 + $0x14] ss:$92 sps:$4 sm:$0xff] (!%p324_p12)  }
  0x41   : > { %v3712_v49 = vld [vmem:[%s4006_s5] ss:$92 sps:$4 sm:$0xff] (!%p324_p12)   ;;  %792 = vrot.lane.b32.xlu0 (!%p324_p12), %v3710_v48, %s3794_s6  ;;  %v3713_v50 = vld [vmem:[%s4006_s5 + $0x8] ss:$92 sps:$4 sm:$0xff] (!%p324_p12)   ;;  %2320 = vmatprep.subr.bf16.mxu0 (!%p324_p12), %v3710_v48  ;;  %v4016_v52 = vld [vmem:[%s4006_s5 + $0x10] ss:$92 sps:$4 sm:$0xff] (!%p324_p12)  }
  0x42   : > { %790 = vrot.lane.b32.xlu1 (!%p324_p12), %v3712_v49, %s3794_s6  ;;  %2321 = vmatpush1.bf16.msra.mxu0 (!%p324_p12), %v3712_v49  ;;  %s3800_s12 = smov (!%p324_p12), 123   ;;  %s3801_s22 = smov (!%p324_p12), 122   ;;  %v4079_v55 = vld [vmem:[%s4006_s5 + $0x18] ss:$92 sps:$4 sm:$0xff] (!%p324_p12)   ;;  %v4089_v57 = vld [vmem:[%s4006_s5 + $0x20] ss:$92 sps:$4 sm:$0xff] (!%p324_p12)  }
  0x43   : > { %2371 = vmatprep.subr.bf16.mxu1 %v3715_v51  ;;  %v4084_v56 = vld [vmem:[%s4006_s5 + $0x1c] ss:$92 sps:$4 sm:$0xff]   ;;  %v4134_v0 = vld [vmem:[%s4006_s5 + $0x24] ss:$92 sps:$4 sm:$0xff]   ;;  %v4181_v24 = vld [vmem:[%s4006_s5 + $0x2c] ss:$92 sps:$4 sm:$0xff]  }
  0x44   : > { %2372 = vmatpush1.bf16.msra.mxu1 %v3713_v50  ;;  %v4171_v19 = vld [vmem:[%s4006_s5 + $0x28] ss:$92 sps:$4 sm:$0xff]   ;;  %v4186_v25 = vld [vmem:[%s4006_s5 + $0x30] ss:$92 sps:$4 sm:$0xff]   ;;  %s337_s13 = sand.u32 1, %s3776_s15  }
  0x45   : > { %794 = vrot.lane.b32.xlu0 %v3713_v50, %s3794_s6  ;;  %s4344_s14 = smul.u32 184, %s337_s13 }
  0x46   : > { %796 = vrot.lane.b32.xlu1 %v3715_v51, %s3794_s6 }
  0x47   : > { %s339_s15 = scalar_lea.vmem [#allocation5], %s4344_s14 }
  0x49   : > { %798 = vrot.lane.b32.xlu0 %v4016_v52, %s3794_s6 }
  0x4a   : > { %958 = vrot.lane.b32.xlu1 %v3710_v48, %s3795_s7 }
  0x4d   : > { %960 = vrot.lane.b32.xlu0 %v3713_v50, %s3795_s7 }
  0x4e   : > { %956 = vrot.lane.b32.xlu1 %v3712_v49, %s3795_s7 }
  0x51   : > { %962 = vrot.lane.b32.xlu0 %v3715_v51, %s3795_s7 }
  0x52   : > { %964 = vrot.lane.b32.xlu1 %v4016_v52, %s3795_s7 }
  0x55   : > { %1124 = vrot.lane.b32.xlu0 %v3710_v48, %s3796_s8 }
  0x56   : > { %1126 = vrot.lane.b32.xlu1 %v3713_v50, %s3796_s8 }
  0x59   : > { %1122 = vrot.lane.b32.xlu0 %v3712_v49, %s3796_s8 }
  0x5a   : > { %1128 = vrot.lane.b32.xlu1 %v3715_v51, %s3796_s8 }
  0x5d   : > { %1130 = vrot.lane.b32.xlu0 %v4016_v52, %s3796_s8 }
  0x5e   : > { %1290 = vrot.lane.b32.xlu1 %v3710_v48, %s3797_s9 }
  0x61   : > { %1292 = vrot.lane.b32.xlu0 %v3713_v50, %s3797_s9 }
  0x62   : > { %1288 = vrot.lane.b32.xlu1 %v3712_v49, %s3797_s9 }
  0x65   : > { %1294 = vrot.lane.b32.xlu0 %v3715_v51, %s3797_s9 }
  0x66   : > { %1296 = vrot.lane.b32.xlu1 %v4016_v52, %s3797_s9 }
  0x69   : > { %1456 = vrot.lane.b32.xlu0 %v3710_v48, %s3798_s10 }
  0x6a   : > { %1458 = vrot.lane.b32.xlu1 %v3713_v50, %s3798_s10 }
  0x6d   : > { %1454 = vrot.lane.b32.xlu0 %v3712_v49, %s3798_s10 }
  0x6e   : > { %1460 = vrot.lane.b32.xlu1 %v3715_v51, %s3798_s10 }
  0x71   : > { %1462 = vrot.lane.b32.xlu0 %v4016_v52, %s3798_s10 }
  0x72   : > { %1622 = vrot.lane.b32.xlu1 %v3713_v50, %s3799_s11 }
  0x75   : > { %1624 = vrot.lane.b32.xlu0 %v3715_v51, %s3799_s11 }
  0x76   : > { %1620 = vrot.lane.b32.xlu1 %v3710_v48, %s3799_s11 }
  0x79   : > { %1626 = vrot.lane.b32.xlu0 %v4016_v52, %s3799_s11 }
  0x7a   : > { %1628 = vrot.lane.b32.xlu1 %v4049_v53, %s3799_s11 }
  0x7d   : > { %1788 = vrot.lane.b32.xlu0 %v3713_v50, %s3800_s12 }
  0x7e   : > { %1790 = vrot.lane.b32.xlu1 %v3715_v51, %s3800_s12 }
  0x81   : > { %1786 = vrot.lane.b32.xlu0 %v3710_v48, %s3800_s12 }
  0x82   : > { %1792 = vrot.lane.b32.xlu1 %v4016_v52, %s3800_s12 }
  0x85   : > { %1794 = vrot.lane.b32.xlu0 %v4049_v53, %s3800_s12 }
  0x86   : > { %1954 = vrot.lane.b32.xlu1 %v3713_v50, %s3801_s22 }
  0x89   : > { %1956 = vrot.lane.b32.xlu0 %v3715_v51, %s3801_s22 }
  0x8a   : > { %1952 = vrot.lane.b32.xlu1 %v3710_v48, %s3801_s22 }
  0x8d   : > { %1958 = vrot.lane.b32.xlu0 %v4016_v52, %s3801_s22 }
  0x8e   : > { %1960 = vrot.lane.b32.xlu1 %v4049_v53, %s3801_s22 }
  0x91   : > { %800 = vrot.lane.b32.xlu0 %v4049_v53, %s3794_s6 }
  0x92   : > { %802 = vrot.lane.b32.xlu1 %v4079_v55, %s3794_s6 }
  0x95   : > { %804 = vrot.lane.b32.xlu0 %v4084_v56, %s3794_s6 }
  0x96   : > { %806 = vrot.lane.b32.xlu1 %v4089_v57, %s3794_s6 }
  0x99   : > { %966 = vrot.lane.b32.xlu0 %v4049_v53, %s3795_s7 }
  0x9a   : > { %968 = vrot.lane.b32.xlu1 %v4079_v55, %s3795_s7 }
  0x9d   : > { %970 = vrot.lane.b32.xlu0 %v4084_v56, %s3795_s7 }
  0x9e   : > { %972 = vrot.lane.b32.xlu1 %v4089_v57, %s3795_s7 }
  0xa1   : > { %1132 = vrot.lane.b32.xlu0 %v4049_v53, %s3796_s8 }
  0xa2   : > { %1134 = vrot.lane.b32.xlu1 %v4079_v55, %s3796_s8 }
  0xa5   : > { %1136 = vrot.lane.b32.xlu0 %v4084_v56, %s3796_s8 }
  0xa6   : > { %1138 = vrot.lane.b32.xlu1 %v4089_v57, %s3796_s8 }
  0xa9   : > { %1298 = vrot.lane.b32.xlu0 %v4049_v53, %s3797_s9 }
  0xaa   : > { %1300 = vrot.lane.b32.xlu1 %v4079_v55, %s3797_s9 }
  0xad   : > { %1302 = vrot.lane.b32.xlu0 %v4084_v56, %s3797_s9 }
  0xae   : > { %1304 = vrot.lane.b32.xlu1 %v4089_v57, %s3797_s9 }
  0xb1   : > { %1464 = vrot.lane.b32.xlu0 %v4049_v53, %s3798_s10 }
  0xb2   : > { %1466 = vrot.lane.b32.xlu1 %v4079_v55, %s3798_s10 }
  0xb3   : > { %v793_v58 = vpop.permute.xlu0 %792 }
  0xb4   : > { %v791_v59 = vpop.permute.xlu1 %790 }
  0xb5   : > { %1468 = vrot.lane.b32.xlu0 %v4084_v56, %s3798_s10  ;;  %v839_v63 = vsel %vm838_vm1, %v791_v59, %v793_v58 }
  0xb6   : > { %1470 = vrot.lane.b32.xlu1 %v4089_v57, %s3798_s10 }
  0xb7   : > { %v795_v60 = vpop.permute.xlu0 %794 }
  0xb8   : > { %v797_v61 = vpop.permute.xlu1 %796  ;;  %v840_v62 = vsel %vm838_vm1, %v793_v58, %v795_v60 }
  0xb9   : > { %1630 = vrot.lane.b32.xlu0 %v4079_v55, %s3799_s11  ;;  %2322 = vmatprep.subr.bf16.mxu0 %v840_v62  ;;  %v841_v4 = vsel %vm838_vm1, %v795_v60, %v797_v61 }
  0xba   : > { %1632 = vrot.lane.b32.xlu1 %v4084_v56, %s3799_s11  ;;  %2323 = vmatpush1.bf16.msra.mxu0 %v839_v63 }
  0xbb   : > { %v4136_v1 = vpop.permute.xlu0 %798 }
  0xbc   : > { %v959_v2 = vpop.permute.xlu1 %958  ;;  %v842_v3 = vsel %vm838_vm1, %v797_v61, %v4136_v1 }
  0xbd   : > { %1634 = vrot.lane.b32.xlu0 %v4089_v57, %s3799_s11  ;;  %2373 = vmatprep.subr.bf16.mxu1 %v842_v3 }
  0xbe   : > { %1636 = vrot.lane.b32.xlu1 %v4134_v0, %s3799_s11  ;;  %2374 = vmatpush1.bf16.msra.mxu1 %v841_v4 }
  0xbf   : > { %v961_v5 = vpop.permute.xlu0 %960 }
  0xc0   : > { %v957_v6 = vpop.permute.xlu1 %956  ;;  %v1006_v7 = vsel %vm1004_vm2, %v959_v2, %v961_v5 }
  0xc1   : > { %1796 = vrot.lane.b32.xlu0 %v4079_v55, %s3800_s12  ;;  %2324 = vmatprep.subr.bf16.mxu0 %v1006_v7  ;;  %v1005_v8 = vsel %vm1004_vm2, %v957_v6, %v959_v2  ;;  %v4257_v6 = vld [vmem:[%s4006_s5 + $0x34] ss:$92 sps:$4 sm:$0xff]  }
  0xc2   : > { %1798 = vrot.lane.b32.xlu1 %v4084_v56, %s3800_s12  ;;  %2325 = vmatpush1.bf16.msra.mxu0 %v1005_v8 }
  0xc3   : > { %v963_v9 = vpop.permute.xlu0 %962 }
  0xc4   : > { %v4151_v10 = vpop.permute.xlu1 %964  ;;  %v1007_v11 = vsel %vm1004_vm2, %v961_v5, %v963_v9 }
  0xc5   : > { %1800 = vrot.lane.b32.xlu0 %v4089_v57, %s3800_s12  ;;  %v1008_v12 = vsel %vm1004_vm2, %v963_v9, %v4151_v10 }
  0xc6   : > { %1802 = vrot.lane.b32.xlu1 %v4134_v0, %s3800_s12  ;;  %2375 = vmatprep.subr.bf16.mxu1 %v1008_v12  ;;  %v4266_v12 = vld [vmem:[%s5199_s2] ss:$8 sps:$4 sm:$0xff]  }
  0xc7   : > { %2376 = vmatpush1.bf16.msra.mxu1 %v1007_v11  ;;  %v1125_v13 = vpop.permute.xlu0 %1124 }
  0xc8   : > { %v1127_v14 = vpop.permute.xlu1 %1126 }
  0xc9   : > { %1962 = vrot.lane.b32.xlu0 %v4079_v55, %s3801_s22  ;;  %v1172_v15 = vsel %vm1170_vm3, %v1125_v13, %v1127_v14 }
  0xca   : > { %1964 = vrot.lane.b32.xlu1 %v4084_v56, %s3801_s22  ;;  %2326 = vmatprep.subr.bf16.mxu0 %v1172_v15 }
  0xcb   : > { %v1123_v16 = vpop.permute.xlu0 %1122 }
  0xcc   : > { %v1129_v17 = vpop.permute.xlu1 %1128  ;;  %v1171_v18 = vsel %vm1170_vm3, %v1123_v16, %v1125_v13  ;;  %v2072_v13 = vld [vmem:[%s5199_s2 + $0x10] sm:$0xff] }
  0xcd   : > { %1966 = vrot.lane.b32.xlu0 %v4089_v57, %s3801_s22  ;;  %2327 = vmatpush1.bf16.msra.mxu0 %v1171_v18  ;;  %v1173_v23 = vsel %vm1170_vm3, %v1127_v14, %v1129_v17 }
  0xce   : > { %1968 = vrot.lane.b32.xlu1 %v4134_v0, %s3801_s22 }
  0xcf   : > { %v4173_v20 = vpop.permute.xlu0 %1130 }
  0xd0   : > { %v1291_v21 = vpop.permute.xlu1 %1290  ;;  %v1174_v22 = vsel %vm1170_vm3, %v1129_v17, %v4173_v20  ;;  %v4277_v17 = vcombine.high %v2072_v13, %v2072_v13 }
  0xd1   : > { %808 = vrot.lane.b32.xlu0 %v4134_v0, %s3794_s6  ;;  %2377 = vmatprep.subr.bf16.mxu1 %v1174_v22 }
  0xd2   : > { %810 = vrot.lane.b32.xlu1 %v4171_v19, %s3794_s6  ;;  %2378 = vmatpush1.bf16.msra.mxu1 %v1173_v23 }
  0xd3   : > { %v1293_v26 = vpop.permute.xlu0 %1292 }
  0xd4   : > { %v1289_v27 = vpop.permute.xlu1 %1288  ;;  %v1338_v28 = vsel %vm1336_vm4, %v1291_v21, %v1293_v26 }
  0xd5   : > { %812 = vrot.lane.b32.xlu0 %v4181_v24, %s3794_s6  ;;  %2328 = vmatprep.subr.bf16.mxu0 %v1338_v28  ;;  %v1337_v29 = vsel %vm1336_vm4, %v1289_v27, %v1291_v21 }
  0xd6   : > { %814 = vrot.lane.b32.xlu1 %v4186_v25, %s3794_s6  ;;  %2329 = vmatpush1.bf16.msra.mxu0 %v1337_v29 }
  0xd7   : > { %v1295_v30 = vpop.permute.xlu0 %1294 }
  0xd8   : > { %v4194_v31 = vpop.permute.xlu1 %1296  ;;  %v1339_v32 = vsel %vm1336_vm4, %v1293_v26, %v1295_v30  ;;  %v4295_v26 = vcombine.low %v2072_v13, %v2072_v13 }
  0xd9   : > { %974 = vrot.lane.b32.xlu0 %v4134_v0, %s3795_s7  ;;  %v1340_v33 = vsel %vm1336_vm4, %v1295_v30, %v4194_v31 }
  0xda   : > { %976 = vrot.lane.b32.xlu1 %v4171_v19, %s3795_s7  ;;  %2379 = vmatprep.subr.bf16.mxu1 %v1340_v33 }
  0xdb   : > { %2380 = vmatpush1.bf16.msra.mxu1 %v1339_v32  ;;  %v1457_v34 = vpop.permute.xlu0 %1456  ;;  %v4323_v32 = vld [vmem:[%s4006_s5 + $0x38] ss:$92 sps:$4 sm:$0xff]  }
  0xdc   : > { %v1459_v35 = vpop.permute.xlu1 %1458 }
  0xdd   : > { %978 = vrot.lane.b32.xlu0 %v4181_v24, %s3795_s7  ;;  %v1504_v36 = vsel %vm1502_vm5, %v1457_v34, %v1459_v35 }
  0xde   : > { %980 = vrot.lane.b32.xlu1 %v4186_v25, %s3795_s7  ;;  %2330 = vmatprep.subr.bf16.mxu0 %v1504_v36  ;;  %v4336_v36 = vld [vmem:[%s4006_s5 + $0x3c] ss:$92 sps:$4 sm:$0xff]  }
  0xdf   : > { %v1455_v37 = vpop.permute.xlu0 %1454 }
  0xe0   : > { %v1461_v38 = vpop.permute.xlu1 %1460  ;;  %v1503_v39 = vsel %vm1502_vm5, %v1455_v37, %v1457_v34  ;;  %v4342_v37 = vld [vmem:[%s4006_s5 + $0x40] ss:$92 sps:$4 sm:$0xff]  }
  0xe1   : > { %1140 = vrot.lane.b32.xlu0 %v4134_v0, %s3796_s8  ;;  %2331 = vmatpush1.bf16.msra.mxu0 %v1503_v39  ;;  %v1505_v43 = vsel %vm1502_vm5, %v1459_v35, %v1461_v38 }
  0xe2   : > { %1142 = vrot.lane.b32.xlu1 %v4171_v19, %s3796_s8 }
  0xe3   : > { %v4213_v40 = vpop.permute.xlu0 %1462 }
  0xe4   : > { %v1623_v41 = vpop.permute.xlu1 %1622  ;;  %v1506_v42 = vsel %vm1502_vm5, %v1461_v38, %v4213_v40 }
  0xe5   : > { %1144 = vrot.lane.b32.xlu0 %v4181_v24, %s3796_s8  ;;  %2381 = vmatprep.subr.bf16.mxu1 %v1506_v42 }
  0xe6   : > { %1146 = vrot.lane.b32.xlu1 %v4186_v25, %s3796_s8  ;;  %2382 = vmatpush1.bf16.msra.mxu1 %v1505_v43 }
  0xe7   : > { %v1625_v44 = vpop.permute.xlu0 %1624 }
  0xe8   : > { %v1621_v45 = vpop.permute.xlu1 %1620  ;;  %v1670_v46 = vsel %vm1668_vm6, %v1623_v41, %v1625_v44 }
  0xe9   : > { %1306 = vrot.lane.b32.xlu0 %v4134_v0, %s3797_s9  ;;  %2332 = vmatprep.subr.bf16.mxu0 %v1670_v46  ;;  %v1669_v47 = vsel %vm1668_vm6, %v1621_v45, %v1623_v41 }
  0xea   : > { %1308 = vrot.lane.b32.xlu1 %v4171_v19, %s3797_s9  ;;  %2333 = vmatpush1.bf16.msra.mxu0 %v1669_v47 }
  0xeb   : > { %v1627_v48 = vpop.permute.xlu0 %1626 }
  0xec   : > { %v4228_v49 = vpop.permute.xlu1 %1628  ;;  %v1671_v50 = vsel %vm1668_vm6, %v1625_v44, %v1627_v48 }
  0xed   : > { %1310 = vrot.lane.b32.xlu0 %v4181_v24, %s3797_s9  ;;  %v1672_v51 = vsel %vm1668_vm6, %v1627_v48, %v4228_v49 }
  0xee   : > { %1312 = vrot.lane.b32.xlu1 %v4186_v25, %s3797_s9  ;;  %2383 = vmatprep.subr.bf16.mxu1 %v1672_v51 }
  0xef   : > { %2384 = vmatpush1.bf16.msra.mxu1 %v1671_v50  ;;  %v1789_v58 = vpop.permute.xlu0 %1788 }
  0xf0   : > { %v1791_v59 = vpop.permute.xlu1 %1790 }
  0xf1   : > { %1472 = vrot.lane.b32.xlu0 %v4134_v0, %s3798_s10  ;;  %v1836_v60 = vsel %vm1834_vm7, %v1789_v58, %v1791_v59 }
  0xf2   : > { %1474 = vrot.lane.b32.xlu1 %v4171_v19, %s3798_s10  ;;  %2334 = vmatprep.subr.bf16.mxu0 %v1836_v60 }
  0xf3   : > { %v1787_v61 = vpop.permute.xlu0 %1786 }
  0xf4   : > { %v1793_v62 = vpop.permute.xlu1 %1792  ;;  %v1835_v63 = vsel %vm1834_vm7, %v1787_v61, %v1789_v58 }
  0xf5   : > { %1476 = vrot.lane.b32.xlu0 %v4181_v24, %s3798_s10  ;;  %2335 = vmatpush1.bf16.msra.mxu0 %v1835_v63  ;;  %v1837_v5 = vsel %vm1834_vm7, %v1791_v59, %v1793_v62 }
  0xf6   : > { %1478 = vrot.lane.b32.xlu1 %v4186_v25, %s3798_s10 }
  0xf7   : > { %v4247_v2 = vpop.permute.xlu0 %1794 }
  0xf8   : > { %v1955_v3 = vpop.permute.xlu1 %1954  ;;  %v1838_v4 = vsel %vm1834_vm7, %v1793_v62, %v4247_v2 }
  0xf9   : > { %1638 = vrot.lane.b32.xlu0 %v4171_v19, %s3799_s11  ;;  %2385 = vmatprep.subr.bf16.mxu1 %v1838_v4 }
  0xfa   : > { %1640 = vrot.lane.b32.xlu1 %v4181_v24, %s3799_s11  ;;  %2386 = vmatpush1.bf16.msra.mxu1 %v1837_v5 }
  0xfb   : > { %v1957_v7 = vpop.permute.xlu0 %1956 }
  0xfc   : > { %v1953_v8 = vpop.permute.xlu1 %1952  ;;  %v2002_v9 = vsel %vm2000_vm8, %v1955_v3, %v1957_v7 }
  0xfd   : > { %1642 = vrot.lane.b32.xlu0 %v4186_v25, %s3799_s11  ;;  %2336 = vmatprep.subr.bf16.mxu0 %v2002_v9  ;;  %v2001_v11 = vsel %vm2000_vm8, %v1953_v8, %v1955_v3 }
  0xfe   : > { %1644 = vrot.lane.b32.xlu1 %v4257_v6, %s3799_s11  ;;  %2337 = vmatpush1.bf16.msra.mxu0 %v2001_v11 }
  0xff   : > { %v1959_v14 = vpop.permute.xlu0 %1958  ;;  %2422 = vmatprep.subr.bf16.mxu0 %v4049_v53 }
 0x100   : > { %v4274_v15 = vpop.permute.xlu1 %1960  ;;  %v2003_v16 = vsel %vm2000_vm8, %v1957_v7, %v1959_v14 }
 0x101   : > { %1804 = vrot.lane.b32.xlu0 %v4171_v19, %s3800_s12  ;;  %v2004_v18 = vsel %vm2000_vm8, %v1959_v14, %v4274_v15  ;;  %2353 = vmatmul.mubr.bf16.vlgmr.msra.gmra.mrb[0].mxu0 %v4266_v12 }
 0x102   : > { %1806 = vrot.lane.b32.xlu1 %v4181_v24, %s3800_s12  ;;  %2387 = vmatprep.subr.bf16.mxu1 %v2004_v18 }
 0x103   : > { %2388 = vmatpush1.bf16.msra.mxu1 %v2003_v16  ;;  %2423 = vmatpush1.bf16.msra.mxu0 %v4016_v52  ;;  %v801_v53 = vpop.permute.xlu0 %800 }
 0x104   : > { %v803_v21 = vpop.permute.xlu1 %802  ;;  %2473 = vmatprep.subr.bf16.mxu1 %v4084_v56  ;;  %v843_v22 = vsel %vm838_vm1, %v4136_v1, %v801_v53  ;;  %3548 = vmatprep.mubr.msk.bf16.mxu0 %vm2313_vm0, %v4277_v17 }
 0x105   : > { %1808 = vrot.lane.b32.xlu0 %v4186_v25, %s3800_s12  ;;  %v844_v23 = vsel %vm838_vm1, %v801_v53, %v803_v21 }
 0x106   : > { %1810 = vrot.lane.b32.xlu1 %v4257_v6, %s3800_s12  ;;  %2424 = vmatprep.subr.bf16.mxu0 %v844_v23 }
 0x107   : > { %2404 = vmatmul.mubr.bf16.vlgmr.msra.gmra.mrb[0].mxu1 %v4266_v12  ;;  %2425 = vmatpush1.bf16.msra.mxu0 %v843_v22  ;;  %v805_v52 = vpop.permute.xlu0 %804 }
 0x108   : > { %2474 = vmatpush1.bf16.msra.mxu1 %v4079_v55  ;;  %v4301_v56 = vpop.permute.xlu1 %806  ;;  %3550 = vmatprep.mubr.msk.bf16.mxu1 %vm2313_vm0, %v4277_v17  ;;  %v845_v27 = vsel %vm838_vm1, %v803_v21, %v805_v52 }
 0x109   : > { %1970 = vrot.lane.b32.xlu0 %v4171_v19, %s3801_s22  ;;  %v846_v1 = vsel %vm838_vm1, %v805_v52, %v4301_v56  ;;  %2363 = vmatmul.mubr.bf16.gmra.mrb[4].mxu0 %v4295_v26 }
 0x10a   : > { %1972 = vrot.lane.b32.xlu1 %v4181_v24, %s3801_s22  ;;  %2475 = vmatprep.subr.bf16.mxu1 %v846_v1 }
 0x10b   : > { %v967_v55 = vpop.permute.xlu0 %966  ;;  %3551 = vmatprep.mubr.msk.bf16.mxu0 %vm2313_vm0, %v4060_v54 }
 0x10c   : > { %2476 = vmatpush1.bf16.msra.mxu1 %v845_v27  ;;  %v969_v28 = vpop.permute.xlu1 %968  ;;  %v1009_v29 = vsel %vm1004_vm2, %v4151_v10, %v967_v55  ;;  %v4428_v27 = vld [vmem:[%s4006_s5 + $0x44] ss:$92 sps:$4 sm:$0xff]  }
 0x10d   : > { %1974 = vrot.lane.b32.xlu0 %v4186_v25, %s3801_s22  ;;  %v1010_v30 = vsel %vm1004_vm2, %v967_v55, %v969_v28 }
 0x10e   : > { %1976 = vrot.lane.b32.xlu1 %v4257_v6, %s3801_s22  ;;  %2426 = vmatprep.subr.bf16.mxu0 %v1010_v30 }
 0x10f   : > { %2427 = vmatpush1.bf16.msra.mxu0 %v1009_v29  ;;  %v971_v33 = vpop.permute.xlu0 %970  ;;  %2414 = vmatmul.mubr.bf16.gmra.mrb[4].mxu1 %v4295_v26 }
 0x110   : > { %v4326_v34 = vpop.permute.xlu1 %972  ;;  %v1011_v10 = vsel %vm1004_vm2, %v969_v28, %v971_v33  ;;  %3553 = vmatprep.mubr.msk.bf16.mxu1 %vm2313_vm0, %v4060_v54 }
 0x111   : > { %816 = vrot.lane.b32.xlu0 %v4257_v6, %s3794_s6  ;;  %v1012_v35 = vsel %vm1004_vm2, %v971_v33, %v4326_v34 }
 0x112   : > { %818 = vrot.lane.b32.xlu1 %v4323_v32, %s3794_s6  ;;  %2477 = vmatprep.subr.bf16.mxu1 %v1012_v35 }
 0x113   : > { %2478 = vmatpush1.bf16.msra.mxu1 %v1011_v10  ;;  %v1133_v38 = vpop.permute.xlu0 %1132 }
 0x114   : > { %v1135_v39 = vpop.permute.xlu1 %1134  ;;  %v1175_v41 = vsel %vm1170_vm3, %v4173_v20, %v1133_v38 }
 0x115   : > { %820 = vrot.lane.b32.xlu0 %v4336_v36, %s3794_s6  ;;  %v1176_v42 = vsel %vm1170_vm3, %v1133_v38, %v1135_v39 }
 0x116   : > { %822 = vrot.lane.b32.xlu1 %v4342_v37, %s3794_s6  ;;  %2428 = vmatprep.subr.bf16.mxu0 %v1176_v42 }
 0x117   : > { %2429 = vmatpush1.bf16.msra.mxu0 %v1175_v41  ;;  %v1137_v43 = vpop.permute.xlu0 %1136 }
 0x118   : > { %v4354_v44 = vpop.permute.xlu1 %1138  ;;  %v1177_v45 = vsel %vm1170_vm3, %v1135_v39, %v1137_v43 }
 0x119   : > { %982 = vrot.lane.b32.xlu0 %v4257_v6, %s3795_s7  ;;  %v1178_v20 = vsel %vm1170_vm3, %v1137_v43, %v4354_v44 }
 0x11a   : > { %984 = vrot.lane.b32.xlu1 %v4323_v32, %s3795_s7  ;;  %2479 = vmatprep.subr.bf16.mxu1 %v1178_v20 }
 0x11b   : > { %2480 = vmatpush1.bf16.msra.mxu1 %v1177_v45  ;;  %v1299_v46 = vpop.permute.xlu0 %1298 }
 0x11c   : > { %v1301_v47 = vpop.permute.xlu1 %1300  ;;  %v1341_v48 = vsel %vm1336_vm4, %v4194_v31, %v1299_v46 }
 0x11d   : > { %986 = vrot.lane.b32.xlu0 %v4336_v36, %s3795_s7  ;;  %v1342_v50 = vsel %vm1336_vm4, %v1299_v46, %v1301_v47  ;;  %v4483_v46 = vld [vmem:[%s4006_s5 + $0x48] ss:$92 sps:$4 sm:$0xff]  }
 0x11e   : > { %988 = vrot.lane.b32.xlu1 %v4342_v37, %s3795_s7  ;;  %2430 = vmatprep.subr.bf16.mxu0 %v1342_v50 }
 0x11f   : > { %2431 = vmatpush1.bf16.msra.mxu0 %v1341_v48  ;;  %v1303_v51 = vpop.permute.xlu0 %1302 }
 0x120   : > { %v4370_v58 = vpop.permute.xlu1 %1304  ;;  %v1343_v59 = vsel %vm1336_vm4, %v1301_v47, %v1303_v51 }
 0x121   : > { %1148 = vrot.lane.b32.xlu0 %v4257_v6, %s3796_s8  ;;  %v1344_v31 = vsel %vm1336_vm4, %v1303_v51, %v4370_v58  ;;  %v4496_v51 = vld [vmem:[%s4006_s5 + $0x4c] ss:$92 sps:$4 sm:$0xff]  }
 0x122   : > { %1150 = vrot.lane.b32.xlu1 %v4323_v32, %s3796_s8  ;;  %2481 = vmatprep.subr.bf16.mxu1 %v1344_v31 }
 0x123   : > { %2482 = vmatpush1.bf16.msra.mxu1 %v1343_v59  ;;  %v1465_v60 = vpop.permute.xlu0 %1464  ;;  %v4501_v59 = vld [vmem:[%s4006_s5 + $0x50] ss:$92 sps:$4 sm:$0xff]  }
 0x124   : > { %v1467_v61 = vpop.permute.xlu1 %1466  ;;  %v1507_v62 = vsel %vm1502_vm5, %v4213_v40, %v1465_v60 }
 0x125   : > { %1152 = vrot.lane.b32.xlu0 %v4336_v36, %s3796_s8  ;;  %v1508_v63 = vsel %vm1502_vm5, %v1465_v60, %v1467_v61 }
 0x126   : > { %1154 = vrot.lane.b32.xlu1 %v4342_v37, %s3796_s8  ;;  %2432 = vmatprep.subr.bf16.mxu0 %v1508_v63 }
 0x127   : > { %2433 = vmatpush1.bf16.msra.mxu0 %v1507_v62  ;;  %v1469_v3 = vpop.permute.xlu0 %1468  ;;  %v3802_v62 = vmov 0  }
 0x128   : > { %v4386_v4 = vpop.permute.xlu1 %1470  ;;  %v1509_v5 = vsel %vm1502_vm5, %v1467_v61, %v1469_v3  ;;  %3709 = vset.pattern.permute.xlu1 %v3802_v62  ;;  %3708 = vset.pattern.permute.xlu0 %v3802_v62 }
 0x129   : > { %1314 = vrot.lane.b32.xlu0 %v4257_v6, %s3797_s9  ;;  %v1510_v40 = vsel %vm1502_vm5, %v1469_v3, %v4386_v4 }
 0x12a   : > { %1316 = vrot.lane.b32.xlu1 %v4323_v32, %s3797_s9  ;;  %2483 = vmatprep.subr.bf16.mxu1 %v1510_v40 }
 0x12b   : > { %2484 = vmatpush1.bf16.msra.mxu1 %v1509_v5  ;;  %v1631_v7 = vpop.permute.xlu0 %1630 }
 0x12c   : > { %v1633_v8 = vpop.permute.xlu1 %1632  ;;  %v1673_v9 = vsel %vm1668_vm6, %v4228_v49, %v1631_v7 }
 0x12d   : > { %1318 = vrot.lane.b32.xlu0 %v4336_v36, %s3797_s9  ;;  %v1674_v11 = vsel %vm1668_vm6, %v1631_v7, %v1633_v8 }
 0x12e   : > { %1320 = vrot.lane.b32.xlu1 %v4342_v37, %s3797_s9  ;;  %2434 = vmatprep.subr.bf16.mxu0 %v1674_v11 }
 0x12f   : > { %2435 = vmatpush1.bf16.msra.mxu0 %v1673_v9  ;;  %v1635_v13 = vpop.permute.xlu0 %1634 }
 0x130   : > { %v4402_v14 = vpop.permute.xlu1 %1636  ;;  %v1675_v16 = vsel %vm1668_vm6, %v1633_v8, %v1635_v13 }
 0x131   : > { %1480 = vrot.lane.b32.xlu0 %v4257_v6, %s3798_s10  ;;  %v1676_v49 = vsel %vm1668_vm6, %v1635_v13, %v4402_v14 }
 0x132   : > { %1482 = vrot.lane.b32.xlu1 %v4323_v32, %s3798_s10  ;;  %2485 = vmatprep.subr.bf16.mxu1 %v1676_v49 }
 0x133   : > { %2486 = vmatpush1.bf16.msra.mxu1 %v1675_v16  ;;  %v1797_v18 = vpop.permute.xlu0 %1796 }
 0x134   : > { %v1799_v53 = vpop.permute.xlu1 %1798  ;;  %v1839_v21 = vsel %vm1834_vm7, %v4247_v2, %v1797_v18 }
 0x135   : > { %1484 = vrot.lane.b32.xlu0 %v4336_v36, %s3798_s10  ;;  %v1840_v22 = vsel %vm1834_vm7, %v1797_v18, %v1799_v53 }
 0x136   : > { %1486 = vrot.lane.b32.xlu1 %v4342_v37, %s3798_s10  ;;  %2436 = vmatprep.subr.bf16.mxu0 %v1840_v22 }
 0x137   : > { %2437 = vmatpush1.bf16.msra.mxu0 %v1839_v21  ;;  %v1801_v23 = vpop.permute.xlu0 %1800 }
 0x138   : > { %v4418_v52 = vpop.permute.xlu1 %1802  ;;  %v1841_v1 = vsel %vm1834_vm7, %v1799_v53, %v1801_v23 }
 0x139   : > { %1646 = vrot.lane.b32.xlu0 %v4323_v32, %s3799_s11  ;;  %v1842_v2 = vsel %vm1834_vm7, %v1801_v23, %v4418_v52 }
 0x13a   : > { %1648 = vrot.lane.b32.xlu1 %v4336_v36, %s3799_s11  ;;  %2487 = vmatprep.subr.bf16.mxu1 %v1842_v2 }
 0x13b   : > { %2488 = vmatpush1.bf16.msra.mxu1 %v1841_v1  ;;  %v1963_v55 = vpop.permute.xlu0 %1962 }
 0x13c   : > { %v1965_v28 = vpop.permute.xlu1 %1964  ;;  %v2005_v29 = vsel %vm2000_vm8, %v4274_v15, %v1963_v55 }
 0x13d   : > { %1650 = vrot.lane.b32.xlu0 %v4342_v37, %s3799_s11  ;;  %v2006_v30 = vsel %vm2000_vm8, %v1963_v55, %v1965_v28 }
 0x13e   : > { %1652 = vrot.lane.b32.xlu1 %v4428_v27, %s3799_s11  ;;  %2438 = vmatprep.subr.bf16.mxu0 %v2006_v30 }
 0x13f   : > { %2439 = vmatpush1.bf16.msra.mxu0 %v2005_v29  ;;  %v1967_v33 = vpop.permute.xlu0 %1966 }
 0x140   : > { %v4437_v10 = vpop.permute.xlu1 %1968  ;;  %2524 = vmatprep.subr.bf16.mxu0 %v4134_v0  ;;  %v2007_v35 = vsel %vm2000_vm8, %v1965_v28, %v1967_v33 }
 0x141   : > { %1812 = vrot.lane.b32.xlu0 %v4323_v32, %s3800_s12  ;;  %v2008_v15 = vsel %vm2000_vm8, %v1967_v33, %v4437_v10 }
 0x142   : > { %1814 = vrot.lane.b32.xlu1 %v4336_v36, %s3800_s12  ;;  %2489 = vmatprep.subr.bf16.mxu1 %v2008_v15 }
 0x143   : > { %2455 = vmatmul.mubr.bf16.vlgmr.msra.gmra.mrb[8].mxu0 %v4266_v12  ;;  %2490 = vmatpush1.bf16.msra.mxu1 %v2007_v35  ;;  %v809_v38 = vpop.permute.xlu0 %808 }
 0x144   : > { %2525 = vmatpush1.bf16.msra.mxu0 %v4089_v57  ;;  %v811_v39 = vpop.permute.xlu1 %810  ;;  %2575 = vmatprep.subr.bf16.mxu1 %v4181_v24  ;;  %v847_v41 = vsel %vm838_vm1, %v4301_v56, %v809_v38 }
 0x145   : > { %1816 = vrot.lane.b32.xlu0 %v4342_v37, %s3800_s12  ;;  %v848_v0 = vsel %vm838_vm1, %v809_v38, %v811_v39  ;;  %3552 = vmatprep.mubr.msk.bf16.mxu0 %vm2313_vm0, %v4277_v17 }
 0x146   : > { %1818 = vrot.lane.b32.xlu1 %v4428_v27, %s3800_s12  ;;  %2526 = vmatprep.subr.bf16.mxu0 %v848_v0 }
 0x147   : > { %2506 = vmatmul.mubr.bf16.vlgmr.msra.gmra.mrb[8].mxu1 %v4266_v12  ;;  %v813_v57 = vpop.permute.xlu0 %812 }
 0x148   : > { %2527 = vmatpush1.bf16.msra.mxu0 %v847_v41  ;;  %2576 = vmatpush1.bf16.msra.mxu1 %v4171_v19  ;;  %v4461_v24 = vpop.permute.xlu1 %814  ;;  %v849_v42 = vsel %vm838_vm1, %v811_v39, %v813_v57 }
 0x149   : > { %1978 = vrot.lane.b32.xlu0 %v4323_v32, %s3801_s22  ;;  %v850_v56 = vsel %vm838_vm1, %v813_v57, %v4461_v24  ;;  %3554 = vmatprep.mubr.msk.bf16.mxu1 %vm2313_vm0, %v4277_v17 }
 0x14a   : > { %1980 = vrot.lane.b32.xlu1 %v4336_v36, %s3801_s22  ;;  %2577 = vmatprep.subr.bf16.mxu1 %v850_v56 }
 0x14b   : > { %v975_v43 = vpop.permute.xlu0 %974  ;;  %2465 = vmatmul.mubr.bf16.gmra.mrb[12].mxu0 %v4295_v26 }
 0x14c   : > { %2578 = vmatpush1.bf16.msra.mxu1 %v849_v42  ;;  %v977_v19 = vpop.permute.xlu1 %976  ;;  %v1013_v45 = vsel %vm1004_vm2, %v4326_v34, %v975_v43  ;;  %3555 = vmatprep.mubr.msk.bf16.mxu0 %vm2313_vm0, %v4060_v54  ;;  %v4586_v42 = vld [vmem:[%s4006_s5 + $0x54] ss:$92 sps:$4 sm:$0xff]  }
 0x14d   : > { %1982 = vrot.lane.b32.xlu0 %v4342_v37, %s3801_s22  ;;  %v1014_v20 = vsel %vm1004_vm2, %v975_v43, %v977_v19 }
 0x14e   : > { %1984 = vrot.lane.b32.xlu1 %v4428_v27, %s3801_s22  ;;  %2528 = vmatprep.subr.bf16.mxu0 %v1014_v20 }
 0x14f   : > { %2529 = vmatpush1.bf16.msra.mxu0 %v1013_v45  ;;  %v979_v47 = vpop.permute.xlu0 %978  ;;  %2516 = vmatmul.mubr.bf16.gmra.mrb[12].mxu1 %v4295_v26 }
 0x150   : > { %v4486_v34 = vpop.permute.xlu1 %980  ;;  %v1015_v48 = vsel %vm1004_vm2, %v977_v19, %v979_v47  ;;  %3557 = vmatprep.mubr.msk.bf16.mxu1 %vm2313_vm0, %v4060_v54 }
 0x151   : > { %824 = vrot.lane.b32.xlu0 %v4428_v27, %s3794_s6  ;;  %v1016_v50 = vsel %vm1004_vm2, %v979_v47, %v4486_v34 }
 0x152   : > { %826 = vrot.lane.b32.xlu1 %v4483_v46, %s3794_s6  ;;  %2579 = vmatprep.subr.bf16.mxu1 %v1016_v50 }
 0x153   : > { %2580 = vmatpush1.bf16.msra.mxu1 %v1015_v48  ;;  %v1141_v31 = vpop.permute.xlu0 %1140 }
 0x154   : > { %v1143_v60 = vpop.permute.xlu1 %1142  ;;  %v1179_v54 = vsel %vm1170_vm3, %v4354_v44, %v1141_v31 }
 0x155   : > { %828 = vrot.lane.b32.xlu0 %v4496_v51, %s3794_s6  ;;  %v1180_v61 = vsel %vm1170_vm3, %v1141_v31, %v1143_v60 }
 0x156   : > { %830 = vrot.lane.b32.xlu1 %v4501_v59, %s3794_s6  ;;  %2530 = vmatprep.subr.bf16.mxu0 %v1180_v61 }
 0x157   : > { %2531 = vmatpush1.bf16.msra.mxu0 %v1179_v54  ;;  %v1145_v63 = vpop.permute.xlu0 %1144 }
 0x158   : > { %v4512_v3 = vpop.permute.xlu1 %1146  ;;  %v1181_v44 = vsel %vm1170_vm3, %v1143_v60, %v1145_v63 }
 0x159   : > { %990 = vrot.lane.b32.xlu0 %v4428_v27, %s3795_s7  ;;  %v1182_v5 = vsel %vm1170_vm3, %v1145_v63, %v4512_v3 }
 0x15a   : > { %992 = vrot.lane.b32.xlu1 %v4483_v46, %s3795_s7  ;;  %2581 = vmatprep.subr.bf16.mxu1 %v1182_v5  ;;  %v4636_v5 = vld [vmem:[%s5199_s2 + $0x4] ss:$8 sps:$4 sm:$0xff]  }
 0x15b   : > { %2582 = vmatpush1.bf16.msra.mxu1 %v1181_v44  ;;  %v1307_v40 = vpop.permute.xlu0 %1306 }
 0x15c   : > { %v1309_v7 = vpop.permute.xlu1 %1308  ;;  %v1345_v8 = vsel %vm1336_vm4, %v4370_v58, %v1307_v40 }
 0x15d   : > { %994 = vrot.lane.b32.xlu0 %v4496_v51, %s3795_s7  ;;  %v1346_v9 = vsel %vm1336_vm4, %v1307_v40, %v1309_v7 }
 0x15e   : > { %996 = vrot.lane.b32.xlu1 %v4501_v59, %s3795_s7  ;;  %2532 = vmatprep.subr.bf16.mxu0 %v1346_v9 }
 0x15f   : > { %2533 = vmatpush1.bf16.msra.mxu0 %v1345_v8  ;;  %v1311_v11 = vpop.permute.xlu0 %1310 }
 0x160   : > { %v4528_v13 = vpop.permute.xlu1 %1312  ;;  %v1347_v16 = vsel %vm1336_vm4, %v1309_v7, %v1311_v11 }
 0x161   : > { %1156 = vrot.lane.b32.xlu0 %v4428_v27, %s3796_s8  ;;  %v1348_v58 = vsel %vm1336_vm4, %v1311_v11, %v4528_v13 }
 0x162   : > { %1158 = vrot.lane.b32.xlu1 %v4483_v46, %s3796_s8  ;;  %2583 = vmatprep.subr.bf16.mxu1 %v1348_v58 }
 0x163   : > { %2584 = vmatpush1.bf16.msra.mxu1 %v1347_v16  ;;  %v1473_v49 = vpop.permute.xlu0 %1472  ;;  %v4660_v16 = vld [vmem:[%s339_s15] ss:$92 sps:$4 sm:$0xff]  }
 0x164   : > { %v1475_v18 = vpop.permute.xlu1 %1474  ;;  %v1511_v53 = vsel %vm1502_vm5, %v4386_v4, %v1473_v49 }
 0x165   : > { %1160 = vrot.lane.b32.xlu0 %v4496_v51, %s3796_s8  ;;  %v1512_v21 = vsel %vm1502_vm5, %v1473_v49, %v1475_v18 }
 0x166   : > { %1162 = vrot.lane.b32.xlu1 %v4501_v59, %s3796_s8  ;;  %2534 = vmatprep.subr.bf16.mxu0 %v1512_v21 }
 0x167   : > { %2535 = vmatpush1.bf16.msra.mxu0 %v1511_v53  ;;  %v1477_v22 = vpop.permute.xlu0 %1476 }
 0x168   : > { %v4544_v23 = vpop.permute.xlu1 %1478  ;;  %v1513_v1 = vsel %vm1502_vm5, %v1475_v18, %v1477_v22 }
 0x169   : > { %1322 = vrot.lane.b32.xlu0 %v4428_v27, %s3797_s9  ;;  %v1514_v4 = vsel %vm1502_vm5, %v1477_v22, %v4544_v23 }
 0x16a   : > { %1324 = vrot.lane.b32.xlu1 %v4483_v46, %s3797_s9  ;;  %2585 = vmatprep.subr.bf16.mxu1 %v1514_v4 }
 0x16b   : > { %2586 = vmatpush1.bf16.msra.mxu1 %v1513_v1  ;;  %v1639_v2 = vpop.permute.xlu0 %1638 }
 0x16c   : > { %v1641_v55 = vpop.permute.xlu1 %1640  ;;  %v1677_v28 = vsel %vm1668_vm6, %v4402_v14, %v1639_v2 }
 0x16d   : > { %1326 = vrot.lane.b32.xlu0 %v4496_v51, %s3797_s9  ;;  %v1678_v29 = vsel %vm1668_vm6, %v1639_v2, %v1641_v55 }
 0x16e   : > { %1328 = vrot.lane.b32.xlu1 %v4501_v59, %s3797_s9  ;;  %2536 = vmatprep.subr.bf16.mxu0 %v1678_v29 }
 0x16f   : > { %2537 = vmatpush1.bf16.msra.mxu0 %v1677_v28  ;;  %v1643_v30 = vpop.permute.xlu0 %1642 }
 0x170   : > { %v4560_v33 = vpop.permute.xlu1 %1644  ;;  %v1679_v35 = vsel %vm1668_vm6, %v1641_v55, %v1643_v30 }
 0x171   : > { %1488 = vrot.lane.b32.xlu0 %v4428_v27, %s3798_s10  ;;  %v1680_v14 = vsel %vm1668_vm6, %v1643_v30, %v4560_v33 }
 0x172   : > { %1490 = vrot.lane.b32.xlu1 %v4483_v46, %s3798_s10  ;;  %2587 = vmatprep.subr.bf16.mxu1 %v1680_v14 }
 0x173   : > { %2588 = vmatpush1.bf16.msra.mxu1 %v1679_v35  ;;  %v1805_v15 = vpop.permute.xlu0 %1804 }
 0x174   : > { %v1843_v38 = vsel %vm1834_vm7, %v4418_v52, %v1805_v15  ;;  %v1807_v39 = vpop.permute.xlu1 %1806 }
 0x175   : > { %1492 = vrot.lane.b32.xlu0 %v4496_v51, %s3798_s10  ;;  %v1844_v0 = vsel %vm1834_vm7, %v1805_v15, %v1807_v39 }
 0x176   : > { %1494 = vrot.lane.b32.xlu1 %v4501_v59, %s3798_s10  ;;  %2538 = vmatprep.subr.bf16.mxu0 %v1844_v0 }
 0x177   : > { %2539 = vmatpush1.bf16.msra.mxu0 %v1843_v38  ;;  %v1809_v41 = vpop.permute.xlu0 %1808 }
 0x178   : > { %v1845_v57 = vsel %vm1834_vm7, %v1807_v39, %v1809_v41  ;;  %v4577_v56 = vpop.permute.xlu1 %1810 }
 0x179   : > { %1654 = vrot.lane.b32.xlu0 %v4483_v46, %s3799_s11  ;;  %v1846_v52 = vsel %vm1834_vm7, %v1809_v41, %v4577_v56 }
 0x17a   : > { %1656 = vrot.lane.b32.xlu1 %v4496_v51, %s3799_s11  ;;  %2589 = vmatprep.subr.bf16.mxu1 %v1846_v52 }
 0x17b   : > { %2590 = vmatpush1.bf16.msra.mxu1 %v1845_v57  ;;  %v1971_v43 = vpop.permute.xlu0 %1970 }
 0x17c   : > { %v2009_v19 = vsel %vm2000_vm8, %v4437_v10, %v1971_v43  ;;  %v1973_v45 = vpop.permute.xlu1 %1972 }
 0x17d   : > { %1658 = vrot.lane.b32.xlu0 %v4501_v59, %s3799_s11  ;;  %v2010_v20 = vsel %vm2000_vm8, %v1971_v43, %v1973_v45 }
 0x17e   : > { %1660 = vrot.lane.b32.xlu1 %v4586_v42, %s3799_s11  ;;  %2540 = vmatprep.subr.bf16.mxu0 %v2010_v20  ;;  %v3751_v20 = vld [vmem:[%s339_s15 + $0x4] ss:$92 sps:$4 sm:$0xff]  }
 0x17f   : > { %2541 = vmatpush1.bf16.msra.mxu0 %v2009_v19  ;;  %v1975_v47 = vpop.permute.xlu0 %1974 }
 0x180   : > { %v2011_v48 = vsel %vm2000_vm8, %v1973_v45, %v1975_v47  ;;  %v4596_v50 = vpop.permute.xlu1 %1976  ;;  %2626 = vmatprep.subr.bf16.mxu0 %v4257_v6 }
 0x181   : > { %1820 = vrot.lane.b32.xlu0 %v4483_v46, %s3800_s12  ;;  %v2012_v10 = vsel %vm2000_vm8, %v1975_v47, %v4596_v50 }
 0x182   : > { %1822 = vrot.lane.b32.xlu1 %v4496_v51, %s3800_s12  ;;  %2591 = vmatprep.subr.bf16.mxu1 %v2012_v10 }
 0x183   : > { %2557 = vmatmul.mubr.bf16.vlgmr.msra.gmra.mrb[16].mxu0 %v4266_v12  ;;  %2592 = vmatpush1.bf16.msra.mxu1 %v2011_v48  ;;  %v817_v31 = vpop.permute.xlu0 %816 }
 0x184   : > { %2627 = vmatpush1.bf16.msra.mxu0 %v4186_v25  ;;  %v819_v60 = vpop.permute.xlu1 %818  ;;  %2677 = vmatprep.subr.bf16.mxu1 %v4336_v36  ;;  %v851_v6 = vsel %vm838_vm1, %v4461_v24, %v817_v31 }
 0x185   : > { %1824 = vrot.lane.b32.xlu0 %v4501_v59, %s3800_s12  ;;  %v852_v54 = vsel %vm838_vm1, %v817_v31, %v819_v60  ;;  %3556 = vmatprep.mubr.msk.bf16.mxu0 %vm2313_vm0, %v4277_v17 }
 0x186   : > { %1826 = vrot.lane.b32.xlu1 %v4586_v42, %s3800_s12  ;;  %2628 = vmatprep.subr.bf16.mxu0 %v852_v54 }
 0x187   : > { %2608 = vmatmul.mubr.bf16.vlgmr.msra.gmra.mrb[16].mxu1 %v4266_v12  ;;  %v821_v25 = vpop.permute.xlu0 %820 }
 0x188   : > { %2629 = vmatpush1.bf16.msra.mxu0 %v851_v6  ;;  %2678 = vmatpush1.bf16.msra.mxu1 %v4323_v32  ;;  %v4619_v36 = vpop.permute.xlu1 %822  ;;  %v853_v24 = vsel %vm838_vm1, %v819_v60, %v821_v25 }
 0x189   : > { %1986 = vrot.lane.b32.xlu0 %v4483_v46, %s3801_s22  ;;  %v854_v61 = vsel %vm838_vm1, %v821_v25, %v4619_v36  ;;  %3558 = vmatprep.mubr.msk.bf16.mxu1 %vm2313_vm0, %v4277_v17 }
 0x18a   : > { %1988 = vrot.lane.b32.xlu1 %v4496_v51, %s3801_s22  ;;  %2679 = vmatprep.subr.bf16.mxu1 %v854_v61 }
 0x18b   : > { %v983_v63 = vpop.permute.xlu0 %982  ;;  %2567 = vmatmul.mubr.bf16.gmra.mrb[20].mxu0 %v4295_v26 }
 0x18c   : > { %2680 = vmatpush1.bf16.msra.mxu1 %v853_v24  ;;  %v1017_v32 = vsel %vm1004_vm2, %v4486_v34, %v983_v63  ;;  %v985_v44 = vpop.permute.xlu1 %984  ;;  %3559 = vmatprep.mubr.msk.bf16.mxu0 %vm2313_vm0, %v4636_v5  ;;  %v4646_v34 = vld [vmem:[%s4006_s5 + $0x58] ss:$92 sps:$4 sm:$0xff]  }
 0x18d   : > { %1990 = vrot.lane.b32.xlu0 %v4501_v59, %s3801_s22  ;;  %v1018_v40 = vsel %vm1004_vm2, %v983_v63, %v985_v44 }
 0x18e   : > { %1992 = vrot.lane.b32.xlu1 %v4586_v42, %s3801_s22  ;;  %2630 = vmatprep.subr.bf16.mxu0 %v1018_v40 }
 0x18f   : > { %2631 = vmatpush1.bf16.msra.mxu0 %v1017_v32  ;;  %v987_v7 = vpop.permute.xlu0 %986  ;;  %2618 = vmatmul.mubr.bf16.gmra.mrb[20].mxu1 %v4295_v26 }
 0x190   : > { %v1019_v8 = vsel %vm1004_vm2, %v985_v44, %v987_v7  ;;  %v4650_v9 = vpop.permute.xlu1 %988  ;;  %3561 = vmatprep.mubr.msk.bf16.mxu1 %vm2313_vm0, %v4636_v5 }
 0x191   : > { %832 = vrot.lane.b32.xlu0 %v4586_v42, %s3794_s6  ;;  %v1020_v11 = vsel %vm1004_vm2, %v987_v7, %v4650_v9  ;;  %v2280_v7 = vld [vmem:[%s5200_s3] sm:$0xff] }
 0x192   : > { %834 = vrot.lane.b32.xlu1 %v4646_v34, %s3794_s6  ;;  %2681 = vmatprep.subr.bf16.mxu1 %v1020_v11 }
 0x193   : > { %2682 = vmatpush1.bf16.msra.mxu1 %v1019_v8  ;;  %v1149_v58 = vpop.permute.xlu0 %1148 }
 0x194   : > { %v1183_v49 = vsel %vm1170_vm3, %v4512_v3, %v1149_v58  ;;  %v1151_v18 = vpop.permute.xlu1 %1150 }
 0x195   : > { %836 = vrot.lane.b32.xlu0 %v4660_v16, %s3794_s6  ;;  %v1184_v53 = vsel %vm1170_vm3, %v1149_v58, %v1151_v18 }
 0x196   : > { %998 = vrot.lane.b32.xlu1 %v4586_v42, %s3795_s7  ;;  %2632 = vmatprep.subr.bf16.mxu0 %v1184_v53 }
 0x197   : > { %2633 = vmatpush1.bf16.msra.mxu0 %v1183_v49  ;;  %v1153_v21 = vpop.permute.xlu0 %1152 }
 0x198   : > { %v1185_v22 = vsel %vm1170_vm3, %v1151_v18, %v1153_v21  ;;  %v4672_v1 = vpop.permute.xlu1 %1154 }
 0x199   : > { %1000 = vrot.lane.b32.xlu0 %v4646_v34, %s3795_s7  ;;  %v1186_v3 = vsel %vm1170_vm3, %v1153_v21, %v4672_v1  ;;  %v2282_v21 = vld [vmem:[%s5200_s3 + $0x10] sm:$0xff] }
 0x19a   : > { %1002 = vrot.lane.b32.xlu1 %v4660_v16, %s3795_s7  ;;  %2683 = vmatprep.subr.bf16.mxu1 %v1186_v3 }
 0x19b   : > { %2684 = vmatpush1.bf16.msra.mxu1 %v1185_v22  ;;  %v1315_v4 = vpop.permute.xlu0 %1314 }
 0x19c   : > { %v1349_v2 = vsel %vm1336_vm4, %v4528_v13, %v1315_v4  ;;  %v1317_v55 = vpop.permute.xlu1 %1316 }
 0x19d   : > { %1164 = vrot.lane.b32.xlu0 %v4586_v42, %s3796_s8  ;;  %v1350_v28 = vsel %vm1336_vm4, %v1315_v4, %v1317_v55 }
 0x19e   : > { %1166 = vrot.lane.b32.xlu1 %v4646_v34, %s3796_s8  ;;  %2634 = vmatprep.subr.bf16.mxu0 %v1350_v28 }
 0x19f   : > { %2635 = vmatpush1.bf16.msra.mxu0 %v1349_v2  ;;  %v1319_v29 = vpop.permute.xlu0 %1318 }
 0x1a0   : > { %v1351_v30 = vsel %vm1336_vm4, %v1317_v55, %v1319_v29  ;;  %v4688_v35 = vpop.permute.xlu1 %1320 }
 0x1a1   : > { %1168 = vrot.lane.b32.xlu0 %v4660_v16, %s3796_s8  ;;  %v1352_v13 = vsel %vm1336_vm4, %v1319_v29, %v4688_v35 }
 0x1a2   : > { %1330 = vrot.lane.b32.xlu1 %v4586_v42, %s3797_s9  ;;  %2685 = vmatprep.subr.bf16.mxu1 %v1352_v13 }
 0x1a3   : > { %2686 = vmatpush1.bf16.msra.mxu1 %v1351_v30  ;;  %v1481_v14 = vpop.permute.xlu0 %1480 }
 0x1a4   : > { %v1515_v15 = vsel %vm1502_vm5, %v4544_v23, %v1481_v14  ;;  %v1483_v38 = vpop.permute.xlu1 %1482 }
 0x1a5   : > { %1332 = vrot.lane.b32.xlu0 %v4646_v34, %s3797_s9  ;;  %v1516_v39 = vsel %vm1502_vm5, %v1481_v14, %v1483_v38 }
 0x1a6   : > { %1334 = vrot.lane.b32.xlu1 %v4660_v16, %s3797_s9  ;;  %2636 = vmatprep.subr.bf16.mxu0 %v1516_v39 }
 0x1a7   : > { %2637 = vmatpush1.bf16.msra.mxu0 %v1515_v15  ;;  %v1485_v0 = vpop.permute.xlu0 %1484 }
 0x1a8   : > { %v1517_v41 = vsel %vm1502_vm5, %v1483_v38, %v1485_v0  ;;  %v4704_v57 = vpop.permute.xlu1 %1486 }
 0x1a9   : > { %1496 = vrot.lane.b32.xlu0 %v4586_v42, %s3798_s10  ;;  %v1518_v23 = vsel %vm1502_vm5, %v1485_v0, %v4704_v57 }
 0x1aa   : > { %1498 = vrot.lane.b32.xlu1 %v4646_v34, %s3798_s10  ;;  %2687 = vmatprep.subr.bf16.mxu1 %v1518_v23 }
 0x1ab   : > { %2688 = vmatpush1.bf16.msra.mxu1 %v1517_v41  ;;  %v1647_v52 = vpop.permute.xlu0 %1646 }
 0x1ac   : > { %v1681_v43 = vsel %vm1668_vm6, %v4560_v33, %v1647_v52  ;;  %v1649_v19 = vpop.permute.xlu1 %1648 }
 0x1ad   : > { %1500 = vrot.lane.b32.xlu0 %v4660_v16, %s3798_s10  ;;  %v1682_v45 = vsel %vm1668_vm6, %v1647_v52, %v1649_v19 }
 0x1ae   : > { %1662 = vrot.lane.b32.xlu1 %v4646_v34, %s3799_s11  ;;  %2638 = vmatprep.subr.bf16.mxu0 %v1682_v45 }
 0x1af   : > { %2639 = vmatpush1.bf16.msra.mxu0 %v1681_v43  ;;  %v1651_v47 = vpop.permute.xlu0 %1650 }
 0x1b0   : > { %v1683_v48 = vsel %vm1668_vm6, %v1649_v19, %v1651_v47  ;;  %v4722_v10 = vpop.permute.xlu1 %1652 }
 0x1b1   : > { %1664 = vrot.lane.b32.xlu0 %v4660_v16, %s3799_s11  ;;  %v1684_v33 = vsel %vm1668_vm6, %v1651_v47, %v4722_v10 }
 0x1b2   : > { %1666 = vrot.lane.b32.xlu1 %v3751_v20, %s3799_s11  ;;  %2689 = vmatprep.subr.bf16.mxu1 %v1684_v33 }
 0x1b3   : > { %2690 = vmatpush1.bf16.msra.mxu1 %v1683_v48  ;;  %v1813_v31 = vpop.permute.xlu0 %1812 }
 0x1b4   : > { %v1847_v60 = vsel %vm1834_vm7, %v4577_v56, %v1813_v31  ;;  %v1815_v6 = vpop.permute.xlu1 %1814 }
 0x1b5   : > { %1828 = vrot.lane.b32.xlu0 %v4646_v34, %s3800_s12  ;;  %v1848_v54 = vsel %vm1834_vm7, %v1813_v31, %v1815_v6 }
 0x1b6   : > { %1830 = vrot.lane.b32.xlu1 %v4660_v16, %s3800_s12  ;;  %2640 = vmatprep.subr.bf16.mxu0 %v1848_v54 }
 0x1b7   : > { %2641 = vmatpush1.bf16.msra.mxu0 %v1847_v60  ;;  %v1817_v25 = vpop.permute.xlu0 %1816 }
 0x1b8   : > { %v1849_v24 = vsel %vm1834_vm7, %v1815_v6, %v1817_v25  ;;  %v4737_v61 = vpop.permute.xlu1 %1818 }
 0x1b9   : > { %1832 = vrot.lane.b32.xlu0 %v3751_v20, %s3800_s12  ;;  %v1850_v56 = vsel %vm1834_vm7, %v1817_v25, %v4737_v61 }
 0x1ba   : > { %1994 = vrot.lane.b32.xlu1 %v4646_v34, %s3801_s22  ;;  %2691 = vmatprep.subr.bf16.mxu1 %v1850_v56 }
 0x1bb   : > { %2692 = vmatpush1.bf16.msra.mxu1 %v1849_v24  ;;  %v1979_v63 = vpop.permute.xlu0 %1978 }
 0x1bc   : > { %v2013_v32 = vsel %vm2000_vm8, %v4596_v50, %v1979_v63  ;;  %v1981_v44 = vpop.permute.xlu1 %1980 }
 0x1bd   : > { %1996 = vrot.lane.b32.xlu0 %v4660_v16, %s3801_s22  ;;  %v2014_v40 = vsel %vm2000_vm8, %v1979_v63, %v1981_v44  ;;  %v2281_v16 = vld [vmem:[%s5200_s3 + $0x8] sm:$0xff] }
 0x1be   : > { %1998 = vrot.lane.b32.xlu1 %v3751_v20, %s3801_s22  ;;  %2642 = vmatprep.subr.bf16.mxu0 %v2014_v40  ;;  %s3658_s22 = smul.u32 276, %s330_s27 }
 0x1bf   : > { %2643 = vmatpush1.bf16.msra.mxu0 %v2013_v32  ;;  %v1983_v8 = vpop.permute.xlu0 %1982  ;;  %s3653_s27 = smul.u32 (%p3880_p8), 92, %s3461_s20 }
 0x1c0   : > { %v2015_v11 = vsel %vm2000_vm8, %v1981_v44, %v1983_v8  ;;  %v4754_v58 = vpop.permute.xlu1 %1984  ;;  %2728 = vmatprep.subr.bf16.mxu0 %v4428_v27  ;;  %s4991_s17 = scalar_lea.vmem [#allocation6], %s3658_s22 }
 0x1c1   : > { %v2016_v50 = vsel %vm2000_vm8, %v1983_v8, %v4754_v58  ;;  %2285 = vperm.xlu0 %3708, %v2280_v7   ;;  %s5113_s26 = scalar_lea.vmem (%p3880_p8), %s5201_s4, %s3653_s27 }
 0x1c2   : > { %2693 = vmatprep.subr.bf16.mxu1 %v2016_v50  ;;  %2659 = vmatmul.mubr.bf16.vlgmr.msra.gmra.mrb[24].mxu0 %v4266_v12 }
 0x1c3   : > { %2694 = vmatpush1.bf16.msra.mxu1 %v2015_v11  ;;  %2729 = vmatpush1.bf16.msra.mxu0 %v4342_v37  ;;  %v825_v49 = vpop.permute.xlu0 %824 }
 0x1c4   : > { %v855_v18 = vsel %vm838_vm1, %v4619_v36, %v825_v49  ;;  %v827_v53 = vpop.permute.xlu1 %826  ;;  %2779 = vmatprep.subr.bf16.mxu1 %v4496_v51  ;;  %2290 = vperm.xlu1 %3709, %v2281_v16  }
 0x1c5   : > { %v856_v27 = vsel %vm838_vm1, %v825_v49, %v827_v53  ;;  %3560 = vmatprep.mubr.msk.bf16.mxu0 %vm2313_vm0, %v4277_v17 }
 0x1c6   : > { %2730 = vmatprep.subr.bf16.mxu0 %v856_v27  ;;  %2710 = vmatmul.mubr.bf16.vlgmr.msra.gmra.mrb[24].mxu1 %v4266_v12 }
 0x1c7   : > { %2731 = vmatpush1.bf16.msra.mxu0 %v855_v18  ;;  %2780 = vmatpush1.bf16.msra.mxu1 %v4483_v46  ;;  %v829_v37 = vpop.permute.xlu0 %828 }
 0x1c8   : > { %v857_v36 = vsel %vm838_vm1, %v827_v53, %v829_v37  ;;  %v4776_v51 = vpop.permute.xlu1 %830  ;;  %2295 = vperm.xlu1 %3709, %v2282_v21   ;;  %3562 = vmatprep.mubr.msk.bf16.mxu1 %vm2313_vm0, %v4277_v17 }
 0x1c9   : > { %v858_v22 = vsel %vm838_vm1, %v829_v37, %v4776_v51 }
 0x1ca   : > { %2781 = vmatprep.subr.bf16.mxu1 %v858_v22  ;;  %2669 = vmatmul.mubr.bf16.gmra.mrb[28].mxu0 %v4295_v26 }
 0x1cb   : > { %2782 = vmatpush1.bf16.msra.mxu1 %v857_v36  ;;  %v991_v12 = vpop.permute.xlu0 %990  ;;  %3563 = vmatprep.mubr.msk.bf16.mxu0 %vm2313_vm0, %v4636_v5 }
 0x1cc   : > { %v1021_v46 = vsel %vm1004_vm2, %v4650_v9, %v991_v12  ;;  %v993_v3 = vpop.permute.xlu1 %992 }
 0x1cd   : > { %v1022_v4 = vsel %vm1004_vm2, %v991_v12, %v993_v3 }
 0x1ce   : > { %2732 = vmatprep.subr.bf16.mxu0 %v1022_v4  ;;  %2720 = vmatmul.mubr.bf16.gmra.mrb[28].mxu1 %v4295_v26 }
 0x1cf   : > { %2733 = vmatpush1.bf16.msra.mxu0 %v1021_v46  ;;  %v995_v2 = vpop.permute.xlu0 %994  ;;  %3565 = vmatprep.mubr.msk.bf16.mxu1 %vm2313_vm0, %v4636_v5 }
 0x1d0   : > { %v1023_v55 = vsel %vm1004_vm2, %v993_v3, %v995_v2  ;;  %v4792_v28 = vpop.permute.xlu1 %996 }
 0x1d1   : > { %v1024_v29 = vsel %vm1004_vm2, %v995_v2, %v4792_v28 }
 0x1d2   : > { %2783 = vmatprep.subr.bf16.mxu1 %v1024_v29 }
 0x1d3   : > { %2784 = vmatpush1.bf16.msra.mxu1 %v1023_v55  ;;  %v1157_v9 = vpop.permute.xlu0 %1156 }
 0x1d4   : > { %v1187_v30 = vsel %vm1170_vm3, %v4672_v1, %v1157_v9  ;;  %v1159_v13 = vpop.permute.xlu1 %1158  ;;  %v4798_v14 = vpop.f32.mrb[0].mxu0 }
 0x1d5   : > { %v1188_v15 = vsel %vm1170_vm3, %v1157_v9, %v1159_v13  ;;  %v4801_v38 = vpop.f32.mrb[1].mxu0 }
 0x1d6   : > { %2734 = vmatprep.subr.bf16.mxu0 %v1188_v15  ;;  %v4803_v39 = vpop.f32.mrb[2].mxu0 }
 0x1d7   : > { %2735 = vmatpush1.bf16.msra.mxu0 %v1187_v30  ;;  %v1161_v0 = vpop.permute.xlu0 %1160  ;;  %v4805_v41 = vpop.f32.mrb[3].mxu0 }
 0x1d8   : > { %v1189_v23 = vsel %vm1170_vm3, %v1159_v13, %v1161_v0  ;;  %v4808_v52 = vpop.permute.xlu1 %1162 }
 0x1d9   : > { %v1190_v1 = vsel %vm1170_vm3, %v1161_v0, %v4808_v52 }
 0x1da   : > { %2785 = vmatprep.subr.bf16.mxu1 %v1190_v1  ;;  %v4812_v43 = vpop.f32.mrb[0].mxu1 }
 0x1db   : > { %2786 = vmatpush1.bf16.msra.mxu1 %v1189_v23  ;;  %v1323_v19 = vpop.permute.xlu0 %1322  ;;  %v4814_v45 = vpop.f32.mrb[1].mxu1 }
 0x1dc   : > { %v1353_v20 = vsel %vm1336_vm4, %v4688_v35, %v1323_v19  ;;  %v1325_v47 = vpop.permute.xlu1 %1324  ;;  %v4818_v48 = vpop.f32.mrb[2].mxu1 }
 0x1dd   : > { %v1354_v33 = vsel %vm1336_vm4, %v1323_v19, %v1325_v47  ;;  %v4821_v31 = vpop.f32.mrb[3].mxu1  ;;  %v4823_v60 = vpop.f32.mrb[4].mxu0 }
 0x1de   : > { %2736 = vmatprep.subr.bf16.mxu0 %v1354_v33  ;;  %v4825_v6 = vpop.f32.mrb[5].mxu0 }
 0x1df   : > { %2737 = vmatpush1.bf16.msra.mxu0 %v1353_v20  ;;  %v1327_v54 = vpop.permute.xlu0 %1326  ;;  %v2368_v25 = vpop.f32.mrb[6].mxu0 }
 0x1e0   : > { %v1355_v24 = vsel %vm1336_vm4, %v1325_v47, %v1327_v54  ;;  %v4828_v56 = vpop.permute.xlu1 %1328  ;;  %v2369_v35 = vpop.f32.mrb[7].mxu0 }
 0x1e1   : > { %v1356_v63 = vsel %vm1336_vm4, %v1327_v54, %v4828_v56 }
 0x1e2   : > { %2787 = vmatprep.subr.bf16.mxu1 %v1356_v63  ;;  %v4832_v32 = vpop.f32.mrb[4].mxu1 }
 0x1e3   : > { %2788 = vmatpush1.bf16.msra.mxu1 %v1355_v24  ;;  %v1489_v44 = vpop.permute.xlu0 %1488  ;;  %v4834_v40 = vpop.f32.mrb[5].mxu1 }
 0x1e4   : > { %v1519_v7 = vsel %vm1502_vm5, %v4704_v57, %v1489_v44  ;;  %v1491_v8 = vpop.permute.xlu1 %1490  ;;  %v2419_v11 = vpop.f32.mrb[6].mxu1 }
 0x1e5   : > { %v1520_v50 = vsel %vm1502_vm5, %v1489_v44, %v1491_v8  ;;  %v2420_v16 = vpop.f32.mrb[7].mxu1 }
 0x1e6   : > { %2738 = vmatprep.subr.bf16.mxu0 %v1520_v50 }
 0x1e7   : > { %2739 = vmatpush1.bf16.msra.mxu0 %v1519_v7  ;;  %v1493_v49 = vpop.permute.xlu0 %1492 }
 0x1e8   : > { %v1521_v18 = vsel %vm1502_vm5, %v1491_v8, %v1493_v49  ;;  %v4840_v53 = vpop.permute.xlu1 %1494 }
 0x1e9   : > { %v1522_v27 = vsel %vm1502_vm5, %v1493_v49, %v4840_v53 }
 0x1ea   : > { %2789 = vmatprep.subr.bf16.mxu1 %v1522_v27 }
 0x1eb   : > { %2790 = vmatpush1.bf16.msra.mxu1 %v1521_v18  ;;  %v1655_v21 = vpop.permute.xlu0 %1654 }
 0x1ec   : > { %v1685_v57 = vsel %vm1668_vm6, %v4722_v10, %v1655_v21  ;;  %v1657_v37 = vpop.permute.xlu1 %1656 }
 0x1ed   : > { %v1686_v36 = vsel %vm1668_vm6, %v1655_v21, %v1657_v37 }
 0x1ee   : > { %2740 = vmatprep.subr.bf16.mxu0 %v1686_v36 }
 0x1ef   : > { %2741 = vmatpush1.bf16.msra.mxu0 %v1685_v57  ;;  %v1659_v22 = vpop.permute.xlu0 %1658 }
 0x1f0   : > { %v1687_v12 = vsel %vm1668_vm6, %v1657_v37, %v1659_v22  ;;  %v4848_v46 = vpop.permute.xlu1 %1660 }
 0x1f1   : > { %v1688_v3 = vsel %vm1668_vm6, %v1659_v22, %v4848_v46 }
 0x1f2   : > { %2791 = vmatprep.subr.bf16.mxu1 %v1688_v3 }
 0x1f3   : > { %2792 = vmatpush1.bf16.msra.mxu1 %v1687_v12  ;;  %v1821_v4 = vpop.permute.xlu0 %1820 }
 0x1f4   : > { %v1851_v2 = vsel %vm1834_vm7, %v4737_v61, %v1821_v4  ;;  %v1823_v10 = vpop.permute.xlu1 %1822 }
 0x1f5   : > { %v1852_v55 = vsel %vm1834_vm7, %v1821_v4, %v1823_v10 }
 0x1f6   : > { %2742 = vmatprep.subr.bf16.mxu0 %v1852_v55 }
 0x1f7   : > { %2743 = vmatpush1.bf16.msra.mxu0 %v1851_v2  ;;  %v1825_v29 = vpop.permute.xlu0 %1824 }
 0x1f8   : > { %v1853_v9 = vsel %vm1834_vm7, %v1823_v10, %v1825_v29  ;;  %v4856_v30 = vpop.permute.xlu1 %1826 }
 0x1f9   : > { %v1854_v13 = vsel %vm1834_vm7, %v1825_v29, %v4856_v30 }
 0x1fa   : > { %2793 = vmatprep.subr.bf16.mxu1 %v1854_v13 }
 0x1fb   : > { %2794 = vmatpush1.bf16.msra.mxu1 %v1853_v9  ;;  %v1987_v15 = vpop.permute.xlu0 %1986 }
 0x1fc   : > { %v2017_v0 = vsel %vm2000_vm8, %v4754_v58, %v1987_v15  ;;  %v1989_v61 = vpop.permute.xlu1 %1988  ;;  %v4872_v58 = vld [vmem:[%s5199_s2] ss:$8 sps:$4 sm:$0xff]  }
 0x1fd   : > { %v2018_v23 = vsel %vm2000_vm8, %v1987_v15, %v1989_v61 }
 0x1fe   : > { %2744 = vmatprep.subr.bf16.mxu0 %v2018_v23 }
 0x1ff   : > { %2745 = vmatpush1.bf16.msra.mxu0 %v2017_v0  ;;  %v1991_v1 = vpop.permute.xlu0 %1990 }
 0x200   : > { %v2019_v19 = vsel %vm2000_vm8, %v1989_v61, %v1991_v1  ;;  %v4864_v20 = vpop.permute.xlu1 %1992  ;;  %2830 = vmatprep.subr.bf16.mxu0 %v4586_v42 }
 0x201   : > { %v2020_v47 = vsel %vm2000_vm8, %v1991_v1, %v4864_v20 }
 0x202   : > { %2795 = vmatprep.subr.bf16.mxu1 %v2020_v47  ;;  %2761 = vmatmul.mubr.bf16.vlgmr.msra.gmra.mrb[32].mxu0 %v4872_v58 }
 0x203   : > { %2796 = vmatpush1.bf16.msra.mxu1 %v2019_v19  ;;  %2831 = vmatpush1.bf16.msra.mxu0 %v4501_v59  ;;  %v833_v33 = vpop.permute.xlu0 %832 }
 0x204   : > { %v859_v54 = vsel %vm838_vm1, %v4776_v51, %v833_v33  ;;  %v835_v25 = vpop.permute.xlu1 %834  ;;  %2881 = vmatprep.subr.bf16.mxu1 %v3802_v62  ;;  %3564 = vmatprep.mubr.msk.bf16.mxu0 %vm2313_vm0, %v4277_v17 }
 0x205   : > { %v860_v42 = vsel %vm838_vm1, %v833_v33, %v835_v25 }
 0x206   : > { %2832 = vmatprep.subr.bf16.mxu0 %v860_v42  ;;  %2812 = vmatmul.mubr.bf16.vlgmr.msra.gmra.mrb[32].mxu1 %v4872_v58 }
 0x207   : > { %2833 = vmatpush1.bf16.msra.mxu0 %v859_v54  ;;  %2882 = vmatpush1.bf16.msra.mxu1 %v4646_v34  ;;  %v837_v24 = vpop.permute.xlu0 %836 }
 0x208   : > { %v861_v59 = vsel %vm838_vm1, %v835_v25, %v837_v24  ;;  %v999_v35 = vpop.permute.xlu1 %998  ;;  %2883 = vmatprep.subr.bf16.mxu1 %v3802_v62  ;;  %3566 = vmatprep.mubr.msk.bf16.mxu1 %vm2313_vm0, %v4277_v17 }
 0x209   : > { %v1025_v34 = vsel %vm1004_vm2, %v4792_v28, %v999_v35 }
 0x20a   : > { %2771 = vmatmul.mubr.bf16.gmra.mrb[36].mxu0 %v4295_v26 }
 0x20b   : > { %2884 = vmatpush1.bf16.msra.mxu1 %v861_v59  ;;  %v1001_v51 = vpop.permute.xlu0 %1000  ;;  %3567 = vmatprep.mubr.msk.bf16.mxu0 %vm2313_vm0, %v4636_v5 }
 0x20c   : > { %v1003_v63 = vpop.permute.xlu1 %1002  ;;  %v1026_v44 = vsel %vm1004_vm2, %v999_v35, %v1001_v51  ;;  %2885 = vmatprep.subr.bf16.mxu1 %v3802_v62 }
 0x20d   : > { %v1027_v7 = vsel %vm1004_vm2, %v1001_v51, %v1003_v63  ;;  %2834 = vmatprep.subr.bf16.mxu0 %v1026_v44 }
 0x20e   : > { %2835 = vmatpush1.bf16.msra.mxu0 %v1025_v34  ;;  %2822 = vmatmul.mubr.bf16.gmra.mrb[36].mxu1 %v4295_v26 }
 0x20f   : > { %2886 = vmatpush1.bf16.msra.mxu1 %v1027_v7  ;;  %v1165_v8 = vpop.permute.xlu0 %1164  ;;  %3569 = vmatprep.mubr.msk.bf16.mxu1 %vm2313_vm0, %v4636_v5 }
 0x210   : > { %v1191_v11 = vsel %vm1170_vm3, %v4808_v52, %v1165_v8  ;;  %v1167_v50 = vpop.permute.xlu1 %1166  ;;  %2887 = vmatprep.subr.bf16.mxu1 %v3802_v62 }
 0x211   : > { %v1192_v16 = vsel %vm1170_vm3, %v1165_v8, %v1167_v50 }
 0x212   : > { %2836 = vmatprep.subr.bf16.mxu0 %v1192_v16 }
 0x213   : > { %2837 = vmatpush1.bf16.msra.mxu0 %v1191_v11  ;;  %v1169_v28 = vpop.permute.xlu0 %1168 }
 0x214   : > { %v1193_v49 = vsel %vm1170_vm3, %v1167_v50, %v1169_v28  ;;  %v1331_v18 = vpop.permute.xlu1 %1330 }
 0x215   : > { %2888 = vmatpush1.bf16.msra.mxu1 %v1193_v49  ;;  %v1357_v36 = vsel %vm1336_vm4, %v4828_v56, %v1331_v18 }
 0x216   : > { %2889 = vmatprep.subr.bf16.mxu1 %v3802_v62  ;;  %v4905_v27 = vpop.f32.mrb[8].mxu0 }
 0x217   : > { %v1333_v5 = vpop.permute.xlu0 %1332  ;;  %v4907_v21 = vpop.f32.mrb[9].mxu0 }
 0x218   : > { %v1335_v52 = vpop.permute.xlu1 %1334  ;;  %v1358_v57 = vsel %vm1336_vm4, %v1331_v18, %v1333_v5  ;;  %v4910_v37 = vpop.f32.mrb[10].mxu0 }
 0x219   : > { %v1359_v22 = vsel %vm1336_vm4, %v1333_v5, %v1335_v52  ;;  %2838 = vmatprep.subr.bf16.mxu0 %v1358_v57  ;;  %v4915_v12 = vpop.f32.mrb[11].mxu0 }
 0x21a   : > { %2890 = vmatpush1.bf16.msra.mxu1 %v1359_v22  ;;  %2839 = vmatpush1.bf16.msra.mxu0 %v1357_v36  ;;  %v4917_v3 = vpop.f32.mrb[8].mxu1 }
 0x21b   : > { %v1497_v4 = vpop.permute.xlu0 %1496  ;;  %2891 = vmatprep.subr.bf16.mxu1 %v3802_v62  ;;  %v4920_v2 = vpop.f32.mrb[9].mxu1 }
 0x21c   : > { %v1523_v10 = vsel %vm1502_vm5, %v4840_v53, %v1497_v4  ;;  %v1499_v55 = vpop.permute.xlu1 %1498  ;;  %v4924_v29 = vpop.f32.mrb[10].mxu1 }
 0x21d   : > { %v1524_v56 = vsel %vm1502_vm5, %v1497_v4, %v1499_v55  ;;  %v4927_v9 = vpop.f32.mrb[11].mxu1 }
 0x21e   : > { %2840 = vmatprep.subr.bf16.mxu0 %v1524_v56  ;;  %v4929_v13 = vpop.f32.mrb[12].mxu0 }
 0x21f   : > { %2841 = vmatpush1.bf16.msra.mxu0 %v1523_v10  ;;  %v1501_v15 = vpop.permute.xlu0 %1500  ;;  %v4931_v0 = vpop.f32.mrb[13].mxu0 }
 0x220   : > { %v1525_v61 = vsel %vm1502_vm5, %v1499_v55, %v1501_v15  ;;  %v1663_v23 = vpop.permute.xlu1 %1662  ;;  %v2470_v1 = vpop.f32.mrb[14].mxu0 }
 0x221   : > { %2892 = vmatpush1.bf16.msra.mxu1 %v1525_v61  ;;  %v2471_v53 = vpop.f32.mrb[15].mxu0  ;;  %v1689_v24 = vsel %vm1668_vm6, %v4848_v46, %v1663_v23 }
 0x222   : > { %2893 = vmatprep.subr.bf16.mxu1 %v3802_v62  ;;  %v4935_v19 = vpop.f32.mrb[12].mxu1 }
 0x223   : > { %v1665_v47 = vpop.permute.xlu0 %1664  ;;  %v4937_v33 = vpop.f32.mrb[13].mxu1 }
 0x224   : > { %v1667_v54 = vpop.permute.xlu1 %1666  ;;  %v1690_v25 = vsel %vm1668_vm6, %v1663_v23, %v1665_v47  ;;  %v2521_v42 = vpop.f32.mrb[14].mxu1 }
 0x225   : > { %v1691_v59 = vsel %vm1668_vm6, %v1665_v47, %v1667_v54  ;;  %2842 = vmatprep.subr.bf16.mxu0 %v1690_v25  ;;  %v2522_v35 = vpop.f32.mrb[15].mxu1 }
 0x226   : > { %2894 = vmatpush1.bf16.msra.mxu1 %v1691_v59  ;;  %2843 = vmatpush1.bf16.msra.mxu0 %v1689_v24 }
 0x227   : > { %v1829_v51 = vpop.permute.xlu0 %1828  ;;  %2895 = vmatprep.subr.bf16.mxu1 %v3802_v62 }
 0x228   : > { %v1855_v63 = vsel %vm1834_vm7, %v4856_v30, %v1829_v51  ;;  %v1831_v44 = vpop.permute.xlu1 %1830 }
 0x229   : > { %v1856_v34 = vsel %vm1834_vm7, %v1829_v51, %v1831_v44 }
 0x22a   : > { %2844 = vmatprep.subr.bf16.mxu0 %v1856_v34 }
 0x22b   : > { %2845 = vmatpush1.bf16.msra.mxu0 %v1855_v63  ;;  %v1833_v7 = vpop.permute.xlu0 %1832 }
 0x22c   : > { %v1857_v46 = vsel %vm1834_vm7, %v1831_v44, %v1833_v7  ;;  %v1995_v8 = vpop.permute.xlu1 %1994 }
 0x22d   : > { %2896 = vmatpush1.bf16.msra.mxu1 %v1857_v46  ;;  %v2021_v30 = vsel %vm2000_vm8, %v4864_v20, %v1995_v8 }
 0x22e   : > { %2897 = vmatprep.subr.bf16.mxu1 %v3802_v62 }
 0x22f   : > { %v1997_v11 = vpop.permute.xlu0 %1996 }
 0x230   : > { %v1999_v50 = vpop.permute.xlu1 %1998  ;;  %v2022_v16 = vsel %vm2000_vm8, %v1995_v8, %v1997_v11 }
 0x231   : > { %v2023_v28 = vsel %vm2000_vm8, %v1997_v11, %v1999_v50  ;;  %2846 = vmatprep.subr.bf16.mxu0 %v2022_v16 }
 0x232   : > { %2898 = vmatpush1.bf16.msra.mxu1 %v2023_v28  ;;  %2847 = vmatpush1.bf16.msra.mxu0 %v2021_v30 }
 0x235   : > { %2914 = vmatmul.mubr.bf16.vlgmr.msra.gmra.mrb[40].mxu1 %v4872_v58  ;;  %2863 = vmatmul.mubr.bf16.vlgmr.msra.gmra.mrb[40].mxu0 %v4872_v58 }
 0x236   : > { %3570 = vmatprep.mubr.msk.bf16.mxu1 %vm2313_vm0, %v4277_v17  ;;  %3568 = vmatprep.mubr.msk.bf16.mxu0 %vm2313_vm0, %v4277_v17 }
 0x23d   : > { %2922 = vmatmul.mubr.bf16.gmra.mrb[44].mxu1 %v4295_v26  ;;  %2873 = vmatmul.mubr.bf16.gmra.mrb[44].mxu0 %v4295_v26 }
 0x240   : > { %v4963_v62 = vpop.permute.xlu0 %2285 }
 0x241   : > { %v2355_v20 = vadd.f32 %v4798_v14, %v4963_v62  ;;  %v2357_v58 = vadd.f32 %v4801_v38, %v4963_v62  ;;  %v2406_v49 = vadd.f32 %v4812_v43, %v4963_v62  ;;  %v2408_v17 = vadd.f32 %v4814_v45, %v4963_v62 }
 0x242   : > { %v2457_v18 = vadd.f32 %v4905_v27, %v4963_v62  ;;  %v2459_v26 = vadd.f32 %v4907_v21, %v4963_v62  ;;  %v2508_v5 = vadd.f32 %v4917_v3, %v4963_v62  ;;  %v2510_v14 = vadd.f32 %v4920_v2, %v4963_v62 }
 0x243   : > { %v2929_v52 = vmax.f32 %v2355_v20, 0.0  ;;  %v2930_v38 = vmax.f32 %v2357_v58, 0.0  ;;  %v2931_v57 = vmax.f32 %v2406_v49, 0.0  ;;  %v2932_v36 = vmax.f32 %v2408_v17, 0.0  ;;  %v4981_v43 = vpop.permute.xlu1 %2290 }
 0x244   : > { %v2359_v45 = vadd.f32 %v4803_v39, %v4981_v43  ;;  %v2361_v27 = vadd.f32 %v4805_v41, %v4981_v43  ;;  %v2410_v21 = vadd.f32 %v4818_v48, %v4981_v43  ;;  %v2412_v22 = vadd.f32 %v4821_v31, %v4981_v43 }
 0x245   : > { %v3617_v3 = vpack.c.bf16 %v2930_v38, %v2929_v52  ;;  %v3618_v4 = vpack.c.bf16 %v2932_v36, %v2931_v57  ;;  %v2933_v2 = vmax.f32 %v2457_v18, 0.0  ;;  %v2934_v10 = vmax.f32 %v2459_v26, 0.0 }
 0x246   : > { %v2952_v55 = vmax.f32 %v2359_v45, 0.0  ;;  %v2953_v56 = vmax.f32 %v2361_v27, 0.0  ;;  %v2954_v15 = vmax.f32 %v2410_v21, 0.0  ;;  %v2955_v61 = vmax.f32 %v2412_v22, 0.0 }
 0x247   : > { %3231 = vst [vmem:[%s4991_s17] sm:$0xff] %v3617_v3  ;;  %3232 = vst [vmem:[%s4991_s17 + $0x8] sm:$0xff] %v3618_v4  ;;  %v4995_v39 = vpop.permute.xlu1 %2295  ;;  %v3619_v41 = vpack.c.bf16 %v2934_v10, %v2933_v2  ;;  %v2935_v48 = vmax.f32 %v2508_v5, 0.0  ;;  %v2461_v31 = vadd.f32 %v4910_v37, %v4981_v43  ;;  %v2936_v23 = vmax.f32 %v2510_v14, 0.0 }
 0x248   : > { %v3629_v1 = vpack.c.bf16 %v2953_v56, %v2952_v55  ;;  %v3630_v53 = vpack.c.bf16 %v2955_v61, %v2954_v15  ;;  %v2365_v47 = vadd.f32 %v4823_v60, %v4995_v39  ;;  %v2367_v54 = vadd.f32 %v4825_v6, %v4995_v39 }
 0x249   : > { %v2416_v25 = vadd.f32 %v4832_v32, %v4995_v39  ;;  %v2418_v42 = vadd.f32 %v4834_v40, %v4995_v39  ;;  %3233 = vst [vmem:[%s4991_s17 + $0x10] sm:$0xff] %v3619_v41  ;;  %v2956_v24 = vmax.f32 %v2461_v31, 0.0  ;;  %v3620_v59 = vpack.c.bf16 %v2936_v23, %v2935_v48 }
 0x24a   : > { %3243 = vst [vmem:[%s4991_s17 + $0x5c] sm:$0xff] %v3629_v1  ;;  %3244 = vst [vmem:[%s4991_s17 + $0x64] sm:$0xff] %v3630_v53  ;;  %v2975_v37 = vmax.f32 %v2365_v47, 0.0  ;;  %v2976_v35 = vmax.f32 %v2367_v54, 0.0  ;;  %v2463_v60 = vadd.f32 %v4915_v12, %v4981_v43  ;;  %v2512_v6 = vadd.f32 %v4924_v29, %v4981_v43 }
 0x24b   : > { %v2977_v51 = vmax.f32 %v2416_v25, 0.0  ;;  %v2978_v63 = vmax.f32 %v2418_v42, 0.0  ;;  %3234 = vst [vmem:[%s4991_s17 + $0x18] sm:$0xff] %v3620_v59  ;;  %v2514_v32 = vadd.f32 %v4927_v9, %v4981_v43  ;;  %v2467_v40 = vadd.f32 %v4929_v13, %v4995_v39 }
 0x24c   : > { %v3641_v44 = vpack.c.bf16 %v2976_v35, %v2975_v37  ;;  %v2957_v34 = vmax.f32 %v2463_v60, 0.0  ;;  %v2958_v7 = vmax.f32 %v2512_v6, 0.0  ;;  %v2469_v12 = vadd.f32 %v4931_v0, %v4995_v39 }
 0x24d   : > { %v3642_v29 = vpack.c.bf16 %v2978_v63, %v2977_v51  ;;  %v2959_v46 = vmax.f32 %v2514_v32, 0.0  ;;  %v2979_v8 = vmax.f32 %v2467_v40, 0.0  ;;  %v2518_v11 = vadd.f32 %v4935_v19, %v4995_v39 }
 0x24e   : > { %3255 = vst [vmem:[%s4991_s17 + $0xb8] sm:$0xff] %v3641_v44  ;;  %v3631_v9 = vpack.c.bf16 %v2957_v34, %v2956_v24  ;;  %v2980_v50 = vmax.f32 %v2469_v12, 0.0  ;;  %v2520_v13 = vadd.f32 %v4937_v33, %v4995_v39 }
 0x24f   : > { %3256 = vst [vmem:[%s4991_s17 + $0xc0] sm:$0xff] %v3642_v29  ;;  %v3632_v16 = vpack.c.bf16 %v2959_v46, %v2958_v7  ;;  %v2981_v30 = vmax.f32 %v2518_v11, 0.0 }
 0x250   : > { %3245 = vst [vmem:[%s4991_s17 + $0x6c] sm:$0xff] %v3631_v9  ;;  %v3643_v28 = vpack.c.bf16 %v2980_v50, %v2979_v8  ;;  %v2982_v0 = vmax.f32 %v2520_v13, 0.0 }
 0x251   : > { %3246 = vst [vmem:[%s4991_s17 + $0x74] sm:$0xff] %v3632_v16 }
 0x252   : > { %3257 = vst [vmem:[%s4991_s17 + $0xc8] sm:$0xff] %v3643_v28  ;;  %v3644_v20 = vpack.c.bf16 %v2982_v0, %v2981_v30 }
 0x254   : > { %3258 = vst [vmem:[%s4991_s17 + $0xd0] sm:$0xff] %v3644_v20 }
 0x256   : > { %v2558_v58 = vpop.f32.mrb[16].mxu0 }
 0x257   : > { %v2559_v49 = vadd.f32 %v2558_v58, %v4963_v62  ;;  %v2560_v19 = vpop.f32.mrb[17].mxu0 }
 0x258   : > { %v2561_v17 = vadd.f32 %v2560_v19, %v4963_v62  ;;  %v2562_v18 = vpop.f32.mrb[18].mxu0 }
 0x259   : > { %v2937_v26 = vmax.f32 %v2559_v49, 0.0  ;;  %v2563_v33 = vadd.f32 %v2562_v18, %v4981_v43  ;;  %v2564_v5 = vpop.f32.mrb[19].mxu0 }
 0x25a   : > { %v2938_v14 = vmax.f32 %v2561_v17, 0.0  ;;  %v2609_v52 = vpop.f32.mrb[16].mxu1  ;;  %v2565_v38 = vadd.f32 %v2564_v5, %v4981_v43 }
 0x25b   : > { %v2610_v57 = vadd.f32 %v2609_v52, %v4963_v62  ;;  %v2960_v36 = vmax.f32 %v2563_v33, 0.0  ;;  %v2611_v45 = vpop.f32.mrb[17].mxu1 }
 0x25c   : > { %v3621_v27 = vpack.c.bf16 %v2938_v14, %v2937_v26  ;;  %v2612_v21 = vadd.f32 %v2611_v45, %v4963_v62  ;;  %v2961_v22 = vmax.f32 %v2565_v38, 0.0  ;;  %v2613_v3 = vpop.f32.mrb[18].mxu1 }
 0x25d   : > { %v2939_v4 = vmax.f32 %v2610_v57, 0.0  ;;  %v2614_v2 = vadd.f32 %v2613_v3, %v4981_v43  ;;  %v2615_v10 = vpop.f32.mrb[19].mxu1 }
 0x25e   : > { %3235 = vst [vmem:[%s4991_s17 + $0x20] sm:$0xff] %v3621_v27  ;;  %v2940_v55 = vmax.f32 %v2612_v21, 0.0  ;;  %v3633_v56 = vpack.c.bf16 %v2961_v22, %v2960_v36  ;;  %v2616_v15 = vadd.f32 %v2615_v10, %v4981_v43  ;;  %v2568_v61 = vpop.f32.mrb[20].mxu0 }
 0x25f   : > { %v2962_v41 = vmax.f32 %v2614_v2, 0.0  ;;  %v2569_v48 = vadd.f32 %v2568_v61, %v4995_v39  ;;  %v2570_v31 = vpop.f32.mrb[21].mxu0 }
 0x260   : > { %v3622_v23 = vpack.c.bf16 %v2940_v55, %v2939_v4  ;;  %3247 = vst [vmem:[%s4991_s17 + $0x7c] sm:$0xff] %v3633_v56  ;;  %v2963_v1 = vmax.f32 %v2616_v15, 0.0  ;;  %v2571_v53 = vadd.f32 %v2570_v31, %v4995_v39  ;;  %v2572_v47 = vpop.f32.mrb[22].mxu0 }
 0x261   : > { %v2983_v54 = vmax.f32 %v2569_v48, 0.0  ;;  %v2573_v25 = vpop.f32.mrb[23].mxu0 }
 0x262   : > { %3236 = vst [vmem:[%s4991_s17 + $0x28] sm:$0xff] %v3622_v23  ;;  %v3634_v42 = vpack.c.bf16 %v2963_v1, %v2962_v41  ;;  %v2984_v24 = vmax.f32 %v2571_v53, 0.0  ;;  %v2619_v59 = vpop.f32.mrb[20].mxu1 }
 0x263   : > { %v2620_v37 = vadd.f32 %v2619_v59, %v4995_v39  ;;  %v2621_v35 = vpop.f32.mrb[21].mxu1 }
 0x264   : > { %3248 = vst [vmem:[%s4991_s17 + $0x84] sm:$0xff] %v3634_v42  ;;  %v3645_v60 = vpack.c.bf16 %v2984_v24, %v2983_v54  ;;  %v2622_v6 = vadd.f32 %v2621_v35, %v4995_v39  ;;  %v2623_v51 = vpop.f32.mrb[22].mxu1 }
 0x265   : > { %v2985_v63 = vmax.f32 %v2620_v37, 0.0  ;;  %v2624_v32 = vpop.f32.mrb[23].mxu1 }
 0x266   : > { %3259 = vst [vmem:[%s4991_s17 + $0xd8] sm:$0xff] %v3645_v60  ;;  %v2986_v40 = vmax.f32 %v2622_v6, 0.0 }
 0x268   : > { %v3646_v44 = vpack.c.bf16 %v2986_v40, %v2985_v63 }
 0x26a   : > { %3260 = vst [vmem:[%s4991_s17 + $0xe0] sm:$0xff] %v3646_v44 }
 0x295   : > { %v2660_v34 = vpop.f32.mrb[24].mxu0 }
 0x296   : > { %v2661_v7 = vadd.f32 %v2660_v34, %v4963_v62  ;;  %v2662_v12 = vpop.f32.mrb[25].mxu0 }
 0x297   : > { %v2663_v29 = vadd.f32 %v2662_v12, %v4963_v62  ;;  %v2664_v46 = vpop.f32.mrb[26].mxu0 }
 0x298   : > { %v2941_v8 = vmax.f32 %v2661_v7, 0.0  ;;  %v2665_v11 = vadd.f32 %v2664_v46, %v4981_v43  ;;  %v2666_v9 = vpop.f32.mrb[27].mxu0 }
 0x299   : > { %v2942_v50 = vmax.f32 %v2663_v29, 0.0  ;;  %v2711_v13 = vpop.f32.mrb[24].mxu1  ;;  %v2667_v16 = vadd.f32 %v2666_v9, %v4981_v43 }
 0x29a   : > { %v2712_v30 = vadd.f32 %v2711_v13, %v4963_v62  ;;  %v2964_v28 = vmax.f32 %v2665_v11, 0.0  ;;  %v2713_v0 = vpop.f32.mrb[25].mxu1 }
 0x29b   : > { %v3623_v20 = vpack.c.bf16 %v2942_v50, %v2941_v8  ;;  %v2714_v58 = vadd.f32 %v2713_v0, %v4963_v62  ;;  %v2965_v49 = vmax.f32 %v2667_v16, 0.0  ;;  %v2715_v19 = vpop.f32.mrb[26].mxu1 }
 0x29c   : > { %v2943_v17 = vmax.f32 %v2712_v30, 0.0  ;;  %v2716_v18 = vadd.f32 %v2715_v19, %v4981_v43  ;;  %v2717_v26 = vpop.f32.mrb[27].mxu1 }
 0x29d   : > { %3237 = vst [vmem:[%s4991_s17 + $0x30] sm:$0xff] %v3623_v20  ;;  %v2944_v33 = vmax.f32 %v2714_v58, 0.0  ;;  %v3635_v5 = vpack.c.bf16 %v2965_v49, %v2964_v28  ;;  %v2718_v14 = vadd.f32 %v2717_v26, %v4981_v43  ;;  %v2670_v52 = vpop.f32.mrb[28].mxu0 }
 0x29e   : > { %v2966_v38 = vmax.f32 %v2716_v18, 0.0  ;;  %v2671_v57 = vadd.f32 %v2670_v52, %v4995_v39  ;;  %v2672_v36 = vpop.f32.mrb[29].mxu0 }
 0x29f   : > { %v3624_v45 = vpack.c.bf16 %v2944_v33, %v2943_v17  ;;  %3249 = vst [vmem:[%s4991_s17 + $0x8c] sm:$0xff] %v3635_v5  ;;  %v2967_v27 = vmax.f32 %v2718_v14, 0.0  ;;  %v2673_v21 = vadd.f32 %v2672_v36, %v4995_v39  ;;  %v2674_v22 = vpop.f32.mrb[30].mxu0 }
 0x2a0   : > { %v2987_v3 = vmax.f32 %v2671_v57, 0.0  ;;  %v2675_v4 = vpop.f32.mrb[31].mxu0 }
 0x2a1   : > { %3238 = vst [vmem:[%s4991_s17 + $0x38] sm:$0xff] %v3624_v45  ;;  %v3636_v2 = vpack.c.bf16 %v2967_v27, %v2966_v38  ;;  %v2988_v10 = vmax.f32 %v2673_v21, 0.0  ;;  %v2721_v55 = vpop.f32.mrb[28].mxu1 }
 0x2a2   : > { %v2722_v56 = vadd.f32 %v2721_v55, %v4995_v39  ;;  %v2723_v15 = vpop.f32.mrb[29].mxu1 }
 0x2a3   : > { %3250 = vst [vmem:[%s4991_s17 + $0x94] sm:$0xff] %v3636_v2  ;;  %v3647_v61 = vpack.c.bf16 %v2988_v10, %v2987_v3  ;;  %v2724_v41 = vadd.f32 %v2723_v15, %v4995_v39  ;;  %v2725_v48 = vpop.f32.mrb[30].mxu1 }
 0x2a4   : > { %v2989_v31 = vmax.f32 %v2722_v56, 0.0  ;;  %v2726_v23 = vpop.f32.mrb[31].mxu1 }
 0x2a5   : > { %3261 = vst [vmem:[%s4991_s17 + $0xe8] sm:$0xff] %v3647_v61  ;;  %v2990_v1 = vmax.f32 %v2724_v41, 0.0 }
 0x2a7   : > { %v3648_v53 = vpack.c.bf16 %v2990_v1, %v2989_v31 }
 0x2a9   : > { %3262 = vst [vmem:[%s4991_s17 + $0xf0] sm:$0xff] %v3648_v53 }
 0x2d5   : > { %v2762_v47 = vpop.f32.mrb[32].mxu0 }
 0x2d6   : > { %v2763_v54 = vadd.f32 %v2762_v47, %v4963_v62  ;;  %v2764_v25 = vpop.f32.mrb[33].mxu0 }
 0x2d7   : > { %v2765_v42 = vadd.f32 %v2764_v25, %v4963_v62  ;;  %v2766_v24 = vpop.f32.mrb[34].mxu0 }
 0x2d8   : > { %v2945_v59 = vmax.f32 %v2763_v54, 0.0  ;;  %v2767_v37 = vadd.f32 %v2766_v24, %v4981_v43  ;;  %v2768_v35 = vpop.f32.mrb[35].mxu0 }
 0x2d9   : > { %v2946_v60 = vmax.f32 %v2765_v42, 0.0  ;;  %v2813_v6 = vpop.f32.mrb[32].mxu1  ;;  %v2769_v51 = vadd.f32 %v2768_v35, %v4981_v43 }
 0x2da   : > { %v2814_v63 = vadd.f32 %v2813_v6, %v4963_v62  ;;  %v2968_v32 = vmax.f32 %v2767_v37, 0.0  ;;  %v2815_v40 = vpop.f32.mrb[33].mxu1 }
 0x2db   : > { %v3625_v44 = vpack.c.bf16 %v2946_v60, %v2945_v59  ;;  %v2816_v34 = vadd.f32 %v2815_v40, %v4963_v62  ;;  %v2969_v7 = vmax.f32 %v2769_v51, 0.0  ;;  %v2817_v12 = vpop.f32.mrb[34].mxu1 }
 0x2dc   : > { %v2947_v29 = vmax.f32 %v2814_v63, 0.0  ;;  %v2818_v46 = vadd.f32 %v2817_v12, %v4981_v43  ;;  %v2819_v8 = vpop.f32.mrb[35].mxu1 }
 0x2dd   : > { %3239 = vst [vmem:[%s4991_s17 + $0x40] sm:$0xff] %v3625_v44  ;;  %v2948_v11 = vmax.f32 %v2816_v34, 0.0  ;;  %v3637_v9 = vpack.c.bf16 %v2969_v7, %v2968_v32  ;;  %v2820_v50 = vadd.f32 %v2819_v8, %v4981_v43  ;;  %v2772_v13 = vpop.f32.mrb[36].mxu0 }
 0x2de   : > { %v2970_v16 = vmax.f32 %v2818_v46, 0.0  ;;  %v2773_v30 = vadd.f32 %v2772_v13, %v4995_v39  ;;  %v2774_v28 = vpop.f32.mrb[37].mxu0  ;;  %v3295_v13 = vld [vmem:[%s4991_s17 + $0x10] sm:$0xff] (%p3880_p8) }
 0x2df   : > { %v3626_v0 = vpack.c.bf16 %v2948_v11, %v2947_v29  ;;  %3251 = vst [vmem:[%s4991_s17 + $0x9c] sm:$0xff] %v3637_v9  ;;  %v2971_v20 = vmax.f32 %v2820_v50, 0.0  ;;  %v2775_v58 = vadd.f32 %v2774_v28, %v4995_v39  ;;  %v2776_v49 = vpop.f32.mrb[38].mxu0  ;;  %v3293_v50 = vld [vmem:[%s4991_s17 + $0x8] sm:$0xff] (%p3880_p8)  ;;  %3296 = vst [vmem:[%s5113_s26 + $0x10] sm:$0xff] (%p3880_p8), %v3295_v13 }
 0x2e0   : > { %v2991_v19 = vmax.f32 %v2773_v30, 0.0  ;;  %v2777_v17 = vpop.f32.mrb[39].mxu0  ;;  %v3299_v30 = vld [vmem:[%s4991_s17 + $0x20] sm:$0xff] (%p3880_p8)  ;;  %v3301_v28 = vld [vmem:[%s4991_s17 + $0x28] sm:$0xff] (%p3880_p8)  ;;  %3294 = vst [vmem:[%s5113_s26 + $0x8] sm:$0xff] (%p3880_p8), %v3293_v50 }
 0x2e1   : > { %3240 = vst [vmem:[%s4991_s17 + $0x48] sm:$0xff] %v3626_v0  ;;  %v3638_v18 = vpack.c.bf16 %v2971_v20, %v2970_v16  ;;  %v2992_v26 = vmax.f32 %v2775_v58, 0.0  ;;  %v2823_v33 = vpop.f32.mrb[36].mxu1  ;;  %v3297_v16 = vld [vmem:[%s4991_s17 + $0x18] sm:$0xff] (%p3880_p8)  ;;  %v3303_v0 = vld [vmem:[%s4991_s17 + $0x30] sm:$0xff] (%p3880_p8)  ;;  %3300 = vst [vmem:[%s5113_s26 + $0x20] sm:$0xff] (%p3880_p8), %v3299_v30 }
 0x2e2   : > { %v2824_v5 = vadd.f32 %v2823_v33, %v4995_v39  ;;  %v2825_v14 = vpop.f32.mrb[37].mxu1  ;;  %v3305_v20 = vld [vmem:[%s4991_s17 + $0x38] sm:$0xff] (%p3880_p8)  ;;  %3298 = vst [vmem:[%s5113_s26 + $0x18] sm:$0xff] (%p3880_p8), %v3297_v16  ;;  %3302 = vst [vmem:[%s5113_s26 + $0x28] sm:$0xff] (%p3880_p8), %v3301_v28 }
 0x2e3   : > { %3252 = vst [vmem:[%s4991_s17 + $0xa4] sm:$0xff] %v3638_v18  ;;  %v3649_v52 = vpack.c.bf16 %v2992_v26, %v2991_v19  ;;  %v2826_v38 = vadd.f32 %v2825_v14, %v4995_v39  ;;  %v2827_v57 = vpop.f32.mrb[38].mxu1  ;;  %3304 = vst [vmem:[%s5113_s26 + $0x30] sm:$0xff] (%p3880_p8), %v3303_v0  ;;  %v3313_v17 = vld [vmem:[%s4991_s17 + $0x5c] sm:$0xff] (%p3880_p8)  ;;  %v3315_v18 = vld [vmem:[%s4991_s17 + $0x64] sm:$0xff] (%p3880_p8) }
 0x2e4   : > { %v2993_v36 = vmax.f32 %v2824_v5, 0.0  ;;  %v2828_v45 = vpop.f32.mrb[39].mxu1  ;;  %v3307_v58 = vld [vmem:[%s4991_s17 + $0x40] sm:$0xff] (%p3880_p8)  ;;  %3306 = vst [vmem:[%s5113_s26 + $0x38] sm:$0xff] (%p3880_p8), %v3305_v20  ;;  %3314 = vst [vmem:[%s5113_s26 + $0x114] sm:$0xff] (%p3880_p8), %v3313_v17  ;;  %v3317_v26 = vld [vmem:[%s4991_s17 + $0x6c] sm:$0xff] (%p3880_p8) }
 0x2e5   : > { %3263 = vst [vmem:[%s4991_s17 + $0xf8] sm:$0xff] %v3649_v52  ;;  %v2994_v27 = vmax.f32 %v2826_v38, 0.0  ;;  %3308 = vst [vmem:[%s5113_s26 + $0x40] sm:$0xff] (%p3880_p8), %v3307_v58  ;;  %v3319_v33 = vld [vmem:[%s4991_s17 + $0x74] sm:$0xff] (%p3880_p8)  ;;  %v3321_v5 = vld [vmem:[%s4991_s17 + $0x7c] sm:$0xff] (%p3880_p8) }
 0x2e6   : > { %3316 = vst [vmem:[%s5113_s26 + $0x11c] sm:$0xff] (%p3880_p8), %v3315_v18  ;;  %3318 = vst [vmem:[%s5113_s26 + $0x124] sm:$0xff] (%p3880_p8), %v3317_v26  ;;  %v3323_v14 = vld [vmem:[%s4991_s17 + $0x84] sm:$0xff] (%p3880_p8)  ;;  %v3325_v52 = vld [vmem:[%s4991_s17 + $0x8c] sm:$0xff] (%p3880_p8) }
 0x2e7   : > { %v3650_v21 = vpack.c.bf16 %v2994_v27, %v2993_v36  ;;  %3320 = vst [vmem:[%s5113_s26 + $0x12c] sm:$0xff] (%p3880_p8), %v3319_v33  ;;  %3322 = vst [vmem:[%s5113_s26 + $0x134] sm:$0xff] (%p3880_p8), %v3321_v5  ;;  %v3327_v38 = vld [vmem:[%s4991_s17 + $0x94] sm:$0xff] (%p3880_p8)  ;;  %v3329_v57 = vld [vmem:[%s4991_s17 + $0x9c] sm:$0xff] (%p3880_p8) }
 0x2e8   : > { %v3309_v49 = vld [vmem:[%s4991_s17 + $0x48] sm:$0xff] (%p3880_p8)  ;;  %3324 = vst [vmem:[%s5113_s26 + $0x13c] sm:$0xff] (%p3880_p8), %v3323_v14  ;;  %3326 = vst [vmem:[%s5113_s26 + $0x144] sm:$0xff] (%p3880_p8), %v3325_v52  ;;  %v3335_v27 = vld [vmem:[%s4991_s17 + $0xb8] sm:$0xff] (%p3880_p8) }
 0x2e9   : > { %3264 = vst [vmem:[%s4991_s17 + $0x100] sm:$0xff] %v3650_v21  ;;  %3310 = vst [vmem:[%s5113_s26 + $0x48] sm:$0xff] (%p3880_p8), %v3309_v49  ;;  %v3337_v21 = vld [vmem:[%s4991_s17 + $0xc0] sm:$0xff] (%p3880_p8) }
 0x2ea   : > { %v3331_v36 = vld [vmem:[%s4991_s17 + $0xa4] sm:$0xff] (%p3880_p8)  ;;  %3328 = vst [vmem:[%s5113_s26 + $0x14c] sm:$0xff] (%p3880_p8), %v3327_v38  ;;  %3330 = vst [vmem:[%s5113_s26 + $0x154] sm:$0xff] (%p3880_p8), %v3329_v57 }
 0x2eb   : > { %3332 = vst [vmem:[%s5113_s26 + $0x15c] sm:$0xff] (%p3880_p8), %v3331_v36  ;;  %3336 = vst [vmem:[%s5113_s26 + $0x228] sm:$0xff] (%p3880_p8), %v3335_v27 }
 0x2ec   : > { %3338 = vst [vmem:[%s5113_s26 + $0x230] sm:$0xff] (%p3880_p8), %v3337_v21 }
 0x308   : > { %v2915_v22 = vpop.f32.mrb[40].mxu1  ;;  %v2864_v3 = vpop.f32.mrb[40].mxu0 }
 0x309   : > { %v2916_v4 = vadd.f32 %v2915_v22, %v4963_v62  ;;  %v2865_v2 = vadd.f32 %v2864_v3, %v4963_v62  ;;  %v2917_v10 = vpop.f32.mrb[41].mxu1  ;;  %v2866_v55 = vpop.f32.mrb[41].mxu0  ;;  %v3339_v22 = vld [vmem:[%s4991_s17 + $0xc8] sm:$0xff] (%p3880_p8)  ;;  %v3341_v3 = vld [vmem:[%s4991_s17 + $0xd0] sm:$0xff] (%p3880_p8) }
 0x30a   : > { %v2867_v56 = vadd.f32 %v2866_v55, %v4963_v62  ;;  %v2918_v15 = vpop.f32.mrb[42].mxu1  ;;  %v2868_v61 = vpop.f32.mrb[42].mxu0  ;;  %3340 = vst [vmem:[%s5113_s26 + $0x238] sm:$0xff] (%p3880_p8), %v3339_v22  ;;  %3342 = vst [vmem:[%s5113_s26 + $0x240] sm:$0xff] (%p3880_p8), %v3341_v3  ;;  %v3347_v10 = vld [vmem:[%s4991_s17 + $0xe8] sm:$0xff] (%p3880_p8)  ;;  %v3349_v55 = vld [vmem:[%s4991_s17 + $0xf0] sm:$0xff] (%p3880_p8) }
 0x30b   : > { %v2951_v41 = vmax.f32 %v2916_v4, 0.0  ;;  %v2949_v48 = vmax.f32 %v2865_v2, 0.0  ;;  %v2919_v31 = vadd.f32 %v2918_v15, %v4981_v43  ;;  %v2869_v23 = vadd.f32 %v2868_v61, %v4981_v43  ;;  %v2920_v1 = vpop.f32.mrb[43].mxu1  ;;  %v2870_v53 = vpop.f32.mrb[43].mxu0  ;;  %v3343_v4 = vld [vmem:[%s4991_s17 + $0xd8] sm:$0xff] (%p3880_p8)  ;;  %v3345_v2 = vld [vmem:[%s4991_s17 + $0xe0] sm:$0xff] (%p3880_p8) }
 0x30c   : > { %v2950_v47 = vmax.f32 %v2867_v56, 0.0  ;;  %v2871_v54 = vadd.f32 %v2870_v53, %v4981_v43  ;;  %3344 = vst [vmem:[%s5113_s26 + $0x248] sm:$0xff] (%p3880_p8), %v3343_v4  ;;  %3346 = vst [vmem:[%s5113_s26 + $0x250] sm:$0xff] (%p3880_p8), %v3345_v2  ;;  %v3351_v56 = vld [vmem:[%s4991_s17 + $0xf8] sm:$0xff] (%p3880_p8)  ;;  %v3353_v15 = vld [vmem:[%s4991_s17 + $0x100] sm:$0xff] (%p3880_p8) }
 0x30d   : > { %v3628_v25 = vpack.c.bf16 %v2951_v41, %v2951_v41  ;;  %v2974_v42 = vmax.f32 %v2919_v31, 0.0  ;;  %v2972_v62 = vmax.f32 %v2869_v23, 0.0  ;;  %3348 = vst [vmem:[%s5113_s26 + $0x258] sm:$0xff] (%p3880_p8), %v3347_v10  ;;  %3350 = vst [vmem:[%s5113_s26 + $0x260] sm:$0xff] (%p3880_p8), %v3349_v55 }
 0x30e   : > { %v3627_v24 = vpack.c.bf16 %v2950_v47, %v2949_v48  ;;  %v2973_v59 = vmax.f32 %v2871_v54, 0.0  ;;  %3352 = vst [vmem:[%s5113_s26 + $0x268] sm:$0xff] (%p3880_p8), %v3351_v56  ;;  %3354 = vst [vmem:[%s5113_s26 + $0x270] sm:$0xff] (%p3880_p8), %v3353_v15 }
 0x30f   : > { %3242 = vst [vmem:[%s4991_s17 + $0x58] sm:$0xf] %v3628_v25  ;;  %v3640_v37 = vpack.c.bf16 %v2974_v42, %v2974_v42 }
 0x310   : > { %3241 = vst [vmem:[%s4991_s17 + $0x50] sm:$0xff] %v3627_v24  ;;  %v3639_v35 = vpack.c.bf16 %v2973_v59, %v2972_v62  ;;  %v2923_v60 = vpop.f32.mrb[44].mxu1  ;;  %v2874_v6 = vpop.f32.mrb[44].mxu0 }
 0x311   : > { %3254 = vst [vmem:[%s4991_s17 + $0xb4] sm:$0xf] %v3640_v37  ;;  %v2924_v51 = vadd.f32 %v2923_v60, %v4995_v39  ;;  %v2875_v63 = vadd.f32 %v2874_v6, %v4995_v39  ;;  %v2925_v43 = vpop.f32.mrb[45].mxu1  ;;  %v2876_v32 = vpop.f32.mrb[45].mxu0 }
 0x312   : > { %3253 = vst [vmem:[%s4991_s17 + $0xac] sm:$0xff] %v3639_v35  ;;  %v2877_v40 = vadd.f32 %v2876_v32, %v4995_v39  ;;  %v2926_v44 = vpop.f32.mrb[46].mxu1  ;;  %v2878_v34 = vpop.f32.mrb[46].mxu0  ;;  %3273 = sbr.rel (!%p3880_p8) target bundleno = 801 (0x321), region = 92  ;;  %v3291_v39 = vld [vmem:[%s4991_s17] sm:$0xff] (%p3880_p8) }
 0x313   : > { %v2997_v7 = vmax.f32 %v2924_v51, 0.0  ;;  %v2995_v12 = vmax.f32 %v2875_v63, 0.0  ;;  %v2927_v29 = vpop.f32.mrb[47].mxu1  ;;  %v2879_v46 = vpop.f32.mrb[47].mxu0  ;;  %3292 = vst [vmem:[%s5113_s26] sm:$0xff] (%p3880_p8), %v3291_v39 }
 0x314   : > { %v2996_v8 = vmax.f32 %v2877_v40, 0.0 }
 0x315   : > { %v3652_v11 = vpack.c.bf16 %v2997_v7, %v2997_v7 }
 0x316   : > { %v3651_v9 = vpack.c.bf16 %v2996_v8, %v2995_v12  ;;  %v3608_v41 = vld [vmem:[%s4991_s17 + $0x58] sm:$0xf] (%p3880_p8) }
 0x317   : > { %3266 = vst [vmem:[%s4991_s17 + $0x110] sm:$0xf] %v3652_v11  ;;  %v3311_v19 = vld [vmem:[%s4991_s17 + $0x50] sm:$0xff] (%p3880_p8)  ;;  %3609 = vst [vmem:[%s5113_s26 + $0x58] sm:$0xf] (%p3880_p8), %v3608_v41 }
 0x318   : > { %3265 = vst [vmem:[%s4991_s17 + $0x108] sm:$0xff] %v3651_v9  ;;  %3312 = vst [vmem:[%s5113_s26 + $0x50] sm:$0xff] (%p3880_p8), %v3311_v19  ;;  %v3610_v48 = vld [vmem:[%s4991_s17 + $0xb4] sm:$0xf] (%p3880_p8) }
 0x319   : > { %v3333_v45 = vld [vmem:[%s4991_s17 + $0xac] sm:$0xff]  ;;  %3611 = vst [vmem:[%s5113_s26 + $0x16c] sm:$0xf] %v3610_v48 }
 0x31a   : > { %3334 = vst [vmem:[%s5113_s26 + $0x164] sm:$0xff] %v3333_v45 }
 0x31e   : > { %v3612_v31 = vld [vmem:[%s4991_s17 + $0x110] sm:$0xf] }
 0x31f   : > { %v3355_v61 = vld [vmem:[%s4991_s17 + $0x108] sm:$0xff]  ;;  %3613 = vst [vmem:[%s5113_s26 + $0x280] sm:$0xf] %v3612_v31 }
 0x320   : > { %3356 = vst [vmem:[%s5113_s26 + $0x278] sm:$0xff] %v3355_v61 }
 0x321 PF: > { %p11_p13 = scmp.ge.s32.totalorder %s3855_s21, 5   ;;  %s5204_s15 = smov %s3780_s16 }
 0x322   : > { %s5205_s16 = smov %s3874_s28  ;;  %s5206_s17 = smov %s3788_s18 }
 0x323   : > { %s5207_s18 = smov %s3865_s25  ;;  %s5208_s19 = smov %s3855_s21 }
 0x324   :  { %13 = sbr.rel (!%p11_p13) target bundleno = 3 (0x3), region = 175 }

// kernel: net_forward.5
= control target key start
LH: loop header
LB: loop body
LE: loop exit
PB: predicated region body
PF: predicated region fallthrough
CT: control target
= control target key end

     0   :  { %16 = vsyncpa [#allocation4], 0  ;;  %s9489_s17 = smov 0   ;;  %s10287_s0 = inlined_call_operand.vmem [shape: bf16[24,2,1024], index: 0, kind: input, shape index: {}]   ;;  %s10288_s1 = inlined_call_operand.vmem [shape: bf16[24,1024,120], index: 1, kind: input, shape index: {}]   ;;  %s10289_s2 = inlined_call_operand.vmem [shape: f32[1,120], index: 2, kind: input, shape index: {}]   ;;  %s10290_s3 = inlined_call_operand.vmem [shape: f32[1,120], index: 3, kind: input, shape index: {}]   ;;  %s10291_s4 = inlined_call_operand.vmem [shape: f32[1,120], index: 4, kind: input, shape index: {}]   ;;  %s10292_s5 = inlined_call_operand.vmem [shape: f32[120,84], index: 5, kind: input, shape index: {}]   ;;  %s10293_s6 = inlined_call_operand.vmem [shape: f32[1,84], index: 6, kind: input, shape index: {}]   ;;  %s10294_s7 = inlined_call_operand.vmem [shape: f32[1,84], index: 7, kind: input, shape index: {}]   ;;  %s10295_s8 = inlined_call_operand.vmem [shape: f32[1,84], index: 8, kind: input, shape index: {}]   ;;  %s10296_s9 = inlined_call_operand.vmem [shape: f32[84,6], index: 9, kind: input, shape index: {}]   ;;  %s10297_s10 = inlined_call_operand.vmem [shape: f32[1,6], index: 10, kind: input, shape index: {}]   ;;  %s10298_s11 = inlined_call_operand.hbm [shape: f32[2,6], index: 11, kind: output, shape index: {}]  }
   0x1 LB: > { %s9495_s18 = sadd.s32 4294967295, %s9421_s17   ;;  %p6581_p0 = scmp.ge.s32.totalorder %s9421_s17, 1  ;;  %s9421_s17 = sphi %s9489_s17, %s22_s17  }
   0x2   : > { %p346_p1 = scmp.lt.s32.totalorder %s9421_s17, 4 }
   0x4   : > { %p347_p2 = pnand %p6581_p0, %p346_p1 }
   0x5   : > { %s6582_s19 = sshll.u32 (!%p347_p2), %s9495_s18, 3  ;;  %p6587_p4 = scmp.ne.s32.totalorder (!%p347_p2), %s9495_s18, 0 }
   0x6   : > { %350 = sbr.rel (%p347_p2) target bundleno = 1233 (0x4d1), region = 64  ;;  %p388_p3 = scmp.lt.s32.totalorder (!%p347_p2), %s6582_s19, 23 }
   0xd   : > { %s10300_s19 = smov (!%p388_p3, %s6582_s19), 23  ;;  %404 = sbr.rel (%p6587_p4) target bundleno = 20 (0x14), region = 68 }
   0xe   : > { %s6583_s20 = sshll.u32 %s10300_s19, 3  ;;  %s8018_s21 = sshll.u32 %s10300_s19, 9  ;;  %vm405_vm0 = vcmask (!%p6587_p4), 975872   ;;  %v9423_v0 = vmov (!%p6587_p4), 0.0  }
   0xf   : > { %s9503_s24 = scalar_lea.vmem %s10287_s0, %s6583_s20  ;;  %s9508_s27 = scalar_lea.vmem %s10288_s1, %s8018_s21  ;;  %406 = vst.msk [vmem:[#allocation2] sm:$0x3] (!%p6587_p4), %vm405_vm0, %v9423_v0 }
  0x14 PF: > { %v8865_v1 = vld [vmem:[%s9508_s27 + $0x240] sm:$0xff]   ;;  %v8869_v5 = vld [vmem:[%s9508_s27 + $0x248] sm:$0xff]   ;;  %v8873_v9 = vld [vmem:[%s9508_s27 + $0x250] sm:$0xff]   ;;  %v672_v29 = vlaneseq  ;;  %v9424_v37 = vmov 1966171168   ;;  %vm6277_vm1 = vcmask 975872  }
  0x15   : > { %v8866_v2 = vld [vmem:[%s9508_s27 + $0x2c0] sm:$0xff]   ;;  %8019 = vmatprep.subr.bf16.mxu0 %v8865_v1  ;;  %v8870_v6 = vld [vmem:[%s9508_s27 + $0x2c8] sm:$0xff]   ;;  %v8874_v10 = vld [vmem:[%s9508_s27 + $0x2d0] sm:$0xff]   ;;  %v670_v38 = vunpack.c.l.s4 %v9424_v37  ;;  %p8003_p5 = scmp.ne.s32.totalorder %s9495_s18, 2 }
  0x16   : > { %v8867_v3 = vld [vmem:[%s9508_s27 + $0x200] sm:$0xff]   ;;  %8041 = vmatprep.subr.bf16.mxu1 %v8866_v2  ;;  %v8871_v7 = vld [vmem:[%s9508_s27 + $0x208] sm:$0xff]   ;;  %v8875_v11 = vld [vmem:[%s9508_s27 + $0x210] sm:$0xff]   ;;  %v673_v34 = vshrl.u32 %v672_v29, 7  ;;  %vm9426_vm2 = vmmov (!%p8003_p5), 0   ;;  %vm6331_vm3 = vcmask (!%p8003_p5), 982016  }
  0x17   : > { %v8868_v4 = vld [vmem:[%s9508_s27 + $0x280] sm:$0xff]   ;;  %8020 = vmatpush3.bf16.msra.mxu0 %v8867_v3  ;;  %v8872_v8 = vld [vmem:[%s9508_s27 + $0x288] sm:$0xff]   ;;  %v8876_v12 = vld [vmem:[%s9508_s27 + $0x290] sm:$0xff]   ;;  %v671_v41 = vunpack.c.0.s8 %v670_v38  ;;  %vm6444_vm4 = vcmask (!%p8003_p5), 1043456   ;;  %vm6440_vm5 = vcmask (!%p8003_p5), 687104   ;;  %vm6518_vm6 = vcmask (!%p8003_p5), 41984  }
  0x18   : > { %8042 = vmatpush3.bf16.msra.mxu1 %v8868_v4  ;;  %8021 = vmatprep.subr.bf16.mxu0 %v8869_v5  ;;  %v8877_v13 = vld [vmem:[%s9508_s27 + $0x258] sm:$0xff]   ;;  %v8881_v17 = vld [vmem:[%s9508_s27 + $0x260] sm:$0xff]   ;;  %v8885_v21 = vld [vmem:[%s9508_s27 + $0x268] sm:$0xff]  }
  0x19   : > { %8043 = vmatprep.subr.bf16.mxu1 %v8870_v6  ;;  %v8878_v14 = vld [vmem:[%s9508_s27 + $0x2d8] sm:$0xff]   ;;  %v8882_v18 = vld [vmem:[%s9508_s27 + $0x2e0] sm:$0xff]   ;;  %v8886_v22 = vld [vmem:[%s9508_s27 + $0x2e8] sm:$0xff]   ;;  %v9546_v42 = vsub.s32 %v671_v41, %v673_v34 }
  0x1a   : > { %v8879_v15 = vld [vmem:[%s9508_s27 + $0x218] sm:$0xff]   ;;  %v8883_v19 = vld [vmem:[%s9508_s27 + $0x220] sm:$0xff]   ;;  %v8887_v23 = vld [vmem:[%s9508_s27 + $0x228] sm:$0xff]  }
  0x1b   : > { %8022 = vmatpush3.bf16.msra.mxu0 %v8871_v7  ;;  %v8880_v16 = vld [vmem:[%s9508_s27 + $0x298] sm:$0xff]   ;;  %v8884_v20 = vld [vmem:[%s9508_s27 + $0x2a0] sm:$0xff]   ;;  %v8888_v24 = vld [vmem:[%s9508_s27 + $0x2a8] sm:$0xff]  }
  0x1c   : > { %8044 = vmatpush3.bf16.msra.mxu1 %v8872_v8  ;;  %8023 = vmatprep.subr.bf16.mxu0 %v8873_v9  ;;  %v8889_v25 = vld [vmem:[%s9508_s27 + $0x270] sm:$0xff]   ;;  %v8893_v30 = vld [vmem:[%s9508_s27 + $0x278] sm:$0xff]   ;;  %v6588_v35 = vld [vmem:[%s9503_s24 + $0x8] sm:$0xff] }
  0x1d   : > { %8045 = vmatprep.subr.bf16.mxu1 %v8874_v10  ;;  %v8890_v26 = vld [vmem:[%s9508_s27 + $0x2f0] sm:$0xff]   ;;  %v8894_v31 = vld [vmem:[%s9508_s27 + $0x2f8] sm:$0xff]   ;;  %v8898_v36 = vld [vmem:[%s9508_s27 + $0x340] sm:$0xff]   ;;  %v668_v40 = vcombine.high %v6588_v35, %v6588_v35  ;;  %v675_v43 = vrot.slane %v6588_v35, %v9546_v42 }
  0x1e   : > { %v8891_v27 = vld [vmem:[%s9508_s27 + $0x230] sm:$0xff]   ;;  %v8895_v32 = vld [vmem:[%s9508_s27 + $0x238] sm:$0xff]   ;;  %v8899_v39 = vld [vmem:[%s9508_s27 + $0x3c0] sm:$0xff]  }
  0x1f   : > { %8024 = vmatpush3.bf16.msra.mxu0 %v8875_v11  ;;  %v8892_v28 = vld [vmem:[%s9508_s27 + $0x2b0] sm:$0xff]   ;;  %v8896_v33 = vld [vmem:[%s9508_s27 + $0x2b8] sm:$0xff]   ;;  %v9550_v44 = vrot.slane %v668_v40, %v9546_v42  ;;  %v683_v45 = vcombine.high %v675_v43, %v675_v43  ;;  %v691_v46 = vrot.slane %v675_v43, %v9546_v42  ;;  %v8900_v48 = vld [vmem:[%s9508_s27 + $0x300] sm:$0xff]  }
  0x20   : > { %8046 = vmatpush3.bf16.msra.mxu1 %v8876_v12  ;;  %8025 = vmatprep.subr.bf16.mxu0 %v8877_v13  ;;  %v8901_v50 = vld [vmem:[%s9508_s27 + $0x380] sm:$0xff]   ;;  %v8902_v53 = vld [vmem:[%s9508_s27 + $0x348] sm:$0xff]   ;;  %v8906_v59 = vld [vmem:[%s9508_s27 + $0x350] sm:$0xff]  }
  0x21   : > { %8047 = vmatprep.subr.bf16.mxu1 %v8878_v14  ;;  %v684_v47 = vcombine.high %v9550_v44, %v9550_v44  ;;  %v705_v49 = vrot.slane %v683_v45, %v9546_v42  ;;  %v713_v52 = vcombine.high %v691_v46, %v691_v46  ;;  %v8903_v55 = vld [vmem:[%s9508_s27 + $0x3c8] sm:$0xff]   ;;  %v8907_v60 = vld [vmem:[%s9508_s27 + $0x3d0] sm:$0xff]   ;;  %v8910_v63 = vld [vmem:[%s9508_s27 + $0x358] sm:$0xff]  }
  0x22   : > { %v8904_v56 = vld [vmem:[%s9508_s27 + $0x308] sm:$0xff]   ;;  %v8908_v61 = vld [vmem:[%s9508_s27 + $0x310] sm:$0xff]   ;;  %v8911_v0 = vld [vmem:[%s9508_s27 + $0x3d8] sm:$0xff]  }
  0x23   : > { %8026 = vmatpush3.bf16.msra.mxu0 %v8879_v15  ;;  %v712_v51 = vrot.slane %v684_v47, %v9546_v42  ;;  %1141 = vmatprep.mubr.bf16.mxu0 %v705_v49  ;;  %v715_v54 = vcombine.high %v705_v49, %v705_v49  ;;  %v8905_v58 = vld [vmem:[%s9508_s27 + $0x388] sm:$0xff]   ;;  %v8909_v62 = vld [vmem:[%s9508_s27 + $0x390] sm:$0xff]   ;;  %v8912_v1 = vld [vmem:[%s9508_s27 + $0x318] sm:$0xff]  }
  0x24   : > { %8048 = vmatpush3.bf16.msra.mxu1 %v8880_v16  ;;  %8027 = vmatprep.subr.bf16.mxu0 %v8881_v17  ;;  %v8913_v2 = vld [vmem:[%s9508_s27 + $0x398] sm:$0xff]   ;;  %v8914_v3 = vld [vmem:[%s9508_s27 + $0x360] sm:$0xff]   ;;  %v8918_v7 = vld [vmem:[%s9508_s27 + $0x368] sm:$0xff]  }
  0x25   : > { %8049 = vmatprep.subr.bf16.mxu1 %v8882_v18  ;;  %v716_v57 = vcombine.high %v712_v51, %v712_v51  ;;  %1181 = vmatprep.mubr.bf16.mxu1 %v715_v54  ;;  %v8915_v4 = vld [vmem:[%s9508_s27 + $0x3e0] sm:$0xff]   ;;  %v8919_v8 = vld [vmem:[%s9508_s27 + $0x3e8] sm:$0xff]   ;;  %v8922_v11 = vld [vmem:[%s9508_s27 + $0x370] sm:$0xff]  }
  0x26   : > { %v8916_v5 = vld [vmem:[%s9508_s27 + $0x320] sm:$0xff]   ;;  %v8920_v9 = vld [vmem:[%s9508_s27 + $0x328] sm:$0xff]   ;;  %v8923_v12 = vld [vmem:[%s9508_s27 + $0x3f0] sm:$0xff]  }
  0x27   : > { %8028 = vmatpush3.bf16.msra.mxu0 %v8883_v19  ;;  %v8917_v6 = vld [vmem:[%s9508_s27 + $0x3a0] sm:$0xff]   ;;  %v8921_v10 = vld [vmem:[%s9508_s27 + $0x3a8] sm:$0xff]   ;;  %v8924_v13 = vld [vmem:[%s9508_s27 + $0x330] sm:$0xff]   ;;  %v698_v19 = vrot.slane %v9550_v44, %v9546_v42 }
  0x28   : > { %8050 = vmatpush3.bf16.msra.mxu1 %v8884_v20  ;;  %8029 = vmatprep.subr.bf16.mxu0 %v8885_v21  ;;  %v8925_v14 = vld [vmem:[%s9508_s27 + $0x3b0] sm:$0xff]   ;;  %v8926_v15 = vld [vmem:[%s9508_s27 + $0x378] sm:$0xff]   ;;  %v8930_v20 = vld [vmem:[%s9508_s27 + $0x40] sm:$0xff]  }
  0x29   : > { %8051 = vmatprep.subr.bf16.mxu1 %v8886_v22  ;;  %v8927_v16 = vld [vmem:[%s9508_s27 + $0x3f8] sm:$0xff]   ;;  %v8931_v21 = vld [vmem:[%s9508_s27 + $0xc0] sm:$0xff]   ;;  %v8938_v29 = vld [vmem:[%s9508_s27 + $0x50] sm:$0xff]  }
  0x2a   : > { %v8928_v17 = vld [vmem:[%s9508_s27 + $0x338] sm:$0xff]   ;;  %v8932_v22 = vld [vmem:[%s9508_s27] sm:$0xff]   ;;  %v8950_v41 = vld [vmem:[%s9508_s27 + $0x68] sm:$0xff]  }
  0x2b   : > { %8030 = vmatpush3.bf16.msra.mxu0 %v8887_v23  ;;  %v8929_v18 = vld [vmem:[%s9508_s27 + $0x3b8] sm:$0xff]   ;;  %v8933_v23 = vld [vmem:[%s9508_s27 + $0x80] sm:$0xff]   ;;  %v8951_v43 = vld [vmem:[%s9508_s27 + $0xe8] sm:$0xff]  }
  0x2c   : > { %8052 = vmatpush3.bf16.msra.mxu1 %v8888_v24  ;;  %8031 = vmatprep.subr.bf16.mxu0 %v8889_v25  ;;  %v714_v24 = vcombine.high %v698_v19, %v698_v19  ;;  %v8934_v25 = vld [vmem:[%s9508_s27 + $0x48] sm:$0xff]   ;;  %v8943_v34 = vld [vmem:[%s9508_s27 + $0xd8] sm:$0xff]   ;;  %v8946_v37 = vld [vmem:[%s9508_s27 + $0x60] sm:$0xff]  }
  0x2d   : > { %8053 = vmatprep.subr.bf16.mxu1 %v8890_v26  ;;  %v8935_v26 = vld [vmem:[%s9508_s27 + $0xc8] sm:$0xff]   ;;  %v8944_v35 = vld [vmem:[%s9508_s27 + $0x18] sm:$0xff]   ;;  %v8947_v38 = vld [vmem:[%s9508_s27 + $0xe0] sm:$0xff]  }
  0x2e   : > { %v8949_v40 = vld [vmem:[%s9508_s27 + $0xa0] sm:$0xff]   ;;  %v8952_v44 = vld [vmem:[%s9508_s27 + $0x28] sm:$0xff]  }
  0x2f   : > { %8032 = vmatpush3.bf16.msra.mxu0 %v8891_v27  ;;  %v8936_v27 = vld [vmem:[%s9508_s27 + $0x8] sm:$0xff]   ;;  %v407_v47 = vld [vmem:[%s9503_s24] sm:$0xff] }
  0x30   : > { %8054 = vmatpush3.bf16.msra.mxu1 %v8892_v28  ;;  %8033 = vmatprep.subr.bf16.mxu0 %v8893_v30  ;;  %v8937_v28 = vld [vmem:[%s9508_s27 + $0x88] sm:$0xff]   ;;  %v8939_v30 = vld [vmem:[%s9508_s27 + $0xd0] sm:$0xff]   ;;  %v1277_v49 = vrot.slane %v407_v47, %v9546_v42 }
  0x31   : > { %8055 = vmatprep.subr.bf16.mxu1 %v8894_v31  ;;  %v8940_v31 = vld [vmem:[%s9508_s27 + $0x10] sm:$0xff]   ;;  %v8953_v45 = vld [vmem:[%s9508_s27 + $0xa8] sm:$0xff]  }
  0x33   : > { %8034 = vmatpush3.bf16.msra.mxu0 %v8895_v32  ;;  %v8941_v32 = vld [vmem:[%s9508_s27 + $0x90] sm:$0xff]  }
  0x34   : > { %8056 = vmatpush3.bf16.msra.mxu1 %v8896_v33  ;;  %8063 = vmatprep.subr.bf16.mxu0 %v8898_v36  ;;  %v8942_v33 = vld [vmem:[%s9508_s27 + $0x58] sm:$0xff]  }
  0x35   : > { %8085 = vmatprep.subr.bf16.mxu1 %v8899_v39  ;;  %v8945_v36 = vld [vmem:[%s9508_s27 + $0x98] sm:$0xff]   ;;  %v8948_v39 = vld [vmem:[%s9508_s27 + $0x20] sm:$0xff]  }
  0x36   : > { %1142 = vmatmul.mubr.bf16.vlgmr.msra.gmra.mrb[0].mxu0 %v691_v46  ;;  %v8954_v46 = vld [vmem:[%s9508_s27 + $0x70] sm:$0xff]  }
  0x37   : > { %8064 = vmatpush3.bf16.msra.mxu0 %v8900_v48  ;;  %1182 = vmatmul.mubr.bf16.vlgmr.msra.gmra.mrb[0].mxu1 %v713_v52  ;;  %v8955_v48 = vld [vmem:[%s9508_s27 + $0xf0] sm:$0xff]  }
  0x38   : > { %8065 = vmatprep.subr.bf16.mxu0 %v8902_v53  ;;  %8086 = vmatpush3.bf16.msra.mxu1 %v8901_v50  ;;  %v1270_v50 = vcombine.high %v407_v47, %v407_v47  ;;  %v8957_v52 = vld [vmem:[%s9508_s27 + $0xb0] sm:$0xff]   ;;  %v1285_v53 = vcombine.high %v1277_v49, %v1277_v49 }
  0x39   : > { %1221 = vmatprep.mubr.bf16.mxu0 %v712_v51  ;;  %8087 = vmatprep.subr.bf16.mxu1 %v8903_v55  ;;  %v8956_v51 = vld [vmem:[%s9508_s27 + $0x30] sm:$0xff]   ;;  %v8958_v55 = vld [vmem:[%s9508_s27 + $0x78] sm:$0xff]  }
  0x3a   : > { %1261 = vmatprep.mubr.bf16.mxu1 %v716_v57  ;;  %v9620_v54 = vrot.slane %v1270_v50, %v9546_v42  ;;  %v1307_v57 = vrot.slane %v1285_v53, %v9546_v42  ;;  %v9005_v47 = vld [vmem:[%s9508_s27 + $0x410] sm:$0xff]   ;;  %v9008_v50 = vld [vmem:[%s9508_s27 + $0x4d8] sm:$0xff]   ;;  %v9011_v53 = vld [vmem:[%s9508_s27 + $0x460] sm:$0xff]  }
  0x3b   : > { %8066 = vmatpush3.bf16.msra.mxu0 %v8904_v56  ;;  %v8959_v56 = vld [vmem:[%s9508_s27 + $0xf8] sm:$0xff]  }
  0x3c   : > { %8067 = vmatprep.subr.bf16.mxu0 %v8906_v59  ;;  %8088 = vmatpush3.bf16.msra.mxu1 %v8905_v58  ;;  %v1286_v58 = vcombine.high %v9620_v54, %v9620_v54  ;;  %v8960_v59 = vld [vmem:[%s9508_s27 + $0x38] sm:$0xff]  }
  0x3d   : > { %8089 = vmatprep.subr.bf16.mxu1 %v8907_v60  ;;  %v8961_v60 = vld [vmem:[%s9508_s27 + $0xb8] sm:$0xff]  }
  0x3f   : > { %8068 = vmatpush3.bf16.msra.mxu0 %v8908_v61  ;;  %v1317_v61 = vcombine.high %v1307_v57, %v1307_v57 }
  0x40   : > { %8069 = vmatprep.subr.bf16.mxu0 %v8910_v63  ;;  %8090 = vmatpush3.bf16.msra.mxu1 %v8909_v62  ;;  %v1293_v62 = vrot.slane %v1277_v49, %v9546_v42  ;;  %v8962_v63 = vld [vmem:[%s9508_s27 + $0x140] sm:$0xff]   ;;  %v9007_v49 = vld [vmem:[%s9508_s27 + $0x458] sm:$0xff]  }
  0x41   : > { %8091 = vmatprep.subr.bf16.mxu1 %v8911_v0  ;;  %v8963_v0 = vld [vmem:[%s9508_s27 + $0x1c0] sm:$0xff]  }
  0x43   : > { %8070 = vmatpush3.bf16.msra.mxu0 %v8912_v1  ;;  %v1314_v1 = vrot.slane %v1286_v58, %v9546_v42  ;;  %v9016_v58 = vld [vmem:[%s9508_s27 + $0x4e8] sm:$0xff]  }
  0x44   : > { %8071 = vmatprep.subr.bf16.mxu0 %v8914_v3  ;;  %8092 = vmatpush3.bf16.msra.mxu1 %v8913_v2  ;;  %v8964_v2 = vld [vmem:[%s9508_s27 + $0x100] sm:$0xff]  }
  0x45   : > { %8093 = vmatprep.subr.bf16.mxu1 %v8915_v4  ;;  %v8965_v3 = vld [vmem:[%s9508_s27 + $0x180] sm:$0xff]   ;;  %v1315_v4 = vcombine.high %v1293_v62, %v1293_v62 }
  0x47   : > { %8072 = vmatpush3.bf16.msra.mxu0 %v8916_v5  ;;  %v8966_v5 = vld [vmem:[%s9508_s27 + $0x148] sm:$0xff]  }
  0x48   : > { %8073 = vmatprep.subr.bf16.mxu0 %v8918_v7  ;;  %8094 = vmatpush3.bf16.msra.mxu1 %v8917_v6  ;;  %v8967_v6 = vld [vmem:[%s9508_s27 + $0x1c8] sm:$0xff]   ;;  %v1318_v7 = vcombine.high %v1314_v1, %v1314_v1 }
  0x49   : > { %8095 = vmatprep.subr.bf16.mxu1 %v8919_v8  ;;  %v8968_v8 = vld [vmem:[%s9508_s27 + $0x108] sm:$0xff]  }
  0x4b   : > { %8074 = vmatpush3.bf16.msra.mxu0 %v8920_v9  ;;  %v8969_v9 = vld [vmem:[%s9508_s27 + $0x188] sm:$0xff]  }
  0x4c   : > { %8075 = vmatprep.subr.bf16.mxu0 %v8922_v11  ;;  %8096 = vmatpush3.bf16.msra.mxu1 %v8921_v10  ;;  %v8970_v10 = vld [vmem:[%s9508_s27 + $0x150] sm:$0xff]  }
  0x4d   : > { %8097 = vmatprep.subr.bf16.mxu1 %v8923_v12  ;;  %v8971_v11 = vld [vmem:[%s9508_s27 + $0x1d0] sm:$0xff]  }
  0x4e   : > { %v8972_v12 = vld [vmem:[%s9508_s27 + $0x110] sm:$0xff]  }
  0x4f   : > { %8076 = vmatpush3.bf16.msra.mxu0 %v8924_v13  ;;  %v8973_v13 = vld [vmem:[%s9508_s27 + $0x190] sm:$0xff]  }
  0x50   : > { %8077 = vmatprep.subr.bf16.mxu0 %v8926_v15  ;;  %8098 = vmatpush3.bf16.msra.mxu1 %v8925_v14  ;;  %v8974_v14 = vld [vmem:[%s9508_s27 + $0x158] sm:$0xff]  }
  0x51   : > { %8099 = vmatprep.subr.bf16.mxu1 %v8927_v16  ;;  %v8975_v15 = vld [vmem:[%s9508_s27 + $0x1d8] sm:$0xff]  }
  0x52   : > { %v8976_v16 = vld [vmem:[%s9508_s27 + $0x118] sm:$0xff]  }
  0x53   : > { %8078 = vmatpush3.bf16.msra.mxu0 %v8928_v17  ;;  %v8977_v17 = vld [vmem:[%s9508_s27 + $0x198] sm:$0xff]  }
  0x54   : > { %8107 = vmatprep.subr.bf16.mxu0 %v8930_v20  ;;  %8100 = vmatpush3.bf16.msra.mxu1 %v8929_v18  ;;  %v8978_v18 = vld [vmem:[%s9508_s27 + $0x160] sm:$0xff]  }
  0x55   : > { %8129 = vmatprep.subr.bf16.mxu1 %v8931_v21  ;;  %v8980_v20 = vld [vmem:[%s9508_s27 + $0x120] sm:$0xff]  }
  0x56   : > { %1222 = vmatmul.mubr.bf16.vlgmr.msra.gmra.mrb[4].mxu0 %v698_v19  ;;  %v8979_v19 = vld [vmem:[%s9508_s27 + $0x1e0] sm:$0xff]  }
  0x57   : > { %8108 = vmatpush3.bf16.msra.mxu0 %v8932_v22  ;;  %1262 = vmatmul.mubr.bf16.vlgmr.msra.gmra.mrb[4].mxu1 %v714_v24  ;;  %v8981_v21 = vld [vmem:[%s9508_s27 + $0x1a0] sm:$0xff]   ;;  %v8982_v22 = vld [vmem:[%s9508_s27 + $0x168] sm:$0xff]  }
  0x58   : > { %8109 = vmatprep.subr.bf16.mxu0 %v8934_v25  ;;  %8130 = vmatpush3.bf16.msra.mxu1 %v8933_v23  ;;  %v8983_v23 = vld [vmem:[%s9508_s27 + $0x1e8] sm:$0xff]  }
  0x59   : > { %8131 = vmatprep.subr.bf16.mxu1 %v8935_v26  ;;  %1743 = vmatprep.mubr.bf16.mxu0 %v1307_v57  ;;  %v8984_v24 = vld [vmem:[%s9508_s27 + $0x128] sm:$0xff]   ;;  %v8986_v26 = vld [vmem:[%s9508_s27 + $0x170] sm:$0xff]  }
  0x5a   : > { %1783 = vmatprep.mubr.bf16.mxu1 %v1317_v61  ;;  %v8985_v25 = vld [vmem:[%s9508_s27 + $0x1a8] sm:$0xff]   ;;  %v9019_v61 = vld [vmem:[%s9508_s27 + $0x470] sm:$0xff]  }
  0x5b   : > { %8110 = vmatpush3.bf16.msra.mxu0 %v8936_v27  ;;  %v8987_v27 = vld [vmem:[%s9508_s27 + $0x1f0] sm:$0xff]   ;;  %v9015_v57 = vld [vmem:[%s9508_s27 + $0x468] sm:$0xff]  }
  0x5c   : > { %8111 = vmatprep.subr.bf16.mxu0 %v8938_v29  ;;  %8132 = vmatpush3.bf16.msra.mxu1 %v8937_v28  ;;  %v8988_v28 = vld [vmem:[%s9508_s27 + $0x130] sm:$0xff]  }
  0x5d   : > { %8133 = vmatprep.subr.bf16.mxu1 %v8939_v30  ;;  %v8989_v29 = vld [vmem:[%s9508_s27 + $0x1b0] sm:$0xff]   ;;  %v8990_v30 = vld [vmem:[%s9508_s27 + $0x178] sm:$0xff]  }
  0x5f   : > { %8112 = vmatpush3.bf16.msra.mxu0 %v8940_v31  ;;  %v8991_v31 = vld [vmem:[%s9508_s27 + $0x1f8] sm:$0xff]  }
  0x60   : > { %8113 = vmatprep.subr.bf16.mxu0 %v8942_v33  ;;  %8134 = vmatpush3.bf16.msra.mxu1 %v8941_v32  ;;  %v8992_v32 = vld [vmem:[%s9508_s27 + $0x138] sm:$0xff]  }
  0x61   : > { %8135 = vmatprep.subr.bf16.mxu1 %v8943_v34  ;;  %v8993_v33 = vld [vmem:[%s9508_s27 + $0x1b8] sm:$0xff]   ;;  %v1300_v34 = vrot.slane %v9620_v54, %v9546_v42  ;;  %v9012_v54 = vld [vmem:[%s9508_s27 + $0x4e0] sm:$0xff]  }
  0x63   : > { %8114 = vmatpush3.bf16.msra.mxu0 %v8944_v35  ;;  %v8995_v35 = vld [vmem:[%s9508_s27 + $0x440] sm:$0xff]  }
  0x64   : > { %8115 = vmatprep.subr.bf16.mxu0 %v8946_v37  ;;  %8136 = vmatpush3.bf16.msra.mxu1 %v8945_v36  ;;  %v8996_v36 = vld [vmem:[%s9508_s27 + $0x4c0] sm:$0xff]  }
  0x65   : > { %8137 = vmatprep.subr.bf16.mxu1 %v8947_v38  ;;  %v8997_v37 = vld [vmem:[%s9508_s27 + $0x400] sm:$0xff]  }
  0x66   : > { %v8998_v38 = vld [vmem:[%s9508_s27 + $0x480] sm:$0xff]  }
  0x67   : > { %8116 = vmatpush3.bf16.msra.mxu0 %v8948_v39  ;;  %v1316_v39 = vcombine.high %v1300_v34, %v1300_v34 }
  0x68   : > { %8117 = vmatprep.subr.bf16.mxu0 %v8950_v41  ;;  %8138 = vmatpush3.bf16.msra.mxu1 %v8949_v40  ;;  %v8999_v40 = vld [vmem:[%s9508_s27 + $0x448] sm:$0xff]  }
  0x69   : > { %8139 = vmatprep.subr.bf16.mxu1 %v8951_v43  ;;  %v9000_v41 = vld [vmem:[%s9508_s27 + $0x4c8] sm:$0xff]  }
  0x6a   : > { %v9001_v43 = vld [vmem:[%s9508_s27 + $0x408] sm:$0xff]  }
  0x6b   : > { %8118 = vmatpush3.bf16.msra.mxu0 %v8952_v44  ;;  %v9002_v44 = vld [vmem:[%s9508_s27 + $0x488] sm:$0xff]  }
  0x6c   : > { %8119 = vmatprep.subr.bf16.mxu0 %v8954_v46  ;;  %8140 = vmatpush3.bf16.msra.mxu1 %v8953_v45  ;;  %v9003_v45 = vld [vmem:[%s9508_s27 + $0x450] sm:$0xff]  }
  0x6d   : > { %8141 = vmatprep.subr.bf16.mxu1 %v8955_v48  ;;  %v9004_v46 = vld [vmem:[%s9508_s27 + $0x4d0] sm:$0xff]  }
  0x6e   : > { %v9006_v48 = vld [vmem:[%s9508_s27 + $0x490] sm:$0xff]  }
  0x6f   : > { %8120 = vmatpush3.bf16.msra.mxu0 %v8956_v51  ;;  %v9009_v51 = vld [vmem:[%s9508_s27 + $0x418] sm:$0xff]  }
  0x70   : > { %8121 = vmatprep.subr.bf16.mxu0 %v8958_v55  ;;  %8142 = vmatpush3.bf16.msra.mxu1 %v8957_v52  ;;  %v9010_v52 = vld [vmem:[%s9508_s27 + $0x498] sm:$0xff]   ;;  %v9013_v55 = vld [vmem:[%s9508_s27 + $0x420] sm:$0xff]  }
  0x71   : > { %8143 = vmatprep.subr.bf16.mxu1 %v8959_v56  ;;  %v9014_v56 = vld [vmem:[%s9508_s27 + $0x4a0] sm:$0xff]  }
  0x73   : > { %8122 = vmatpush3.bf16.msra.mxu0 %v8960_v59  ;;  %v9017_v59 = vld [vmem:[%s9508_s27 + $0x428] sm:$0xff]  }
  0x74   : > { %8151 = vmatprep.subr.bf16.mxu0 %v8962_v63  ;;  %8144 = vmatpush3.bf16.msra.mxu1 %v8961_v60  ;;  %v9018_v60 = vld [vmem:[%s9508_s27 + $0x4a8] sm:$0xff]   ;;  %v9020_v63 = vld [vmem:[%s9508_s27 + $0x4f0] sm:$0xff]  }
  0x75   : > { %8173 = vmatprep.subr.bf16.mxu1 %v8963_v0 }
  0x76   : > { %1744 = vmatmul.mubr.bf16.vlgmr.msra.gmra.mrb[8].mxu0 %v1293_v62  ;;  %v6845_v62 = vld [vmem:[%s9503_s24 + $0x10] sm:$0xff] }
  0x77   : > { %8152 = vmatpush3.bf16.msra.mxu0 %v8964_v2  ;;  %1823 = vmatprep.mubr.bf16.mxu0 %v1314_v1  ;;  %v2010_v0 = vrot.slane %v6845_v62, %v9546_v42  ;;  %v2003_v1 = vcombine.high %v6845_v62, %v6845_v62  ;;  %v9021_v2 = vld [vmem:[%s9508_s27 + $0x430] sm:$0xff]  }
  0x78   : > { %1784 = vmatmul.mubr.bf16.vlgmr.msra.gmra.mrb[8].mxu1 %v1315_v4  ;;  %8153 = vmatprep.subr.bf16.mxu0 %v8966_v5  ;;  %v9070_v62 = vld [vmem:[%s9508_s27 + $0x610] sm:$0xff]  }
  0x79   : > { %8174 = vmatpush3.bf16.msra.mxu1 %v8965_v3  ;;  %1863 = vmatprep.mubr.bf16.mxu1 %v1318_v7  ;;  %v9022_v3 = vld [vmem:[%s9508_s27 + $0x4b0] sm:$0xff]   ;;  %v2018_v4 = vcombine.high %v2010_v0, %v2010_v0  ;;  %v9696_v5 = vrot.slane %v2003_v1, %v9546_v42  ;;  %v9024_v7 = vld [vmem:[%s9508_s27 + $0x4f8] sm:$0xff]  }
  0x7a   : > { %8175 = vmatprep.subr.bf16.mxu1 %v8967_v6  ;;  %v9023_v6 = vld [vmem:[%s9508_s27 + $0x478] sm:$0xff]  }
  0x7b   : > { %8154 = vmatpush3.bf16.msra.mxu0 %v8968_v8  ;;  %v2040_v8 = vrot.slane %v2018_v4, %v9546_v42  ;;  %v9073_v1 = vld [vmem:[%s9508_s27 + $0x6d8] sm:$0xff]   ;;  %v9076_v4 = vld [vmem:[%s9508_s27 + $0x660] sm:$0xff]  }
  0x7c   : > { %8155 = vmatprep.subr.bf16.mxu0 %v8970_v10  ;;  %v9025_v10 = vld [vmem:[%s9508_s27 + $0x438] sm:$0xff]  }
  0x7d   : > { %8176 = vmatpush3.bf16.msra.mxu1 %v8969_v9  ;;  %v2019_v9 = vcombine.high %v9696_v5, %v9696_v5 }
  0x7e   : > { %8177 = vmatprep.subr.bf16.mxu1 %v8971_v11  ;;  %v9026_v11 = vld [vmem:[%s9508_s27 + $0x4b8] sm:$0xff]  }
  0x7f   : > { %8156 = vmatpush3.bf16.msra.mxu0 %v8972_v12  ;;  %v2050_v12 = vcombine.high %v2040_v8, %v2040_v8 }
  0x80   : > { %8157 = vmatprep.subr.bf16.mxu0 %v8974_v14  ;;  %v9027_v14 = vld [vmem:[%s9508_s27 + $0x540] sm:$0xff]  }
  0x81   : > { %8178 = vmatpush3.bf16.msra.mxu1 %v8973_v13  ;;  %v2026_v13 = vrot.slane %v2010_v0, %v9546_v42  ;;  %v9072_v0 = vld [vmem:[%s9508_s27 + $0x658] sm:$0xff]  }
  0x82   : > { %8179 = vmatprep.subr.bf16.mxu1 %v8975_v15  ;;  %v9028_v15 = vld [vmem:[%s9508_s27 + $0x5c0] sm:$0xff]  }
  0x83   : > { %8158 = vmatpush3.bf16.msra.mxu0 %v8976_v16  ;;  %v2047_v16 = vrot.slane %v2019_v9, %v9546_v42  ;;  %v9081_v9 = vld [vmem:[%s9508_s27 + $0x6e8] sm:$0xff]  }
  0x84   : > { %8159 = vmatprep.subr.bf16.mxu0 %v8978_v18  ;;  %v9030_v18 = vld [vmem:[%s9508_s27 + $0x580] sm:$0xff]  }
  0x85   : > { %8180 = vmatpush3.bf16.msra.mxu1 %v8977_v17  ;;  %v9029_v17 = vld [vmem:[%s9508_s27 + $0x500] sm:$0xff]  }
  0x86   : > { %8181 = vmatprep.subr.bf16.mxu1 %v8979_v19  ;;  %v2048_v19 = vcombine.high %v2026_v13, %v2026_v13 }
  0x87   : > { %8160 = vmatpush3.bf16.msra.mxu0 %v8980_v20  ;;  %v9031_v20 = vld [vmem:[%s9508_s27 + $0x548] sm:$0xff]  }
  0x88   : > { %8161 = vmatprep.subr.bf16.mxu0 %v8982_v22  ;;  %v2051_v22 = vcombine.high %v2047_v16, %v2047_v16 }
  0x89   : > { %8182 = vmatpush3.bf16.msra.mxu1 %v8981_v21  ;;  %v9032_v21 = vld [vmem:[%s9508_s27 + $0x5c8] sm:$0xff]  }
  0x8a   : > { %8183 = vmatprep.subr.bf16.mxu1 %v8983_v23  ;;  %v9033_v23 = vld [vmem:[%s9508_s27 + $0x508] sm:$0xff]  }
  0x8b   : > { %8162 = vmatpush3.bf16.msra.mxu0 %v8984_v24  ;;  %v9034_v24 = vld [vmem:[%s9508_s27 + $0x588] sm:$0xff]  }
  0x8c   : > { %8163 = vmatprep.subr.bf16.mxu0 %v8986_v26  ;;  %v9036_v26 = vld [vmem:[%s9508_s27 + $0x5d0] sm:$0xff]  }
  0x8d   : > { %8184 = vmatpush3.bf16.msra.mxu1 %v8985_v25  ;;  %v9035_v25 = vld [vmem:[%s9508_s27 + $0x550] sm:$0xff]  }
  0x8e   : > { %8185 = vmatprep.subr.bf16.mxu1 %v8987_v27  ;;  %v9037_v27 = vld [vmem:[%s9508_s27 + $0x510] sm:$0xff]  }
  0x8f   : > { %8164 = vmatpush3.bf16.msra.mxu0 %v8988_v28  ;;  %v9038_v28 = vld [vmem:[%s9508_s27 + $0x590] sm:$0xff]  }
  0x90   : > { %8165 = vmatprep.subr.bf16.mxu0 %v8990_v30  ;;  %v9040_v30 = vld [vmem:[%s9508_s27 + $0x5d8] sm:$0xff]  }
  0x91   : > { %8186 = vmatpush3.bf16.msra.mxu1 %v8989_v29  ;;  %v9039_v29 = vld [vmem:[%s9508_s27 + $0x558] sm:$0xff]  }
  0x92   : > { %8187 = vmatprep.subr.bf16.mxu1 %v8991_v31  ;;  %v9041_v31 = vld [vmem:[%s9508_s27 + $0x518] sm:$0xff]  }
  0x93   : > { %8166 = vmatpush3.bf16.msra.mxu0 %v8992_v32  ;;  %v9042_v32 = vld [vmem:[%s9508_s27 + $0x598] sm:$0xff]  }
  0x94   : > { %8195 = vmatprep.subr.bf16.mxu0 %v8995_v35  ;;  %v9045_v35 = vld [vmem:[%s9508_s27 + $0x520] sm:$0xff]  }
  0x95   : > { %8188 = vmatpush3.bf16.msra.mxu1 %v8993_v33  ;;  %v9043_v33 = vld [vmem:[%s9508_s27 + $0x560] sm:$0xff]  }
  0x96   : > { %1824 = vmatmul.mubr.bf16.vlgmr.msra.gmra.mrb[12].mxu0 %v1300_v34  ;;  %8217 = vmatprep.subr.bf16.mxu1 %v8996_v36  ;;  %v9044_v34 = vld [vmem:[%s9508_s27 + $0x5e0] sm:$0xff]  }
  0x97   : > { %8196 = vmatpush3.bf16.msra.mxu0 %v8997_v37  ;;  %2476 = vmatprep.mubr.bf16.mxu0 %v2040_v8  ;;  %v9046_v36 = vld [vmem:[%s9508_s27 + $0x5a0] sm:$0xff]   ;;  %v9047_v37 = vld [vmem:[%s9508_s27 + $0x568] sm:$0xff]  }
  0x98   : > { %1864 = vmatmul.mubr.bf16.vlgmr.msra.gmra.mrb[12].mxu1 %v1316_v39  ;;  %8197 = vmatprep.subr.bf16.mxu0 %v8999_v40  ;;  %v9049_v39 = vld [vmem:[%s9508_s27 + $0x528] sm:$0xff]  }
  0x99   : > { %8218 = vmatpush3.bf16.msra.mxu1 %v8998_v38  ;;  %2516 = vmatprep.mubr.bf16.mxu1 %v2050_v12  ;;  %v9048_v38 = vld [vmem:[%s9508_s27 + $0x5e8] sm:$0xff]   ;;  %v9084_v12 = vld [vmem:[%s9508_s27 + $0x670] sm:$0xff]  }
  0x9a   : > { %8219 = vmatprep.subr.bf16.mxu1 %v9000_v41  ;;  %v9050_v40 = vld [vmem:[%s9508_s27 + $0x5a8] sm:$0xff]   ;;  %v9051_v41 = vld [vmem:[%s9508_s27 + $0x570] sm:$0xff]  }
  0x9b   : > { %8198 = vmatpush3.bf16.msra.mxu0 %v9001_v43  ;;  %v9052_v43 = vld [vmem:[%s9508_s27 + $0x5f0] sm:$0xff]   ;;  %v9080_v8 = vld [vmem:[%s9508_s27 + $0x668] sm:$0xff]  }
  0x9c   : > { %8199 = vmatprep.subr.bf16.mxu0 %v9003_v45  ;;  %v9054_v45 = vld [vmem:[%s9508_s27 + $0x5b0] sm:$0xff]  }
  0x9d   : > { %8220 = vmatpush3.bf16.msra.mxu1 %v9002_v44  ;;  %v9053_v44 = vld [vmem:[%s9508_s27 + $0x530] sm:$0xff]  }
  0x9e   : > { %8221 = vmatprep.subr.bf16.mxu1 %v9004_v46  ;;  %v9055_v46 = vld [vmem:[%s9508_s27 + $0x578] sm:$0xff]  }
  0x9f   : > { %8200 = vmatpush3.bf16.msra.mxu0 %v9005_v47  ;;  %v9056_v47 = vld [vmem:[%s9508_s27 + $0x5f8] sm:$0xff]  }
  0xa0   : > { %8201 = vmatprep.subr.bf16.mxu0 %v9007_v49  ;;  %v9058_v49 = vld [vmem:[%s9508_s27 + $0x5b8] sm:$0xff]  }
  0xa1   : > { %8222 = vmatpush3.bf16.msra.mxu1 %v9006_v48  ;;  %v9057_v48 = vld [vmem:[%s9508_s27 + $0x538] sm:$0xff]  }
  0xa2   : > { %8223 = vmatprep.subr.bf16.mxu1 %v9008_v50  ;;  %v2033_v50 = vrot.slane %v9696_v5, %v9546_v42  ;;  %v9077_v5 = vld [vmem:[%s9508_s27 + $0x6e0] sm:$0xff]  }
  0xa3   : > { %8202 = vmatpush3.bf16.msra.mxu0 %v9009_v51  ;;  %v9060_v51 = vld [vmem:[%s9508_s27 + $0x640] sm:$0xff]  }
  0xa4   : > { %8203 = vmatprep.subr.bf16.mxu0 %v9011_v53  ;;  %v9062_v53 = vld [vmem:[%s9508_s27 + $0x600] sm:$0xff]  }
  0xa5   : > { %8224 = vmatpush3.bf16.msra.mxu1 %v9010_v52  ;;  %v9061_v52 = vld [vmem:[%s9508_s27 + $0x6c0] sm:$0xff]  }
  0xa6   : > { %8225 = vmatprep.subr.bf16.mxu1 %v9012_v54  ;;  %v9063_v54 = vld [vmem:[%s9508_s27 + $0x680] sm:$0xff]  }
  0xa7   : > { %8204 = vmatpush3.bf16.msra.mxu0 %v9013_v55  ;;  %v2049_v55 = vcombine.high %v2033_v50, %v2033_v50 }
  0xa8   : > { %8205 = vmatprep.subr.bf16.mxu0 %v9015_v57  ;;  %v9065_v57 = vld [vmem:[%s9508_s27 + $0x6c8] sm:$0xff]  }
  0xa9   : > { %8226 = vmatpush3.bf16.msra.mxu1 %v9014_v56  ;;  %v9064_v56 = vld [vmem:[%s9508_s27 + $0x648] sm:$0xff]  }
  0xaa   : > { %8227 = vmatprep.subr.bf16.mxu1 %v9016_v58  ;;  %v9066_v58 = vld [vmem:[%s9508_s27 + $0x608] sm:$0xff]  }
  0xab   : > { %8206 = vmatpush3.bf16.msra.mxu0 %v9017_v59  ;;  %v9067_v59 = vld [vmem:[%s9508_s27 + $0x688] sm:$0xff]  }
  0xac   : > { %8207 = vmatprep.subr.bf16.mxu0 %v9019_v61  ;;  %v9069_v61 = vld [vmem:[%s9508_s27 + $0x6d0] sm:$0xff]  }
  0xad   : > { %8228 = vmatpush3.bf16.msra.mxu1 %v9018_v60  ;;  %v9068_v60 = vld [vmem:[%s9508_s27 + $0x650] sm:$0xff]  }
  0xae   : > { %8229 = vmatprep.subr.bf16.mxu1 %v9020_v63  ;;  %v9071_v63 = vld [vmem:[%s9508_s27 + $0x690] sm:$0xff]  }
  0xaf   : > { %8208 = vmatpush3.bf16.msra.mxu0 %v9021_v2  ;;  %v9074_v2 = vld [vmem:[%s9508_s27 + $0x618] sm:$0xff]  }
  0xb0   : > { %8209 = vmatprep.subr.bf16.mxu0 %v9023_v6  ;;  %v9078_v6 = vld [vmem:[%s9508_s27 + $0x620] sm:$0xff]  }
  0xb1   : > { %8230 = vmatpush3.bf16.msra.mxu1 %v9022_v3  ;;  %v9075_v3 = vld [vmem:[%s9508_s27 + $0x698] sm:$0xff]  }
  0xb2   : > { %8231 = vmatprep.subr.bf16.mxu1 %v9024_v7  ;;  %v9079_v7 = vld [vmem:[%s9508_s27 + $0x6a0] sm:$0xff]  }
  0xb3   : > { %8210 = vmatpush3.bf16.msra.mxu0 %v9025_v10  ;;  %v9082_v10 = vld [vmem:[%s9508_s27 + $0x628] sm:$0xff]  }
  0xb4   : > { %8239 = vmatprep.subr.bf16.mxu0 %v9027_v14  ;;  %v7038_v14 = vld [vmem:[%s9503_s24 + $0x18] sm:$0xff] }
  0xb5   : > { %8232 = vmatpush3.bf16.msra.mxu1 %v9026_v11  ;;  %v9083_v11 = vld [vmem:[%s9508_s27 + $0x6a8] sm:$0xff]  }
  0xb6   : > { %2477 = vmatmul.mubr.bf16.vlgmr.msra.gmra.mrb[16].mxu0 %v2026_v13  ;;  %8261 = vmatprep.subr.bf16.mxu1 %v9028_v15  ;;  %v9085_v13 = vld [vmem:[%s9508_s27 + $0x6f0] sm:$0xff]  }
  0xb7   : > { %8240 = vmatpush3.bf16.msra.mxu0 %v9029_v17  ;;  %2556 = vmatprep.mubr.bf16.mxu0 %v2047_v16  ;;  %v9086_v15 = vld [vmem:[%s9508_s27 + $0x630] sm:$0xff]   ;;  %v2744_v16 = vrot.slane %v7038_v14, %v9546_v42  ;;  %v2737_v17 = vcombine.high %v7038_v14, %v7038_v14  ;;  %v9126_v14 = vld [vmem:[%s9508_s27 + $0x8c0] sm:$0xff]  }
  0xb8   : > { %2517 = vmatmul.mubr.bf16.vlgmr.msra.gmra.mrb[16].mxu1 %v2048_v19  ;;  %8241 = vmatprep.subr.bf16.mxu0 %v9031_v20  ;;  %v9088_v19 = vld [vmem:[%s9508_s27 + $0x678] sm:$0xff]  }
  0xb9   : > { %8262 = vmatpush3.bf16.msra.mxu1 %v9030_v18  ;;  %2596 = vmatprep.mubr.bf16.mxu1 %v2051_v22  ;;  %v9087_v18 = vld [vmem:[%s9508_s27 + $0x6b0] sm:$0xff]   ;;  %v2752_v20 = vcombine.high %v2744_v16, %v2744_v16  ;;  %v9089_v22 = vld [vmem:[%s9508_s27 + $0x6f8] sm:$0xff]  }
  0xba   : > { %8263 = vmatprep.subr.bf16.mxu1 %v9032_v21  ;;  %v9773_v21 = vrot.slane %v2737_v17, %v9546_v42 }
  0xbb   : > { %8242 = vmatpush3.bf16.msra.mxu0 %v9033_v23  ;;  %v9090_v23 = vld [vmem:[%s9508_s27 + $0x638] sm:$0xff]  }
  0xbc   : > { %8243 = vmatprep.subr.bf16.mxu0 %v9035_v25  ;;  %v2753_v25 = vcombine.high %v9773_v21, %v9773_v21 }
  0xbd   : > { %8264 = vmatpush3.bf16.msra.mxu1 %v9034_v24  ;;  %v2774_v24 = vrot.slane %v2752_v20, %v9546_v42  ;;  %v9131_v20 = vld [vmem:[%s9508_s27 + $0x808] sm:$0xff]  }
  0xbe   : > { %8265 = vmatprep.subr.bf16.mxu1 %v9036_v26  ;;  %v9091_v26 = vld [vmem:[%s9508_s27 + $0x6b8] sm:$0xff]  }
  0xbf   : > { %8244 = vmatpush3.bf16.msra.mxu0 %v9037_v27  ;;  %v2784_v27 = vcombine.high %v2774_v24, %v2774_v24 }
  0xc0   : > { %8245 = vmatprep.subr.bf16.mxu0 %v9039_v29  ;;  %v9092_v29 = vld [vmem:[%s9508_s27 + $0x740] sm:$0xff]  }
  0xc1   : > { %8266 = vmatpush3.bf16.msra.mxu1 %v9038_v28  ;;  %v2760_v28 = vrot.slane %v2744_v16, %v9546_v42  ;;  %v9128_v16 = vld [vmem:[%s9508_s27 + $0x880] sm:$0xff]  }
  0xc2   : > { %8267 = vmatprep.subr.bf16.mxu1 %v9040_v30  ;;  %v9093_v30 = vld [vmem:[%s9508_s27 + $0x7c0] sm:$0xff]  }
  0xc3   : > { %8246 = vmatpush3.bf16.msra.mxu0 %v9041_v31  ;;  %v2781_v31 = vrot.slane %v2753_v25, %v9546_v42  ;;  %v9136_v25 = vld [vmem:[%s9508_s27 + $0x890] sm:$0xff]  }
  0xc4   : > { %8247 = vmatprep.subr.bf16.mxu0 %v9043_v33  ;;  %v9095_v33 = vld [vmem:[%s9508_s27 + $0x780] sm:$0xff]  }
  0xc5   : > { %8268 = vmatpush3.bf16.msra.mxu1 %v9042_v32  ;;  %v9094_v32 = vld [vmem:[%s9508_s27 + $0x700] sm:$0xff]  }
  0xc6   : > { %8269 = vmatprep.subr.bf16.mxu1 %v9044_v34  ;;  %v2782_v34 = vcombine.high %v2760_v28, %v2760_v28 }
  0xc7   : > { %8248 = vmatpush3.bf16.msra.mxu0 %v9045_v35  ;;  %v9096_v35 = vld [vmem:[%s9508_s27 + $0x748] sm:$0xff]  }
  0xc8   : > { %8249 = vmatprep.subr.bf16.mxu0 %v9047_v37  ;;  %v2785_v37 = vcombine.high %v2781_v31, %v2781_v31 }
  0xc9   : > { %8270 = vmatpush3.bf16.msra.mxu1 %v9046_v36  ;;  %v9097_v36 = vld [vmem:[%s9508_s27 + $0x7c8] sm:$0xff]  }
  0xca   : > { %8271 = vmatprep.subr.bf16.mxu1 %v9048_v38  ;;  %v9098_v38 = vld [vmem:[%s9508_s27 + $0x708] sm:$0xff]  }
  0xcb   : > { %8250 = vmatpush3.bf16.msra.mxu0 %v9049_v39  ;;  %v9099_v39 = vld [vmem:[%s9508_s27 + $0x788] sm:$0xff]  }
  0xcc   : > { %8251 = vmatprep.subr.bf16.mxu0 %v9051_v41  ;;  %v9101_v41 = vld [vmem:[%s9508_s27 + $0x7d0] sm:$0xff]  }
  0xcd   : > { %8272 = vmatpush3.bf16.msra.mxu1 %v9050_v40  ;;  %v9100_v40 = vld [vmem:[%s9508_s27 + $0x750] sm:$0xff]  }
  0xce   : > { %8273 = vmatprep.subr.bf16.mxu1 %v9052_v43  ;;  %v9102_v43 = vld [vmem:[%s9508_s27 + $0x710] sm:$0xff]  }
  0xcf   : > { %8252 = vmatpush3.bf16.msra.mxu0 %v9053_v44  ;;  %v9103_v44 = vld [vmem:[%s9508_s27 + $0x790] sm:$0xff]  }
  0xd0   : > { %8253 = vmatprep.subr.bf16.mxu0 %v9055_v46  ;;  %v9105_v46 = vld [vmem:[%s9508_s27 + $0x7d8] sm:$0xff]  }
  0xd1   : > { %8274 = vmatpush3.bf16.msra.mxu1 %v9054_v45  ;;  %v9104_v45 = vld [vmem:[%s9508_s27 + $0x758] sm:$0xff]  }
  0xd2   : > { %8275 = vmatprep.subr.bf16.mxu1 %v9056_v47  ;;  %v9106_v47 = vld [vmem:[%s9508_s27 + $0x718] sm:$0xff]  }
  0xd3   : > { %8254 = vmatpush3.bf16.msra.mxu0 %v9057_v48  ;;  %v9107_v48 = vld [vmem:[%s9508_s27 + $0x798] sm:$0xff]  }
  0xd4   : > { %8283 = vmatprep.subr.bf16.mxu0 %v9060_v51  ;;  %v9110_v51 = vld [vmem:[%s9508_s27 + $0x720] sm:$0xff]  }
  0xd5   : > { %8276 = vmatpush3.bf16.msra.mxu1 %v9058_v49  ;;  %v9108_v49 = vld [vmem:[%s9508_s27 + $0x760] sm:$0xff]  }
  0xd6   : > { %2557 = vmatmul.mubr.bf16.vlgmr.msra.gmra.mrb[20].mxu0 %v2033_v50  ;;  %8305 = vmatprep.subr.bf16.mxu1 %v9061_v52  ;;  %v9109_v50 = vld [vmem:[%s9508_s27 + $0x7e0] sm:$0xff]  }
  0xd7   : > { %8284 = vmatpush3.bf16.msra.mxu0 %v9062_v53  ;;  %3210 = vmatprep.mubr.bf16.mxu0 %v2774_v24  ;;  %v9111_v52 = vld [vmem:[%s9508_s27 + $0x7a0] sm:$0xff]   ;;  %v9112_v53 = vld [vmem:[%s9508_s27 + $0x768] sm:$0xff]   ;;  %v9135_v24 = vld [vmem:[%s9508_s27 + $0x810] sm:$0xff]  }
  0xd8   : > { %2597 = vmatmul.mubr.bf16.vlgmr.msra.gmra.mrb[20].mxu1 %v2049_v55  ;;  %8285 = vmatprep.subr.bf16.mxu0 %v9064_v56  ;;  %v9114_v55 = vld [vmem:[%s9508_s27 + $0x728] sm:$0xff]  }
  0xd9   : > { %8306 = vmatpush3.bf16.msra.mxu1 %v9063_v54  ;;  %3250 = vmatprep.mubr.bf16.mxu1 %v2784_v27  ;;  %v9113_v54 = vld [vmem:[%s9508_s27 + $0x7e8] sm:$0xff]   ;;  %v9138_v27 = vld [vmem:[%s9508_s27 + $0x8d8] sm:$0xff]  }
  0xda   : > { %8307 = vmatprep.subr.bf16.mxu1 %v9065_v57  ;;  %v9115_v56 = vld [vmem:[%s9508_s27 + $0x7a8] sm:$0xff]   ;;  %v9116_v57 = vld [vmem:[%s9508_s27 + $0x770] sm:$0xff]  }
  0xdb   : > { %8286 = vmatpush3.bf16.msra.mxu0 %v9066_v58 }
  0xdc   : > { %8287 = vmatprep.subr.bf16.mxu0 %v9068_v60 }
  0xdd   : > { %8308 = vmatpush3.bf16.msra.mxu1 %v9067_v59  ;;  %v9117_v59 = vld [vmem:[%s9508_s27 + $0x7f0] sm:$0xff]  }
  0xde   : > { %8309 = vmatprep.subr.bf16.mxu1 %v9069_v61  ;;  %v9118_v61 = vld [vmem:[%s9508_s27 + $0x730] sm:$0xff]  }
  0xdf   : > { %8288 = vmatpush3.bf16.msra.mxu0 %v9070_v62 }
  0xe0   : > { %8289 = vmatprep.subr.bf16.mxu0 %v9072_v0 }
  0xe1   : > { %8310 = vmatpush3.bf16.msra.mxu1 %v9071_v63 }
  0xe2   : > { %8311 = vmatprep.subr.bf16.mxu1 %v9073_v1  ;;  %v9119_v1 = vld [vmem:[%s9508_s27 + $0x7b0] sm:$0xff]  }
  0xe3   : > { %8290 = vmatpush3.bf16.msra.mxu0 %v9074_v2  ;;  %v9120_v2 = vld [vmem:[%s9508_s27 + $0x778] sm:$0xff]  }
  0xe4   : > { %8291 = vmatprep.subr.bf16.mxu0 %v9076_v4 }
  0xe5   : > { %8312 = vmatpush3.bf16.msra.mxu1 %v9075_v3 }
  0xe6   : > { %8313 = vmatprep.subr.bf16.mxu1 %v9077_v5 }
  0xe7   : > { %8292 = vmatpush3.bf16.msra.mxu0 %v9078_v6 }
  0xe8   : > { %8293 = vmatprep.subr.bf16.mxu0 %v9080_v8 }
  0xe9   : > { %8314 = vmatpush3.bf16.msra.mxu1 %v9079_v7  ;;  %v9121_v7 = vld [vmem:[%s9508_s27 + $0x7f8] sm:$0xff]  }
  0xea   : > { %8315 = vmatprep.subr.bf16.mxu1 %v9081_v9  ;;  %v9122_v9 = vld [vmem:[%s9508_s27 + $0x738] sm:$0xff]  }
  0xeb   : > { %8294 = vmatpush3.bf16.msra.mxu0 %v9082_v10 }
  0xec   : > { %8295 = vmatprep.subr.bf16.mxu0 %v9084_v12  ;;  %v2767_v12 = vrot.slane %v9773_v21, %v9546_v42  ;;  %v9132_v21 = vld [vmem:[%s9508_s27 + $0x888] sm:$0xff]  }
  0xed   : > { %8316 = vmatpush3.bf16.msra.mxu1 %v9083_v11  ;;  %v9123_v11 = vld [vmem:[%s9508_s27 + $0x7b8] sm:$0xff]  }
  0xee   : > { %8317 = vmatprep.subr.bf16.mxu1 %v9085_v13  ;;  %v9125_v13 = vld [vmem:[%s9508_s27 + $0x840] sm:$0xff]   ;;  %v2783_v17 = vcombine.high %v2767_v12, %v2767_v12 }
  0xef   : > { %8296 = vmatpush3.bf16.msra.mxu0 %v9086_v15  ;;  %v9127_v15 = vld [vmem:[%s9508_s27 + $0x800] sm:$0xff]  }
  0xf0   : > { %8297 = vmatprep.subr.bf16.mxu0 %v9088_v19  ;;  %v9130_v19 = vld [vmem:[%s9508_s27 + $0x8c8] sm:$0xff]  }
  0xf1   : > { %8318 = vmatpush3.bf16.msra.mxu1 %v9087_v18  ;;  %v9129_v18 = vld [vmem:[%s9508_s27 + $0x848] sm:$0xff]  }
  0xf2   : > { %8319 = vmatprep.subr.bf16.mxu1 %v9089_v22  ;;  %v9133_v22 = vld [vmem:[%s9508_s27 + $0x850] sm:$0xff]  }
  0xf3   : > { %8298 = vmatpush3.bf16.msra.mxu0 %v9090_v23  ;;  %v9134_v23 = vld [vmem:[%s9508_s27 + $0x8d0] sm:$0xff]  }
  0xf4   : > { %8327 = vmatprep.subr.bf16.mxu0 %v9092_v29  ;;  %v9140_v29 = vld [vmem:[%s9508_s27 + $0x898] sm:$0xff]  }
  0xf5   : > { %8320 = vmatpush3.bf16.msra.mxu1 %v9091_v26  ;;  %v9137_v26 = vld [vmem:[%s9508_s27 + $0x858] sm:$0xff]  }
  0xf6   : > { %3211 = vmatmul.mubr.bf16.vlgmr.msra.gmra.mrb[24].mxu0 %v2760_v28  ;;  %8349 = vmatprep.subr.bf16.mxu1 %v9093_v30  ;;  %v9139_v28 = vld [vmem:[%s9508_s27 + $0x818] sm:$0xff]   ;;  %v9141_v30 = vld [vmem:[%s9508_s27 + $0x860] sm:$0xff]  }
  0xf7   : > { %8328 = vmatpush3.bf16.msra.mxu0 %v9094_v32  ;;  %3290 = vmatprep.mubr.bf16.mxu0 %v2781_v31  ;;  %v9142_v31 = vld [vmem:[%s9508_s27 + $0x8e0] sm:$0xff]  }
  0xf8   : > { %3251 = vmatmul.mubr.bf16.vlgmr.msra.gmra.mrb[24].mxu1 %v2782_v34  ;;  %8329 = vmatprep.subr.bf16.mxu0 %v9096_v35  ;;  %v9143_v32 = vld [vmem:[%s9508_s27 + $0x820] sm:$0xff]   ;;  %v9145_v34 = vld [vmem:[%s9508_s27 + $0x868] sm:$0xff]  }
  0xf9   : > { %8350 = vmatpush3.bf16.msra.mxu1 %v9095_v33  ;;  %3330 = vmatprep.mubr.bf16.mxu1 %v2785_v37  ;;  %v9144_v33 = vld [vmem:[%s9508_s27 + $0x8a0] sm:$0xff]   ;;  %v9146_v35 = vld [vmem:[%s9508_s27 + $0x8e8] sm:$0xff]  }
  0xfa   : > { %8351 = vmatprep.subr.bf16.mxu1 %v9097_v36  ;;  %v9147_v36 = vld [vmem:[%s9508_s27 + $0x828] sm:$0xff]  }
  0xfb   : > { %8330 = vmatpush3.bf16.msra.mxu0 %v9098_v38  ;;  %v9148_v37 = vld [vmem:[%s9508_s27 + $0x8a8] sm:$0xff]   ;;  %v9149_v38 = vld [vmem:[%s9508_s27 + $0x870] sm:$0xff]  }
  0xfc   : > { %8331 = vmatprep.subr.bf16.mxu0 %v9100_v40  ;;  %v9150_v40 = vld [vmem:[%s9508_s27 + $0x8f0] sm:$0xff]  }
  0xfd   : > { %8352 = vmatpush3.bf16.msra.mxu1 %v9099_v39 }
  0xfe   : > { %8353 = vmatprep.subr.bf16.mxu1 %v9101_v41  ;;  %v7231_v41 = vld [vmem:[%s9503_s24 + $0x20] sm:$0xff] }
  0xff   : > { %8332 = vmatpush3.bf16.msra.mxu0 %v9102_v43 }
 0x100   : > { %8333 = vmatprep.subr.bf16.mxu0 %v9104_v45  ;;  %v3478_v45 = vrot.slane %v7231_v41, %v9546_v42 }
 0x101   : > { %8354 = vmatpush3.bf16.msra.mxu1 %v9103_v44  ;;  %v9151_v44 = vld [vmem:[%s9508_s27 + $0x830] sm:$0xff]  }
 0x102   : > { %8355 = vmatprep.subr.bf16.mxu1 %v9105_v46  ;;  %v3471_v46 = vcombine.high %v7231_v41, %v7231_v41 }
 0x103   : > { %8334 = vmatpush3.bf16.msra.mxu0 %v9106_v47 }
 0x104   : > { %8335 = vmatprep.subr.bf16.mxu0 %v9108_v49 }
 0x105   : > { %8356 = vmatpush3.bf16.msra.mxu1 %v9107_v48 }
 0x106   : > { %8357 = vmatprep.subr.bf16.mxu1 %v9109_v50 }
 0x107   : > { %8336 = vmatpush3.bf16.msra.mxu0 %v9110_v51 }
 0x108   : > { %8337 = vmatprep.subr.bf16.mxu0 %v9112_v53  ;;  %v9153_v53 = vld [vmem:[%s9508_s27 + $0x878] sm:$0xff]  }
 0x109   : > { %8358 = vmatpush3.bf16.msra.mxu1 %v9111_v52  ;;  %v8035_v58 = vpop.f32.mrb[0].mxu0  ;;  %v9152_v52 = vld [vmem:[%s9508_s27 + $0x8b0] sm:$0xff]  }
 0x10a   : > { %v8036_v60 = vpop.f32.mrb[1].mxu0  ;;  %8359 = vmatprep.subr.bf16.mxu1 %v9113_v54  ;;  %v8057_v62 = vpop.f32.mrb[0].mxu1  ;;  %v3486_v54 = vcombine.high %v3478_v45, %v3478_v45 }
 0x10b   : > { %v8037_v63 = vadd.f32 %v8036_v60, %v8035_v58  ;;  %v8038_v0 = vpop.f32.mrb[2].mxu0  ;;  %8338 = vmatpush3.bf16.msra.mxu0 %v9114_v55  ;;  %v8058_v3 = vpop.f32.mrb[1].mxu1  ;;  %v9851_v55 = vrot.slane %v3471_v46, %v9546_v42 }
 0x10c   : > { %v8039_v4 = vpop.f32.mrb[3].mxu0  ;;  %8339 = vmatprep.subr.bf16.mxu0 %v9116_v57  ;;  %v8059_v5 = vadd.f32 %v8058_v3, %v8057_v62  ;;  %v8060_v6 = vpop.f32.mrb[2].mxu1  ;;  %v3508_v62 = vrot.slane %v3486_v54, %v9546_v42  ;;  %v3494_v3 = vrot.slane %v3478_v45, %v9546_v42  ;;  %v9191_v54 = vld [vmem:[%s9508_s27 + $0xac0] sm:$0xff]  }
 0x10d   : > { %8360 = vmatpush3.bf16.msra.mxu1 %v9115_v56  ;;  %v8061_v8 = vpop.f32.mrb[3].mxu1  ;;  %v9157_v4 = vld [vmem:[%s9508_s27 + $0x940] sm:$0xff]  }
 0x10e   : > { %8361 = vmatprep.subr.bf16.mxu1 %v9117_v59  ;;  %v9814_v10 = vadd.f32 %v8059_v5, %v8037_v63  ;;  %v9154_v59 = vld [vmem:[%s9508_s27 + $0x8f8] sm:$0xff]   ;;  %v3487_v63 = vcombine.high %v9851_v55, %v9851_v55  ;;  %v9158_v5 = vld [vmem:[%s9508_s27 + $0x9c0] sm:$0xff]  }
 0x10f   : > { %8340 = vmatpush3.bf16.msra.mxu0 %v9118_v61  ;;  %v9155_v61 = vld [vmem:[%s9508_s27 + $0x838] sm:$0xff]   ;;  %v9160_v8 = vld [vmem:[%s9508_s27 + $0x980] sm:$0xff]  }
 0x110   : > { %8341 = vmatprep.subr.bf16.mxu0 %v9120_v2  ;;  %v3518_v2 = vcombine.high %v3508_v62, %v3508_v62  ;;  %v3515_v6 = vrot.slane %v3487_v63, %v9546_v42  ;;  %v9199_v63 = vld [vmem:[%s9508_s27 + $0xad0] sm:$0xff]  }
 0x111   : > { %8362 = vmatpush3.bf16.msra.mxu1 %v9119_v1  ;;  %v9156_v1 = vld [vmem:[%s9508_s27 + $0x8b8] sm:$0xff]  }
 0x112   : > { %8363 = vmatprep.subr.bf16.mxu1 %v9121_v7  ;;  %v9159_v7 = vld [vmem:[%s9508_s27 + $0x900] sm:$0xff]  }
 0x113   : > { %8342 = vmatpush3.bf16.msra.mxu0 %v9122_v9  ;;  %v3516_v9 = vcombine.high %v3494_v3, %v3494_v3 }
 0x114   : > { %8371 = vmatprep.subr.bf16.mxu0 %v9125_v13  ;;  %v9163_v13 = vld [vmem:[%s9508_s27 + $0x908] sm:$0xff]  }
 0x115   : > { %8364 = vmatpush3.bf16.msra.mxu1 %v9123_v11  ;;  %v9162_v11 = vld [vmem:[%s9508_s27 + $0x9c8] sm:$0xff]  }
 0x116   : > { %3291 = vmatmul.mubr.bf16.vlgmr.msra.gmra.mrb[28].mxu0 %v2767_v12  ;;  %8393 = vmatprep.subr.bf16.mxu1 %v9126_v14  ;;  %v3519_v12 = vcombine.high %v3515_v6, %v3515_v6  ;;  %v9164_v14 = vld [vmem:[%s9508_s27 + $0x988] sm:$0xff]  }
 0x117   : > { %8372 = vmatpush3.bf16.msra.mxu0 %v9127_v15  ;;  %3944 = vmatprep.mubr.bf16.mxu0 %v3508_v62  ;;  %v9165_v15 = vld [vmem:[%s9508_s27 + $0x950] sm:$0xff]  }
 0x118   : > { %3331 = vmatmul.mubr.bf16.vlgmr.msra.gmra.mrb[28].mxu1 %v2783_v17  ;;  %8373 = vmatprep.subr.bf16.mxu0 %v9129_v18  ;;  %v9167_v17 = vld [vmem:[%s9508_s27 + $0x910] sm:$0xff]  }
 0x119   : > { %8394 = vmatpush3.bf16.msra.mxu1 %v9128_v16  ;;  %3984 = vmatprep.mubr.bf16.mxu1 %v3518_v2  ;;  %v9166_v16 = vld [vmem:[%s9508_s27 + $0x9d0] sm:$0xff]   ;;  %v9202_v2 = vld [vmem:[%s9508_s27 + $0xa58] sm:$0xff]  }
 0x11a   : > { %8395 = vmatprep.subr.bf16.mxu1 %v9130_v19  ;;  %v9168_v18 = vld [vmem:[%s9508_s27 + $0x990] sm:$0xff]   ;;  %v9169_v19 = vld [vmem:[%s9508_s27 + $0x958] sm:$0xff]  }
 0x11b   : > { %8374 = vmatpush3.bf16.msra.mxu0 %v9131_v20  ;;  %v9170_v20 = vld [vmem:[%s9508_s27 + $0x9d8] sm:$0xff]   ;;  %v9198_v62 = vld [vmem:[%s9508_s27 + $0xa50] sm:$0xff]  }
 0x11c   : > { %8375 = vmatprep.subr.bf16.mxu0 %v9133_v22  ;;  %v9172_v22 = vld [vmem:[%s9508_s27 + $0x998] sm:$0xff]  }
 0x11d   : > { %8396 = vmatpush3.bf16.msra.mxu1 %v9132_v21  ;;  %v9171_v21 = vld [vmem:[%s9508_s27 + $0x918] sm:$0xff]  }
 0x11e   : > { %8397 = vmatprep.subr.bf16.mxu1 %v9134_v23  ;;  %v9173_v23 = vld [vmem:[%s9508_s27 + $0x960] sm:$0xff]  }
 0x11f   : > { %8376 = vmatpush3.bf16.msra.mxu0 %v9135_v24  ;;  %v9174_v24 = vld [vmem:[%s9508_s27 + $0x9e0] sm:$0xff]  }
 0x120   : > { %8377 = vmatprep.subr.bf16.mxu0 %v9137_v26  ;;  %v9176_v26 = vld [vmem:[%s9508_s27 + $0x9a0] sm:$0xff]  }
 0x121   : > { %8398 = vmatpush3.bf16.msra.mxu1 %v9136_v25  ;;  %v9175_v25 = vld [vmem:[%s9508_s27 + $0x920] sm:$0xff]  }
 0x122   : > { %8399 = vmatprep.subr.bf16.mxu1 %v9138_v27  ;;  %v9177_v27 = vld [vmem:[%s9508_s27 + $0x968] sm:$0xff]  }
 0x123   : > { %8378 = vmatpush3.bf16.msra.mxu0 %v9139_v28  ;;  %v9178_v28 = vld [vmem:[%s9508_s27 + $0x9e8] sm:$0xff]  }
 0x124   : > { %8379 = vmatprep.subr.bf16.mxu0 %v9141_v30  ;;  %v9180_v30 = vld [vmem:[%s9508_s27 + $0x9a8] sm:$0xff]  }
 0x125   : > { %8400 = vmatpush3.bf16.msra.mxu1 %v9140_v29  ;;  %v9179_v29 = vld [vmem:[%s9508_s27 + $0x928] sm:$0xff]  }
 0x126   : > { %8401 = vmatprep.subr.bf16.mxu1 %v9142_v31  ;;  %v9181_v31 = vld [vmem:[%s9508_s27 + $0x970] sm:$0xff]  }
 0x127   : > { %8380 = vmatpush3.bf16.msra.mxu0 %v9143_v32 }
 0x128   : > { %8381 = vmatprep.subr.bf16.mxu0 %v9145_v34 }
 0x129   : > { %8402 = vmatpush3.bf16.msra.mxu1 %v9144_v33  ;;  %v8079_v39 = vpop.f32.mrb[4].mxu0  ;;  %v9182_v33 = vld [vmem:[%s9508_s27 + $0x9f0] sm:$0xff]  }
 0x12a   : > { %v8080_v43 = vpop.f32.mrb[5].mxu0  ;;  %8403 = vmatprep.subr.bf16.mxu1 %v9146_v35  ;;  %v8101_v47 = vpop.f32.mrb[4].mxu1  ;;  %v9183_v35 = vld [vmem:[%s9508_s27 + $0x930] sm:$0xff]  }
 0x12b   : > { %v8081_v48 = vadd.f32 %v8080_v43, %v8079_v39  ;;  %v8082_v49 = vpop.f32.mrb[6].mxu0  ;;  %8382 = vmatpush3.bf16.msra.mxu0 %v9147_v36  ;;  %v8102_v50 = vpop.f32.mrb[5].mxu1  ;;  %v9184_v39 = vld [vmem:[%s9508_s27 + $0x9b0] sm:$0xff]  }
 0x12c   : > { %v8083_v51 = vpop.f32.mrb[7].mxu0  ;;  %8383 = vmatprep.subr.bf16.mxu0 %v9149_v38  ;;  %v8103_v57 = vadd.f32 %v8102_v50, %v8101_v47  ;;  %v8104_v58 = vpop.f32.mrb[6].mxu1  ;;  %v9186_v47 = vld [vmem:[%s9508_s27 + $0x9f8] sm:$0xff]  }
 0x12d   : > { %v1224_v56 = vadd.f32 %v8081_v48, %v9814_v10  ;;  %8404 = vmatpush3.bf16.msra.mxu1 %v9148_v37  ;;  %v8105_v60 = vpop.f32.mrb[7].mxu1  ;;  %v9161_v10 = vld [vmem:[%s9508_s27 + $0x948] sm:$0xff]   ;;  %v9187_v49 = vld [vmem:[%s9508_s27 + $0x938] sm:$0xff]  }
 0x12e   : > { %8405 = vmatprep.subr.bf16.mxu1 %v9150_v40  ;;  %v9185_v40 = vld [vmem:[%s9508_s27 + $0x978] sm:$0xff]   ;;  %v9195_v60 = vld [vmem:[%s9508_s27 + $0xac8] sm:$0xff]  }
 0x12f   : > { %v9859_v0 = vadd.f32 %v8103_v57, %v1224_v56  ;;  %8384 = vmatpush3.bf16.msra.mxu0 %v9151_v44  ;;  %v9188_v51 = vld [vmem:[%s9508_s27 + $0x9b8] sm:$0xff]   ;;  %v9192_v56 = vld [vmem:[%s9508_s27 + $0xa00] sm:$0xff]  }
 0x130   : > { %8385 = vmatprep.subr.bf16.mxu0 %v9153_v53  ;;  %v9190_v53 = vld [vmem:[%s9508_s27 + $0xa40] sm:$0xff]  }
 0x131   : > { %8406 = vmatpush3.bf16.msra.mxu1 %v9152_v52  ;;  %v3501_v52 = vrot.slane %v9851_v55, %v9546_v42  ;;  %v9193_v57 = vld [vmem:[%s9508_s27 + $0xa80] sm:$0xff]   ;;  %v9196_v55 = vld [vmem:[%s9508_s27 + $0xa08] sm:$0xff]  }
 0x132   : > { %8407 = vmatprep.subr.bf16.mxu1 %v9154_v59  ;;  %v9194_v59 = vld [vmem:[%s9508_s27 + $0xa48] sm:$0xff]  }
 0x133   : > { %8386 = vmatpush3.bf16.msra.mxu0 %v9155_v61  ;;  %v3517_v58 = vcombine.high %v3501_v52, %v3501_v52  ;;  %v9197_v61 = vld [vmem:[%s9508_s27 + $0xa88] sm:$0xff]  }
 0x134   : > { %8415 = vmatprep.subr.bf16.mxu0 %v9157_v4  ;;  %v9204_v4 = vld [vmem:[%s9508_s27 + $0xa18] sm:$0xff]  }
 0x135   : > { %8408 = vmatpush3.bf16.msra.mxu1 %v9156_v1  ;;  %v9201_v1 = vld [vmem:[%s9508_s27 + $0xa90] sm:$0xff]  }
 0x136   : > { %3945 = vmatmul.mubr.bf16.vlgmr.msra.gmra.mrb[32].mxu0 %v3494_v3  ;;  %8437 = vmatprep.subr.bf16.mxu1 %v9158_v5  ;;  %v9203_v3 = vld [vmem:[%s9508_s27 + $0xad8] sm:$0xff]  }
 0x137   : > { %8416 = vmatpush3.bf16.msra.mxu0 %v9159_v7  ;;  %4024 = vmatprep.mubr.bf16.mxu0 %v3515_v6  ;;  %v9205_v5 = vld [vmem:[%s9508_s27 + $0xa98] sm:$0xff]   ;;  %v9206_v6 = vld [vmem:[%s9508_s27 + $0xa60] sm:$0xff]  }
 0x138   : > { %3985 = vmatmul.mubr.bf16.vlgmr.msra.gmra.mrb[32].mxu1 %v3516_v9  ;;  %8417 = vmatprep.subr.bf16.mxu0 %v9161_v10  ;;  %v9207_v7 = vld [vmem:[%s9508_s27 + $0xae0] sm:$0xff]   ;;  %v9210_v10 = vld [vmem:[%s9508_s27 + $0xa68] sm:$0xff]  }
 0x139   : > { %8438 = vmatpush3.bf16.msra.mxu1 %v9160_v8  ;;  %4064 = vmatprep.mubr.bf16.mxu1 %v3519_v12  ;;  %v9208_v8 = vld [vmem:[%s9508_s27 + $0xa20] sm:$0xff]   ;;  %v9212_v12 = vld [vmem:[%s9508_s27 + $0xa28] sm:$0xff]  }
 0x13a   : > { %8439 = vmatprep.subr.bf16.mxu1 %v9162_v11  ;;  %v9209_v9 = vld [vmem:[%s9508_s27 + $0xaa0] sm:$0xff]   ;;  %v9211_v11 = vld [vmem:[%s9508_s27 + $0xae8] sm:$0xff]  }
 0x13b   : > { %8418 = vmatpush3.bf16.msra.mxu0 %v9163_v13  ;;  %v9213_v13 = vld [vmem:[%s9508_s27 + $0xaa8] sm:$0xff]  }
 0x13c   : > { %8419 = vmatprep.subr.bf16.mxu0 %v9165_v15 }
 0x13d   : > { %8440 = vmatpush3.bf16.msra.mxu1 %v9164_v14  ;;  %v9214_v14 = vld [vmem:[%s9508_s27 + $0xa70] sm:$0xff]  }
 0x13e   : > { %8441 = vmatprep.subr.bf16.mxu1 %v9166_v16  ;;  %v9215_v16 = vld [vmem:[%s9508_s27 + $0xaf0] sm:$0xff]  }
 0x13f   : > { %8420 = vmatpush3.bf16.msra.mxu0 %v9167_v17 }
 0x140   : > { %8421 = vmatprep.subr.bf16.mxu0 %v9169_v19  ;;  %v7424_v19 = vld [vmem:[%s9503_s24 + $0x28] sm:$0xff] }
 0x141   : > { %8442 = vmatpush3.bf16.msra.mxu1 %v9168_v18  ;;  %v9216_v18 = vld [vmem:[%s9508_s27 + $0xa30] sm:$0xff]  }
 0x142   : > { %8443 = vmatprep.subr.bf16.mxu1 %v9170_v20 }
 0x143   : > { %8422 = vmatpush3.bf16.msra.mxu0 %v9171_v21 }
 0x144   : > { %8423 = vmatprep.subr.bf16.mxu0 %v9173_v23  ;;  %v4212_v23 = vrot.slane %v7424_v19, %v9546_v42 }
 0x145   : > { %8444 = vmatpush3.bf16.msra.mxu1 %v9172_v22 }
 0x146   : > { %8445 = vmatprep.subr.bf16.mxu1 %v9174_v24  ;;  %v4205_v24 = vcombine.high %v7424_v19, %v7424_v19 }
 0x147   : > { %8424 = vmatpush3.bf16.msra.mxu0 %v9175_v25 }
 0x148   : > { %8425 = vmatprep.subr.bf16.mxu0 %v9177_v27  ;;  %v9217_v27 = vld [vmem:[%s9508_s27 + $0xab0] sm:$0xff]  }
 0x149   : > { %8446 = vmatpush3.bf16.msra.mxu1 %v9176_v26  ;;  %v8123_v32 = vpop.f32.mrb[8].mxu0 }
 0x14a   : > { %v8124_v34 = vpop.f32.mrb[9].mxu0  ;;  %8447 = vmatprep.subr.bf16.mxu1 %v9178_v28  ;;  %v9218_v28 = vld [vmem:[%s9508_s27 + $0xa78] sm:$0xff]  }
 0x14b   : > { %v8145_v36 = vpop.f32.mrb[8].mxu1  ;;  %v8125_v37 = vadd.f32 %v8124_v34, %v8123_v32  ;;  %v8126_v38 = vpop.f32.mrb[10].mxu0  ;;  %8426 = vmatpush3.bf16.msra.mxu0 %v9179_v29  ;;  %v9219_v32 = vld [vmem:[%s9508_s27 + $0xaf8] sm:$0xff]  }
 0x14c   : > { %v8146_v41 = vpop.f32.mrb[9].mxu1  ;;  %v8127_v43 = vpop.f32.mrb[11].mxu0  ;;  %8427 = vmatprep.subr.bf16.mxu0 %v9181_v31  ;;  %v9221_v38 = vld [vmem:[%s9508_s27 + $0xab8] sm:$0xff]  }
 0x14d   : > { %v1746_v44 = vadd.f32 %v8125_v37, %v9859_v0  ;;  %v8147_v45 = vadd.f32 %v8146_v41, %v8145_v36  ;;  %v8148_v46 = vpop.f32.mrb[10].mxu1  ;;  %8448 = vmatpush3.bf16.msra.mxu1 %v9180_v30  ;;  %v9200_v0 = vld [vmem:[%s9508_s27 + $0xa10] sm:$0xff]   ;;  %v9936_v36 = vrot.slane %v4205_v24, %v9546_v42  ;;  %v9222_v41 = vld [vmem:[%s9508_s27 + $0xb40] sm:$0xff]  }
 0x14e   : > { %v8149_v48 = vpop.f32.mrb[11].mxu1  ;;  %8449 = vmatprep.subr.bf16.mxu1 %v9182_v33  ;;  %v4220_v33 = vcombine.high %v4212_v23, %v4212_v23  ;;  %v9224_v46 = vld [vmem:[%s9508_s27 + $0xb00] sm:$0xff]  }
 0x14f   : > { %v9896_v50 = vadd.f32 %v8147_v45, %v1746_v44  ;;  %8428 = vmatpush3.bf16.msra.mxu0 %v9183_v35  ;;  %v9220_v35 = vld [vmem:[%s9508_s27 + $0xa38] sm:$0xff]   ;;  %v4221_v43 = vcombine.high %v9936_v36, %v9936_v36  ;;  %v9223_v45 = vld [vmem:[%s9508_s27 + $0xbc0] sm:$0xff]  }
 0x150   : > { %8429 = vmatprep.subr.bf16.mxu0 %v9185_v40  ;;  %v4228_v40 = vrot.slane %v4212_v23, %v9546_v42  ;;  %v9225_v48 = vld [vmem:[%s9508_s27 + $0xb80] sm:$0xff]   ;;  %v9252_v23 = vld [vmem:[%s9508_s27 + $0xb38] sm:$0xff]  }
 0x151   : > { %8450 = vmatpush3.bf16.msra.mxu1 %v9184_v39  ;;  %v4242_v39 = vrot.slane %v4220_v33, %v9546_v42  ;;  %v9260_v33 = vld [vmem:[%s9508_s27 + $0xcc8] sm:$0xff]  }
 0x152   : > { %8451 = vmatprep.subr.bf16.mxu1 %v9186_v47  ;;  %v4249_v47 = vrot.slane %v4221_v43, %v9546_v42  ;;  %v9268_v43 = vld [vmem:[%s9508_s27 + $0xcd8] sm:$0xff]  }
 0x153   : > { %8430 = vmatpush3.bf16.msra.mxu0 %v9187_v49  ;;  %v4252_v44 = vcombine.high %v4242_v39, %v4242_v39  ;;  %v4250_v49 = vcombine.high %v4228_v40, %v4228_v40 }
 0x154   : > { %8459 = vmatprep.subr.bf16.mxu0 %v9190_v53  ;;  %v9228_v53 = vld [vmem:[%s9508_s27 + $0xb08] sm:$0xff]  }
 0x155   : > { %8452 = vmatpush3.bf16.msra.mxu1 %v9188_v51  ;;  %v9227_v51 = vld [vmem:[%s9508_s27 + $0xbc8] sm:$0xff]  }
 0x156   : > { %4025 = vmatmul.mubr.bf16.vlgmr.msra.gmra.mrb[36].mxu0 %v3501_v52  ;;  %8481 = vmatprep.subr.bf16.mxu1 %v9191_v54  ;;  %v4253_v52 = vcombine.high %v4249_v47, %v4249_v47  ;;  %v9229_v54 = vld [vmem:[%s9508_s27 + $0xb88] sm:$0xff]  }
 0x157   : > { %8460 = vmatpush3.bf16.msra.mxu0 %v9192_v56  ;;  %4678 = vmatprep.mubr.bf16.mxu0 %v4242_v39  ;;  %v9230_v56 = vld [vmem:[%s9508_s27 + $0xb50] sm:$0xff]  }
 0x158   : > { %4065 = vmatmul.mubr.bf16.vlgmr.msra.gmra.mrb[36].mxu1 %v3517_v58  ;;  %8461 = vmatprep.subr.bf16.mxu0 %v9194_v59  ;;  %v9232_v58 = vld [vmem:[%s9508_s27 + $0xb10] sm:$0xff]  }
 0x159   : > { %8482 = vmatpush3.bf16.msra.mxu1 %v9193_v57  ;;  %4718 = vmatprep.mubr.bf16.mxu1 %v4252_v44  ;;  %v9231_v57 = vld [vmem:[%s9508_s27 + $0xbd0] sm:$0xff]   ;;  %v9269_v44 = vld [vmem:[%s9508_s27 + $0xc18] sm:$0xff]  }
 0x15a   : > { %8483 = vmatprep.subr.bf16.mxu1 %v9195_v60  ;;  %v9233_v59 = vld [vmem:[%s9508_s27 + $0xb90] sm:$0xff]   ;;  %v9234_v60 = vld [vmem:[%s9508_s27 + $0xb58] sm:$0xff]  }
 0x15b   : > { %8462 = vmatpush3.bf16.msra.mxu0 %v9196_v55  ;;  %v9235_v55 = vld [vmem:[%s9508_s27 + $0xbd8] sm:$0xff]   ;;  %v9265_v39 = vld [vmem:[%s9508_s27 + $0xc10] sm:$0xff]  }
 0x15c   : > { %8463 = vmatprep.subr.bf16.mxu0 %v9198_v62  ;;  %v9237_v62 = vld [vmem:[%s9508_s27 + $0xb98] sm:$0xff]  }
 0x15d   : > { %8484 = vmatpush3.bf16.msra.mxu1 %v9197_v61  ;;  %v9236_v61 = vld [vmem:[%s9508_s27 + $0xb18] sm:$0xff]  }
 0x15e   : > { %8485 = vmatprep.subr.bf16.mxu1 %v9199_v63  ;;  %v9238_v63 = vld [vmem:[%s9508_s27 + $0xb60] sm:$0xff]  }
 0x15f   : > { %8464 = vmatpush3.bf16.msra.mxu0 %v9200_v0  ;;  %v9239_v0 = vld [vmem:[%s9508_s27 + $0xbe0] sm:$0xff]  }
 0x160   : > { %8465 = vmatprep.subr.bf16.mxu0 %v9202_v2  ;;  %v9241_v2 = vld [vmem:[%s9508_s27 + $0xba0] sm:$0xff]  }
 0x161   : > { %8486 = vmatpush3.bf16.msra.mxu1 %v9201_v1  ;;  %v9240_v1 = vld [vmem:[%s9508_s27 + $0xb20] sm:$0xff]  }
 0x162   : > { %8487 = vmatprep.subr.bf16.mxu1 %v9203_v3  ;;  %v9242_v3 = vld [vmem:[%s9508_s27 + $0xb68] sm:$0xff]  }
 0x163   : > { %8466 = vmatpush3.bf16.msra.mxu0 %v9204_v4  ;;  %v9243_v4 = vld [vmem:[%s9508_s27 + $0xbe8] sm:$0xff]  }
 0x164   : > { %8467 = vmatprep.subr.bf16.mxu0 %v9206_v6  ;;  %v9245_v6 = vld [vmem:[%s9508_s27 + $0xba8] sm:$0xff]  }
 0x165   : > { %8488 = vmatpush3.bf16.msra.mxu1 %v9205_v5  ;;  %v9244_v5 = vld [vmem:[%s9508_s27 + $0xb28] sm:$0xff]  }
 0x166   : > { %8489 = vmatprep.subr.bf16.mxu1 %v9207_v7  ;;  %v9246_v7 = vld [vmem:[%s9508_s27 + $0xb70] sm:$0xff]  }
 0x167   : > { %8468 = vmatpush3.bf16.msra.mxu0 %v9208_v8 }
 0x168   : > { %8469 = vmatprep.subr.bf16.mxu0 %v9210_v10 }
 0x169   : > { %8490 = vmatpush3.bf16.msra.mxu1 %v9209_v9  ;;  %v8167_v15 = vpop.f32.mrb[12].mxu0  ;;  %v9247_v9 = vld [vmem:[%s9508_s27 + $0xbf0] sm:$0xff]  }
 0x16a   : > { %v8168_v17 = vpop.f32.mrb[13].mxu0  ;;  %8491 = vmatprep.subr.bf16.mxu1 %v9211_v11  ;;  %v9248_v11 = vld [vmem:[%s9508_s27 + $0xb30] sm:$0xff]  }
 0x16b   : > { %v8189_v20 = vpop.f32.mrb[12].mxu1  ;;  %v8169_v21 = vadd.f32 %v8168_v17, %v8167_v15  ;;  %v8170_v22 = vpop.f32.mrb[14].mxu0  ;;  %8470 = vmatpush3.bf16.msra.mxu0 %v9212_v12  ;;  %v9249_v15 = vld [vmem:[%s9508_s27 + $0xbb0] sm:$0xff]  }
 0x16c   : > { %v8190_v25 = vpop.f32.mrb[13].mxu1  ;;  %v8171_v26 = vpop.f32.mrb[15].mxu0  ;;  %8471 = vmatprep.subr.bf16.mxu0 %v9214_v14 }
 0x16d   : > { %v1826_v29 = vadd.f32 %v8169_v21, %v9896_v50  ;;  %v8191_v30 = vadd.f32 %v8190_v25, %v8189_v20  ;;  %v8192_v31 = vpop.f32.mrb[14].mxu1  ;;  %8492 = vmatpush3.bf16.msra.mxu1 %v9213_v13  ;;  %v9226_v50 = vld [vmem:[%s9508_s27 + $0xb48] sm:$0xff]   ;;  %v9251_v21 = vld [vmem:[%s9508_s27 + $0xbf8] sm:$0xff]   ;;  %v4235_v26 = vrot.slane %v9936_v36, %v9546_v42  ;;  %v9263_v36 = vld [vmem:[%s9508_s27 + $0xc50] sm:$0xff]  }
 0x16e   : > { %v8193_v34 = vpop.f32.mrb[15].mxu1  ;;  %8493 = vmatprep.subr.bf16.mxu1 %v9215_v16  ;;  %v9250_v16 = vld [vmem:[%s9508_s27 + $0xb78] sm:$0xff]  }
 0x16f   : > { %v9938_v37 = vadd.f32 %v8191_v30, %v1826_v29  ;;  %8472 = vmatpush3.bf16.msra.mxu0 %v9216_v18  ;;  %v9253_v25 = vld [vmem:[%s9508_s27 + $0xbb8] sm:$0xff]   ;;  %v9257_v29 = vld [vmem:[%s9508_s27 + $0xc00] sm:$0xff]   ;;  %v4251_v31 = vcombine.high %v4235_v26, %v4235_v26  ;;  %v9261_v34 = vld [vmem:[%s9508_s27 + $0xc08] sm:$0xff]  }
 0x170   : > { %8473 = vmatprep.subr.bf16.mxu0 %v9218_v28  ;;  %v9256_v28 = vld [vmem:[%s9508_s27 + $0xcc0] sm:$0xff]  }
 0x171   : > { %8494 = vmatpush3.bf16.msra.mxu1 %v9217_v27  ;;  %v9255_v27 = vld [vmem:[%s9508_s27 + $0xc40] sm:$0xff]  }
 0x172   : > { %8495 = vmatprep.subr.bf16.mxu1 %v9219_v32  ;;  %v9258_v30 = vld [vmem:[%s9508_s27 + $0xc80] sm:$0xff]   ;;  %v9259_v32 = vld [vmem:[%s9508_s27 + $0xc48] sm:$0xff]  }
 0x173   : > { %8474 = vmatpush3.bf16.msra.mxu0 %v9220_v35  ;;  %v9262_v35 = vld [vmem:[%s9508_s27 + $0xc88] sm:$0xff]  }
 0x174   : > { %8503 = vmatprep.subr.bf16.mxu0 %v9222_v41  ;;  %v9267_v41 = vld [vmem:[%s9508_s27 + $0xc58] sm:$0xff]  }
 0x175   : > { %8496 = vmatpush3.bf16.msra.mxu1 %v9221_v38  ;;  %v9264_v38 = vld [vmem:[%s9508_s27 + $0xcd0] sm:$0xff]  }
 0x176   : > { %4679 = vmatmul.mubr.bf16.vlgmr.msra.gmra.mrb[40].mxu0 %v4228_v40  ;;  %8525 = vmatprep.subr.bf16.mxu1 %v9223_v45  ;;  %v9266_v40 = vld [vmem:[%s9508_s27 + $0xc90] sm:$0xff]   ;;  %v9270_v45 = vld [vmem:[%s9508_s27 + $0xc98] sm:$0xff]  }
 0x177   : > { %8504 = vmatpush3.bf16.msra.mxu0 %v9224_v46  ;;  %4758 = vmatprep.mubr.bf16.mxu0 %v4249_v47  ;;  %v9271_v46 = vld [vmem:[%s9508_s27 + $0xc60] sm:$0xff]  }
 0x178   : > { %4719 = vmatmul.mubr.bf16.vlgmr.msra.gmra.mrb[40].mxu1 %v4250_v49  ;;  %8505 = vmatprep.subr.bf16.mxu0 %v9226_v50  ;;  %v9272_v47 = vld [vmem:[%s9508_s27 + $0xce0] sm:$0xff]   ;;  %v9275_v50 = vld [vmem:[%s9508_s27 + $0xc68] sm:$0xff]  }
 0x179   : > { %8526 = vmatpush3.bf16.msra.mxu1 %v9225_v48  ;;  %4798 = vmatprep.mubr.bf16.mxu1 %v4253_v52  ;;  %v9273_v48 = vld [vmem:[%s9508_s27 + $0xc20] sm:$0xff]   ;;  %v9277_v52 = vld [vmem:[%s9508_s27 + $0xc28] sm:$0xff]  }
 0x17a   : > { %8527 = vmatprep.subr.bf16.mxu1 %v9227_v51  ;;  %v9274_v49 = vld [vmem:[%s9508_s27 + $0xca0] sm:$0xff]   ;;  %v9276_v51 = vld [vmem:[%s9508_s27 + $0xce8] sm:$0xff]  }
 0x17b   : > { %8506 = vmatpush3.bf16.msra.mxu0 %v9228_v53  ;;  %v9278_v53 = vld [vmem:[%s9508_s27 + $0xca8] sm:$0xff]  }
 0x17c   : > { %8507 = vmatprep.subr.bf16.mxu0 %v9230_v56 }
 0x17d   : > { %8528 = vmatpush3.bf16.msra.mxu1 %v9229_v54  ;;  %v9279_v54 = vld [vmem:[%s9508_s27 + $0xc70] sm:$0xff]  }
 0x17e   : > { %8529 = vmatprep.subr.bf16.mxu1 %v9231_v57  ;;  %v9280_v57 = vld [vmem:[%s9508_s27 + $0xcf0] sm:$0xff]  }
 0x17f   : > { %8508 = vmatpush3.bf16.msra.mxu0 %v9232_v58 }
 0x180   : > { %8509 = vmatprep.subr.bf16.mxu0 %v9234_v60 }
 0x181   : > { %8530 = vmatpush3.bf16.msra.mxu1 %v9233_v59  ;;  %v9281_v59 = vld [vmem:[%s9508_s27 + $0xc30] sm:$0xff]  }
 0x182   : > { %8531 = vmatprep.subr.bf16.mxu1 %v9235_v55 }
 0x183   : > { %8510 = vmatpush3.bf16.msra.mxu0 %v9236_v61 }
 0x184   : > { %8511 = vmatprep.subr.bf16.mxu0 %v9238_v63  ;;  %v9283_v63 = vld [vmem:[%s9508_s27 + $0xc78] sm:$0xff]  }
 0x185   : > { %8532 = vmatpush3.bf16.msra.mxu1 %v9237_v62  ;;  %v9282_v62 = vld [vmem:[%s9508_s27 + $0xcb0] sm:$0xff]  }
 0x186   : > { %8533 = vmatprep.subr.bf16.mxu1 %v9239_v0  ;;  %v7617_v0 = vld [vmem:[%s9503_s24 + $0x30] sm:$0xff] }
 0x187   : > { %8512 = vmatpush3.bf16.msra.mxu0 %v9240_v1 }
 0x188   : > { %8513 = vmatprep.subr.bf16.mxu0 %v9242_v3  ;;  %v4946_v3 = vrot.slane %v7617_v0, %v9546_v42 }
 0x189   : > { %8534 = vmatpush3.bf16.msra.mxu1 %v9241_v2  ;;  %v8211_v8 = vpop.f32.mrb[16].mxu0 }
 0x18a   : > { %v8212_v10 = vpop.f32.mrb[17].mxu0  ;;  %8535 = vmatprep.subr.bf16.mxu1 %v9243_v4  ;;  %v4939_v4 = vcombine.high %v7617_v0, %v7617_v0  ;;  %v9317_v0 = vld [vmem:[%s9508_s27 + $0xd38] sm:$0xff]  }
 0x18b   : > { %v8233_v12 = vpop.f32.mrb[16].mxu1  ;;  %v8213_v13 = vadd.f32 %v8212_v10, %v8211_v8  ;;  %v8214_v14 = vpop.f32.mrb[18].mxu0  ;;  %8514 = vmatpush3.bf16.msra.mxu0 %v9244_v5  ;;  %v9284_v8 = vld [vmem:[%s9508_s27 + $0xcf8] sm:$0xff]  }
 0x18c   : > { %v8234_v17 = vpop.f32.mrb[17].mxu1  ;;  %v8215_v18 = vpop.f32.mrb[19].mxu0  ;;  %8515 = vmatprep.subr.bf16.mxu0 %v9246_v7  ;;  %v9285_v10 = vld [vmem:[%s9508_s27 + $0xc38] sm:$0xff]  }
 0x18d   : > { %v8235_v19 = vadd.f32 %v8234_v17, %v8233_v12  ;;  %v8236_v20 = vpop.f32.mrb[18].mxu1  ;;  %8536 = vmatpush3.bf16.msra.mxu1 %v9245_v6  ;;  %v10017_v12 = vrot.slane %v4939_v4, %v9546_v42  ;;  %v9286_v14 = vld [vmem:[%s9508_s27 + $0xcb8] sm:$0xff]   ;;  %v9287_v17 = vld [vmem:[%s9508_s27 + $0xd40] sm:$0xff]  }
 0x18e   : > { %v8237_v22 = vpop.f32.mrb[19].mxu1  ;;  %8537 = vmatprep.subr.bf16.mxu1 %v9247_v9  ;;  %v9288_v20 = vld [vmem:[%s9508_s27 + $0xdc0] sm:$0xff]  }
 0x18f   : > { %v9977_v24 = vadd.f32 %v8235_v19, %v8213_v13  ;;  %8516 = vmatpush3.bf16.msra.mxu0 %v9248_v11  ;;  %v4954_v11 = vcombine.high %v4946_v3, %v4946_v3  ;;  %v4955_v18 = vcombine.high %v10017_v12, %v10017_v12  ;;  %v9289_v22 = vld [vmem:[%s9508_s27 + $0xd00] sm:$0xff]  }
 0x190   : > { %8517 = vmatprep.subr.bf16.mxu0 %v9250_v16  ;;  %v4962_v16 = vrot.slane %v4946_v3, %v9546_v42  ;;  %v4969_v3 = vrot.slane %v10017_v12, %v9546_v42  ;;  %v9320_v4 = vld [vmem:[%s9508_s27 + $0xe40] sm:$0xff]   ;;  %v9327_v12 = vld [vmem:[%s9508_s27 + $0xe88] sm:$0xff]  }
 0x191   : > { %8538 = vmatpush3.bf16.msra.mxu1 %v9249_v15  ;;  %v4976_v15 = vrot.slane %v4954_v11, %v9546_v42  ;;  %v9326_v11 = vld [vmem:[%s9508_s27 + $0xe08] sm:$0xff]  }
 0x192   : > { %8539 = vmatprep.subr.bf16.mxu1 %v9251_v21 }
 0x193   : > { %8518 = vmatpush3.bf16.msra.mxu0 %v9252_v23  ;;  %v4986_v21 = vcombine.high %v4976_v15, %v4976_v15  ;;  %v4983_v23 = vrot.slane %v4955_v18, %v9546_v42  ;;  %v9333_v18 = vld [vmem:[%s9508_s27 + $0xed8] sm:$0xff]  }
 0x194   : > { %8547 = vmatprep.subr.bf16.mxu0 %v9255_v27 }
 0x195   : > { %8540 = vmatpush3.bf16.msra.mxu1 %v9253_v25  ;;  %v4984_v25 = vcombine.high %v4962_v16, %v4962_v16  ;;  %v4987_v27 = vcombine.high %v4983_v23, %v4983_v23 }
 0x196   : > { %4759 = vmatmul.mubr.bf16.vlgmr.msra.gmra.mrb[44].mxu0 %v4235_v26  ;;  %8569 = vmatprep.subr.bf16.mxu1 %v9256_v28  ;;  %v9291_v26 = vld [vmem:[%s9508_s27 + $0xd48] sm:$0xff]  }
 0x197   : > { %8548 = vmatpush3.bf16.msra.mxu0 %v9257_v29  ;;  %5412 = vmatprep.mubr.bf16.mxu0 %v4976_v15  ;;  %v9293_v28 = vld [vmem:[%s9508_s27 + $0xd08] sm:$0xff]   ;;  %v9330_v15 = vld [vmem:[%s9508_s27 + $0xe10] sm:$0xff]  }
 0x198   : > { %4799 = vmatmul.mubr.bf16.vlgmr.msra.gmra.mrb[44].mxu1 %v4251_v31  ;;  %8549 = vmatprep.subr.bf16.mxu0 %v9259_v32  ;;  %v9294_v29 = vld [vmem:[%s9508_s27 + $0xd88] sm:$0xff]   ;;  %v9296_v31 = vld [vmem:[%s9508_s27 + $0xdd0] sm:$0xff]  }
 0x199   : > { %8570 = vmatpush3.bf16.msra.mxu1 %v9258_v30  ;;  %5452 = vmatprep.mubr.bf16.mxu1 %v4986_v21  ;;  %v9295_v30 = vld [vmem:[%s9508_s27 + $0xd50] sm:$0xff]   ;;  %v9335_v21 = vld [vmem:[%s9508_s27 + $0xe98] sm:$0xff]  }
 0x19a   : > { %8571 = vmatprep.subr.bf16.mxu1 %v9260_v33  ;;  %v9297_v32 = vld [vmem:[%s9508_s27 + $0xd10] sm:$0xff]  }
 0x19b   : > { %8550 = vmatpush3.bf16.msra.mxu0 %v9261_v34  ;;  %v9298_v33 = vld [vmem:[%s9508_s27 + $0xd90] sm:$0xff]   ;;  %v9299_v34 = vld [vmem:[%s9508_s27 + $0xd58] sm:$0xff]  }
 0x19c   : > { %8551 = vmatprep.subr.bf16.mxu0 %v9263_v36  ;;  %v9301_v36 = vld [vmem:[%s9508_s27 + $0xd18] sm:$0xff]  }
 0x19d   : > { %8572 = vmatpush3.bf16.msra.mxu1 %v9262_v35  ;;  %v9300_v35 = vld [vmem:[%s9508_s27 + $0xdd8] sm:$0xff]  }
 0x19e   : > { %8573 = vmatprep.subr.bf16.mxu1 %v9264_v38  ;;  %v9302_v38 = vld [vmem:[%s9508_s27 + $0xd98] sm:$0xff]  }
 0x19f   : > { %8552 = vmatpush3.bf16.msra.mxu0 %v9265_v39  ;;  %v9303_v39 = vld [vmem:[%s9508_s27 + $0xd60] sm:$0xff]  }
 0x1a0   : > { %8553 = vmatprep.subr.bf16.mxu0 %v9267_v41  ;;  %v9305_v41 = vld [vmem:[%s9508_s27 + $0xd20] sm:$0xff]  }
 0x1a1   : > { %8574 = vmatpush3.bf16.msra.mxu1 %v9266_v40  ;;  %v9304_v40 = vld [vmem:[%s9508_s27 + $0xde0] sm:$0xff]  }
 0x1a2   : > { %8575 = vmatprep.subr.bf16.mxu1 %v9268_v43  ;;  %v9306_v43 = vld [vmem:[%s9508_s27 + $0xda0] sm:$0xff]  }
 0x1a3   : > { %8554 = vmatpush3.bf16.msra.mxu0 %v9269_v44  ;;  %v9307_v44 = vld [vmem:[%s9508_s27 + $0xd68] sm:$0xff]  }
 0x1a4   : > { %8555 = vmatprep.subr.bf16.mxu0 %v9271_v46  ;;  %v9309_v46 = vld [vmem:[%s9508_s27 + $0xd28] sm:$0xff]  }
 0x1a5   : > { %8576 = vmatpush3.bf16.msra.mxu1 %v9270_v45  ;;  %v9308_v45 = vld [vmem:[%s9508_s27 + $0xde8] sm:$0xff]  }
 0x1a6   : > { %8577 = vmatprep.subr.bf16.mxu1 %v9272_v47  ;;  %v9310_v47 = vld [vmem:[%s9508_s27 + $0xda8] sm:$0xff]  }
 0x1a7   : > { %8556 = vmatpush3.bf16.msra.mxu0 %v9273_v48  ;;  %v9311_v48 = vld [vmem:[%s9508_s27 + $0xd70] sm:$0xff]  }
 0x1a8   : > { %8557 = vmatprep.subr.bf16.mxu0 %v9275_v50  ;;  %v9312_v50 = vld [vmem:[%s9508_s27 + $0xdf0] sm:$0xff]  }
 0x1a9   : > { %8578 = vmatpush3.bf16.msra.mxu1 %v9274_v49  ;;  %v8255_v56 = vpop.f32.mrb[20].mxu0 }
 0x1aa   : > { %v8256_v58 = vpop.f32.mrb[21].mxu0  ;;  %8579 = vmatprep.subr.bf16.mxu1 %v9276_v51 }
 0x1ab   : > { %v8277_v60 = vpop.f32.mrb[20].mxu1  ;;  %v8257_v55 = vadd.f32 %v8256_v58, %v8255_v56  ;;  %v8258_v61 = vpop.f32.mrb[22].mxu0  ;;  %8558 = vmatpush3.bf16.msra.mxu0 %v9277_v52  ;;  %v9313_v52 = vld [vmem:[%s9508_s27 + $0xd30] sm:$0xff]   ;;  %v9315_v58 = vld [vmem:[%s9508_s27 + $0xd78] sm:$0xff]  }
 0x1ac   : > { %v8278_v1 = vpop.f32.mrb[21].mxu1  ;;  %v8259_v2 = vpop.f32.mrb[23].mxu0  ;;  %8559 = vmatprep.subr.bf16.mxu0 %v9279_v54 }
 0x1ad   : > { %v2559_v5 = vadd.f32 %v8257_v55, %v9977_v24  ;;  %v8279_v6 = vadd.f32 %v8278_v1, %v8277_v60  ;;  %v8280_v7 = vpop.f32.mrb[22].mxu1  ;;  %8580 = vmatpush3.bf16.msra.mxu1 %v9278_v53  ;;  %v9290_v24 = vld [vmem:[%s9508_s27 + $0xd80] sm:$0xff]   ;;  %v9318_v2 = vld [vmem:[%s9508_s27 + $0xdb8] sm:$0xff]  }
 0x1ae   : > { %v8281_v9 = vpop.f32.mrb[23].mxu1  ;;  %8581 = vmatprep.subr.bf16.mxu1 %v9280_v57  ;;  %v9314_v57 = vld [vmem:[%s9508_s27 + $0xdb0] sm:$0xff]   ;;  %v9323_v7 = vld [vmem:[%s9508_s27 + $0xe80] sm:$0xff]  }
 0x1af   : > { %v2599_v13 = vadd.f32 %v8279_v6, %v2559_v5  ;;  %8560 = vmatpush3.bf16.msra.mxu0 %v9281_v59  ;;  %v9321_v5 = vld [vmem:[%s9508_s27 + $0xec0] sm:$0xff]   ;;  %v9324_v9 = vld [vmem:[%s9508_s27 + $0xe48] sm:$0xff]  }
 0x1b0   : > { %8561 = vmatprep.subr.bf16.mxu0 %v9283_v63  ;;  %v9322_v6 = vld [vmem:[%s9508_s27 + $0xe00] sm:$0xff]  }
 0x1b1   : > { %v10026_v19 = vadd.f32 %v2599_v13, %v9938_v37  ;;  %8582 = vmatpush3.bf16.msra.mxu1 %v9282_v62  ;;  %v9292_v37 = vld [vmem:[%s9508_s27 + $0xdc8] sm:$0xff]   ;;  %v9316_v62 = vld [vmem:[%s9508_s27 + $0xdf8] sm:$0xff]   ;;  %v9328_v13 = vld [vmem:[%s9508_s27 + $0xe50] sm:$0xff]  }
 0x1b2   : > { %8583 = vmatprep.subr.bf16.mxu1 %v9284_v8  ;;  %v4985_v8 = vcombine.high %v4969_v3, %v4969_v3 }
 0x1b3   : > { %8562 = vmatpush3.bf16.msra.mxu0 %v9285_v10  ;;  %v9325_v10 = vld [vmem:[%s9508_s27 + $0xec8] sm:$0xff]  }
 0x1b4   : > { %8591 = vmatprep.subr.bf16.mxu0 %v9287_v17  ;;  %v9332_v17 = vld [vmem:[%s9508_s27 + $0xe58] sm:$0xff]  }
 0x1b5   : > { %8584 = vmatpush3.bf16.msra.mxu1 %v9286_v14  ;;  %v9329_v14 = vld [vmem:[%s9508_s27 + $0xed0] sm:$0xff]  }
 0x1b6   : > { %5413 = vmatmul.mubr.bf16.vlgmr.msra.gmra.mrb[48].mxu0 %v4962_v16  ;;  %8613 = vmatprep.subr.bf16.mxu1 %v9288_v20  ;;  %v9331_v16 = vld [vmem:[%s9508_s27 + $0xe90] sm:$0xff]   ;;  %v9334_v20 = vld [vmem:[%s9508_s27 + $0xe18] sm:$0xff]  }
 0x1b7   : > { %8592 = vmatpush3.bf16.msra.mxu0 %v9289_v22  ;;  %5492 = vmatprep.mubr.bf16.mxu0 %v4983_v23  ;;  %v9336_v22 = vld [vmem:[%s9508_s27 + $0xe60] sm:$0xff]  }
 0x1b8   : > { %5453 = vmatmul.mubr.bf16.vlgmr.msra.gmra.mrb[48].mxu1 %v4984_v25  ;;  %8593 = vmatprep.subr.bf16.mxu0 %v9291_v26  ;;  %v9337_v23 = vld [vmem:[%s9508_s27 + $0xee0] sm:$0xff]   ;;  %v9340_v26 = vld [vmem:[%s9508_s27 + $0xe68] sm:$0xff]  }
 0x1b9   : > { %8614 = vmatpush3.bf16.msra.mxu1 %v9290_v24  ;;  %5532 = vmatprep.mubr.bf16.mxu1 %v4987_v27  ;;  %v9338_v24 = vld [vmem:[%s9508_s27 + $0xe20] sm:$0xff]   ;;  %v9342_v27 = vld [vmem:[%s9508_s27 + $0xe28] sm:$0xff]  }
 0x1ba   : > { %8615 = vmatprep.subr.bf16.mxu1 %v9292_v37  ;;  %v9339_v25 = vld [vmem:[%s9508_s27 + $0xea0] sm:$0xff]   ;;  %v9341_v37 = vld [vmem:[%s9508_s27 + $0xee8] sm:$0xff]  }
 0x1bb   : > { %8594 = vmatpush3.bf16.msra.mxu0 %v9293_v28  ;;  %v9343_v28 = vld [vmem:[%s9508_s27 + $0xea8] sm:$0xff]  }
 0x1bc   : > { %8595 = vmatprep.subr.bf16.mxu0 %v9295_v30 }
 0x1bd   : > { %8616 = vmatpush3.bf16.msra.mxu1 %v9294_v29  ;;  %v9344_v29 = vld [vmem:[%s9508_s27 + $0xe70] sm:$0xff]  }
 0x1be   : > { %8617 = vmatprep.subr.bf16.mxu1 %v9296_v31  ;;  %v9345_v31 = vld [vmem:[%s9508_s27 + $0xef0] sm:$0xff]  }
 0x1bf   : > { %8596 = vmatpush3.bf16.msra.mxu0 %v9297_v32 }
 0x1c0   : > { %8597 = vmatprep.subr.bf16.mxu0 %v9299_v34 }
 0x1c1   : > { %8618 = vmatpush3.bf16.msra.mxu1 %v9298_v33  ;;  %v9346_v33 = vld [vmem:[%s9508_s27 + $0xe30] sm:$0xff]  }
 0x1c2   : > { %8619 = vmatprep.subr.bf16.mxu1 %v9300_v35 }
 0x1c3   : > { %8598 = vmatpush3.bf16.msra.mxu0 %v9301_v36 }
 0x1c4   : > { %8599 = vmatprep.subr.bf16.mxu0 %v9303_v39  ;;  %v9348_v39 = vld [vmem:[%s9508_s27 + $0xe78] sm:$0xff]  }
 0x1c5   : > { %8620 = vmatpush3.bf16.msra.mxu1 %v9302_v38  ;;  %v9347_v38 = vld [vmem:[%s9508_s27 + $0xeb0] sm:$0xff]  }
 0x1c6   : > { %8621 = vmatprep.subr.bf16.mxu1 %v9304_v40 }
 0x1c7   : > { %8600 = vmatpush3.bf16.msra.mxu0 %v9305_v41 }
 0x1c8   : > { %8601 = vmatprep.subr.bf16.mxu0 %v9307_v44 }
 0x1c9   : > { %8622 = vmatpush3.bf16.msra.mxu1 %v9306_v43  ;;  %v8299_v49 = vpop.f32.mrb[24].mxu0 }
 0x1ca   : > { %v8300_v51 = vpop.f32.mrb[25].mxu0  ;;  %8623 = vmatprep.subr.bf16.mxu1 %v9308_v45 }
 0x1cb   : > { %v8321_v53 = vpop.f32.mrb[24].mxu1  ;;  %v8301_v54 = vadd.f32 %v8300_v51, %v8299_v49  ;;  %v8302_v56 = vpop.f32.mrb[26].mxu0  ;;  %8602 = vmatpush3.bf16.msra.mxu0 %v9309_v46  ;;  %v7810_v46 = vld [vmem:[%s9503_s24 + $0x38] sm:$0xff] }
 0x1cc   : > { %v8322_v59 = vpop.f32.mrb[25].mxu1  ;;  %v8303_v60 = vpop.f32.mrb[27].mxu0  ;;  %8603 = vmatprep.subr.bf16.mxu0 %v9311_v48  ;;  %v9349_v48 = vld [vmem:[%s9508_s27 + $0xef8] sm:$0xff]   ;;  %v5680_v49 = vrot.slane %v7810_v46, %v9546_v42  ;;  %v9352_v56 = vld [vmem:[%s9508_s27 + $0xf40] sm:$0xff]  }
 0x1cd   : > { %v8323_v55 = vadd.f32 %v8322_v59, %v8321_v53  ;;  %v8324_v61 = vpop.f32.mrb[26].mxu1  ;;  %8624 = vmatpush3.bf16.msra.mxu1 %v9310_v47  ;;  %v9351_v59 = vld [vmem:[%s9508_s27 + $0xeb8] sm:$0xff]  }
 0x1ce   : > { %v8325_v63 = vpop.f32.mrb[27].mxu1  ;;  %8625 = vmatprep.subr.bf16.mxu1 %v9312_v50  ;;  %v5673_v50 = vcombine.high %v7810_v46, %v7810_v46  ;;  %v5688_v53 = vcombine.high %v5680_v49, %v5680_v49 }
 0x1cf   : > { %v10059_v1 = vadd.f32 %v8323_v55, %v8301_v54  ;;  %8604 = vmatpush3.bf16.msra.mxu0 %v9313_v52  ;;  %v9350_v52 = vld [vmem:[%s9508_s27 + $0xe38] sm:$0xff]   ;;  %v5696_v54 = vrot.slane %v5680_v49, %v9546_v42  ;;  %v9353_v55 = vld [vmem:[%s9508_s27 + $0xfc0] sm:$0xff]  }
 0x1d0   : > { %8605 = vmatprep.subr.bf16.mxu0 %v9315_v58  ;;  %v5710_v60 = vrot.slane %v5688_v53, %v9546_v42 }
 0x1d1   : > { %8626 = vmatpush3.bf16.msra.mxu1 %v9314_v57  ;;  %v10101_v57 = vrot.slane %v5673_v50, %v9546_v42 }
 0x1d2   : > { %8627 = vmatprep.subr.bf16.mxu1 %v9316_v62  ;;  %v9354_v62 = vld [vmem:[%s9508_s27 + $0xf00] sm:$0xff]   ;;  %v5720_v63 = vcombine.high %v5710_v60, %v5710_v60 }
 0x1d3   : > { %8606 = vmatpush3.bf16.msra.mxu0 %v9317_v0  ;;  %v5689_v61 = vcombine.high %v10101_v57, %v10101_v57  ;;  %v5718_v0 = vcombine.high %v5696_v54, %v5696_v54 }
 0x1d4   : > { %8635 = vmatprep.subr.bf16.mxu0 %v9320_v4 }
 0x1d5   : > { %8628 = vmatpush3.bf16.msra.mxu1 %v9318_v2  ;;  %v9355_v2 = vld [vmem:[%s9508_s27 + $0xf80] sm:$0xff]  }
 0x1d6   : > { %5493 = vmatmul.mubr.bf16.vlgmr.msra.gmra.mrb[52].mxu0 %v4969_v3  ;;  %8657 = vmatprep.subr.bf16.mxu1 %v9321_v5  ;;  %v9357_v3 = vld [vmem:[%s9508_s27 + $0xfc8] sm:$0xff]  }
 0x1d7   : > { %8636 = vmatpush3.bf16.msra.mxu0 %v9322_v6  ;;  %6146 = vmatprep.mubr.bf16.mxu0 %v5710_v60  ;;  %v9358_v5 = vld [vmem:[%s9508_s27 + $0xf08] sm:$0xff]   ;;  %v9360_v6 = vld [vmem:[%s9508_s27 + $0xf50] sm:$0xff]  }
 0x1d8   : > { %5533 = vmatmul.mubr.bf16.vlgmr.msra.gmra.mrb[52].mxu1 %v4985_v8  ;;  %8637 = vmatprep.subr.bf16.mxu0 %v9324_v9  ;;  %v9361_v8 = vld [vmem:[%s9508_s27 + $0xfd0] sm:$0xff]  }
 0x1d9   : > { %8658 = vmatpush3.bf16.msra.mxu1 %v9323_v7  ;;  %6186 = vmatprep.mubr.bf16.mxu1 %v5720_v63  ;;  %v9359_v7 = vld [vmem:[%s9508_s27 + $0xf88] sm:$0xff]   ;;  %v9362_v9 = vld [vmem:[%s9508_s27 + $0xf10] sm:$0xff]  }
 0x1da   : > { %8659 = vmatprep.subr.bf16.mxu1 %v9325_v10  ;;  %v9364_v10 = vld [vmem:[%s9508_s27 + $0xf58] sm:$0xff]  }
 0x1db   : > { %8638 = vmatpush3.bf16.msra.mxu0 %v9326_v11  ;;  %v9363_v11 = vld [vmem:[%s9508_s27 + $0xf90] sm:$0xff]  }
 0x1dc   : > { %8639 = vmatprep.subr.bf16.mxu0 %v9328_v13  ;;  %v9366_v13 = vld [vmem:[%s9508_s27 + $0xf18] sm:$0xff]  }
 0x1dd   : > { %8660 = vmatpush3.bf16.msra.mxu1 %v9327_v12  ;;  %v9365_v12 = vld [vmem:[%s9508_s27 + $0xfd8] sm:$0xff]  }
 0x1de   : > { %8661 = vmatprep.subr.bf16.mxu1 %v9329_v14  ;;  %v9368_v14 = vld [vmem:[%s9508_s27 + $0xf60] sm:$0xff]  }
 0x1df   : > { %8640 = vmatpush3.bf16.msra.mxu0 %v9330_v15  ;;  %v9367_v15 = vld [vmem:[%s9508_s27 + $0xf98] sm:$0xff]  }
 0x1e0   : > { %8641 = vmatprep.subr.bf16.mxu0 %v9332_v17  ;;  %v9370_v17 = vld [vmem:[%s9508_s27 + $0xf20] sm:$0xff]  }
 0x1e1   : > { %8662 = vmatpush3.bf16.msra.mxu1 %v9331_v16  ;;  %v9369_v16 = vld [vmem:[%s9508_s27 + $0xfe0] sm:$0xff]  }
 0x1e2   : > { %8663 = vmatprep.subr.bf16.mxu1 %v9333_v18  ;;  %v9372_v18 = vld [vmem:[%s9508_s27 + $0xf68] sm:$0xff]  }
 0x1e3   : > { %8642 = vmatpush3.bf16.msra.mxu0 %v9334_v20  ;;  %v9371_v20 = vld [vmem:[%s9508_s27 + $0xfa0] sm:$0xff]  }
 0x1e4   : > { %8643 = vmatprep.subr.bf16.mxu0 %v9336_v22  ;;  %v9374_v22 = vld [vmem:[%s9508_s27 + $0xf28] sm:$0xff]  }
 0x1e5   : > { %8664 = vmatpush3.bf16.msra.mxu1 %v9335_v21  ;;  %v9373_v21 = vld [vmem:[%s9508_s27 + $0xfe8] sm:$0xff]  }
 0x1e6   : > { %8665 = vmatprep.subr.bf16.mxu1 %v9337_v23  ;;  %v9376_v23 = vld [vmem:[%s9508_s27 + $0xf70] sm:$0xff]  }
 0x1e7   : > { %8644 = vmatpush3.bf16.msra.mxu0 %v9338_v24 }
 0x1e8   : > { %8645 = vmatprep.subr.bf16.mxu0 %v9340_v26 }
 0x1e9   : > { %8666 = vmatpush3.bf16.msra.mxu1 %v9339_v25  ;;  %v8343_v30 = vpop.f32.mrb[28].mxu0  ;;  %v9375_v25 = vld [vmem:[%s9508_s27 + $0xfa8] sm:$0xff]  }
 0x1ea   : > { %v8344_v32 = vpop.f32.mrb[29].mxu0  ;;  %8667 = vmatprep.subr.bf16.mxu1 %v9341_v37  ;;  %v9377_v37 = vld [vmem:[%s9508_s27 + $0xff0] sm:$0xff]  }
 0x1eb   : > { %v8365_v34 = vpop.f32.mrb[28].mxu1  ;;  %v8345_v35 = vadd.f32 %v8344_v32, %v8343_v30  ;;  %v8346_v36 = vpop.f32.mrb[30].mxu0  ;;  %8646 = vmatpush3.bf16.msra.mxu0 %v9342_v27  ;;  %v9378_v30 = vld [vmem:[%s9508_s27 + $0xf30] sm:$0xff]  }
 0x1ec   : > { %v8366_v40 = vpop.f32.mrb[29].mxu1  ;;  %v8347_v41 = vpop.f32.mrb[31].mxu0  ;;  %8647 = vmatprep.subr.bf16.mxu0 %v9344_v29  ;;  %v9379_v36 = vld [vmem:[%s9508_s27 + $0xfb0] sm:$0xff]  }
 0x1ed   : > { %v3293_v43 = vadd.f32 %v8345_v35, %v10059_v1  ;;  %v8367_v44 = vadd.f32 %v8366_v40, %v8365_v34  ;;  %v8368_v45 = vpop.f32.mrb[30].mxu1  ;;  %8668 = vmatpush3.bf16.msra.mxu1 %v9343_v28  ;;  %v5717_v1 = vrot.slane %v5689_v61, %v9546_v42  ;;  %v9382_v41 = vld [vmem:[%s9508_s27 + $0xf38] sm:$0xff]  }
 0x1ee   : > { %v8369_v47 = vpop.f32.mrb[31].mxu1  ;;  %8669 = vmatprep.subr.bf16.mxu1 %v9345_v31  ;;  %v9380_v31 = vld [vmem:[%s9508_s27 + $0xf78] sm:$0xff]  }
 0x1ef   : > { %v3333_v51 = vadd.f32 %v8367_v44, %v3293_v43  ;;  %8648 = vmatpush3.bf16.msra.mxu0 %v9346_v33  ;;  %v5721_v4 = vcombine.high %v5717_v1, %v5717_v1  ;;  %v5703_v43 = vrot.slane %v10101_v57, %v9546_v42  ;;  %v9383_v44 = vld [vmem:[%s9508_s27 + $0xfb8] sm:$0xff]  }
 0x1f0   : > { %8649 = vmatprep.subr.bf16.mxu0 %v9348_v39  ;;  %v9381_v39 = vld [vmem:[%s9508_s27 + $0xff8] sm:$0xff]  }
 0x1f1   : > { %v10104_v58 = vadd.f32 %v3333_v51, %v10026_v19  ;;  %8670 = vmatpush3.bf16.msra.mxu1 %v9347_v38  ;;  %v9356_v19 = vld [vmem:[%s9508_s27 + $0xf48] sm:$0xff]   ;;  %v5719_v45 = vcombine.high %v5703_v43, %v5703_v43 }
 0x1f2   : > { %8671 = vmatprep.subr.bf16.mxu1 %v9349_v48 }
 0x1f3   : > { %8650 = vmatpush3.bf16.msra.mxu0 %v9350_v52 }
 0x1f4   : > { %8679 = vmatprep.subr.bf16.mxu0 %v9352_v56 }
 0x1f5   : > { %8672 = vmatpush3.bf16.msra.mxu1 %v9351_v59 }
 0x1f6   : > { %6147 = vmatmul.mubr.bf16.vlgmr.msra.gmra.mrb[56].mxu0 %v5696_v54  ;;  %8701 = vmatprep.subr.bf16.mxu1 %v9353_v55 }
 0x1f7   : > { %8680 = vmatpush3.bf16.msra.mxu0 %v9354_v62  ;;  %6226 = vmatprep.mubr.bf16.mxu0 %v5717_v1 }
 0x1f8   : > { %6187 = vmatmul.mubr.bf16.vlgmr.msra.gmra.mrb[56].mxu1 %v5718_v0  ;;  %8681 = vmatprep.subr.bf16.mxu0 %v9356_v19 }
 0x1f9   : > { %8702 = vmatpush3.bf16.msra.mxu1 %v9355_v2  ;;  %6266 = vmatprep.mubr.bf16.mxu1 %v5721_v4 }
 0x1fa   : > { %8703 = vmatprep.subr.bf16.mxu1 %v9357_v3 }
 0x1fb   : > { %8682 = vmatpush3.bf16.msra.mxu0 %v9358_v5 }
 0x1fc   : > { %8683 = vmatprep.subr.bf16.mxu0 %v9360_v6 }
 0x1fd   : > { %8704 = vmatpush3.bf16.msra.mxu1 %v9359_v7 }
 0x1fe   : > { %8705 = vmatprep.subr.bf16.mxu1 %v9361_v8 }
 0x1ff   : > { %8684 = vmatpush3.bf16.msra.mxu0 %v9362_v9 }
 0x200   : > { %8685 = vmatprep.subr.bf16.mxu0 %v9364_v10 }
 0x201   : > { %8706 = vmatpush3.bf16.msra.mxu1 %v9363_v11 }
 0x202   : > { %8707 = vmatprep.subr.bf16.mxu1 %v9365_v12 }
 0x203   : > { %8686 = vmatpush3.bf16.msra.mxu0 %v9366_v13 }
 0x204   : > { %8687 = vmatprep.subr.bf16.mxu0 %v9368_v14 }
 0x205   : > { %8708 = vmatpush3.bf16.msra.mxu1 %v9367_v15 }
 0x206   : > { %8709 = vmatprep.subr.bf16.mxu1 %v9369_v16 }
 0x207   : > { %8688 = vmatpush3.bf16.msra.mxu0 %v9370_v17 }
 0x208   : > { %8689 = vmatprep.subr.bf16.mxu0 %v9372_v18 }
 0x209   : > { %8710 = vmatpush3.bf16.msra.mxu1 %v9371_v20  ;;  %v8387_v24 = vpop.f32.mrb[32].mxu0 }
 0x20a   : > { %v8388_v26 = vpop.f32.mrb[33].mxu0  ;;  %8711 = vmatprep.subr.bf16.mxu1 %v9373_v21 }
 0x20b   : > { %v8409_v27 = vpop.f32.mrb[32].mxu1  ;;  %v8389_v28 = vadd.f32 %v8388_v26, %v8387_v24  ;;  %v8390_v29 = vpop.f32.mrb[34].mxu0  ;;  %8690 = vmatpush3.bf16.msra.mxu0 %v9374_v22 }
 0x20c   : > { %v8410_v32 = vpop.f32.mrb[33].mxu1  ;;  %v8391_v33 = vpop.f32.mrb[35].mxu0  ;;  %8691 = vmatprep.subr.bf16.mxu0 %v9376_v23 }
 0x20d   : > { %v8411_v34 = vadd.f32 %v8410_v32, %v8409_v27  ;;  %v8412_v35 = vpop.f32.mrb[34].mxu1  ;;  %8712 = vmatpush3.bf16.msra.mxu1 %v9375_v25 }
 0x20e   : > { %v8413_v38 = vpop.f32.mrb[35].mxu1  ;;  %8713 = vmatprep.subr.bf16.mxu1 %v9377_v37 }
 0x20f   : > { %v3987_v40 = vadd.f32 %v8411_v34, %v8389_v28  ;;  %8692 = vmatpush3.bf16.msra.mxu0 %v9378_v30 }
 0x210   : > { %8693 = vmatprep.subr.bf16.mxu0 %v9380_v31 }
 0x211   : > { %8714 = vmatpush3.bf16.msra.mxu1 %v9379_v36 }
 0x212   : > { %8715 = vmatprep.subr.bf16.mxu1 %v9381_v39 }
 0x213   : > { %8694 = vmatpush3.bf16.msra.mxu0 %v9382_v41 }
 0x215   : > { %8716 = vmatpush3.bf16.msra.mxu1 %v9383_v44 }
 0x216   : > { %6227 = vmatmul.mubr.bf16.vlgmr.msra.gmra.mrb[60].mxu0 %v5703_v43 }
 0x218   : > { %6267 = vmatmul.mubr.bf16.vlgmr.msra.gmra.mrb[60].mxu1 %v5719_v45 }
 0x229   : > { %v8431_v46 = vpop.f32.mrb[36].mxu0 }
 0x22a   : > { %v8432_v47 = vpop.f32.mrb[37].mxu0 }
 0x22b   : > { %v8453_v48 = vpop.f32.mrb[36].mxu1  ;;  %v8433_v49 = vadd.f32 %v8432_v47, %v8431_v46  ;;  %v8434_v50 = vpop.f32.mrb[38].mxu0 }
 0x22c   : > { %v8454_v51 = vpop.f32.mrb[37].mxu1  ;;  %v8435_v52 = vpop.f32.mrb[39].mxu0 }
 0x22d   : > { %v4027_v53 = vadd.f32 %v8433_v49, %v3987_v40  ;;  %v8455_v54 = vadd.f32 %v8454_v51, %v8453_v48  ;;  %v8456_v56 = vpop.f32.mrb[38].mxu1 }
 0x22e   : > { %v8457_v59 = vpop.f32.mrb[39].mxu1 }
 0x22f   : > { %v4067_v42 = vadd.f32 %v8455_v54, %v4027_v53 }
 0x231   : > { %v4072_v57 = vadd.f32 %v4067_v42, %v10104_v58 }
 0x249   : > { %v8475_v60 = vpop.f32.mrb[40].mxu0 }
 0x24a   : > { %v8476_v55 = vpop.f32.mrb[41].mxu0 }
 0x24b   : > { %v8497_v61 = vpop.f32.mrb[40].mxu1  ;;  %v8477_v62 = vadd.f32 %v8476_v55, %v8475_v60  ;;  %v8478_v63 = vpop.f32.mrb[42].mxu0 }
 0x24c   : > { %v8498_v0 = vpop.f32.mrb[41].mxu1  ;;  %v8479_v19 = vpop.f32.mrb[43].mxu0 }
 0x24d   : > { %v8499_v1 = vadd.f32 %v8498_v0, %v8497_v61  ;;  %v8500_v2 = vpop.f32.mrb[42].mxu1 }
 0x24e   : > { %v8501_v3 = vpop.f32.mrb[43].mxu1 }
 0x24f   : > { %v4721_v4 = vadd.f32 %v8499_v1, %v8477_v62  ;;  %v6275_v1 = vld [vmem:[#allocation2] sm:$0x3] }
 0x269   : > { %v8519_v5 = vpop.f32.mrb[44].mxu0 }
 0x26a   : > { %v8520_v6 = vpop.f32.mrb[45].mxu0 }
 0x26b   : > { %v8541_v7 = vpop.f32.mrb[44].mxu1  ;;  %v8521_v8 = vadd.f32 %v8520_v6, %v8519_v5  ;;  %v8522_v9 = vpop.f32.mrb[46].mxu0  ;;  %v6310_v5 = vld [vmem:[%s10292_s5 + $0x8] sm:$0xff] (!%p8003_p5)  ;;  %v6311_v6 = vld [vmem:[%s10292_s5 + $0x10] sm:$0xff] (!%p8003_p5) }
 0x26c   : > { %v8542_v10 = vpop.f32.mrb[45].mxu1  ;;  %v8523_v11 = vpop.f32.mrb[47].mxu0  ;;  %v6312_v9 = vld [vmem:[%s10292_s5 + $0x18] sm:$0xff] (!%p8003_p5) }
 0x26d   : > { %v4761_v12 = vadd.f32 %v8521_v8, %v4721_v4  ;;  %v8543_v58 = vadd.f32 %v8542_v10, %v8541_v7  ;;  %v8544_v13 = vpop.f32.mrb[46].mxu1  ;;  %v6309_v4 = vld [vmem:[%s10292_s5] sm:$0xff] (!%p8003_p5)  ;;  %v9425_v7 = vmov (!%p8003_p5), 0.0|0.0   ;;  %v9427_v10 = vmov (!%p8003_p5), 0.0  }
 0x26e   : > { %v8545_v14 = vpop.f32.mrb[47].mxu1  ;;  %8809 = vmatprep.subr.bf16.mxu0 (!%p8003_p5), %v9425_v7  ;;  %v8810_v8 = vpack.c.bf16 (!%p8003_p5), %v6310_v5, %v6309_v4  ;;  %8781 = vmatprep.mubr.msk.f32.mxu0 (!%p8003_p5), %vm9426_vm2, %v9427_v10  ;;  %v8813_v11 = vpack.c.bf16 (!%p8003_p5), %v6312_v9, %v6311_v6  ;;  %v6422_v13 = vld [vmem:[%s10296_s9] sm:$0xff] (!%p8003_p5) }
 0x26f   : > { %v4801_v15 = vadd.f32 %v8543_v58, %v4761_v12  ;;  %8830 = vmatprep.subr.bf16.mxu1 (!%p8003_p5), %v9425_v7  ;;  %8806 = vmatprep.mubr.msk.f32.mxu1 (!%p8003_p5), %vm9426_vm2, %v9427_v10  ;;  %v6313_v12 = vld [vmem:[%s10292_s5 + $0x20] sm:$0xff] (!%p8003_p5)  ;;  %v6314_v58 = vld [vmem:[%s10292_s5 + $0x28] sm:$0xff] (!%p8003_p5) }
 0x270   : > { %8811 = vmatpush3.bf16.msra.mxu0 (!%p8003_p5), %v8810_v8  ;;  %v6423_v14 = vld [vmem:[%s10296_s9 + $0x8] sm:$0xff] (!%p8003_p5) }
 0x271   : > { %v4806_v16 = vadd.f32 %v4801_v15, %v4072_v57  ;;  %8812 = vmatprep.subr.bf16.mxu0 (!%p8003_p5), %v9425_v7  ;;  %v8816_v15 = vpack.c.bf16 (!%p8003_p5), %v6314_v58, %v6313_v12 }
 0x274   : > { %8814 = vmatpush3.bf16.msra.mxu0 (!%p8003_p5), %v8813_v11 }
 0x275   : > { %8815 = vmatprep.subr.bf16.mxu0 (!%p8003_p5), %v9425_v7 }
 0x278   : > { %8817 = vmatpush3.bf16.msra.mxu0 (!%p8003_p5), %v8816_v15 }
 0x279   : > { %8818 = vmatprep.subr.bf16.mxu0 (!%p8003_p5), %v9425_v7 }
 0x289   : > { %v8563_v17 = vpop.f32.mrb[48].mxu0 }
 0x28a   : > { %v8564_v18 = vpop.f32.mrb[49].mxu0 }
 0x28b   : > { %v8585_v20 = vpop.f32.mrb[48].mxu1  ;;  %v8565_v21 = vadd.f32 %v8564_v18, %v8563_v17  ;;  %v8566_v22 = vpop.f32.mrb[50].mxu0  ;;  %v6424_v17 = vld [vmem:[%s10296_s9 + $0x10] sm:$0xff] (!%p8003_p5)  ;;  %v6425_v18 = vld [vmem:[%s10296_s9 + $0x18] sm:$0xff] (!%p8003_p5) }
 0x28c   : > { %v8586_v23 = vpop.f32.mrb[49].mxu1  ;;  %v8567_v24 = vpop.f32.mrb[51].mxu0  ;;  %v8834_v22 = vpack.c.bf16 (!%p8003_p5), %v6425_v18, %v6424_v17 }
 0x28d   : > { %v8587_v25 = vadd.f32 %v8586_v23, %v8585_v20  ;;  %v8588_v26 = vpop.f32.mrb[50].mxu1  ;;  %v6315_v20 = vld [vmem:[%s10292_s5 + $0x30] sm:$0xff] (!%p8003_p5)  ;;  %v6426_v23 = vld [vmem:[%s10296_s9 + $0x20] sm:$0xff] (!%p8003_p5)  ;;  %v6427_v24 = vld [vmem:[%s10296_s9 + $0x28] sm:$0xff] (!%p8003_p5) }
 0x28e   : > { %v8589_v37 = vpop.f32.mrb[51].mxu1  ;;  %v6317_v26 = vld [vmem:[%s10292_s5 + $0x40] sm:$0xff] (!%p8003_p5) }
 0x28f   : > { %v5455_v27 = vadd.f32 %v8587_v25, %v8565_v21  ;;  %v6316_v21 = vld [vmem:[%s10292_s5 + $0x38] sm:$0xff] (!%p8003_p5)  ;;  %v6318_v37 = vld [vmem:[%s10292_s5 + $0x48] sm:$0xff] (!%p8003_p5) }
 0x290   : > { %v8819_v25 = vpack.c.bf16 (!%p8003_p5), %v6316_v21, %v6315_v20 }
 0x292   : > { %8820 = vmatpush3.bf16.msra.mxu0 (!%p8003_p5), %v8819_v25 }
 0x293   : > { %8821 = vmatprep.subr.bf16.mxu0 (!%p8003_p5), %v9425_v7 }
 0x2a9   : > { %v8607_v28 = vpop.f32.mrb[52].mxu0 }
 0x2aa   : > { %v8608_v29 = vpop.f32.mrb[53].mxu0 }
 0x2ab   : > { %v8629_v30 = vpop.f32.mrb[52].mxu1  ;;  %v8609_v31 = vadd.f32 %v8608_v29, %v8607_v28  ;;  %v8610_v32 = vpop.f32.mrb[54].mxu0  ;;  %v8004_v28 = vld [vmem:[%s10289_s2] ss:$0 sm:$0xff] (!%p8003_p5)  ;;  %v8837_v29 = vpack.c.bf16 (!%p8003_p5), %v6427_v24, %v6426_v23 }
 0x2ac   : > { %v8630_v33 = vpop.f32.mrb[53].mxu1  ;;  %v8611_v34 = vpop.f32.mrb[55].mxu0  ;;  %v6320_v32 = vld [vmem:[%s10292_s5 + $0x58] sm:$0xff] (!%p8003_p5) }
 0x2ad   : > { %v5495_v35 = vadd.f32 %v8609_v31, %v5455_v27  ;;  %v8631_v36 = vadd.f32 %v8630_v33, %v8629_v30  ;;  %v8632_v38 = vpop.f32.mrb[54].mxu1  ;;  %v8822_v30 = vpack.c.bf16 (!%p8003_p5), %v6318_v37, %v6317_v26  ;;  %v6319_v31 = vld [vmem:[%s10292_s5 + $0x50] sm:$0xff] (!%p8003_p5)  ;;  %v8005_v34 = vld [vmem:[%s10290_s3] ss:$0 sm:$0xff] (!%p8003_p5) }
 0x2ae   : > { %v8633_v39 = vpop.f32.mrb[55].mxu1  ;;  %v6322_v38 = vld [vmem:[%s10292_s5 + $0x68] sm:$0xff] (!%p8003_p5) }
 0x2af   : > { %v5535_v40 = vadd.f32 %v8631_v36, %v5495_v35  ;;  %8823 = vmatpush3.bf16.msra.mxu0 (!%p8003_p5), %v8822_v30  ;;  %v8825_v35 = vpack.c.bf16 (!%p8003_p5), %v6320_v32, %v6319_v31  ;;  %v6321_v36 = vld [vmem:[%s10292_s5 + $0x60] sm:$0xff] (!%p8003_p5) }
 0x2b0   : > { %8824 = vmatprep.subr.bf16.mxu0 (!%p8003_p5), %v9425_v7 }
 0x2b1   : > { %v5540_v41 = vadd.f32 %v5535_v40, %v4806_v16  ;;  %v8831_v16 = vpack.c.bf16 (!%p8003_p5), %v6423_v14, %v6422_v13  ;;  %v8006_v40 = vld [vmem:[%s10291_s4] ss:$0 sm:$0xff] (!%p8003_p5) }
 0x2b3   : > { %8832 = vmatpush3.bf16.msra.mxu1 (!%p8003_p5), %v8831_v16  ;;  %8826 = vmatpush3.bf16.msra.mxu0 (!%p8003_p5), %v8825_v35 }
 0x2b4   : > { %8833 = vmatprep.subr.bf16.mxu1 (!%p8003_p5), %v9425_v7  ;;  %8827 = vmatprep.subr.bf16.mxu0 (!%p8003_p5), %v9425_v7 }
 0x2b7   : > { %8835 = vmatpush3.bf16.msra.mxu1 (!%p8003_p5), %v8834_v22 }
 0x2b8   : > { %8836 = vmatprep.subr.bf16.mxu1 (!%p8003_p5), %v9425_v7 }
 0x2bb   : > { %8838 = vmatpush3.bf16.msra.mxu1 (!%p8003_p5), %v8837_v29 }
 0x2bc   : > { %8839 = vmatprep.subr.bf16.mxu1 (!%p8003_p5), %v9425_v7 }
 0x2c9   : > { %v8651_v43 = vpop.f32.mrb[56].mxu0 }
 0x2ca   : > { %v8652_v44 = vpop.f32.mrb[57].mxu0 }
 0x2cb   : > { %v8673_v45 = vpop.f32.mrb[56].mxu1  ;;  %v8653_v46 = vadd.f32 %v8652_v44, %v8651_v43  ;;  %v8654_v47 = vpop.f32.mrb[58].mxu0  ;;  %v6323_v44 = vld [vmem:[%s10292_s5 + $0x70] sm:$0xff] (!%p8003_p5) }
 0x2cc   : > { %v8674_v48 = vpop.f32.mrb[57].mxu1  ;;  %v8655_v49 = vpop.f32.mrb[59].mxu0  ;;  %v6429_v47 = vld [vmem:[%s10296_s9 + $0x38] sm:$0xff] (!%p8003_p5) }
 0x2cd   : > { %v8675_v50 = vadd.f32 %v8674_v48, %v8673_v45  ;;  %v8676_v51 = vpop.f32.mrb[58].mxu1  ;;  %v6430_v49 = vld [vmem:[%s10296_s9 + $0x40] sm:$0xff] (!%p8003_p5) }
 0x2ce   : > { %v8677_v52 = vpop.f32.mrb[59].mxu1 }
 0x2cf   : > { %v6189_v53 = vadd.f32 %v8675_v50, %v8653_v46  ;;  %v6428_v46 = vld [vmem:[%s10296_s9 + $0x30] sm:$0xff] (!%p8003_p5)  ;;  %v6431_v50 = vld [vmem:[%s10296_s9 + $0x48] sm:$0xff] (!%p8003_p5) }
 0x2d0   : > { %v8840_v48 = vpack.c.bf16 (!%p8003_p5), %v6429_v47, %v6428_v46  ;;  %v8843_v51 = vpack.c.bf16 (!%p8003_p5), %v6431_v50, %v6430_v49  ;;  %v6432_v52 = vld [vmem:[%s10296_s9 + $0x50] sm:$0xf] (!%p8003_p5) }
 0x2d2   : > { %8841 = vmatpush3.bf16.msra.mxu1 (!%p8003_p5), %v8840_v48 }
 0x2d3   : > { %8842 = vmatprep.subr.bf16.mxu1 (!%p8003_p5), %v9425_v7 }
 0x2d6   : > { %8844 = vmatpush3.bf16.msra.mxu1 (!%p8003_p5), %v8843_v51 }
 0x2d7   : > { %8804 = vmatprep.subr.mxu1 (!%p8003_p5), %v9427_v10 }
 0x2da   : > { %8805 = vmatpush3.msk.msra.mxu1 (!%p8003_p5), %vm6444_vm4, %v6432_v52 }
 0x2e9   : > { %v8695_v54 = vpop.f32.mrb[60].mxu0 }
 0x2ea   : > { %v8696_v56 = vpop.f32.mrb[61].mxu0 }
 0x2eb   : > { %v8717_v59 = vpop.f32.mrb[60].mxu1  ;;  %v8697_v42 = vadd.f32 %v8696_v56, %v8695_v54  ;;  %v8698_v57 = vpop.f32.mrb[62].mxu0  ;;  %v8009_v56 = vld [vmem:[%s10294_s7] ss:$0 sm:$0xff] (!%p8003_p5) }
 0x2ec   : > { %v8718_v60 = vpop.f32.mrb[61].mxu1  ;;  %v8699_v55 = vpop.f32.mrb[63].mxu0  ;;  %v8010_v57 = vld [vmem:[%s10295_s8] ss:$0 sm:$0xff] (!%p8003_p5) }
 0x2ed   : > { %v6229_v61 = vadd.f32 %v8697_v42, %v6189_v53  ;;  %v8719_v62 = vadd.f32 %v8718_v60, %v8717_v59  ;;  %v8720_v63 = vpop.f32.mrb[62].mxu1  ;;  %v8007_v53 = vld [vmem:[%s10293_s6] ss:$0 sm:$0xff] (!%p8003_p5) }
 0x2ee   : > { %v8721_v0 = vpop.f32.mrb[63].mxu1 }
 0x2ef   : > { %v6269_v19 = vadd.f32 %v8719_v62, %v6229_v61  ;;  %6282 = sbr.rel (%p8003_p5) target bundleno = 1208 (0x4b8), region = 72  ;;  %v8011_v62 = vld [vmem:[%s10297_s10] ss:$0 sm:$0xff] (!%p8003_p5) }
 0x2f1   : > { %v6274_v2 = vadd.f32 %v6269_v19, %v5540_v41  ;;  %v8828_v41 = vpack.c.bf16 (!%p8003_p5), %v6322_v38, %v6321_v36 }
 0x2f3   : > { %v6276_v3 = vadd.f32 %v6275_v1, %v6274_v2  ;;  %8829 = vmatpush3.bf16.msra.mxu0 (!%p8003_p5), %v8828_v41 }
 0x2f4   : > { %8779 = vmatprep.subr.mxu0 (!%p8003_p5), %v9427_v10 }
 0x2f5   : > { %6278 = vst.msk [vmem:[#allocation2] sm:$0x3] %vm6277_vm1, %v6276_v3 }
 0x2f7   : > { %8780 = vmatpush3.msra.mxu0 %v6323_v44 }
 0x2fc   : > { %v6283_v27 = vld [vmem:[#allocation2] sm:$0x3] }
 0x2fd   : > { %v6291_v33 = vadd.f32 %v8004_v28, %v6283_v27 }
 0x2ff   : > { %v6299_v39 = vmul.f32 %v8005_v34, %v6291_v33 }
 0x301   : > { %v6307_v43 = vadd.f32 %v8006_v40, %v6299_v39 }
 0x303   : > { %v6308_v45 = vmax.f32 %v6307_v43, 0.0 }
 0x305   : > { %8782 = vmatmul.mubr.msk.f32.vlgmr.msra.gmra.mrb[0].mxu0 %vm6331_vm3, %v6308_v45 }
 0x3d8   : > { %v6401_v54 = vpop.f32.mrb[0].mxu0 }
 0x3d9   : > { %v6402_v59 = vadd.f32 %v8007_v53, %v6401_v54  ;;  %v8783_v42 = vpop.f32.mrb[1].mxu0 }
 0x3db   : > { %v6412_v60 = vmul.f32 %v8009_v56, %v6402_v59 }
 0x3dd   : > { %v6420_v55 = vadd.f32 %v8010_v57, %v6412_v60 }
 0x3df   : > { %v6421_v61 = vmax.f32 %v6420_v55, 0.0 }
 0x3e1   : > { %8807 = vmatmul.mubr.msk.f32.vlgmr.msra.gmra.mrb[0].mxu1 %vm6440_vm5, %v6421_v61 }
 0x4b4   : > { %v6514_v63 = vpop.f32.mrb[0].mxu1 }
 0x4b5   : > { %v6515_v0 = vadd.f32 %v8011_v62, %v6514_v63  ;;  %v8808_v19 = vpop.f32.mrb[1].mxu1 }
 0x4b7   : > { %6519 = vst.msk [vmem:[#allocation3] sm:$0x3] %vm6518_vm6, %v6515_v0 }
 0x4b8 PF: > { %p8849_p6 = scmp.eq.s32.totalorder %s9495_s18, 2  ;;  %s9428_s26 = smov [#allocation3]  }
 0x4b9   : > { %s6527_s27 = sshll.u32 %s9428_s26, 4  ;;  %s6528_s27 = int_to_ptr.vmem [resolvable:$true] %s6527_s27 }
 0x4ba   : > { %s9385_s28 = scalar_lea.vmem %s6528_s27, 32  ;;  %p9392_p10 = scmp.lt.s32.totalorder %s6528_s27, %s6528_s27 }
 0x4bb   : > { %p9386_p7 = scmp.ne.s32.totalorder %s6528_s27, %s9385_s28  ;;  %p9393_p11 = scmp.lt.s32.totalorder %s9385_s28, %s9385_s28 }
 0x4bd   : > { %p9387_p8 = pnand %p9386_p7, %p8849_p6  ;;  %p9394_p12 = por %p9393_p11, %p9392_p10 }
 0x4bf   : > { %p9388_p9 = pneg %p9387_p8 }
 0x4c1   : > { %p9395_p13 = pnand %p9394_p12, %p9388_p9 }
 0x4c3   : > { %9398 = shalt.err (!%p9395_p13)
}
 0x4c4   : > { %s9399_s12 = scalar_lea.hbm %s10298_s11, 32 }
 0x4c5   : > { %p9400_p0 = scmp.ne.s32.totalorder %s10298_s11, %s9399_s12  ;;  %p9405_p3 = scmp.lt.u32.totalorder %s9399_s12, %s10298_s11 }
 0x4c7   : > { %p9401_p1 = pnand %p9400_p0, %p8849_p6 }
 0x4c9   : > { %p9402_p2 = pneg %p9401_p1 }
 0x4cb   : > { %p9407_p4 = pnand %p9405_p3, %p9402_p2 }
 0x4cd   : > { %9410 = shalt.err (!%p9407_p4)
}
 0x4ce   : > { %8846 = dma.vmem_to_hbm [thread:$0]  (%p8849_p6), %s6528_s27, 32, %s10298_s11, [#allocation4]  }
 0x4cf   : > { %9416 = dma.done.wait (%p8849_p6), [#allocation4], 32  }
 0x4d0   : > { %9418 = vsyncadd (%p8849_p6), [#allocation4], 4294967264 }
 0x4d1 PF: > { %s22_s17 = sadd.s32 1, %s9421_s17  }
 0x4d2   : > { %p19_p5 = scmp.ge.s32.totalorder %s22_s17, 5  }
 0x4d4   :  { %21 = sbr.rel (!%p19_p5) target bundleno = 1 (0x1), region = 116 }
 0x4db   :  { %6540 = vsyncpa [#allocation4], 1 }
 0x4dc   :  { %6542 = vsyncpa [#allocation4 + $0x1], 1 }

</bundles_post_ra>
